<compile_context>
chip_gen: v7x
topology: tpu7x:2x2x1
jax: 0.10.0
libtpu: 0.0.40
codegen_flags: <defaults>
</compile_context>

<pallas_src>
import functools

import jax
import jax.numpy as jnp
from jax import lax
from jax.experimental import pallas as pl
from jax.experimental.pallas import tpu as pltpu

_BN_EPS = 1e-5
_LANES = 128
_SUBLANES = 8


def _round_up(x, m):
    return (x + m - 1) // m * m


# ----------------------------- Pallas kernels -------------------------------

def _gemm_kernel(x_ref, w_ref, b_ref, o_ref, acc_ref, *, act, nk):
    """Tiled GEMM: (tm, tk) @ (tk, Cp) accumulated over K steps, bias + act."""
    @pl.when(pl.program_id(1) == 0)
    def _():
        acc_ref[...] = jnp.zeros_like(acc_ref)

    acc_ref[...] += jnp.dot(x_ref[...], w_ref[...],
                            preferred_element_type=jnp.float32)

    @pl.when(pl.program_id(1) == nk - 1)
    def _():
        y = acc_ref[...] + b_ref[...]
        if act == "relu":
            y = jnp.maximum(y, 0.0)
        elif act == "sigmoid":
            y = jax.nn.sigmoid(y)
        o_ref[...] = y.astype(o_ref.dtype)


def _gemm_bn_kernel(*refs, nk, m_valid, relu, add_residual):
    """GEMM with a fused BatchNorm(+ReLU / +residual) finalize phase.

    Full (M_pad, Cp) output lives in a VMEM scratch so the per-channel batch
    statistics stay *global* (never per-tile).  Padded rows are masked out."""
    if add_residual:
        x_ref, w_ref, g_ref, b_ref, r_ref, o_ref, acc_ref = refs
    else:
        x_ref, w_ref, g_ref, b_ref, o_ref, acc_ref = refs

    @pl.when(pl.program_id(0) == 0)
    def _():
        acc_ref[...] = jnp.zeros_like(acc_ref)

    acc_ref[...] += jnp.dot(x_ref[...], w_ref[...],
                            preferred_element_type=jnp.float32)

    @pl.when(pl.program_id(0) == nk - 1)
    def _():
        x = acc_ref[...]                                      # (Mp, Cp) f32
        rows = lax.broadcasted_iota(jnp.int32, x.shape, 0)
        mask = (rows < m_valid).astype(jnp.float32)
        inv_m = 1.0 / m_valid
        mean = jnp.sum(x * mask, axis=0, keepdims=True) * inv_m
        d = (x - mean) * mask
        var = jnp.sum(d * d, axis=0, keepdims=True) * inv_m   # biased variance
        y = (x - mean) * lax.rsqrt(var + _BN_EPS) * g_ref[...] + b_ref[...]
        if relu:
            y = jnp.maximum(y, 0.0)
        if add_residual:
            y = y + r_ref[...]
        o_ref[...] = y.astype(o_ref.dtype)


def _bn_relu_kernel(x_ref, g_ref, b_ref, o_ref, *, m_valid):
    """Standalone BN + ReLU on a flattened (M, C) tensor, single-pass stats."""
    x = x_ref[...]
    inv_m = 1.0 / m_valid
    mean = jnp.sum(x, axis=0, keepdims=True) * inv_m
    d = x - mean
    var = jnp.sum(d * d, axis=0, keepdims=True) * inv_m
    y = d * lax.rsqrt(var + _BN_EPS) * g_ref[...] + b_ref[...]
    o_ref[...] = jnp.maximum(y, 0.0)


# ------------------------------- JAX glue -----------------------------------

def _reflect_pad(x, p):
    # nn.ReflectionPad2d(p) (NHWC here)
    return jnp.pad(x, ((0, 0), (p, p), (p, p), (0, 0)), mode="reflect")


def _im2col(x, kh, kw, stride):
    """x: (N, Hp, Wp, C) -> (N*Ho*Wo, kh*kw*C), patch column order [kh, kw, c]."""
    # TODO(synk): for large images keep the padded activation in VMEM and loop
    # over the kh*kw taps inside the kernel instead of materializing patches.
    n, hp, wp, c = x.shape
    ho = (hp - kh) // stride + 1
    wo = (wp - kw) // stride + 1
    cols = []
    for i in range(kh):
        for j in range(kw):
            cols.append(x[:, i:i + (ho - 1) * stride + 1:stride,
                             j:j + (wo - 1) * stride + 1:stride, :])
    patches = jnp.stack(cols, axis=3)                 # (N, Ho, Wo, kh*kw, C)
    return patches.reshape(n * ho * wo, kh * kw * c), ho, wo


def _pad_gemm_operands(patches, w2, cout):
    """Pad K to a multiple of 128 and Cout to 128 lanes (lane-dense stores)."""
    _, k = patches.shape
    kp = _round_up(k, _LANES)
    cp = _round_up(cout, _LANES)
    if kp != k:
        patches = jnp.pad(patches, ((0, 0), (0, kp - k)))
        w2 = jnp.pad(w2, ((0, kp - k), (0, 0)))
    if cp != cout:
        w2 = jnp.pad(w2, ((0, 0), (0, cp - cout)))
    return patches, w2, kp, cp


def _pick_k_tile(kp):
    # K = kh*kw*Cin is bounded (<= 1664 in this network); a single K step keeps
    # the grid small (the net is launch-bound at 16x16).  For larger K fall
    # back to a divisor tile so the accumulator pattern still applies.
    if kp <= 2048:
        return kp
    for cand in (1024, 768, 640, 512, 384, 256, 128):
        if kp % cand == 0:
            return cand
    return _LANES


def conv2d(x, w_hwio, bias=None, stride=1, act="none"):
    """Valid conv (NHWC in, HWIO weights) as a batch-folded tiled Pallas GEMM."""
    kh, kw, cin, cout = w_hwio.shape
    n = x.shape[0]
    patches, ho, wo = _im2col(x, kh, kw, stride)            # (M, K) f32
    m, _ = patches.shape
    w2 = w_hwio.reshape(kh * kw * cin, cout)
    patches, w2, kp, cp = _pad_gemm_operands(patches, w2, cout)

    tm = 256 if m >= 256 else _round_up(m, _SUBLANES)       # MXU-shaped M tiles
    mp = _round_up(m, tm)
    if mp != m:
        patches = jnp.pad(patches, ((0, mp - m), (0, 0)))
    tk = _pick_k_tile(kp)
    nk = kp // tk

    b = bias if bias is not None else jnp.zeros((cout,), jnp.float32)
    b2 = jnp.pad(b.reshape(1, cout).astype(jnp.float32),
                 ((0, 0), (0, cp - cout)))

    xb = patches.astype(jnp.bfloat16)                       # MXU-native inputs
    wb = w2.astype(jnp.bfloat16)

    out = pl.pallas_call(
        functools.partial(_gemm_kernel, act=act, nk=nk),
        out_shape=jax.ShapeDtypeStruct((mp, cp), jnp.float32),
        grid=(mp // tm, nk),
        in_specs=[
            pl.BlockSpec((tm, tk), lambda i, kq: (i, kq)),
            pl.BlockSpec((tk, cp), lambda i, kq: (kq, 0)),
            pl.BlockSpec((1, cp), lambda i, kq: (0, 0)),
        ],
        out_specs=pl.BlockSpec((tm, cp), lambda i, kq: (i, 0)),
        scratch_shapes=[pltpu.VMEM((tm, cp), jnp.float32)],
        compiler_params=pltpu.CompilerParams(
            dimension_semantics=("parallel", "arbitrary")),
    )(xb, wb, b2)

    return out[:m, :cout].reshape(n, ho, wo, cout)


def conv2d_bn(x, w_hwio, gamma, beta, *, stride=1, relu=False, residual=None):
    """Conv (no bias) with the BatchNorm(+ReLU/+residual) epilogue fused into
    the same Pallas kernel (global per-channel batch statistics)."""
    kh, kw, cin, cout = w_hwio.shape
    n = x.shape[0]
    patches, ho, wo = _im2col(x, kh, kw, stride)
    m, _ = patches.shape
    w2 = w_hwio.reshape(kh * kw * cin, cout)
    patches, w2, kp, cp = _pad_gemm_operands(patches, w2, cout)

    mp = _round_up(m, _SUBLANES)
    if mp != m:
        patches = jnp.pad(patches, ((0, mp - m), (0, 0)))
    tk = _pick_k_tile(kp)
    nk = kp // tk

    g2 = jnp.pad(gamma.reshape(1, cout).astype(jnp.float32),
                 ((0, 0), (0, cp - cout)))
    b2 = jnp.pad(beta.reshape(1, cout).astype(jnp.float32),
                 ((0, 0), (0, cp - cout)))

    xb = patches.astype(jnp.bfloat16)
    wb = w2.astype(jnp.bfloat16)

    inputs = [xb, wb, g2, b2]
    in_specs = [
        pl.BlockSpec((mp, tk), lambda kq: (0, kq)),
        pl.BlockSpec((tk, cp), lambda kq: (kq, 0)),
        pl.BlockSpec((1, cp), lambda kq: (0, 0)),
        pl.BlockSpec((1, cp), lambda kq: (0, 0)),
    ]
    add_residual = residual is not None
    if add_residual:
        r2 = residual.reshape(m, cout).astype(jnp.float32)
        r2 = jnp.pad(r2, ((0, mp - m), (0, cp - cout)))
        inputs.append(r2)
        in_specs.append(pl.BlockSpec((mp, cp), lambda kq: (0, 0)))

    out = pl.pallas_call(
        functools.partial(_gemm_bn_kernel, nk=nk, m_valid=m,
                          relu=relu, add_residual=add_residual),
        out_shape=jax.ShapeDtypeStruct((mp, cp), jnp.float32),
        grid=(nk,),
        in_specs=in_specs,
        out_specs=pl.BlockSpec((mp, cp), lambda kq: (0, 0)),
        scratch_shapes=[pltpu.VMEM((mp, cp), jnp.float32)],
        compiler_params=pltpu.CompilerParams(
            dimension_semantics=("arbitrary",)),
    )(*inputs)

    return out[:m, :cout].reshape(n, ho, wo, cout)


def batchnorm_relu(x, gamma, beta):
    """Standalone BN+ReLU (used only after the phase-assembled transposed conv)."""
    n, h, w, c = x.shape
    m = n * h * w
    out = pl.pallas_call(
        functools.partial(_bn_relu_kernel, m_valid=m),
        out_shape=jax.ShapeDtypeStruct((m, c), jnp.float32),
    )(x.reshape(m, c), gamma.reshape(1, c).astype(jnp.float32),
      beta.reshape(1, c).astype(jnp.float32))
    return out.reshape(n, h, w, c)


def conv_transpose2d(x, w_t, stride, padding, output_padding, act="none"):
    """nn.ConvTranspose2d via stride^2 phase decomposition (no zero-insertion
    MACs).  x: (N, H, W, Cin) NHWC; w_t: PyTorch layout (Cin, Cout, kh, kw)."""
    n, h, w, cin = x.shape
    _, cout, kh, kw = w_t.shape
    hout = (h - 1) * stride - 2 * padding + kh + output_padding
    wout = (w - 1) * stride - 2 * padding + kw + output_padding

    def phase_taps(r, ksize, size_out):
        taps = [t for t in range(ksize) if (r + padding - t) % stride == 0]
        offs = [(r + padding - t) // stride for t in taps]
        q = (size_out - 1 - r) // stride + 1
        return taps, offs, q

    out = jnp.zeros((n, hout, wout, cout), jnp.float32)
    for r in range(stride):
        khs, dhs, qh = phase_taps(r, kh, hout)
        if qh <= 0 or not khs:
            continue
        dh0, dh1 = min(dhs), max(dhs)
        for c in range(stride):
            kws, dws, qw = phase_taps(c, kw, wout)
            if qw <= 0 or not kws:
                continue
            dw0, dw1 = min(dws), max(dws)
            # Input window [dh0, dh1+qh-1] x [dw0, dw1+qw-1]; zero-pad if it
            # ever leaves the input (not needed for this network's params).
            pt, pb = max(0, -dh0), max(0, dh1 + qh - 1 - (h - 1))
            pleft, pright = max(0, -dw0), max(0, dw1 + qw - 1 - (w - 1))
            xs = x
            if pt or pb or pleft or pright:
                xs = jnp.pad(xs, ((0, 0), (pt, pb), (pleft, pright), (0, 0)))
            xs = xs[:, dh0 + pt: dh0 + pt + qh + (dh1 - dh0),
                       dw0 + pleft: dw0 + pleft + qw + (dw1 - dw0), :]
            # Per-phase sub-kernel (HWIO), taps ordered by ascending offset.
            sub = jnp.stack([
                jnp.stack([w_t[:, :, r + padding - stride * (dh0 + di),
                                     c + padding - stride * (dw0 + dj)]
                           for dj in range(dw1 - dw0 + 1)], axis=0)
                for di in range(dh1 - dh0 + 1)], axis=0)     # (sh, sw, cin, cout)
            ph = conv2d(xs, sub, stride=1, act=act)          # (N, qh, qw, cout)
            out = out.at[:, r::stride, c::stride, :].set(ph)
    return out


def _upsample_nearest2x(x):
    # F.interpolate(scale_factor=2, mode='nearest') in NHWC
    return jnp.repeat(jnp.repeat(x, 2, axis=1), 2, axis=2)


# ------------------------------ model blocks --------------------------------

def res_block(x, p, downsample=False, upsample=False):
    out = _reflect_pad(x, 1)
    if downsample and not upsample:
        out = conv2d_bn(out, p["conv1"], p["bn1_g"], p["bn1_b"],   # d_conv1+BN1+ReLU
                        stride=2, relu=True)
    elif upsample and not downsample:
        out = conv_transpose2d(out, p["conv1_t"], stride=2,        # u_conv1
                               padding=3, output_padding=1)
        out = batchnorm_relu(out, p["bn1_g"], p["bn1_b"])          # BN1 + ReLU
    else:
        out = conv2d_bn(out, p["conv1"], p["bn1_g"], p["bn1_b"],   # s_conv1+BN1+ReLU
                        stride=1, relu=True)
    out = _reflect_pad(out, 1)

    if downsample and not upsample:
        sc = conv2d(x, p["shortcut"], stride=2)                    # d_shortcut
    elif upsample and not downsample:
        sc = conv2d(x, p["shortcut"], stride=1)                    # u_shortcut
        sc = _upsample_nearest2x(sc)
    else:
        sc = x
    # conv2 + BN2 + residual add, fused in one kernel
    return conv2d_bn(out, p["conv2"], p["bn2_g"], p["bn2_b"],
                     stride=1, relu=False, residual=sc)


def resnet_forward(x_nchw, params):
    x = jnp.transpose(x_nchw, (0, 2, 3, 1))                        # NCHW -> NHWC
    out = _reflect_pad(x, 3)
    out = conv2d(out, params["conv1"], stride=1, act="relu")
    out = _reflect_pad(out, 2)
    out = conv2d(out, params["conv2"], stride=2, act="relu")
    out = res_block(out, params["down"], downsample=True)
    for p in params["std"]:
        out = res_block(out, p)
    out = res_block(out, params["up"], upsample=True)
    out = _reflect_pad(out, 1)
    out = conv_transpose2d(out, params["deconv_t"], stride=2,
                           padding=4, output_padding=1, act="relu")
    out = _reflect_pad(out, 3)
    out = conv2d(out, params["conv3"], bias=params["conv3_b"],
                 stride=1, act="sigmoid")
    return jnp.transpose(out, (0, 3, 1, 2))                        # NHWC -> NCHW


# ------------------------------ parameters ----------------------------------

def make_params(key):
    keys = iter(jax.random.split(key, 128))

    def w(shape, scale=0.05):
        return scale * jax.random.normal(next(keys), shape, dtype=jnp.float32)

    def bn(c):
        return jnp.ones((c,), jnp.float32), jnp.zeros((c,), jnp.float32)

    def block(cin, cout, down=False, up=False):
        p = {}
        if up:
            p["conv1_t"] = w((cin, cout, 3, 3))          # ConvTranspose2d layout
            p["shortcut"] = w((1, 1, cin, cout))         # u_shortcut (1x1, s=1)
        elif down:
            p["conv1"] = w((3, 3, cin, cout))            # d_conv1 (HWIO)
            p["shortcut"] = w((1, 1, cin, cout))         # d_shortcut (1x1, s=2)
        else:
            p["conv1"] = w((3, 3, cin, cout))            # s_conv1
        p["conv2"] = w((3, 3, cout, cout))
        p["bn1_g"], p["bn1_b"] = bn(cout)
        p["bn2_g"], p["bn2_b"] = bn(cout)
        return p

    params = {
        "conv1": w((7, 7, 4, 32)),
        "conv2": w((5, 5, 32, 64)),
        "down": block(64, 128, down=True),
        "std": [block(128, 128) for _ in range(6)],
        "up": block(128, 64, up=True),
        "deconv_t": w((64, 32, 5, 5)),                   # ConvTranspose2d layout
        "conv3": w((7, 7, 32, 3)),
        "conv3_b": w((3,), scale=0.01),
    }
    return params


# --------------------------------- main --------------------------------------

if __name__ == "__main__":
    root = jax.random.PRNGKey(0)
    pkey, xkey = jax.random.split(root)
    params = make_params(pkey)
    x = jax.random.normal(xkey, (2, 4, 16, 16), dtype=jnp.float32)  # NCHW

    fwd = jax.jit(resnet_forward)
    out = fwd(x, params)
    out = jax.block_until_ready(out)

    assert out.shape == (2, 3, 16, 16), out.shape
    assert bool(jnp.all(jnp.isfinite(out)))
    assert bool(jnp.all((out >= 0.0) & (out <= 1.0)))   # sigmoid output range
    print("KERNEL_OK")
</pallas_src>

<mosaic_0001>
module attributes {stable_mosaic.version = 11 : i64} {
  func.func @_gemm_kernel(%arg0: i32, %arg1: i32, %arg2: memref<256x256xbf16, #tpu.memory_space<vmem>>, %arg3: memref<256x128xbf16, #tpu.memory_space<vmem>>, %arg4: memref<1x128xf32, #tpu.memory_space<vmem>>, %arg5: memref<256x128xf32, #tpu.memory_space<vmem>>, %arg6: memref<256x128xf32, #tpu.memory_space<vmem>>) attributes {dimension_semantics = [#tpu.dimension_semantics<parallel>, #tpu.dimension_semantics<arbitrary>], iteration_bounds = array<i64: 2, 1>, scalar_prefetch = 0 : i64, scratch_operands = 1 : i64, tpu.core_type = #tpu.core_type<tc>, window_params = [{transform_indices = @transform_0, window_bounds = array<i64: 256, 256>}, {transform_indices = @transform_1, window_bounds = array<i64: 256, 128>}, {pipeline_mode = #tpu.pipeline_mode<synchronous>, transform_indices = @transform_2, window_bounds = array<i64: 1, 128>}, {transform_indices = @transform_3, window_bounds = array<i64: 256, 128>}]} {
    %c0_i32 = arith.constant 0 : i32
    %0 = arith.cmpi eq, %arg1, %c0_i32 : i32
    %1 = arith.extui %0 : i1 to i32
    %c0_i32_0 = arith.constant 0 : i32
    %2 = arith.cmpi ne, %1, %c0_i32_0 : i32
    scf.if %2 {
      %cst_10 = arith.constant 0.000000e+00 : f32
      %12 = vector.broadcast %cst_10 : f32 to vector<256x128xf32>
      %c0_11 = arith.constant 0 : index
      %c0_12 = arith.constant 0 : index
      %13 = vector.load %arg6[%c0_11, %c0_12] : memref<256x128xf32, #tpu.memory_space<vmem>>, vector<256x128xf32>
      tpu.vector_store %arg6[%c0_11, %c0_12], %12 {strides = array<i32>} : memref<256x128xf32, #tpu.memory_space<vmem>>, vector<256x128xf32>,
    } else {
    }
    %c0 = arith.constant 0 : index
    %c0_1 = arith.constant 0 : index
    %3 = vector.load %arg6[%c0, %c0_1] : memref<256x128xf32, #tpu.memory_space<vmem>>, vector<256x128xf32>
    %c0_2 = arith.constant 0 : index
    %c0_3 = arith.constant 0 : index
    %4 = vector.load %arg2[%c0_2, %c0_3] : memref<256x256xbf16, #tpu.memory_space<vmem>>, vector<256x256xbf16>
    %c0_4 = arith.constant 0 : index
    %c0_5 = arith.constant 0 : index
    %5 = vector.load %arg3[%c0_4, %c0_5] : memref<256x128xbf16, #tpu.memory_space<vmem>>, vector<256x128xbf16>
    %cst = arith.constant dense<0.000000e+00> : vector<256x128xf32>
    %6 = tpu.matmul %4, %5, %cst {dimension_numbers = #tpu.dot_dimension_numbers<[1], [0], [0], [1], [0, 0, 1, 1], [], []>} : vector<256x256xbf16>, vector<256x128xbf16>, vector<256x128xf32> -> vector<256x128xf32>
    %7 = arith.addf %3, %6 : vector<256x128xf32>
    %c0_6 = arith.constant 0 : index
    %c0_7 = arith.constant 0 : index
    %8 = vector.load %arg6[%c0_6, %c0_7] : memref<256x128xf32, #tpu.memory_space<vmem>>, vector<256x128xf32>
    tpu.vector_store %arg6[%c0_6, %c0_7], %7 {strides = array<i32>} : memref<256x128xf32, #tpu.memory_space<vmem>>, vector<256x128xf32>,
    %c0_i32_8 = arith.constant 0 : i32
    %9 = arith.cmpi eq, %arg1, %c0_i32_8 : i32
    %10 = arith.extui %9 : i1 to i32
    %c0_i32_9 = arith.constant 0 : i32
    %11 = arith.cmpi ne, %10, %c0_i32_9 : i32
    scf.if %11 {
      %c0_10 = arith.constant 0 : index
      %c0_11 = arith.constant 0 : index
      %12 = vector.load %arg6[%c0_10, %c0_11] : memref<256x128xf32, #tpu.memory_space<vmem>>, vector<256x128xf32>
      %c0_12 = arith.constant 0 : index
      %c0_13 = arith.constant 0 : index
      %13 = vector.load %arg4[%c0_12, %c0_13] : memref<1x128xf32, #tpu.memory_space<vmem>>, vector<1x128xf32>
      %14 = vector.broadcast %13 : vector<1x128xf32> to vector<256x128xf32>
      %15 = arith.addf %12, %14 : vector<256x128xf32>
      %cst_14 = arith.constant 0.000000e+00 : f32
      %16 = vector.broadcast %cst_14 : f32 to vector<256x128xf32>
      %17 = arith.maximumf %15, %16 : vector<256x128xf32>
      %c0_15 = arith.constant 0 : index
      %c0_16 = arith.constant 0 : index
      %18 = vector.load %arg5[%c0_15, %c0_16] : memref<256x128xf32, #tpu.memory_space<vmem>>, vector<256x128xf32>
      tpu.vector_store %arg5[%c0_15, %c0_16], %17 {strides = array<i32>} : memref<256x128xf32, #tpu.memory_space<vmem>>, vector<256x128xf32>,
    } else {
    }
    return
  }
  func.func @transform_0(%arg0: i32, %arg1: i32) -> (i32, i32) {
    %c0_i32 = arith.constant 0 : i32
    return %arg0, %arg1 : i32, i32
  }
  func.func @transform_1(%arg0: i32, %arg1: i32) -> (i32, i32) {
    %c0_i32 = arith.constant 0 : i32
    %c0_i32_0 = arith.constant 0 : i32
    return %arg1, %c0_i32 : i32, i32
  }
  func.func @transform_2(%arg0: i32, %arg1: i32) -> (i32, i32) {
    %c0_i32 = arith.constant 0 : i32
    %c0_i32_0 = arith.constant 0 : i32
    %c0_i32_1 = arith.constant 0 : i32
    return %c0_i32, %c0_i32_0 : i32, i32
  }
  func.func @transform_3(%arg0: i32, %arg1: i32) -> (i32, i32) {
    %c0_i32 = arith.constant 0 : i32
    %c0_i32_0 = arith.constant 0 : i32
    return %arg0, %c0_i32 : i32, i32
  }
}

module attributes {stable_mosaic.version = 11 : i64} {
  func.func @_gemm_kernel(%arg0: i32, %arg1: i32, %arg2: memref<128x896xbf16, #tpu.memory_space<vmem>>, %arg3: memref<896x128xbf16, #tpu.memory_space<vmem>>, %arg4: memref<1x128xf32, #tpu.memory_space<vmem>>, %arg5: memref<128x128xf32, #tpu.memory_space<vmem>>, %arg6: memref<128x128xf32, #tpu.memory_space<vmem>>) attributes {dimension_semantics = [#tpu.dimension_semantics<parallel>, #tpu.dimension_semantics<arbitrary>], iteration_bounds = array<i64: 1, 1>, scalar_prefetch = 0 : i64, scratch_operands = 1 : i64, tpu.core_type = #tpu.core_type<tc>, window_params = [{transform_indices = @transform_0, window_bounds = array<i64: 128, 896>}, {transform_indices = @transform_1, window_bounds = array<i64: 896, 128>}, {pipeline_mode = #tpu.pipeline_mode<synchronous>, transform_indices = @transform_2, window_bounds = array<i64: 1, 128>}, {transform_indices = @transform_3, window_bounds = array<i64: 128, 128>}]} {
    %c0_i32 = arith.constant 0 : i32
    %0 = arith.cmpi eq, %arg1, %c0_i32 : i32
    %1 = arith.extui %0 : i1 to i32
    %c0_i32_0 = arith.constant 0 : i32
    %2 = arith.cmpi ne, %1, %c0_i32_0 : i32
    scf.if %2 {
      %cst_10 = arith.constant 0.000000e+00 : f32
      %12 = vector.broadcast %cst_10 : f32 to vector<128x128xf32>
      %c0_11 = arith.constant 0 : index
      %c0_12 = arith.constant 0 : index
      %13 = vector.load %arg6[%c0_11, %c0_12] : memref<128x128xf32, #tpu.memory_space<vmem>>, vector<128x128xf32>
      tpu.vector_store %arg6[%c0_11, %c0_12], %12 {strides = array<i32>} : memref<128x128xf32, #tpu.memory_space<vmem>>, vector<128x128xf32>,
    } else {
    }
    %c0 = arith.constant 0 : index
    %c0_1 = arith.constant 0 : index
    %3 = vector.load %arg6[%c0, %c0_1] : memref<128x128xf32, #tpu.memory_space<vmem>>, vector<128x128xf32>
    %c0_2 = arith.constant 0 : index
    %c0_3 = arith.constant 0 : index
    %4 = vector.load %arg2[%c0_2, %c0_3] : memref<128x896xbf16, #tpu.memory_space<vmem>>, vector<128x896xbf16>
    %c0_4 = arith.constant 0 : index
    %c0_5 = arith.constant 0 : index
    %5 = vector.load %arg3[%c0_4, %c0_5] : memref<896x128xbf16, #tpu.memory_space<vmem>>, vector<896x128xbf16>
    %cst = arith.constant dense<0.000000e+00> : vector<128x128xf32>
    %6 = tpu.matmul %4, %5, %cst {dimension_numbers = #tpu.dot_dimension_numbers<[1], [0], [0], [1], [0, 0, 1, 1], [], []>} : vector<128x896xbf16>, vector<896x128xbf16>, vector<128x128xf32> -> vector<128x128xf32>
    %7 = arith.addf %3, %6 : vector<128x128xf32>
    %c0_6 = arith.constant 0 : index
    %c0_7 = arith.constant 0 : index
    %8 = vector.load %arg6[%c0_6, %c0_7] : memref<128x128xf32, #tpu.memory_space<vmem>>, vector<128x128xf32>
    tpu.vector_store %arg6[%c0_6, %c0_7], %7 {strides = array<i32>} : memref<128x128xf32, #tpu.memory_space<vmem>>, vector<128x128xf32>,
    %c0_i32_8 = arith.constant 0 : i32
    %9 = arith.cmpi eq, %arg1, %c0_i32_8 : i32
    %10 = arith.extui %9 : i1 to i32
    %c0_i32_9 = arith.constant 0 : i32
    %11 = arith.cmpi ne, %10, %c0_i32_9 : i32
    scf.if %11 {
      %c0_10 = arith.constant 0 : index
      %c0_11 = arith.constant 0 : index
      %12 = vector.load %arg6[%c0_10, %c0_11] : memref<128x128xf32, #tpu.memory_space<vmem>>, vector<128x128xf32>
      %c0_12 = arith.constant 0 : index
      %c0_13 = arith.constant 0 : index
      %13 = vector.load %arg4[%c0_12, %c0_13] : memref<1x128xf32, #tpu.memory_space<vmem>>, vector<1x128xf32>
      %14 = vector.broadcast %13 : vector<1x128xf32> to vector<128x128xf32>
      %15 = arith.addf %12, %14 : vector<128x128xf32>
      %cst_14 = arith.constant 0.000000e+00 : f32
      %16 = vector.broadcast %cst_14 : f32 to vector<128x128xf32>
      %17 = arith.maximumf %15, %16 : vector<128x128xf32>
      %c0_15 = arith.constant 0 : index
      %c0_16 = arith.constant 0 : index
      %18 = vector.load %arg5[%c0_15, %c0_16] : memref<128x128xf32, #tpu.memory_space<vmem>>, vector<128x128xf32>
      tpu.vector_store %arg5[%c0_15, %c0_16], %17 {strides = array<i32>} : memref<128x128xf32, #tpu.memory_space<vmem>>, vector<128x128xf32>,
    } else {
    }
    return
  }
  func.func @transform_0(%arg0: i32, %arg1: i32) -> (i32, i32) {
    %c0_i32 = arith.constant 0 : i32
    return %arg0, %arg1 : i32, i32
  }
  func.func @transform_1(%arg0: i32, %arg1: i32) -> (i32, i32) {
    %c0_i32 = arith.constant 0 : i32
    %c0_i32_0 = arith.constant 0 : i32
    return %arg1, %c0_i32 : i32, i32
  }
  func.func @transform_2(%arg0: i32, %arg1: i32) -> (i32, i32) {
    %c0_i32 = arith.constant 0 : i32
    %c0_i32_0 = arith.constant 0 : i32
    %c0_i32_1 = arith.constant 0 : i32
    return %c0_i32, %c0_i32_0 : i32, i32
  }
  func.func @transform_3(%arg0: i32, %arg1: i32) -> (i32, i32) {
    %c0_i32 = arith.constant 0 : i32
    %c0_i32_0 = arith.constant 0 : i32
    return %arg0, %c0_i32 : i32, i32
  }
}

module attributes {stable_mosaic.version = 11 : i64} {
  func.func @_gemm_bn_kernel(%arg0: i32, %arg1: memref<32x640xbf16, #tpu.memory_space<vmem>>, %arg2: memref<640x128xbf16, #tpu.memory_space<vmem>>, %arg3: memref<1x128xf32, #tpu.memory_space<vmem>>, %arg4: memref<1x128xf32, #tpu.memory_space<vmem>>, %arg5: memref<32x128xf32, #tpu.memory_space<vmem>>, %arg6: memref<32x128xf32, #tpu.memory_space<vmem>>) attributes {dimension_semantics = [#tpu.dimension_semantics<arbitrary>], iteration_bounds = array<i64: 1>, scalar_prefetch = 0 : i64, scratch_operands = 1 : i64, tpu.core_type = #tpu.core_type<tc>, window_params = [{transform_indices = @transform_0, window_bounds = array<i64: 32, 640>}, {transform_indices = @transform_1, window_bounds = array<i64: 640, 128>}, {pipeline_mode = #tpu.pipeline_mode<synchronous>, transform_indices = @transform_2, window_bounds = array<i64: 1, 128>}, {pipeline_mode = #tpu.pipeline_mode<synchronous>, transform_indices = @transform_3, window_bounds = array<i64: 1, 128>}, {pipeline_mode = #tpu.pipeline_mode<synchronous>, transform_indices = @transform_4, window_bounds = array<i64: 32, 128>}]} {
    %c0_i32 = arith.constant 0 : i32
    %0 = arith.cmpi eq, %arg0, %c0_i32 : i32
    %1 = arith.extui %0 : i1 to i32
    %c0_i32_0 = arith.constant 0 : i32
    %2 = arith.cmpi ne, %1, %c0_i32_0 : i32
    scf.if %2 {
      %cst_10 = arith.constant 0.000000e+00 : f32
      %12 = vector.broadcast %cst_10 : f32 to vector<32x128xf32>
      %c0_11 = arith.constant 0 : index
      %c0_12 = arith.constant 0 : index
      %13 = vector.load %arg6[%c0_11, %c0_12] : memref<32x128xf32, #tpu.memory_space<vmem>>, vector<32x128xf32>
      tpu.vector_store %arg6[%c0_11, %c0_12], %12 {strides = array<i32>} : memref<32x128xf32, #tpu.memory_space<vmem>>, vector<32x128xf32>,
    } else {
    }
    %c0 = arith.constant 0 : index
    %c0_1 = arith.constant 0 : index
    %3 = vector.load %arg6[%c0, %c0_1] : memref<32x128xf32, #tpu.memory_space<vmem>>, vector<32x128xf32>
    %c0_2 = arith.constant 0 : index
    %c0_3 = arith.constant 0 : index
    %4 = vector.load %arg1[%c0_2, %c0_3] : memref<32x640xbf16, #tpu.memory_space<vmem>>, vector<32x640xbf16>
    %c0_4 = arith.constant 0 : index
    %c0_5 = arith.constant 0 : index
    %5 = vector.load %arg2[%c0_4, %c0_5] : memref<640x128xbf16, #tpu.memory_space<vmem>>, vector<640x128xbf16>
    %cst = arith.constant dense<0.000000e+00> : vector<32x128xf32>
    %6 = tpu.matmul %4, %5, %cst {dimension_numbers = #tpu.dot_dimension_numbers<[1], [0], [0], [1], [0, 0, 1, 1], [], []>} : vector<32x640xbf16>, vector<640x128xbf16>, vector<32x128xf32> -> vector<32x128xf32>
    %7 = arith.addf %3, %6 : vector<32x128xf32>
    %c0_6 = arith.constant 0 : index
    %c0_7 = arith.constant 0 : index
    %8 = vector.load %arg6[%c0_6, %c0_7] : memref<32x128xf32, #tpu.memory_space<vmem>>, vector<32x128xf32>
    tpu.vector_store %arg6[%c0_6, %c0_7], %7 {strides = array<i32>} : memref<32x128xf32, #tpu.memory_space<vmem>>, vector<32x128xf32>,
    %c0_i32_8 = arith.constant 0 : i32
    %9 = arith.cmpi eq, %arg0, %c0_i32_8 : i32
    %10 = arith.extui %9 : i1 to i32
    %c0_i32_9 = arith.constant 0 : i32
    %11 = arith.cmpi ne, %10, %c0_i32_9 : i32
    scf.if %11 {
      %c0_10 = arith.constant 0 : index
      %c0_11 = arith.constant 0 : index
      %12 = vector.load %arg6[%c0_10, %c0_11] : memref<32x128xf32, #tpu.memory_space<vmem>>, vector<32x128xf32>
      %13 = tpu.iota {dimensions = array<i32: 0>} : vector<32x128xi32>
      %c32_i32 = arith.constant 32 : i32
      %14 = vector.broadcast %c32_i32 : i32 to vector<32x128xi32>
      %15 = arith.cmpi slt, %13, %14 : vector<32x128xi32>
      %16 = arith.extui %15 : vector<32x128xi1> to vector<32x128xi32>
      %17 = arith.sitofp %16 : vector<32x128xi32> to vector<32x128xf32>
      %18 = arith.mulf %12, %17 : vector<32x128xf32>
      %cst_12 = arith.constant dense<0.000000e+00> : vector<128xf32>
      %19 = vector.multi_reduction <add>, %18, %cst_12 [0] : vector<32x128xf32> to vector<128xf32>
      %20 = vector.shape_cast %19 : vector<128xf32> to vector<1x128xf32>
      %cst_13 = arith.constant 3.125000e-02 : f32
      %21 = vector.broadcast %cst_13 : f32 to vector<1x128xf32>
      %22 = arith.mulf %20, %21 : vector<1x128xf32>
      %23 = vector.broadcast %22 : vector<1x128xf32> to vector<32x128xf32>
      %24 = arith.subf %12, %23 : vector<32x128xf32>
      %25 = arith.mulf %24, %17 : vector<32x128xf32>
      %26 = arith.mulf %25, %25 : vector<32x128xf32>
      %cst_14 = arith.constant dense<0.000000e+00> : vector<128xf32>
      %27 = vector.multi_reduction <add>, %26, %cst_14 [0] : vector<32x128xf32> to vector<128xf32>
      %28 = vector.shape_cast %27 : vector<128xf32> to vector<1x128xf32>
      %cst_15 = arith.constant 3.125000e-02 : f32
      %29 = vector.broadcast %cst_15 : f32 to vector<1x128xf32>
      %30 = arith.mulf %28, %29 : vector<1x128xf32>
      %31 = vector.broadcast %22 : vector<1x128xf32> to vector<32x128xf32>
      %32 = arith.subf %12, %31 : vector<32x128xf32>
      %cst_16 = arith.constant 9.99999974E-6 : f32
      %33 = vector.broadcast %cst_16 : f32 to vector<1x128xf32>
      %34 = arith.addf %30, %33 : vector<1x128xf32>
      %35 = math.rsqrt %34 : vector<1x128xf32>
      %36 = vector.broadcast %35 : vector<1x128xf32> to vector<32x128xf32>
      %37 = arith.mulf %32, %36 : vector<32x128xf32>
      %c0_17 = arith.constant 0 : index
      %c0_18 = arith.constant 0 : index
      %38 = vector.load %arg3[%c0_17, %c0_18] : memref<1x128xf32, #tpu.memory_space<vmem>>, vector<1x128xf32>
      %39 = vector.broadcast %38 : vector<1x128xf32> to vector<32x128xf32>
      %40 = arith.mulf %37, %39 : vector<32x128xf32>
      %c0_19 = arith.constant 0 : index
      %c0_20 = arith.constant 0 : index
      %41 = vector.load %arg4[%c0_19, %c0_20] : memref<1x128xf32, #tpu.memory_space<vmem>>, vector<1x128xf32>
      %42 = vector.broadcast %41 : vector<1x128xf32> to vector<32x128xf32>
      %43 = arith.addf %40, %42 : vector<32x128xf32>
      %cst_21 = arith.constant 0.000000e+00 : f32
      %44 = vector.broadcast %cst_21 : f32 to vector<32x128xf32>
      %45 = arith.maximumf %43, %44 : vector<32x128xf32>
      %c0_22 = arith.constant 0 : index
      %c0_23 = arith.constant 0 : index
      %46 = vector.load %arg5[%c0_22, %c0_23] : memref<32x128xf32, #tpu.memory_space<vmem>>, vector<32x128xf32>
      tpu.vector_store %arg5[%c0_22, %c0_23], %45 {strides = array<i32>} : memref<32x128xf32, #tpu.memory_space<vmem>>, vector<32x128xf32>,
    } else {
    }
    return
  }
  func.func @transform_0(%arg0: i32) -> (i32, i32) {
    %c0_i32 = arith.constant 0 : i32
    %c0_i32_0 = arith.constant 0 : i32
    return %c0_i32, %arg0 : i32, i32
  }
  func.func @transform_1(%arg0: i32) -> (i32, i32) {
    %c0_i32 = arith.constant 0 : i32
    %c0_i32_0 = arith.constant 0 : i32
    return %arg0, %c0_i32 : i32, i32
  }
  func.func @transform_2(%arg0: i32) -> (i32, i32) {
    %c0_i32 = arith.constant 0 : i32
    %c0_i32_0 = arith.constant 0 : i32
    %c0_i32_1 = arith.constant 0 : i32
    return %c0_i32, %c0_i32_0 : i32, i32
  }
  func.func @transform_3(%arg0: i32) -> (i32, i32) {
    %c0_i32 = arith.constant 0 : i32
    %c0_i32_0 = arith.constant 0 : i32
    %c0_i32_1 = arith.constant 0 : i32
    return %c0_i32, %c0_i32_0 : i32, i32
  }
  func.func @transform_4(%arg0: i32) -> (i32, i32) {
    %c0_i32 = arith.constant 0 : i32
    %c0_i32_0 = arith.constant 0 : i32
    %c0_i32_1 = arith.constant 0 : i32
    return %c0_i32, %c0_i32_0 : i32, i32
  }
}

module attributes {stable_mosaic.version = 11 : i64} {
  func.func @_gemm_kernel(%arg0: i32, %arg1: i32, %arg2: memref<32x128xbf16, #tpu.memory_space<vmem>>, %arg3: memref<128x128xbf16, #tpu.memory_space<vmem>>, %arg4: memref<1x128xf32, #tpu.memory_space<vmem>>, %arg5: memref<32x128xf32, #tpu.memory_space<vmem>>, %arg6: memref<32x128xf32, #tpu.memory_space<vmem>>) attributes {dimension_semantics = [#tpu.dimension_semantics<parallel>, #tpu.dimension_semantics<arbitrary>], iteration_bounds = array<i64: 1, 1>, scalar_prefetch = 0 : i64, scratch_operands = 1 : i64, tpu.core_type = #tpu.core_type<tc>, window_params = [{transform_indices = @transform_0, window_bounds = array<i64: 32, 128>}, {transform_indices = @transform_1, window_bounds = array<i64: 128, 128>}, {pipeline_mode = #tpu.pipeline_mode<synchronous>, transform_indices = @transform_2, window_bounds = array<i64: 1, 128>}, {transform_indices = @transform_3, window_bounds = array<i64: 32, 128>}]} {
    %c0_i32 = arith.constant 0 : i32
    %0 = arith.cmpi eq, %arg1, %c0_i32 : i32
    %1 = arith.extui %0 : i1 to i32
    %c0_i32_0 = arith.constant 0 : i32
    %2 = arith.cmpi ne, %1, %c0_i32_0 : i32
    scf.if %2 {
      %cst_10 = arith.constant 0.000000e+00 : f32
      %12 = vector.broadcast %cst_10 : f32 to vector<32x128xf32>
      %c0_11 = arith.constant 0 : index
      %c0_12 = arith.constant 0 : index
      %13 = vector.load %arg6[%c0_11, %c0_12] : memref<32x128xf32, #tpu.memory_space<vmem>>, vector<32x128xf32>
      tpu.vector_store %arg6[%c0_11, %c0_12], %12 {strides = array<i32>} : memref<32x128xf32, #tpu.memory_space<vmem>>, vector<32x128xf32>,
    } else {
    }
    %c0 = arith.constant 0 : index
    %c0_1 = arith.constant 0 : index
    %3 = vector.load %arg6[%c0, %c0_1] : memref<32x128xf32, #tpu.memory_space<vmem>>, vector<32x128xf32>
    %c0_2 = arith.constant 0 : index
    %c0_3 = arith.constant 0 : index
    %4 = vector.load %arg2[%c0_2, %c0_3] : memref<32x128xbf16, #tpu.memory_space<vmem>>, vector<32x128xbf16>
    %c0_4 = arith.constant 0 : index
    %c0_5 = arith.constant 0 : index
    %5 = vector.load %arg3[%c0_4, %c0_5] : memref<128x128xbf16, #tpu.memory_space<vmem>>, vector<128x128xbf16>
    %cst = arith.constant dense<0.000000e+00> : vector<32x128xf32>
    %6 = tpu.matmul %4, %5, %cst {dimension_numbers = #tpu.dot_dimension_numbers<[1], [0], [0], [1], [0, 0, 1, 1], [], []>} : vector<32x128xbf16>, vector<128x128xbf16>, vector<32x128xf32> -> vector<32x128xf32>
    %7 = arith.addf %3, %6 : vector<32x128xf32>
    %c0_6 = arith.constant 0 : index
    %c0_7 = arith.constant 0 : index
    %8 = vector.load %arg6[%c0_6, %c0_7] : memref<32x128xf32, #tpu.memory_space<vmem>>, vector<32x128xf32>
    tpu.vector_store %arg6[%c0_6, %c0_7], %7 {strides = array<i32>} : memref<32x128xf32, #tpu.memory_space<vmem>>, vector<32x128xf32>,
    %c0_i32_8 = arith.constant 0 : i32
    %9 = arith.cmpi eq, %arg1, %c0_i32_8 : i32
    %10 = arith.extui %9 : i1 to i32
    %c0_i32_9 = arith.constant 0 : i32
    %11 = arith.cmpi ne, %10, %c0_i32_9 : i32
    scf.if %11 {
      %c0_10 = arith.constant 0 : index
      %c0_11 = arith.constant 0 : index
      %12 = vector.load %arg6[%c0_10, %c0_11] : memref<32x128xf32, #tpu.memory_space<vmem>>, vector<32x128xf32>
      %c0_12 = arith.constant 0 : index
      %c0_13 = arith.constant 0 : index
      %13 = vector.load %arg4[%c0_12, %c0_13] : memref<1x128xf32, #tpu.memory_space<vmem>>, vector<1x128xf32>
      %14 = vector.broadcast %13 : vector<1x128xf32> to vector<32x128xf32>
      %15 = arith.addf %12, %14 : vector<32x128xf32>
      %c0_14 = arith.constant 0 : index
      %c0_15 = arith.constant 0 : index
      %16 = vector.load %arg5[%c0_14, %c0_15] : memref<32x128xf32, #tpu.memory_space<vmem>>, vector<32x128xf32>
      tpu.vector_store %arg5[%c0_14, %c0_15], %15 {strides = array<i32>} : memref<32x128xf32, #tpu.memory_space<vmem>>, vector<32x128xf32>,
    } else {
    }
    return
  }
  func.func @transform_0(%arg0: i32, %arg1: i32) -> (i32, i32) {
    %c0_i32 = arith.constant 0 : i32
    return %arg0, %arg1 : i32, i32
  }
  func.func @transform_1(%arg0: i32, %arg1: i32) -> (i32, i32) {
    %c0_i32 = arith.constant 0 : i32
    %c0_i32_0 = arith.constant 0 : i32
    return %arg1, %c0_i32 : i32, i32
  }
  func.func @transform_2(%arg0: i32, %arg1: i32) -> (i32, i32) {
    %c0_i32 = arith.constant 0 : i32
    %c0_i32_0 = arith.constant 0 : i32
    %c0_i32_1 = arith.constant 0 : i32
    return %c0_i32, %c0_i32_0 : i32, i32
  }
  func.func @transform_3(%arg0: i32, %arg1: i32) -> (i32, i32) {
    %c0_i32 = arith.constant 0 : i32
    %c0_i32_0 = arith.constant 0 : i32
    return %arg0, %c0_i32 : i32, i32
  }
}

module attributes {stable_mosaic.version = 11 : i64} {
  func.func @_gemm_bn_kernel(%arg0: i32, %arg1: memref<32x1152xbf16, #tpu.memory_space<vmem>>, %arg2: memref<1152x128xbf16, #tpu.memory_space<vmem>>, %arg3: memref<1x128xf32, #tpu.memory_space<vmem>>, %arg4: memref<1x128xf32, #tpu.memory_space<vmem>>, %arg5: memref<32x128xf32, #tpu.memory_space<vmem>>, %arg6: memref<32x128xf32, #tpu.memory_space<vmem>>, %arg7: memref<32x128xf32, #tpu.memory_space<vmem>>) attributes {dimension_semantics = [#tpu.dimension_semantics<arbitrary>], iteration_bounds = array<i64: 1>, scalar_prefetch = 0 : i64, scratch_operands = 1 : i64, tpu.core_type = #tpu.core_type<tc>, window_params = [{transform_indices = @transform_0, window_bounds = array<i64: 32, 1152>}, {transform_indices = @transform_1, window_bounds = array<i64: 1152, 128>}, {pipeline_mode = #tpu.pipeline_mode<synchronous>, transform_indices = @transform_2, window_bounds = array<i64: 1, 128>}, {pipeline_mode = #tpu.pipeline_mode<synchronous>, transform_indices = @transform_3, window_bounds = array<i64: 1, 128>}, {pipeline_mode = #tpu.pipeline_mode<synchronous>, transform_indices = @transform_4, window_bounds = array<i64: 32, 128>}, {pipeline_mode = #tpu.pipeline_mode<synchronous>, transform_indices = @transform_5, window_bounds = array<i64: 32, 128>}]} {
    %c0_i32 = arith.constant 0 : i32
    %0 = arith.cmpi eq, %arg0, %c0_i32 : i32
    %1 = arith.extui %0 : i1 to i32
    %c0_i32_0 = arith.constant 0 : i32
    %2 = arith.cmpi ne, %1, %c0_i32_0 : i32
    scf.if %2 {
      %cst_10 = arith.constant 0.000000e+00 : f32
      %12 = vector.broadcast %cst_10 : f32 to vector<32x128xf32>
      %c0_11 = arith.constant 0 : index
      %c0_12 = arith.constant 0 : index
      %13 = vector.load %arg7[%c0_11, %c0_12] : memref<32x128xf32, #tpu.memory_space<vmem>>, vector<32x128xf32>
      tpu.vector_store %arg7[%c0_11, %c0_12], %12 {strides = array<i32>} : memref<32x128xf32, #tpu.memory_space<vmem>>, vector<32x128xf32>,
    } else {
    }
    %c0 = arith.constant 0 : index
    %c0_1 = arith.constant 0 : index
    %3 = vector.load %arg7[%c0, %c0_1] : memref<32x128xf32, #tpu.memory_space<vmem>>, vector<32x128xf32>
    %c0_2 = arith.constant 0 : index
    %c0_3 = arith.constant 0 : index
    %4 = vector.load %arg1[%c0_2, %c0_3] : memref<32x1152xbf16, #tpu.memory_space<vmem>>, vector<32x1152xbf16>
    %c0_4 = arith.constant 0 : index
    %c0_5 = arith.constant 0 : index
    %5 = vector.load %arg2[%c0_4, %c0_5] : memref<1152x128xbf16, #tpu.memory_space<vmem>>, vector<1152x128xbf16>
    %cst = arith.constant dense<0.000000e+00> : vector<32x128xf32>
    %6 = tpu.matmul %4, %5, %cst {dimension_numbers = #tpu.dot_dimension_numbers<[1], [0], [0], [1], [0, 0, 1, 1], [], []>} : vector<32x1152xbf16>, vector<1152x128xbf16>, vector<32x128xf32> -> vector<32x128xf32>
    %7 = arith.addf %3, %6 : vector<32x128xf32>
    %c0_6 = arith.constant 0 : index
    %c0_7 = arith.constant 0 : index
    %8 = vector.load %arg7[%c0_6, %c0_7] : memref<32x128xf32, #tpu.memory_space<vmem>>, vector<32x128xf32>
    tpu.vector_store %arg7[%c0_6, %c0_7], %7 {strides = array<i32>} : memref<32x128xf32, #tpu.memory_space<vmem>>, vector<32x128xf32>,
    %c0_i32_8 = arith.constant 0 : i32
    %9 = arith.cmpi eq, %arg0, %c0_i32_8 : i32
    %10 = arith.extui %9 : i1 to i32
    %c0_i32_9 = arith.constant 0 : i32
    %11 = arith.cmpi ne, %10, %c0_i32_9 : i32
    scf.if %11 {
      %c0_10 = arith.constant 0 : index
      %c0_11 = arith.constant 0 : index
      %12 = vector.load %arg7[%c0_10, %c0_11] : memref<32x128xf32, #tpu.memory_space<vmem>>, vector<32x128xf32>
      %13 = tpu.iota {dimensions = array<i32: 0>} : vector<32x128xi32>
      %c32_i32 = arith.constant 32 : i32
      %14 = vector.broadcast %c32_i32 : i32 to vector<32x128xi32>
      %15 = arith.cmpi slt, %13, %14 : vector<32x128xi32>
      %16 = arith.extui %15 : vector<32x128xi1> to vector<32x128xi32>
      %17 = arith.sitofp %16 : vector<32x128xi32> to vector<32x128xf32>
      %18 = arith.mulf %12, %17 : vector<32x128xf32>
      %cst_12 = arith.constant dense<0.000000e+00> : vector<128xf32>
      %19 = vector.multi_reduction <add>, %18, %cst_12 [0] : vector<32x128xf32> to vector<128xf32>
      %20 = vector.shape_cast %19 : vector<128xf32> to vector<1x128xf32>
      %cst_13 = arith.constant 3.125000e-02 : f32
      %21 = vector.broadcast %cst_13 : f32 to vector<1x128xf32>
      %22 = arith.mulf %20, %21 : vector<1x128xf32>
      %23 = vector.broadcast %22 : vector<1x128xf32> to vector<32x128xf32>
      %24 = arith.subf %12, %23 : vector<32x128xf32>
      %25 = arith.mulf %24, %17 : vector<32x128xf32>
      %26 = arith.mulf %25, %25 : vector<32x128xf32>
      %cst_14 = arith.constant dense<0.000000e+00> : vector<128xf32>
      %27 = vector.multi_reduction <add>, %26, %cst_14 [0] : vector<32x128xf32> to vector<128xf32>
      %28 = vector.shape_cast %27 : vector<128xf32> to vector<1x128xf32>
      %cst_15 = arith.constant 3.125000e-02 : f32
      %29 = vector.broadcast %cst_15 : f32 to vector<1x128xf32>
      %30 = arith.mulf %28, %29 : vector<1x128xf32>
      %31 = vector.broadcast %22 : vector<1x128xf32> to vector<32x128xf32>
      %32 = arith.subf %12, %31 : vector<32x128xf32>
      %cst_16 = arith.constant 9.99999974E-6 : f32
      %33 = vector.broadcast %cst_16 : f32 to vector<1x128xf32>
      %34 = arith.addf %30, %33 : vector<1x128xf32>
      %35 = math.rsqrt %34 : vector<1x128xf32>
      %36 = vector.broadcast %35 : vector<1x128xf32> to vector<32x128xf32>
      %37 = arith.mulf %32, %36 : vector<32x128xf32>
      %c0_17 = arith.constant 0 : index
      %c0_18 = arith.constant 0 : index
      %38 = vector.load %arg3[%c0_17, %c0_18] : memref<1x128xf32, #tpu.memory_space<vmem>>, vector<1x128xf32>
      %39 = vector.broadcast %38 : vector<1x128xf32> to vector<32x128xf32>
      %40 = arith.mulf %37, %39 : vector<32x128xf32>
      %c0_19 = arith.constant 0 : index
      %c0_20 = arith.constant 0 : index
      %41 = vector.load %arg4[%c0_19, %c0_20] : memref<1x128xf32, #tpu.memory_space<vmem>>, vector<1x128xf32>
      %42 = vector.broadcast %41 : vector<1x128xf32> to vector<32x128xf32>
      %43 = arith.addf %40, %42 : vector<32x128xf32>
      %c0_21 = arith.constant 0 : index
      %c0_22 = arith.constant 0 : index
      %44 = vector.load %arg5[%c0_21, %c0_22] : memref<32x128xf32, #tpu.memory_space<vmem>>, vector<32x128xf32>
      %45 = arith.addf %43, %44 : vector<32x128xf32>
      %c0_23 = arith.constant 0 : index
      %c0_24 = arith.constant 0 : index
      %46 = vector.load %arg6[%c0_23, %c0_24] : memref<32x128xf32, #tpu.memory_space<vmem>>, vector<32x128xf32>
      tpu.vector_store %arg6[%c0_23, %c0_24], %45 {strides = array<i32>} : memref<32x128xf32, #tpu.memory_space<vmem>>, vector<32x128xf32>,
    } else {
    }
    return
  }
  func.func @transform_0(%arg0: i32) -> (i32, i32) {
    %c0_i32 = arith.constant 0 : i32
    %c0_i32_0 = arith.constant 0 : i32
    return %c0_i32, %arg0 : i32, i32
  }
  func.func @transform_1(%arg0: i32) -> (i32, i32) {
    %c0_i32 = arith.constant 0 : i32
    %c0_i32_0 = arith.constant 0 : i32
    return %arg0, %c0_i32 : i32, i32
  }
  func.func @transform_2(%arg0: i32) -> (i32, i32) {
    %c0_i32 = arith.constant 0 : i32
    %c0_i32_0 = arith.constant 0 : i32
    %c0_i32_1 = arith.constant 0 : i32
    return %c0_i32, %c0_i32_0 : i32, i32
  }
  func.func @transform_3(%arg0: i32) -> (i32, i32) {
    %c0_i32 = arith.constant 0 : i32
    %c0_i32_0 = arith.constant 0 : i32
    %c0_i32_1 = arith.constant 0 : i32
    return %c0_i32, %c0_i32_0 : i32, i32
  }
  func.func @transform_4(%arg0: i32) -> (i32, i32) {
    %c0_i32 = arith.constant 0 : i32
    %c0_i32_0 = arith.constant 0 : i32
    %c0_i32_1 = arith.constant 0 : i32
    return %c0_i32, %c0_i32_0 : i32, i32
  }
  func.func @transform_5(%arg0: i32) -> (i32, i32) {
    %c0_i32 = arith.constant 0 : i32
    %c0_i32_0 = arith.constant 0 : i32
    %c0_i32_1 = arith.constant 0 : i32
    return %c0_i32, %c0_i32_0 : i32, i32
  }
}

module attributes {stable_mosaic.version = 11 : i64} {
  func.func @_gemm_bn_kernel(%arg0: i32, %arg1: memref<32x1152xbf16, #tpu.memory_space<vmem>>, %arg2: memref<1152x128xbf16, #tpu.memory_space<vmem>>, %arg3: memref<1x128xf32, #tpu.memory_space<vmem>>, %arg4: memref<1x128xf32, #tpu.memory_space<vmem>>, %arg5: memref<32x128xf32, #tpu.memory_space<vmem>>, %arg6: memref<32x128xf32, #tpu.memory_space<vmem>>) attributes {dimension_semantics = [#tpu.dimension_semantics<arbitrary>], iteration_bounds = array<i64: 1>, scalar_prefetch = 0 : i64, scratch_operands = 1 : i64, tpu.core_type = #tpu.core_type<tc>, window_params = [{transform_indices = @transform_0, window_bounds = array<i64: 32, 1152>}, {transform_indices = @transform_1, window_bounds = array<i64: 1152, 128>}, {pipeline_mode = #tpu.pipeline_mode<synchronous>, transform_indices = @transform_2, window_bounds = array<i64: 1, 128>}, {pipeline_mode = #tpu.pipeline_mode<synchronous>, transform_indices = @transform_3, window_bounds = array<i64: 1, 128>}, {pipeline_mode = #tpu.pipeline_mode<synchronous>, transform_indices = @transform_4, window_bounds = array<i64: 32, 128>}]} {
    %c0_i32 = arith.constant 0 : i32
    %0 = arith.cmpi eq, %arg0, %c0_i32 : i32
    %1 = arith.extui %0 : i1 to i32
    %c0_i32_0 = arith.constant 0 : i32
    %2 = arith.cmpi ne, %1, %c0_i32_0 : i32
    scf.if %2 {
      %cst_10 = arith.constant 0.000000e+00 : f32
      %12 = vector.broadcast %cst_10 : f32 to vector<32x128xf32>
      %c0_11 = arith.constant 0 : index
      %c0_12 = arith.constant 0 : index
      %13 = vector.load %arg6[%c0_11, %c0_12] : memref<32x128xf32, #tpu.memory_space<vmem>>, vector<32x128xf32>
      tpu.vector_store %arg6[%c0_11, %c0_12], %12 {strides = array<i32>} : memref<32x128xf32, #tpu.memory_space<vmem>>, vector<32x128xf32>,
    } else {
    }
    %c0 = arith.constant 0 : index
    %c0_1 = arith.constant 0 : index
    %3 = vector.load %arg6[%c0, %c0_1] : memref<32x128xf32, #tpu.memory_space<vmem>>, vector<32x128xf32>
    %c0_2 = arith.constant 0 : index
    %c0_3 = arith.constant 0 : index
    %4 = vector.load %arg1[%c0_2, %c0_3] : memref<32x1152xbf16, #tpu.memory_space<vmem>>, vector<32x1152xbf16>
    %c0_4 = arith.constant 0 : index
    %c0_5 = arith.constant 0 : index
    %5 = vector.load %arg2[%c0_4, %c0_5] : memref<1152x128xbf16, #tpu.memory_space<vmem>>, vector<1152x128xbf16>
    %cst = arith.constant dense<0.000000e+00> : vector<32x128xf32>
    %6 = tpu.matmul %4, %5, %cst {dimension_numbers = #tpu.dot_dimension_numbers<[1], [0], [0], [1], [0, 0, 1, 1], [], []>} : vector<32x1152xbf16>, vector<1152x128xbf16>, vector<32x128xf32> -> vector<32x128xf32>
    %7 = arith.addf %3, %6 : vector<32x128xf32>
    %c0_6 = arith.constant 0 : index
    %c0_7 = arith.constant 0 : index
    %8 = vector.load %arg6[%c0_6, %c0_7] : memref<32x128xf32, #tpu.memory_space<vmem>>, vector<32x128xf32>
    tpu.vector_store %arg6[%c0_6, %c0_7], %7 {strides = array<i32>} : memref<32x128xf32, #tpu.memory_space<vmem>>, vector<32x128xf32>,
    %c0_i32_8 = arith.constant 0 : i32
    %9 = arith.cmpi eq, %arg0, %c0_i32_8 : i32
    %10 = arith.extui %9 : i1 to i32
    %c0_i32_9 = arith.constant 0 : i32
    %11 = arith.cmpi ne, %10, %c0_i32_9 : i32
    scf.if %11 {
      %c0_10 = arith.constant 0 : index
      %c0_11 = arith.constant 0 : index
      %12 = vector.load %arg6[%c0_10, %c0_11] : memref<32x128xf32, #tpu.memory_space<vmem>>, vector<32x128xf32>
      %13 = tpu.iota {dimensions = array<i32: 0>} : vector<32x128xi32>
      %c32_i32 = arith.constant 32 : i32
      %14 = vector.broadcast %c32_i32 : i32 to vector<32x128xi32>
      %15 = arith.cmpi slt, %13, %14 : vector<32x128xi32>
      %16 = arith.extui %15 : vector<32x128xi1> to vector<32x128xi32>
      %17 = arith.sitofp %16 : vector<32x128xi32> to vector<32x128xf32>
      %18 = arith.mulf %12, %17 : vector<32x128xf32>
      %cst_12 = arith.constant dense<0.000000e+00> : vector<128xf32>
      %19 = vector.multi_reduction <add>, %18, %cst_12 [0] : vector<32x128xf32> to vector<128xf32>
      %20 = vector.shape_cast %19 : vector<128xf32> to vector<1x128xf32>
      %cst_13 = arith.constant 3.125000e-02 : f32
      %21 = vector.broadcast %cst_13 : f32 to vector<1x128xf32>
      %22 = arith.mulf %20, %21 : vector<1x128xf32>
      %23 = vector.broadcast %22 : vector<1x128xf32> to vector<32x128xf32>
      %24 = arith.subf %12, %23 : vector<32x128xf32>
      %25 = arith.mulf %24, %17 : vector<32x128xf32>
      %26 = arith.mulf %25, %25 : vector<32x128xf32>
      %cst_14 = arith.constant dense<0.000000e+00> : vector<128xf32>
      %27 = vector.multi_reduction <add>, %26, %cst_14 [0] : vector<32x128xf32> to vector<128xf32>
      %28 = vector.shape_cast %27 : vector<128xf32> to vector<1x128xf32>
      %cst_15 = arith.constant 3.125000e-02 : f32
      %29 = vector.broadcast %cst_15 : f32 to vector<1x128xf32>
      %30 = arith.mulf %28, %29 : vector<1x128xf32>
      %31 = vector.broadcast %22 : vector<1x128xf32> to vector<32x128xf32>
      %32 = arith.subf %12, %31 : vector<32x128xf32>
      %cst_16 = arith.constant 9.99999974E-6 : f32
      %33 = vector.broadcast %cst_16 : f32 to vector<1x128xf32>
      %34 = arith.addf %30, %33 : vector<1x128xf32>
      %35 = math.rsqrt %34 : vector<1x128xf32>
      %36 = vector.broadcast %35 : vector<1x128xf32> to vector<32x128xf32>
      %37 = arith.mulf %32, %36 : vector<32x128xf32>
      %c0_17 = arith.constant 0 : index
      %c0_18 = arith.constant 0 : index
      %38 = vector.load %arg3[%c0_17, %c0_18] : memref<1x128xf32, #tpu.memory_space<vmem>>, vector<1x128xf32>
      %39 = vector.broadcast %38 : vector<1x128xf32> to vector<32x128xf32>
      %40 = arith.mulf %37, %39 : vector<32x128xf32>
      %c0_19 = arith.constant 0 : index
      %c0_20 = arith.constant 0 : index
      %41 = vector.load %arg4[%c0_19, %c0_20] : memref<1x128xf32, #tpu.memory_space<vmem>>, vector<1x128xf32>
      %42 = vector.broadcast %41 : vector<1x128xf32> to vector<32x128xf32>
      %43 = arith.addf %40, %42 : vector<32x128xf32>
      %cst_21 = arith.constant 0.000000e+00 : f32
      %44 = vector.broadcast %cst_21 : f32 to vector<32x128xf32>
      %45 = arith.maximumf %43, %44 : vector<32x128xf32>
      %c0_22 = arith.constant 0 : index
      %c0_23 = arith.constant 0 : index
      %46 = vector.load %arg5[%c0_22, %c0_23] : memref<32x128xf32, #tpu.memory_space<vmem>>, vector<32x128xf32>
      tpu.vector_store %arg5[%c0_22, %c0_23], %45 {strides = array<i32>} : memref<32x128xf32, #tpu.memory_space<vmem>>, vector<32x128xf32>,
    } else {
    }
    return
  }
  func.func @transform_0(%arg0: i32) -> (i32, i32) {
    %c0_i32 = arith.constant 0 : i32
    %c0_i32_0 = arith.constant 0 : i32
    return %c0_i32, %arg0 : i32, i32
  }
  func.func @transform_1(%arg0: i32) -> (i32, i32) {
    %c0_i32 = arith.constant 0 : i32
    %c0_i32_0 = arith.constant 0 : i32
    return %arg0, %c0_i32 : i32, i32
  }
  func.func @transform_2(%arg0: i32) -> (i32, i32) {
    %c0_i32 = arith.constant 0 : i32
    %c0_i32_0 = arith.constant 0 : i32
    %c0_i32_1 = arith.constant 0 : i32
    return %c0_i32, %c0_i32_0 : i32, i32
  }
  func.func @transform_3(%arg0: i32) -> (i32, i32) {
    %c0_i32 = arith.constant 0 : i32
    %c0_i32_0 = arith.constant 0 : i32
    %c0_i32_1 = arith.constant 0 : i32
    return %c0_i32, %c0_i32_0 : i32, i32
  }
  func.func @transform_4(%arg0: i32) -> (i32, i32) {
    %c0_i32 = arith.constant 0 : i32
    %c0_i32_0 = arith.constant 0 : i32
    %c0_i32_1 = arith.constant 0 : i32
    return %c0_i32, %c0_i32_0 : i32, i32
  }
}

module attributes {stable_mosaic.version = 11 : i64} {
  func.func @_gemm_kernel(%arg0: i32, %arg1: i32, %arg2: memref<32x512xbf16, #tpu.memory_space<vmem>>, %arg3: memref<512x128xbf16, #tpu.memory_space<vmem>>, %arg4: memref<1x128xf32, #tpu.memory_space<vmem>>, %arg5: memref<32x128xf32, #tpu.memory_space<vmem>>, %arg6: memref<32x128xf32, #tpu.memory_space<vmem>>) attributes {dimension_semantics = [#tpu.dimension_semantics<parallel>, #tpu.dimension_semantics<arbitrary>], iteration_bounds = array<i64: 1, 1>, scalar_prefetch = 0 : i64, scratch_operands = 1 : i64, tpu.core_type = #tpu.core_type<tc>, window_params = [{transform_indices = @transform_0, window_bounds = array<i64: 32, 512>}, {transform_indices = @transform_1, window_bounds = array<i64: 512, 128>}, {pipeline_mode = #tpu.pipeline_mode<synchronous>, transform_indices = @transform_2, window_bounds = array<i64: 1, 128>}, {transform_indices = @transform_3, window_bounds = array<i64: 32, 128>}]} {
    %c0_i32 = arith.constant 0 : i32
    %0 = arith.cmpi eq, %arg1, %c0_i32 : i32
    %1 = arith.extui %0 : i1 to i32
    %c0_i32_0 = arith.constant 0 : i32
    %2 = arith.cmpi ne, %1, %c0_i32_0 : i32
    scf.if %2 {
      %cst_10 = arith.constant 0.000000e+00 : f32
      %12 = vector.broadcast %cst_10 : f32 to vector<32x128xf32>
      %c0_11 = arith.constant 0 : index
      %c0_12 = arith.constant 0 : index
      %13 = vector.load %arg6[%c0_11, %c0_12] : memref<32x128xf32, #tpu.memory_space<vmem>>, vector<32x128xf32>
      tpu.vector_store %arg6[%c0_11, %c0_12], %12 {strides = array<i32>} : memref<32x128xf32, #tpu.memory_space<vmem>>, vector<32x128xf32>,
    } else {
    }
    %c0 = arith.constant 0 : index
    %c0_1 = arith.constant 0 : index
    %3 = vector.load %arg6[%c0, %c0_1] : memref<32x128xf32, #tpu.memory_space<vmem>>, vector<32x128xf32>
    %c0_2 = arith.constant 0 : index
    %c0_3 = arith.constant 0 : index
    %4 = vector.load %arg2[%c0_2, %c0_3] : memref<32x512xbf16, #tpu.memory_space<vmem>>, vector<32x512xbf16>
    %c0_4 = arith.constant 0 : index
    %c0_5 = arith.constant 0 : index
    %5 = vector.load %arg3[%c0_4, %c0_5] : memref<512x128xbf16, #tpu.memory_space<vmem>>, vector<512x128xbf16>
    %cst = arith.constant dense<0.000000e+00> : vector<32x128xf32>
    %6 = tpu.matmul %4, %5, %cst {dimension_numbers = #tpu.dot_dimension_numbers<[1], [0], [0], [1], [0, 0, 1, 1], [], []>} : vector<32x512xbf16>, vector<512x128xbf16>, vector<32x128xf32> -> vector<32x128xf32>
    %7 = arith.addf %3, %6 : vector<32x128xf32>
    %c0_6 = arith.constant 0 : index
    %c0_7 = arith.constant 0 : index
    %8 = vector.load %arg6[%c0_6, %c0_7] : memref<32x128xf32, #tpu.memory_space<vmem>>, vector<32x128xf32>
    tpu.vector_store %arg6[%c0_6, %c0_7], %7 {strides = array<i32>} : memref<32x128xf32, #tpu.memory_space<vmem>>, vector<32x128xf32>,
    %c0_i32_8 = arith.constant 0 : i32
    %9 = arith.cmpi eq, %arg1, %c0_i32_8 : i32
    %10 = arith.extui %9 : i1 to i32
    %c0_i32_9 = arith.constant 0 : i32
    %11 = arith.cmpi ne, %10, %c0_i32_9 : i32
    scf.if %11 {
      %c0_10 = arith.constant 0 : index
      %c0_11 = arith.constant 0 : index
      %12 = vector.load %arg6[%c0_10, %c0_11] : memref<32x128xf32, #tpu.memory_space<vmem>>, vector<32x128xf32>
      %c0_12 = arith.constant 0 : index
      %c0_13 = arith.constant 0 : index
      %13 = vector.load %arg4[%c0_12, %c0_13] : memref<1x128xf32, #tpu.memory_space<vmem>>, vector<1x128xf32>
      %14 = vector.broadcast %13 : vector<1x128xf32> to vector<32x128xf32>
      %15 = arith.addf %12, %14 : vector<32x128xf32>
      %c0_14 = arith.constant 0 : index
      %c0_15 = arith.constant 0 : index
      %16 = vector.load %arg5[%c0_14, %c0_15] : memref<32x128xf32, #tpu.memory_space<vmem>>, vector<32x128xf32>
      tpu.vector_store %arg5[%c0_14, %c0_15], %15 {strides = array<i32>} : memref<32x128xf32, #tpu.memory_space<vmem>>, vector<32x128xf32>,
    } else {
    }
    return
  }
  func.func @transform_0(%arg0: i32, %arg1: i32) -> (i32, i32) {
    %c0_i32 = arith.constant 0 : i32
    return %arg0, %arg1 : i32, i32
  }
  func.func @transform_1(%arg0: i32, %arg1: i32) -> (i32, i32) {
    %c0_i32 = arith.constant 0 : i32
    %c0_i32_0 = arith.constant 0 : i32
    return %arg1, %c0_i32 : i32, i32
  }
  func.func @transform_2(%arg0: i32, %arg1: i32) -> (i32, i32) {
    %c0_i32 = arith.constant 0 : i32
    %c0_i32_0 = arith.constant 0 : i32
    %c0_i32_1 = arith.constant 0 : i32
    return %c0_i32, %c0_i32_0 : i32, i32
  }
  func.func @transform_3(%arg0: i32, %arg1: i32) -> (i32, i32) {
    %c0_i32 = arith.constant 0 : i32
    %c0_i32_0 = arith.constant 0 : i32
    return %arg0, %c0_i32 : i32, i32
  }
}

module attributes {stable_mosaic.version = 11 : i64} {
  func.func @_gemm_kernel(%arg0: i32, %arg1: i32, %arg2: memref<32x256xbf16, #tpu.memory_space<vmem>>, %arg3: memref<256x128xbf16, #tpu.memory_space<vmem>>, %arg4: memref<1x128xf32, #tpu.memory_space<vmem>>, %arg5: memref<32x128xf32, #tpu.memory_space<vmem>>, %arg6: memref<32x128xf32, #tpu.memory_space<vmem>>) attributes {dimension_semantics = [#tpu.dimension_semantics<parallel>, #tpu.dimension_semantics<arbitrary>], iteration_bounds = array<i64: 1, 1>, scalar_prefetch = 0 : i64, scratch_operands = 1 : i64, tpu.core_type = #tpu.core_type<tc>, window_params = [{transform_indices = @transform_0, window_bounds = array<i64: 32, 256>}, {transform_indices = @transform_1, window_bounds = array<i64: 256, 128>}, {pipeline_mode = #tpu.pipeline_mode<synchronous>, transform_indices = @transform_2, window_bounds = array<i64: 1, 128>}, {transform_indices = @transform_3, window_bounds = array<i64: 32, 128>}]} {
    %c0_i32 = arith.constant 0 : i32
    %0 = arith.cmpi eq, %arg1, %c0_i32 : i32
    %1 = arith.extui %0 : i1 to i32
    %c0_i32_0 = arith.constant 0 : i32
    %2 = arith.cmpi ne, %1, %c0_i32_0 : i32
    scf.if %2 {
      %cst_10 = arith.constant 0.000000e+00 : f32
      %12 = vector.broadcast %cst_10 : f32 to vector<32x128xf32>
      %c0_11 = arith.constant 0 : index
      %c0_12 = arith.constant 0 : index
      %13 = vector.load %arg6[%c0_11, %c0_12] : memref<32x128xf32, #tpu.memory_space<vmem>>, vector<32x128xf32>
      tpu.vector_store %arg6[%c0_11, %c0_12], %12 {strides = array<i32>} : memref<32x128xf32, #tpu.memory_space<vmem>>, vector<32x128xf32>,
    } else {
    }
    %c0 = arith.constant 0 : index
    %c0_1 = arith.constant 0 : index
    %3 = vector.load %arg6[%c0, %c0_1] : memref<32x128xf32, #tpu.memory_space<vmem>>, vector<32x128xf32>
    %c0_2 = arith.constant 0 : index
    %c0_3 = arith.constant 0 : index
    %4 = vector.load %arg2[%c0_2, %c0_3] : memref<32x256xbf16, #tpu.memory_space<vmem>>, vector<32x256xbf16>
    %c0_4 = arith.constant 0 : index
    %c0_5 = arith.constant 0 : index
    %5 = vector.load %arg3[%c0_4, %c0_5] : memref<256x128xbf16, #tpu.memory_space<vmem>>, vector<256x128xbf16>
    %cst = arith.constant dense<0.000000e+00> : vector<32x128xf32>
    %6 = tpu.matmul %4, %5, %cst {dimension_numbers = #tpu.dot_dimension_numbers<[1], [0], [0], [1], [0, 0, 1, 1], [], []>} : vector<32x256xbf16>, vector<256x128xbf16>, vector<32x128xf32> -> vector<32x128xf32>
    %7 = arith.addf %3, %6 : vector<32x128xf32>
    %c0_6 = arith.constant 0 : index
    %c0_7 = arith.constant 0 : index
    %8 = vector.load %arg6[%c0_6, %c0_7] : memref<32x128xf32, #tpu.memory_space<vmem>>, vector<32x128xf32>
    tpu.vector_store %arg6[%c0_6, %c0_7], %7 {strides = array<i32>} : memref<32x128xf32, #tpu.memory_space<vmem>>, vector<32x128xf32>,
    %c0_i32_8 = arith.constant 0 : i32
    %9 = arith.cmpi eq, %arg1, %c0_i32_8 : i32
    %10 = arith.extui %9 : i1 to i32
    %c0_i32_9 = arith.constant 0 : i32
    %11 = arith.cmpi ne, %10, %c0_i32_9 : i32
    scf.if %11 {
      %c0_10 = arith.constant 0 : index
      %c0_11 = arith.constant 0 : index
      %12 = vector.load %arg6[%c0_10, %c0_11] : memref<32x128xf32, #tpu.memory_space<vmem>>, vector<32x128xf32>
      %c0_12 = arith.constant 0 : index
      %c0_13 = arith.constant 0 : index
      %13 = vector.load %arg4[%c0_12, %c0_13] : memref<1x128xf32, #tpu.memory_space<vmem>>, vector<1x128xf32>
      %14 = vector.broadcast %13 : vector<1x128xf32> to vector<32x128xf32>
      %15 = arith.addf %12, %14 : vector<32x128xf32>
      %c0_14 = arith.constant 0 : index
      %c0_15 = arith.constant 0 : index
      %16 = vector.load %arg5[%c0_14, %c0_15] : memref<32x128xf32, #tpu.memory_space<vmem>>, vector<32x128xf32>
      tpu.vector_store %arg5[%c0_14, %c0_15], %15 {strides = array<i32>} : memref<32x128xf32, #tpu.memory_space<vmem>>, vector<32x128xf32>,
    } else {
    }
    return
  }
  func.func @transform_0(%arg0: i32, %arg1: i32) -> (i32, i32) {
    %c0_i32 = arith.constant 0 : i32
    return %arg0, %arg1 : i32, i32
  }
  func.func @transform_1(%arg0: i32, %arg1: i32) -> (i32, i32) {
    %c0_i32 = arith.constant 0 : i32
    %c0_i32_0 = arith.constant 0 : i32
    return %arg1, %c0_i32 : i32, i32
  }
  func.func @transform_2(%arg0: i32, %arg1: i32) -> (i32, i32) {
    %c0_i32 = arith.constant 0 : i32
    %c0_i32_0 = arith.constant 0 : i32
    %c0_i32_1 = arith.constant 0 : i32
    return %c0_i32, %c0_i32_0 : i32, i32
  }
  func.func @transform_3(%arg0: i32, %arg1: i32) -> (i32, i32) {
    %c0_i32 = arith.constant 0 : i32
    %c0_i32_0 = arith.constant 0 : i32
    return %arg0, %c0_i32 : i32, i32
  }
}

module attributes {stable_mosaic.version = 11 : i64} {
  func.func @_bn_relu_kernel(%arg0: memref<128x64xf32, #tpu.memory_space<vmem>>, %arg1: memref<1x64xf32, #tpu.memory_space<vmem>>, %arg2: memref<1x64xf32, #tpu.memory_space<vmem>>, %arg3: memref<128x64xf32, #tpu.memory_space<vmem>>) attributes {dimension_semantics = [], scalar_prefetch = 0 : i64, scratch_operands = 0 : i64, tpu.core_type = #tpu.core_type<tc>} {
    %c0 = arith.constant 0 : index
    %c0_0 = arith.constant 0 : index
    %0 = vector.load %arg0[%c0, %c0_0] : memref<128x64xf32, #tpu.memory_space<vmem>>, vector<128x64xf32>
    %cst = arith.constant dense<0.000000e+00> : vector<64xf32>
    %1 = vector.multi_reduction <add>, %0, %cst [0] : vector<128x64xf32> to vector<64xf32>
    %2 = vector.shape_cast %1 : vector<64xf32> to vector<1x64xf32>
    %cst_1 = arith.constant 7.812500e-03 : f32
    %3 = vector.broadcast %cst_1 : f32 to vector<1x64xf32>
    %4 = arith.mulf %2, %3 : vector<1x64xf32>
    %5 = vector.broadcast %4 : vector<1x64xf32> to vector<128x64xf32>
    %6 = arith.subf %0, %5 : vector<128x64xf32>
    %7 = arith.mulf %6, %6 : vector<128x64xf32>
    %cst_2 = arith.constant dense<0.000000e+00> : vector<64xf32>
    %8 = vector.multi_reduction <add>, %7, %cst_2 [0] : vector<128x64xf32> to vector<64xf32>
    %9 = vector.shape_cast %8 : vector<64xf32> to vector<1x64xf32>
    %cst_3 = arith.constant 7.812500e-03 : f32
    %10 = vector.broadcast %cst_3 : f32 to vector<1x64xf32>
    %11 = arith.mulf %9, %10 : vector<1x64xf32>
    %cst_4 = arith.constant 9.99999974E-6 : f32
    %12 = vector.broadcast %cst_4 : f32 to vector<1x64xf32>
    %13 = arith.addf %11, %12 : vector<1x64xf32>
    %14 = math.rsqrt %13 : vector<1x64xf32>
    %15 = vector.broadcast %14 : vector<1x64xf32> to vector<128x64xf32>
    %16 = arith.mulf %6, %15 : vector<128x64xf32>
    %c0_5 = arith.constant 0 : index
    %c0_6 = arith.constant 0 : index
    %17 = vector.load %arg1[%c0_5, %c0_6] : memref<1x64xf32, #tpu.memory_space<vmem>>, vector<1x64xf32>
    %18 = vector.broadcast %17 : vector<1x64xf32> to vector<128x64xf32>
    %19 = arith.mulf %16, %18 : vector<128x64xf32>
    %c0_7 = arith.constant 0 : index
    %c0_8 = arith.constant 0 : index
    %20 = vector.load %arg2[%c0_7, %c0_8] : memref<1x64xf32, #tpu.memory_space<vmem>>, vector<1x64xf32>
    %21 = vector.broadcast %20 : vector<1x64xf32> to vector<128x64xf32>
    %22 = arith.addf %19, %21 : vector<128x64xf32>
    %cst_9 = arith.constant 0.000000e+00 : f32
    %23 = vector.broadcast %cst_9 : f32 to vector<128x64xf32>
    %24 = arith.maximumf %22, %23 : vector<128x64xf32>
    %c0_10 = arith.constant 0 : index
    %c0_11 = arith.constant 0 : index
    %25 = vector.load %arg3[%c0_10, %c0_11] : memref<128x64xf32, #tpu.memory_space<vmem>>, vector<128x64xf32>
    tpu.vector_store %arg3[%c0_10, %c0_11], %24 {strides = array<i32>} : memref<128x64xf32, #tpu.memory_space<vmem>>, vector<128x64xf32>,
    return
  }
}

module attributes {stable_mosaic.version = 11 : i64} {
  func.func @_gemm_bn_kernel(%arg0: i32, %arg1: memref<128x640xbf16, #tpu.memory_space<vmem>>, %arg2: memref<640x128xbf16, #tpu.memory_space<vmem>>, %arg3: memref<1x128xf32, #tpu.memory_space<vmem>>, %arg4: memref<1x128xf32, #tpu.memory_space<vmem>>, %arg5: memref<128x128xf32, #tpu.memory_space<vmem>>, %arg6: memref<128x128xf32, #tpu.memory_space<vmem>>, %arg7: memref<128x128xf32, #tpu.memory_space<vmem>>) attributes {dimension_semantics = [#tpu.dimension_semantics<arbitrary>], iteration_bounds = array<i64: 1>, scalar_prefetch = 0 : i64, scratch_operands = 1 : i64, tpu.core_type = #tpu.core_type<tc>, window_params = [{transform_indices = @transform_0, window_bounds = array<i64: 128, 640>}, {transform_indices = @transform_1, window_bounds = array<i64: 640, 128>}, {pipeline_mode = #tpu.pipeline_mode<synchronous>, transform_indices = @transform_2, window_bounds = array<i64: 1, 128>}, {pipeline_mode = #tpu.pipeline_mode<synchronous>, transform_indices = @transform_3, window_bounds = array<i64: 1, 128>}, {pipeline_mode = #tpu.pipeline_mode<synchronous>, transform_indices = @transform_4, window_bounds = array<i64: 128, 128>}, {pipeline_mode = #tpu.pipeline_mode<synchronous>, transform_indices = @transform_5, window_bounds = array<i64: 128, 128>}]} {
    %c0_i32 = arith.constant 0 : i32
    %0 = arith.cmpi eq, %arg0, %c0_i32 : i32
    %1 = arith.extui %0 : i1 to i32
    %c0_i32_0 = arith.constant 0 : i32
    %2 = arith.cmpi ne, %1, %c0_i32_0 : i32
    scf.if %2 {
      %cst_10 = arith.constant 0.000000e+00 : f32
      %12 = vector.broadcast %cst_10 : f32 to vector<128x128xf32>
      %c0_11 = arith.constant 0 : index
      %c0_12 = arith.constant 0 : index
      %13 = vector.load %arg7[%c0_11, %c0_12] : memref<128x128xf32, #tpu.memory_space<vmem>>, vector<128x128xf32>
      tpu.vector_store %arg7[%c0_11, %c0_12], %12 {strides = array<i32>} : memref<128x128xf32, #tpu.memory_space<vmem>>, vector<128x128xf32>,
    } else {
    }
    %c0 = arith.constant 0 : index
    %c0_1 = arith.constant 0 : index
    %3 = vector.load %arg7[%c0, %c0_1] : memref<128x128xf32, #tpu.memory_space<vmem>>, vector<128x128xf32>
    %c0_2 = arith.constant 0 : index
    %c0_3 = arith.constant 0 : index
    %4 = vector.load %arg1[%c0_2, %c0_3] : memref<128x640xbf16, #tpu.memory_space<vmem>>, vector<128x640xbf16>
    %c0_4 = arith.constant 0 : index
    %c0_5 = arith.constant 0 : index
    %5 = vector.load %arg2[%c0_4, %c0_5] : memref<640x128xbf16, #tpu.memory_space<vmem>>, vector<640x128xbf16>
    %cst = arith.constant dense<0.000000e+00> : vector<128x128xf32>
    %6 = tpu.matmul %4, %5, %cst {dimension_numbers = #tpu.dot_dimension_numbers<[1], [0], [0], [1], [0, 0, 1, 1], [], []>} : vector<128x640xbf16>, vector<640x128xbf16>, vector<128x128xf32> -> vector<128x128xf32>
    %7 = arith.addf %3, %6 : vector<128x128xf32>
    %c0_6 = arith.constant 0 : index
    %c0_7 = arith.constant 0 : index
    %8 = vector.load %arg7[%c0_6, %c0_7] : memref<128x128xf32, #tpu.memory_space<vmem>>, vector<128x128xf32>
    tpu.vector_store %arg7[%c0_6, %c0_7], %7 {strides = array<i32>} : memref<128x128xf32, #tpu.memory_space<vmem>>, vector<128x128xf32>,
    %c0_i32_8 = arith.constant 0 : i32
    %9 = arith.cmpi eq, %arg0, %c0_i32_8 : i32
    %10 = arith.extui %9 : i1 to i32
    %c0_i32_9 = arith.constant 0 : i32
    %11 = arith.cmpi ne, %10, %c0_i32_9 : i32
    scf.if %11 {
      %c0_10 = arith.constant 0 : index
      %c0_11 = arith.constant 0 : index
      %12 = vector.load %arg7[%c0_10, %c0_11] : memref<128x128xf32, #tpu.memory_space<vmem>>, vector<128x128xf32>
      %13 = tpu.iota {dimensions = array<i32: 0>} : vector<128x128xi32>
      %c128_i32 = arith.constant 128 : i32
      %14 = vector.broadcast %c128_i32 : i32 to vector<128x128xi32>
      %15 = arith.cmpi slt, %13, %14 : vector<128x128xi32>
      %16 = arith.extui %15 : vector<128x128xi1> to vector<128x128xi32>
      %17 = arith.sitofp %16 : vector<128x128xi32> to vector<128x128xf32>
      %18 = arith.mulf %12, %17 : vector<128x128xf32>
      %cst_12 = arith.constant dense<0.000000e+00> : vector<128xf32>
      %19 = vector.multi_reduction <add>, %18, %cst_12 [0] : vector<128x128xf32> to vector<128xf32>
      %20 = vector.shape_cast %19 : vector<128xf32> to vector<1x128xf32>
      %cst_13 = arith.constant 7.812500e-03 : f32
      %21 = vector.broadcast %cst_13 : f32 to vector<1x128xf32>
      %22 = arith.mulf %20, %21 : vector<1x128xf32>
      %23 = vector.broadcast %22 : vector<1x128xf32> to vector<128x128xf32>
      %24 = arith.subf %12, %23 : vector<128x128xf32>
      %25 = arith.mulf %24, %17 : vector<128x128xf32>
      %26 = arith.mulf %25, %25 : vector<128x128xf32>
      %cst_14 = arith.constant dense<0.000000e+00> : vector<128xf32>
      %27 = vector.multi_reduction <add>, %26, %cst_14 [0] : vector<128x128xf32> to vector<128xf32>
      %28 = vector.shape_cast %27 : vector<128xf32> to vector<1x128xf32>
      %cst_15 = arith.constant 7.812500e-03 : f32
      %29 = vector.broadcast %cst_15 : f32 to vector<1x128xf32>
      %30 = arith.mulf %28, %29 : vector<1x128xf32>
      %31 = vector.broadcast %22 : vector<1x128xf32> to vector<128x128xf32>
      %32 = arith.subf %12, %31 : vector<128x128xf32>
      %cst_16 = arith.constant 9.99999974E-6 : f32
      %33 = vector.broadcast %cst_16 : f32 to vector<1x128xf32>
      %34 = arith.addf %30, %33 : vector<1x128xf32>
      %35 = math.rsqrt %34 : vector<1x128xf32>
      %36 = vector.broadcast %35 : vector<1x128xf32> to vector<128x128xf32>
      %37 = arith.mulf %32, %36 : vector<128x128xf32>
      %c0_17 = arith.constant 0 : index
      %c0_18 = arith.constant 0 : index
      %38 = vector.load %arg3[%c0_17, %c0_18] : memref<1x128xf32, #tpu.memory_space<vmem>>, vector<1x128xf32>
      %39 = vector.broadcast %38 : vector<1x128xf32> to vector<128x128xf32>
      %40 = arith.mulf %37, %39 : vector<128x128xf32>
      %c0_19 = arith.constant 0 : index
      %c0_20 = arith.constant 0 : index
      %41 = vector.load %arg4[%c0_19, %c0_20] : memref<1x128xf32, #tpu.memory_space<vmem>>, vector<1x128xf32>
      %42 = vector.broadcast %41 : vector<1x128xf32> to vector<128x128xf32>
      %43 = arith.addf %40, %42 : vector<128x128xf32>
      %c0_21 = arith.constant 0 : index
      %c0_22 = arith.constant 0 : index
      %44 = vector.load %arg5[%c0_21, %c0_22] : memref<128x128xf32, #tpu.memory_space<vmem>>, vector<128x128xf32>
      %45 = arith.addf %43, %44 : vector<128x128xf32>
      %c0_23 = arith.constant 0 : index
      %c0_24 = arith.constant 0 : index
      %46 = vector.load %arg6[%c0_23, %c0_24] : memref<128x128xf32, #tpu.memory_space<vmem>>, vector<128x128xf32>
      tpu.vector_store %arg6[%c0_23, %c0_24], %45 {strides = array<i32>} : memref<128x128xf32, #tpu.memory_space<vmem>>, vector<128x128xf32>,
    } else {
    }
    return
  }
  func.func @transform_0(%arg0: i32) -> (i32, i32) {
    %c0_i32 = arith.constant 0 : i32
    %c0_i32_0 = arith.constant 0 : i32
    return %c0_i32, %arg0 : i32, i32
  }
  func.func @transform_1(%arg0: i32) -> (i32, i32) {
    %c0_i32 = arith.constant 0 : i32
    %c0_i32_0 = arith.constant 0 : i32
    return %arg0, %c0_i32 : i32, i32
  }
  func.func @transform_2(%arg0: i32) -> (i32, i32) {
    %c0_i32 = arith.constant 0 : i32
    %c0_i32_0 = arith.constant 0 : i32
    %c0_i32_1 = arith.constant 0 : i32
    return %c0_i32, %c0_i32_0 : i32, i32
  }
  func.func @transform_3(%arg0: i32) -> (i32, i32) {
    %c0_i32 = arith.constant 0 : i32
    %c0_i32_0 = arith.constant 0 : i32
    %c0_i32_1 = arith.constant 0 : i32
    return %c0_i32, %c0_i32_0 : i32, i32
  }
  func.func @transform_4(%arg0: i32) -> (i32, i32) {
    %c0_i32 = arith.constant 0 : i32
    %c0_i32_0 = arith.constant 0 : i32
    %c0_i32_1 = arith.constant 0 : i32
    return %c0_i32, %c0_i32_0 : i32, i32
  }
  func.func @transform_5(%arg0: i32) -> (i32, i32) {
    %c0_i32 = arith.constant 0 : i32
    %c0_i32_0 = arith.constant 0 : i32
    %c0_i32_1 = arith.constant 0 : i32
    return %c0_i32, %c0_i32_0 : i32, i32
  }
}

module attributes {stable_mosaic.version = 11 : i64} {
  func.func @_gemm_kernel(%arg0: i32, %arg1: i32, %arg2: memref<128x256xbf16, #tpu.memory_space<vmem>>, %arg3: memref<256x128xbf16, #tpu.memory_space<vmem>>, %arg4: memref<1x128xf32, #tpu.memory_space<vmem>>, %arg5: memref<128x128xf32, #tpu.memory_space<vmem>>, %arg6: memref<128x128xf32, #tpu.memory_space<vmem>>) attributes {dimension_semantics = [#tpu.dimension_semantics<parallel>, #tpu.dimension_semantics<arbitrary>], iteration_bounds = array<i64: 1, 1>, scalar_prefetch = 0 : i64, scratch_operands = 1 : i64, tpu.core_type = #tpu.core_type<tc>, window_params = [{transform_indices = @transform_0, window_bounds = array<i64: 128, 256>}, {transform_indices = @transform_1, window_bounds = array<i64: 256, 128>}, {pipeline_mode = #tpu.pipeline_mode<synchronous>, transform_indices = @transform_2, window_bounds = array<i64: 1, 128>}, {transform_indices = @transform_3, window_bounds = array<i64: 128, 128>}]} {
    %c0_i32 = arith.constant 0 : i32
    %0 = arith.cmpi eq, %arg1, %c0_i32 : i32
    %1 = arith.extui %0 : i1 to i32
    %c0_i32_0 = arith.constant 0 : i32
    %2 = arith.cmpi ne, %1, %c0_i32_0 : i32
    scf.if %2 {
      %cst_10 = arith.constant 0.000000e+00 : f32
      %12 = vector.broadcast %cst_10 : f32 to vector<128x128xf32>
      %c0_11 = arith.constant 0 : index
      %c0_12 = arith.constant 0 : index
      %13 = vector.load %arg6[%c0_11, %c0_12] : memref<128x128xf32, #tpu.memory_space<vmem>>, vector<128x128xf32>
      tpu.vector_store %arg6[%c0_11, %c0_12], %12 {strides = array<i32>} : memref<128x128xf32, #tpu.memory_space<vmem>>, vector<128x128xf32>,
    } else {
    }
    %c0 = arith.constant 0 : index
    %c0_1 = arith.constant 0 : index
    %3 = vector.load %arg6[%c0, %c0_1] : memref<128x128xf32, #tpu.memory_space<vmem>>, vector<128x128xf32>
    %c0_2 = arith.constant 0 : index
    %c0_3 = arith.constant 0 : index
    %4 = vector.load %arg2[%c0_2, %c0_3] : memref<128x256xbf16, #tpu.memory_space<vmem>>, vector<128x256xbf16>
    %c0_4 = arith.constant 0 : index
    %c0_5 = arith.constant 0 : index
    %5 = vector.load %arg3[%c0_4, %c0_5] : memref<256x128xbf16, #tpu.memory_space<vmem>>, vector<256x128xbf16>
    %cst = arith.constant dense<0.000000e+00> : vector<128x128xf32>
    %6 = tpu.matmul %4, %5, %cst {dimension_numbers = #tpu.dot_dimension_numbers<[1], [0], [0], [1], [0, 0, 1, 1], [], []>} : vector<128x256xbf16>, vector<256x128xbf16>, vector<128x128xf32> -> vector<128x128xf32>
    %7 = arith.addf %3, %6 : vector<128x128xf32>
    %c0_6 = arith.constant 0 : index
    %c0_7 = arith.constant 0 : index
    %8 = vector.load %arg6[%c0_6, %c0_7] : memref<128x128xf32, #tpu.memory_space<vmem>>, vector<128x128xf32>
    tpu.vector_store %arg6[%c0_6, %c0_7], %7 {strides = array<i32>} : memref<128x128xf32, #tpu.memory_space<vmem>>, vector<128x128xf32>,
    %c0_i32_8 = arith.constant 0 : i32
    %9 = arith.cmpi eq, %arg1, %c0_i32_8 : i32
    %10 = arith.extui %9 : i1 to i32
    %c0_i32_9 = arith.constant 0 : i32
    %11 = arith.cmpi ne, %10, %c0_i32_9 : i32
    scf.if %11 {
      %c0_10 = arith.constant 0 : index
      %c0_11 = arith.constant 0 : index
      %12 = vector.load %arg6[%c0_10, %c0_11] : memref<128x128xf32, #tpu.memory_space<vmem>>, vector<128x128xf32>
      %c0_12 = arith.constant 0 : index
      %c0_13 = arith.constant 0 : index
      %13 = vector.load %arg4[%c0_12, %c0_13] : memref<1x128xf32, #tpu.memory_space<vmem>>, vector<1x128xf32>
      %14 = vector.broadcast %13 : vector<1x128xf32> to vector<128x128xf32>
      %15 = arith.addf %12, %14 : vector<128x128xf32>
      %cst_14 = arith.constant 0.000000e+00 : f32
      %16 = vector.broadcast %cst_14 : f32 to vector<128x128xf32>
      %17 = arith.maximumf %15, %16 : vector<128x128xf32>
      %c0_15 = arith.constant 0 : index
      %c0_16 = arith.constant 0 : index
      %18 = vector.load %arg5[%c0_15, %c0_16] : memref<128x128xf32, #tpu.memory_space<vmem>>, vector<128x128xf32>
      tpu.vector_store %arg5[%c0_15, %c0_16], %17 {strides = array<i32>} : memref<128x128xf32, #tpu.memory_space<vmem>>, vector<128x128xf32>,
    } else {
    }
    return
  }
  func.func @transform_0(%arg0: i32, %arg1: i32) -> (i32, i32) {
    %c0_i32 = arith.constant 0 : i32
    return %arg0, %arg1 : i32, i32
  }
  func.func @transform_1(%arg0: i32, %arg1: i32) -> (i32, i32) {
    %c0_i32 = arith.constant 0 : i32
    %c0_i32_0 = arith.constant 0 : i32
    return %arg1, %c0_i32 : i32, i32
  }
  func.func @transform_2(%arg0: i32, %arg1: i32) -> (i32, i32) {
    %c0_i32 = arith.constant 0 : i32
    %c0_i32_0 = arith.constant 0 : i32
    %c0_i32_1 = arith.constant 0 : i32
    return %c0_i32, %c0_i32_0 : i32, i32
  }
  func.func @transform_3(%arg0: i32, %arg1: i32) -> (i32, i32) {
    %c0_i32 = arith.constant 0 : i32
    %c0_i32_0 = arith.constant 0 : i32
    return %arg0, %c0_i32 : i32, i32
  }
}

module attributes {stable_mosaic.version = 11 : i64} {
  func.func @_gemm_kernel(%arg0: i32, %arg1: i32, %arg2: memref<128x384xbf16, #tpu.memory_space<vmem>>, %arg3: memref<384x128xbf16, #tpu.memory_space<vmem>>, %arg4: memref<1x128xf32, #tpu.memory_space<vmem>>, %arg5: memref<128x128xf32, #tpu.memory_space<vmem>>, %arg6: memref<128x128xf32, #tpu.memory_space<vmem>>) attributes {dimension_semantics = [#tpu.dimension_semantics<parallel>, #tpu.dimension_semantics<arbitrary>], iteration_bounds = array<i64: 1, 1>, scalar_prefetch = 0 : i64, scratch_operands = 1 : i64, tpu.core_type = #tpu.core_type<tc>, window_params = [{transform_indices = @transform_0, window_bounds = array<i64: 128, 384>}, {transform_indices = @transform_1, window_bounds = array<i64: 384, 128>}, {pipeline_mode = #tpu.pipeline_mode<synchronous>, transform_indices = @transform_2, window_bounds = array<i64: 1, 128>}, {transform_indices = @transform_3, window_bounds = array<i64: 128, 128>}]} {
    %c0_i32 = arith.constant 0 : i32
    %0 = arith.cmpi eq, %arg1, %c0_i32 : i32
    %1 = arith.extui %0 : i1 to i32
    %c0_i32_0 = arith.constant 0 : i32
    %2 = arith.cmpi ne, %1, %c0_i32_0 : i32
    scf.if %2 {
      %cst_10 = arith.constant 0.000000e+00 : f32
      %12 = vector.broadcast %cst_10 : f32 to vector<128x128xf32>
      %c0_11 = arith.constant 0 : index
      %c0_12 = arith.constant 0 : index
      %13 = vector.load %arg6[%c0_11, %c0_12] : memref<128x128xf32, #tpu.memory_space<vmem>>, vector<128x128xf32>
      tpu.vector_store %arg6[%c0_11, %c0_12], %12 {strides = array<i32>} : memref<128x128xf32, #tpu.memory_space<vmem>>, vector<128x128xf32>,
    } else {
    }
    %c0 = arith.constant 0 : index
    %c0_1 = arith.constant 0 : index
    %3 = vector.load %arg6[%c0, %c0_1] : memref<128x128xf32, #tpu.memory_space<vmem>>, vector<128x128xf32>
    %c0_2 = arith.constant 0 : index
    %c0_3 = arith.constant 0 : index
    %4 = vector.load %arg2[%c0_2, %c0_3] : memref<128x384xbf16, #tpu.memory_space<vmem>>, vector<128x384xbf16>
    %c0_4 = arith.constant 0 : index
    %c0_5 = arith.constant 0 : index
    %5 = vector.load %arg3[%c0_4, %c0_5] : memref<384x128xbf16, #tpu.memory_space<vmem>>, vector<384x128xbf16>
    %cst = arith.constant dense<0.000000e+00> : vector<128x128xf32>
    %6 = tpu.matmul %4, %5, %cst {dimension_numbers = #tpu.dot_dimension_numbers<[1], [0], [0], [1], [0, 0, 1, 1], [], []>} : vector<128x384xbf16>, vector<384x128xbf16>, vector<128x128xf32> -> vector<128x128xf32>
    %7 = arith.addf %3, %6 : vector<128x128xf32>
    %c0_6 = arith.constant 0 : index
    %c0_7 = arith.constant 0 : index
    %8 = vector.load %arg6[%c0_6, %c0_7] : memref<128x128xf32, #tpu.memory_space<vmem>>, vector<128x128xf32>
    tpu.vector_store %arg6[%c0_6, %c0_7], %7 {strides = array<i32>} : memref<128x128xf32, #tpu.memory_space<vmem>>, vector<128x128xf32>,
    %c0_i32_8 = arith.constant 0 : i32
    %9 = arith.cmpi eq, %arg1, %c0_i32_8 : i32
    %10 = arith.extui %9 : i1 to i32
    %c0_i32_9 = arith.constant 0 : i32
    %11 = arith.cmpi ne, %10, %c0_i32_9 : i32
    scf.if %11 {
      %c0_10 = arith.constant 0 : index
      %c0_11 = arith.constant 0 : index
      %12 = vector.load %arg6[%c0_10, %c0_11] : memref<128x128xf32, #tpu.memory_space<vmem>>, vector<128x128xf32>
      %c0_12 = arith.constant 0 : index
      %c0_13 = arith.constant 0 : index
      %13 = vector.load %arg4[%c0_12, %c0_13] : memref<1x128xf32, #tpu.memory_space<vmem>>, vector<1x128xf32>
      %14 = vector.broadcast %13 : vector<1x128xf32> to vector<128x128xf32>
      %15 = arith.addf %12, %14 : vector<128x128xf32>
      %cst_14 = arith.constant 0.000000e+00 : f32
      %16 = vector.broadcast %cst_14 : f32 to vector<128x128xf32>
      %17 = arith.maximumf %15, %16 : vector<128x128xf32>
      %c0_15 = arith.constant 0 : index
      %c0_16 = arith.constant 0 : index
      %18 = vector.load %arg5[%c0_15, %c0_16] : memref<128x128xf32, #tpu.memory_space<vmem>>, vector<128x128xf32>
      tpu.vector_store %arg5[%c0_15, %c0_16], %17 {strides = array<i32>} : memref<128x128xf32, #tpu.memory_space<vmem>>, vector<128x128xf32>,
    } else {
    }
    return
  }
  func.func @transform_0(%arg0: i32, %arg1: i32) -> (i32, i32) {
    %c0_i32 = arith.constant 0 : i32
    return %arg0, %arg1 : i32, i32
  }
  func.func @transform_1(%arg0: i32, %arg1: i32) -> (i32, i32) {
    %c0_i32 = arith.constant 0 : i32
    %c0_i32_0 = arith.constant 0 : i32
    return %arg1, %c0_i32 : i32, i32
  }
  func.func @transform_2(%arg0: i32, %arg1: i32) -> (i32, i32) {
    %c0_i32 = arith.constant 0 : i32
    %c0_i32_0 = arith.constant 0 : i32
    %c0_i32_1 = arith.constant 0 : i32
    return %c0_i32, %c0_i32_0 : i32, i32
  }
  func.func @transform_3(%arg0: i32, %arg1: i32) -> (i32, i32) {
    %c0_i32 = arith.constant 0 : i32
    %c0_i32_0 = arith.constant 0 : i32
    return %arg0, %c0_i32 : i32, i32
  }
}

module attributes {stable_mosaic.version = 11 : i64} {
  func.func @_gemm_kernel(%arg0: i32, %arg1: i32, %arg2: memref<128x640xbf16, #tpu.memory_space<vmem>>, %arg3: memref<640x128xbf16, #tpu.memory_space<vmem>>, %arg4: memref<1x128xf32, #tpu.memory_space<vmem>>, %arg5: memref<128x128xf32, #tpu.memory_space<vmem>>, %arg6: memref<128x128xf32, #tpu.memory_space<vmem>>) attributes {dimension_semantics = [#tpu.dimension_semantics<parallel>, #tpu.dimension_semantics<arbitrary>], iteration_bounds = array<i64: 1, 1>, scalar_prefetch = 0 : i64, scratch_operands = 1 : i64, tpu.core_type = #tpu.core_type<tc>, window_params = [{transform_indices = @transform_0, window_bounds = array<i64: 128, 640>}, {transform_indices = @transform_1, window_bounds = array<i64: 640, 128>}, {pipeline_mode = #tpu.pipeline_mode<synchronous>, transform_indices = @transform_2, window_bounds = array<i64: 1, 128>}, {transform_indices = @transform_3, window_bounds = array<i64: 128, 128>}]} {
    %c0_i32 = arith.constant 0 : i32
    %0 = arith.cmpi eq, %arg1, %c0_i32 : i32
    %1 = arith.extui %0 : i1 to i32
    %c0_i32_0 = arith.constant 0 : i32
    %2 = arith.cmpi ne, %1, %c0_i32_0 : i32
    scf.if %2 {
      %cst_10 = arith.constant 0.000000e+00 : f32
      %12 = vector.broadcast %cst_10 : f32 to vector<128x128xf32>
      %c0_11 = arith.constant 0 : index
      %c0_12 = arith.constant 0 : index
      %13 = vector.load %arg6[%c0_11, %c0_12] : memref<128x128xf32, #tpu.memory_space<vmem>>, vector<128x128xf32>
      tpu.vector_store %arg6[%c0_11, %c0_12], %12 {strides = array<i32>} : memref<128x128xf32, #tpu.memory_space<vmem>>, vector<128x128xf32>,
    } else {
    }
    %c0 = arith.constant 0 : index
    %c0_1 = arith.constant 0 : index
    %3 = vector.load %arg6[%c0, %c0_1] : memref<128x128xf32, #tpu.memory_space<vmem>>, vector<128x128xf32>
    %c0_2 = arith.constant 0 : index
    %c0_3 = arith.constant 0 : index
    %4 = vector.load %arg2[%c0_2, %c0_3] : memref<128x640xbf16, #tpu.memory_space<vmem>>, vector<128x640xbf16>
    %c0_4 = arith.constant 0 : index
    %c0_5 = arith.constant 0 : index
    %5 = vector.load %arg3[%c0_4, %c0_5] : memref<640x128xbf16, #tpu.memory_space<vmem>>, vector<640x128xbf16>
    %cst = arith.constant dense<0.000000e+00> : vector<128x128xf32>
    %6 = tpu.matmul %4, %5, %cst {dimension_numbers = #tpu.dot_dimension_numbers<[1], [0], [0], [1], [0, 0, 1, 1], [], []>} : vector<128x640xbf16>, vector<640x128xbf16>, vector<128x128xf32> -> vector<128x128xf32>
    %7 = arith.addf %3, %6 : vector<128x128xf32>
    %c0_6 = arith.constant 0 : index
    %c0_7 = arith.constant 0 : index
    %8 = vector.load %arg6[%c0_6, %c0_7] : memref<128x128xf32, #tpu.memory_space<vmem>>, vector<128x128xf32>
    tpu.vector_store %arg6[%c0_6, %c0_7], %7 {strides = array<i32>} : memref<128x128xf32, #tpu.memory_space<vmem>>, vector<128x128xf32>,
    %c0_i32_8 = arith.constant 0 : i32
    %9 = arith.cmpi eq, %arg1, %c0_i32_8 : i32
    %10 = arith.extui %9 : i1 to i32
    %c0_i32_9 = arith.constant 0 : i32
    %11 = arith.cmpi ne, %10, %c0_i32_9 : i32
    scf.if %11 {
      %c0_10 = arith.constant 0 : index
      %c0_11 = arith.constant 0 : index
      %12 = vector.load %arg6[%c0_10, %c0_11] : memref<128x128xf32, #tpu.memory_space<vmem>>, vector<128x128xf32>
      %c0_12 = arith.constant 0 : index
      %c0_13 = arith.constant 0 : index
      %13 = vector.load %arg4[%c0_12, %c0_13] : memref<1x128xf32, #tpu.memory_space<vmem>>, vector<1x128xf32>
      %14 = vector.broadcast %13 : vector<1x128xf32> to vector<128x128xf32>
      %15 = arith.addf %12, %14 : vector<128x128xf32>
      %cst_14 = arith.constant 0.000000e+00 : f32
      %16 = vector.broadcast %cst_14 : f32 to vector<128x128xf32>
      %17 = arith.maximumf %15, %16 : vector<128x128xf32>
      %c0_15 = arith.constant 0 : index
      %c0_16 = arith.constant 0 : index
      %18 = vector.load %arg5[%c0_15, %c0_16] : memref<128x128xf32, #tpu.memory_space<vmem>>, vector<128x128xf32>
      tpu.vector_store %arg5[%c0_15, %c0_16], %17 {strides = array<i32>} : memref<128x128xf32, #tpu.memory_space<vmem>>, vector<128x128xf32>,
    } else {
    }
    return
  }
  func.func @transform_0(%arg0: i32, %arg1: i32) -> (i32, i32) {
    %c0_i32 = arith.constant 0 : i32
    return %arg0, %arg1 : i32, i32
  }
  func.func @transform_1(%arg0: i32, %arg1: i32) -> (i32, i32) {
    %c0_i32 = arith.constant 0 : i32
    %c0_i32_0 = arith.constant 0 : i32
    return %arg1, %c0_i32 : i32, i32
  }
  func.func @transform_2(%arg0: i32, %arg1: i32) -> (i32, i32) {
    %c0_i32 = arith.constant 0 : i32
    %c0_i32_0 = arith.constant 0 : i32
    %c0_i32_1 = arith.constant 0 : i32
    return %c0_i32, %c0_i32_0 : i32, i32
  }
  func.func @transform_3(%arg0: i32, %arg1: i32) -> (i32, i32) {
    %c0_i32 = arith.constant 0 : i32
    %c0_i32_0 = arith.constant 0 : i32
    return %arg0, %c0_i32 : i32, i32
  }
}

module attributes {stable_mosaic.version = 11 : i64} {
  func.func @_gemm_kernel(%arg0: i32, %arg1: i32, %arg2: memref<256x1664xbf16, #tpu.memory_space<vmem>>, %arg3: memref<1664x128xbf16, #tpu.memory_space<vmem>>, %arg4: memref<1x128xf32, #tpu.memory_space<vmem>>, %arg5: memref<256x128xf32, #tpu.memory_space<vmem>>, %arg6: memref<256x128xf32, #tpu.memory_space<vmem>>) attributes {dimension_semantics = [#tpu.dimension_semantics<parallel>, #tpu.dimension_semantics<arbitrary>], iteration_bounds = array<i64: 2, 1>, scalar_prefetch = 0 : i64, scratch_operands = 1 : i64, tpu.core_type = #tpu.core_type<tc>, window_params = [{transform_indices = @transform_0, window_bounds = array<i64: 256, 1664>}, {transform_indices = @transform_1, window_bounds = array<i64: 1664, 128>}, {pipeline_mode = #tpu.pipeline_mode<synchronous>, transform_indices = @transform_2, window_bounds = array<i64: 1, 128>}, {transform_indices = @transform_3, window_bounds = array<i64: 256, 128>}]} {
    %c0_i32 = arith.constant 0 : i32
    %0 = arith.cmpi eq, %arg1, %c0_i32 : i32
    %1 = arith.extui %0 : i1 to i32
    %c0_i32_0 = arith.constant 0 : i32
    %2 = arith.cmpi ne, %1, %c0_i32_0 : i32
    scf.if %2 {
      %cst_10 = arith.constant 0.000000e+00 : f32
      %12 = vector.broadcast %cst_10 : f32 to vector<256x128xf32>
      %c0_11 = arith.constant 0 : index
      %c0_12 = arith.constant 0 : index
      %13 = vector.load %arg6[%c0_11, %c0_12] : memref<256x128xf32, #tpu.memory_space<vmem>>, vector<256x128xf32>
      tpu.vector_store %arg6[%c0_11, %c0_12], %12 {strides = array<i32>} : memref<256x128xf32, #tpu.memory_space<vmem>>, vector<256x128xf32>,
    } else {
    }
    %c0 = arith.constant 0 : index
    %c0_1 = arith.constant 0 : index
    %3 = vector.load %arg6[%c0, %c0_1] : memref<256x128xf32, #tpu.memory_space<vmem>>, vector<256x128xf32>
    %c0_2 = arith.constant 0 : index
    %c0_3 = arith.constant 0 : index
    %4 = vector.load %arg2[%c0_2, %c0_3] : memref<256x1664xbf16, #tpu.memory_space<vmem>>, vector<256x1664xbf16>
    %c0_4 = arith.constant 0 : index
    %c0_5 = arith.constant 0 : index
    %5 = vector.load %arg3[%c0_4, %c0_5] : memref<1664x128xbf16, #tpu.memory_space<vmem>>, vector<1664x128xbf16>
    %cst = arith.constant dense<0.000000e+00> : vector<256x128xf32>
    %6 = tpu.matmul %4, %5, %cst {dimension_numbers = #tpu.dot_dimension_numbers<[1], [0], [0], [1], [0, 0, 1, 1], [], []>} : vector<256x1664xbf16>, vector<1664x128xbf16>, vector<256x128xf32> -> vector<256x128xf32>
    %7 = arith.addf %3, %6 : vector<256x128xf32>
    %c0_6 = arith.constant 0 : index
    %c0_7 = arith.constant 0 : index
    %8 = vector.load %arg6[%c0_6, %c0_7] : memref<256x128xf32, #tpu.memory_space<vmem>>, vector<256x128xf32>
    tpu.vector_store %arg6[%c0_6, %c0_7], %7 {strides = array<i32>} : memref<256x128xf32, #tpu.memory_space<vmem>>, vector<256x128xf32>,
    %c0_i32_8 = arith.constant 0 : i32
    %9 = arith.cmpi eq, %arg1, %c0_i32_8 : i32
    %10 = arith.extui %9 : i1 to i32
    %c0_i32_9 = arith.constant 0 : i32
    %11 = arith.cmpi ne, %10, %c0_i32_9 : i32
    scf.if %11 {
      %c0_10 = arith.constant 0 : index
      %c0_11 = arith.constant 0 : index
      %12 = vector.load %arg6[%c0_10, %c0_11] : memref<256x128xf32, #tpu.memory_space<vmem>>, vector<256x128xf32>
      %c0_12 = arith.constant 0 : index
      %c0_13 = arith.constant 0 : index
      %13 = vector.load %arg4[%c0_12, %c0_13] : memref<1x128xf32, #tpu.memory_space<vmem>>, vector<1x128xf32>
      %14 = vector.broadcast %13 : vector<1x128xf32> to vector<256x128xf32>
      %15 = arith.addf %12, %14 : vector<256x128xf32>
      %16 = arith.negf %15 : vector<256x128xf32>
      %17 = math.exp %16 : vector<256x128xf32>
      %cst_14 = arith.constant 1.000000e+00 : f32
      %18 = vector.broadcast %cst_14 : f32 to vector<256x128xf32>
      %19 = arith.addf %18, %17 : vector<256x128xf32>
      %20 = arith.divf %18, %19 : vector<256x128xf32>
      %c0_15 = arith.constant 0 : index
      %c0_16 = arith.constant 0 : index
      %21 = vector.load %arg5[%c0_15, %c0_16] : memref<256x128xf32, #tpu.memory_space<vmem>>, vector<256x128xf32>
      tpu.vector_store %arg5[%c0_15, %c0_16], %20 {strides = array<i32>} : memref<256x128xf32, #tpu.memory_space<vmem>>, vector<256x128xf32>,
    } else {
    }
    return
  }
  func.func @transform_0(%arg0: i32, %arg1: i32) -> (i32, i32) {
    %c0_i32 = arith.constant 0 : i32
    return %arg0, %arg1 : i32, i32
  }
  func.func @transform_1(%arg0: i32, %arg1: i32) -> (i32, i32) {
    %c0_i32 = arith.constant 0 : i32
    %c0_i32_0 = arith.constant 0 : i32
    return %arg1, %c0_i32 : i32, i32
  }
  func.func @transform_2(%arg0: i32, %arg1: i32) -> (i32, i32) {
    %c0_i32 = arith.constant 0 : i32
    %c0_i32_0 = arith.constant 0 : i32
    %c0_i32_1 = arith.constant 0 : i32
    return %c0_i32, %c0_i32_0 : i32, i32
  }
  func.func @transform_3(%arg0: i32, %arg1: i32) -> (i32, i32) {
    %c0_i32 = arith.constant 0 : i32
    %c0_i32_0 = arith.constant 0 : i32
    return %arg0, %c0_i32 : i32, i32
  }
}

</mosaic_0001>

<bundles_post_ra>
// kernel: resnet_forward.29
= control target key start
LH: loop header
LB: loop body
LE: loop exit
PB: predicated region body
PF: predicated region fallthrough
CT: control target
= control target key end

     0   :  { %s1388_s12 = smov 0   ;;  %s1390_s13 = smov 0   ;;  %s1581_s0 = inlined_call_operand.vmem [shape: bf16[512,256], index: 0, kind: input, shape index: {}]   ;;  %s1582_s1 = inlined_call_operand.vmem [shape: bf16[256,128], index: 1, kind: input, shape index: {}]   ;;  %s1583_s2 = inlined_call_operand.vmem [shape: f32[1,128], index: 2, kind: input, shape index: {}]   ;;  %s1584_s3 = inlined_call_operand.vmem [shape: f32[512,128], index: 3, kind: output, shape index: {}]  }
   0x1   :  { %s1392_s14 = smov 0  }
   0x2 LB: > { %s25_s15 = sadd.s32 1, %s1362_s13  ;;  %p1070_p0 = scmp.ge.s32.totalorder %s1366_s14, 1  ;;  %s1366_s14 = sphi %s1392_s14, %s13_s14   ;;  %s1362_s13 = sphi %s1390_s13, %s1586_s13   ;;  %s1358_s12 = sphi %s1388_s12, %s1585_s12  }
   0x3   : > { %p27_p1 = scmp.ge.s32.totalorder %s25_s15, 2  ;;  %p169_p2 = scmp.lt.s32.totalorder %s1366_s14, 3 }
   0x5   : > { %s1588_s15 = smov (%p27_p1, %s25_s15), 0  ;;  %p170_p3 = pnand %p1070_p0, %p169_p2 }
   0x6   : > { %v1280_v0 = vld [vmem:[%s1582_s1 + $0x40] sm:$0xff] (!%p170_p3)   ;;  %s1071_s18 = sshll.u32 (!%p170_p3), %s1358_s12, 5  ;;  %v1282_v2 = vld [vmem:[%s1582_s1 + $0x48] sm:$0xff] (!%p170_p3)   ;;  %v1284_v4 = vld [vmem:[%s1582_s1 + $0x50] sm:$0xff] (!%p170_p3)  }
   0x7   : > { %173 = sbr.rel (%p170_p3) target bundleno = 317 (0x13d), region = 32  ;;  %v1281_v1 = vld [vmem:[%s1582_s1] sm:$0xff] (!%p170_p3)   ;;  %1128 = vmatprep.subr.bf16.mxu0 (!%p170_p3), %v1280_v0  ;;  %1240 = vmatprep.subr.bf16.mxu1 (!%p170_p3), %v1280_v0  ;;  %v1283_v3 = vld [vmem:[%s1582_s1 + $0x8] sm:$0xff] (!%p170_p3)   ;;  %p205_p4 = scmp.lt.s32.totalorder (!%p170_p3), %s1071_s18, 63  ;;  %v1285_v5 = vld [vmem:[%s1582_s1 + $0x10] sm:$0xff] (!%p170_p3)  }
   0x8   : > { %1129 = vmatpush3.bf16.msra.mxu0 (!%p170_p3), %v1281_v1  ;;  %1248 = vmatpush3.bf16.msra.mxu1 (!%p170_p3), %v1281_v1  ;;  %v1286_v6 = vld [vmem:[%s1582_s1 + $0x58] sm:$0xff] (!%p170_p3)   ;;  %v1288_v8 = vld [vmem:[%s1582_s1 + $0x60] sm:$0xff] (!%p170_p3)   ;;  %v1290_v10 = vld [vmem:[%s1582_s1 + $0x68] sm:$0xff] (!%p170_p3)  }
   0x9   : > { %1130 = vmatprep.subr.bf16.mxu0 (!%p170_p3), %v1282_v2  ;;  %1241 = vmatprep.subr.bf16.mxu1 (!%p170_p3), %v1282_v2  ;;  %v1287_v7 = vld [vmem:[%s1582_s1 + $0x18] sm:$0xff] (!%p170_p3)   ;;  %v1289_v9 = vld [vmem:[%s1582_s1 + $0x20] sm:$0xff] (!%p170_p3)   ;;  %v1291_v13 = vld [vmem:[%s1582_s1 + $0x28] sm:$0xff] (!%p170_p3)  }
   0xa   : > { %v1292_v14 = vld [vmem:[%s1582_s1 + $0x70] sm:$0xff] (!%p170_p3)   ;;  %v1294_v16 = vld [vmem:[%s1582_s1 + $0x78] sm:$0xff] (!%p170_p3)   ;;  %v1499_v51 = vld [vmem:[%s1583_s2] ss:$0 sm:$0xff] (!%p170_p3) }
   0xb   : > { %v1293_v15 = vld [vmem:[%s1582_s1 + $0x30] sm:$0xff] (!%p170_p3)   ;;  %v1295_v17 = vld [vmem:[%s1582_s1 + $0x38] sm:$0xff] (!%p170_p3)  }
   0xc   : > { %1131 = vmatpush3.bf16.msra.mxu0 (!%p170_p3), %v1283_v3  ;;  %1249 = vmatpush3.bf16.msra.mxu1 (!%p170_p3), %v1283_v3 }
   0xd   : > { %1132 = vmatprep.subr.bf16.mxu0 (!%p170_p3), %v1284_v4  ;;  %1242 = vmatprep.subr.bf16.mxu1 (!%p170_p3), %v1284_v4 }
   0xe   : > { %s1590_s18 = smov (!%p205_p4, %s1071_s18), 63 }
   0xf   : > { %s1127_s6 = sshll.u32 %s1590_s18, 3 }
  0x10   : > { %1133 = vmatpush3.bf16.msra.mxu0 %v1285_v5  ;;  %1250 = vmatpush3.bf16.msra.mxu1 %v1285_v5  ;;  %s1441_s11 = scalar_lea.vmem %s1581_s0, %s1127_s6  ;;  %s1508_s8 = scalar_lea.vmem %s1584_s3, %s1127_s6 }
  0x11   : > { %1134 = vmatprep.subr.bf16.mxu0 %v1286_v6  ;;  %1243 = vmatprep.subr.bf16.mxu1 %v1286_v6  ;;  %v1298_v11 = vld [vmem:[%s1441_s11 + $0x4] ss:$8 sps:$4 sm:$0xff]   ;;  %v1296_v18 = vld [vmem:[%s1441_s11] ss:$8 sps:$4 sm:$0xff]   ;;  %v1302_v20 = vld [vmem:[%s1441_s11 + $0x14] ss:$8 sps:$4 sm:$0xff]  }
  0x12   : > { %v1301_v12 = vld [vmem:[%s1441_s11 + $0x84] ss:$8 sps:$4 sm:$0xff]   ;;  %648 = vmatprep.mubr.bf16.mxu0 %v1298_v11  ;;  %v1299_v19 = vld [vmem:[%s1441_s11 + $0x80] ss:$8 sps:$4 sm:$0xff]   ;;  %v1304_v21 = vld [vmem:[%s1441_s11 + $0x94] ss:$8 sps:$4 sm:$0xff]  }
  0x13   : > { %712 = vmatprep.mubr.bf16.mxu1 %v1301_v12  ;;  %v1306_v22 = vld [vmem:[%s1441_s11 + $0x10] ss:$8 sps:$4 sm:$0xff]   ;;  %v1308_v24 = vld [vmem:[%s1441_s11 + $0x24] ss:$8 sps:$4 sm:$0xff]   ;;  %v1312_v26 = vld [vmem:[%s1441_s11 + $0x20] ss:$8 sps:$4 sm:$0xff]  }
  0x14   : > { %1135 = vmatpush3.bf16.msra.mxu0 %v1287_v7  ;;  %1251 = vmatpush3.bf16.msra.mxu1 %v1287_v7  ;;  %v1307_v23 = vld [vmem:[%s1441_s11 + $0x90] ss:$8 sps:$4 sm:$0xff]   ;;  %v1310_v25 = vld [vmem:[%s1441_s11 + $0xa4] ss:$8 sps:$4 sm:$0xff]   ;;  %v1313_v27 = vld [vmem:[%s1441_s11 + $0xa0] ss:$8 sps:$4 sm:$0xff]  }
  0x15   : > { %1136 = vmatprep.subr.bf16.mxu0 %v1288_v8  ;;  %1244 = vmatprep.subr.bf16.mxu1 %v1288_v8  ;;  %v1314_v28 = vld [vmem:[%s1441_s11 + $0x34] ss:$8 sps:$4 sm:$0xff]   ;;  %v1318_v30 = vld [vmem:[%s1441_s11 + $0x30] ss:$8 sps:$4 sm:$0xff]   ;;  %v1320_v32 = vld [vmem:[%s1441_s11 + $0x44] ss:$8 sps:$4 sm:$0xff]  }
  0x16   : > { %v1316_v29 = vld [vmem:[%s1441_s11 + $0xb4] ss:$8 sps:$4 sm:$0xff]   ;;  %v1319_v31 = vld [vmem:[%s1441_s11 + $0xb0] ss:$8 sps:$4 sm:$0xff]   ;;  %v1322_v33 = vld [vmem:[%s1441_s11 + $0xc4] ss:$8 sps:$4 sm:$0xff]  }
  0x17   : > { %v1324_v34 = vld [vmem:[%s1441_s11 + $0x40] ss:$8 sps:$4 sm:$0xff]   ;;  %v1326_v36 = vld [vmem:[%s1441_s11 + $0x54] ss:$8 sps:$4 sm:$0xff]   ;;  %v1330_v38 = vld [vmem:[%s1441_s11 + $0x50] ss:$8 sps:$4 sm:$0xff]  }
  0x18   : > { %1137 = vmatpush3.bf16.msra.mxu0 %v1289_v9  ;;  %1252 = vmatpush3.bf16.msra.mxu1 %v1289_v9  ;;  %v1325_v35 = vld [vmem:[%s1441_s11 + $0xc0] ss:$8 sps:$4 sm:$0xff]   ;;  %v1328_v37 = vld [vmem:[%s1441_s11 + $0xd4] ss:$8 sps:$4 sm:$0xff]   ;;  %v1331_v39 = vld [vmem:[%s1441_s11 + $0xd0] ss:$8 sps:$4 sm:$0xff]  }
  0x19   : > { %1138 = vmatprep.subr.bf16.mxu0 %v1290_v10  ;;  %1245 = vmatprep.subr.bf16.mxu1 %v1290_v10  ;;  %v1332_v40 = vld [vmem:[%s1441_s11 + $0x64] ss:$8 sps:$4 sm:$0xff]   ;;  %v1336_v42 = vld [vmem:[%s1441_s11 + $0x60] ss:$8 sps:$4 sm:$0xff]   ;;  %v1338_v44 = vld [vmem:[%s1441_s11 + $0x74] ss:$8 sps:$4 sm:$0xff]  }
  0x1a   : > { %v1334_v41 = vld [vmem:[%s1441_s11 + $0xe4] ss:$8 sps:$4 sm:$0xff]   ;;  %v1337_v43 = vld [vmem:[%s1441_s11 + $0xe0] ss:$8 sps:$4 sm:$0xff]   ;;  %v1340_v45 = vld [vmem:[%s1441_s11 + $0xf4] ss:$8 sps:$4 sm:$0xff]  }
  0x1b   : > { %v1342_v46 = vld [vmem:[%s1441_s11 + $0x70] ss:$8 sps:$4 sm:$0xff]  }
  0x1c   : > { %1139 = vmatpush3.bf16.msra.mxu0 %v1291_v13  ;;  %1253 = vmatpush3.bf16.msra.mxu1 %v1291_v13  ;;  %v1343_v47 = vld [vmem:[%s1441_s11 + $0xf0] ss:$8 sps:$4 sm:$0xff]  }
  0x1d   : > { %1140 = vmatprep.subr.bf16.mxu0 %v1292_v14  ;;  %1246 = vmatprep.subr.bf16.mxu1 %v1292_v14 }
  0x20   : > { %1141 = vmatpush3.bf16.msra.mxu0 %v1293_v15  ;;  %1254 = vmatpush3.bf16.msra.mxu1 %v1293_v15 }
  0x21   : > { %1142 = vmatprep.subr.bf16.mxu0 %v1294_v16  ;;  %1247 = vmatprep.subr.bf16.mxu1 %v1294_v16 }
  0x24   : > { %1143 = vmatpush3.bf16.msra.mxu0 %v1295_v17  ;;  %1255 = vmatpush3.bf16.msra.mxu1 %v1295_v17 }
  0x27   : > { %649 = vmatmul.mubr.bf16.vlgmr.msra.gmra.mrb[0].mxu0 %v1296_v18  ;;  %713 = vmatmul.mubr.bf16.vlgmr.msra.gmra.mrb[0].mxu1 %v1299_v19 }
  0x28   : > { %656 = vmatprep.mubr.bf16.mxu0 %v1302_v20  ;;  %720 = vmatprep.mubr.bf16.mxu1 %v1304_v21 }
  0x2f   : > { %657 = vmatmul.mubr.bf16.gmra.mrb[4].mxu0 %v1306_v22  ;;  %721 = vmatmul.mubr.bf16.gmra.mrb[4].mxu1 %v1307_v23 }
  0x30   : > { %664 = vmatprep.mubr.bf16.mxu0 %v1308_v24  ;;  %728 = vmatprep.mubr.bf16.mxu1 %v1310_v25 }
  0x37   : > { %665 = vmatmul.mubr.bf16.gmra.mrb[8].mxu0 %v1312_v26  ;;  %729 = vmatmul.mubr.bf16.gmra.mrb[8].mxu1 %v1313_v27 }
  0x38   : > { %672 = vmatprep.mubr.bf16.mxu0 %v1314_v28  ;;  %736 = vmatprep.mubr.bf16.mxu1 %v1316_v29 }
  0x3f   : > { %673 = vmatmul.mubr.bf16.gmra.mrb[12].mxu0 %v1318_v30  ;;  %737 = vmatmul.mubr.bf16.gmra.mrb[12].mxu1 %v1319_v31 }
  0x40   : > { %680 = vmatprep.mubr.bf16.mxu0 %v1320_v32  ;;  %744 = vmatprep.mubr.bf16.mxu1 %v1322_v33 }
  0x47   : > { %681 = vmatmul.mubr.bf16.gmra.mrb[16].mxu0 %v1324_v34  ;;  %745 = vmatmul.mubr.bf16.gmra.mrb[16].mxu1 %v1325_v35 }
  0x48   : > { %688 = vmatprep.mubr.bf16.mxu0 %v1326_v36  ;;  %752 = vmatprep.mubr.bf16.mxu1 %v1328_v37 }
  0x4f   : > { %689 = vmatmul.mubr.bf16.gmra.mrb[20].mxu0 %v1330_v38  ;;  %753 = vmatmul.mubr.bf16.gmra.mrb[20].mxu1 %v1331_v39 }
  0x50   : > { %696 = vmatprep.mubr.bf16.mxu0 %v1332_v40  ;;  %760 = vmatprep.mubr.bf16.mxu1 %v1334_v41 }
  0x57   : > { %697 = vmatmul.mubr.bf16.gmra.mrb[24].mxu0 %v1336_v42  ;;  %761 = vmatmul.mubr.bf16.gmra.mrb[24].mxu1 %v1337_v43 }
  0x58   : > { %704 = vmatprep.mubr.bf16.mxu0 %v1338_v44  ;;  %768 = vmatprep.mubr.bf16.mxu1 %v1340_v45 }
  0x5f   : > { %705 = vmatmul.mubr.bf16.gmra.mrb[28].mxu0 %v1342_v46  ;;  %769 = vmatmul.mubr.bf16.gmra.mrb[28].mxu1 %v1343_v47 }
  0xfa   : > { %v1144_v48 = vpop.f32.mrb[0].mxu0  ;;  %v1192_v49 = vpop.f32.mrb[0].mxu1 }
  0xfb   : > { %v1145_v50 = vpop.f32.mrb[1].mxu0  ;;  %v1193_v52 = vpop.f32.mrb[1].mxu1 }
  0xfc   : > { %v1146_v53 = vadd.f32 %v1145_v50, %v1144_v48  ;;  %v1194_v54 = vadd.f32 %v1193_v52, %v1192_v49  ;;  %v1147_v55 = vpop.f32.mrb[2].mxu0  ;;  %v1195_v56 = vpop.f32.mrb[2].mxu1 }
  0xfd   : > { %v1148_v57 = vpop.f32.mrb[3].mxu0  ;;  %v1196_v58 = vpop.f32.mrb[3].mxu1 }
  0xfe   : > { %v883_v59 = vadd.f32 %v1146_v53, %v1499_v51  ;;  %v899_v60 = vadd.f32 %v1194_v54, %v1499_v51  ;;  %v1149_v61 = vadd.f32 %v1148_v57, %v1147_v55  ;;  %v1197_v62 = vadd.f32 %v1196_v58, %v1195_v56 }
 0x100   : > { %v915_v63 = vmax.f32 %v883_v59, 0.0  ;;  %v931_v0 = vmax.f32 %v899_v60, 0.0  ;;  %v884_v1 = vadd.f32 %v1149_v61, %v1499_v51  ;;  %v900_v2 = vadd.f32 %v1197_v62, %v1499_v51 }
 0x102   : > { %947 = vst [vmem:[%s1508_s8] sm:$0xff] %v915_v63  ;;  %963 = vst [vmem:[%s1508_s8 + $0x80] sm:$0xff] %v931_v0  ;;  %v916_v3 = vmax.f32 %v884_v1, 0.0  ;;  %v932_v4 = vmax.f32 %v900_v2, 0.0  ;;  %v1150_v5 = vpop.f32.mrb[4].mxu0  ;;  %v1198_v6 = vpop.f32.mrb[4].mxu1 }
 0x103   : > { %v1151_v7 = vpop.f32.mrb[5].mxu0  ;;  %v1199_v8 = vpop.f32.mrb[5].mxu1 }
 0x104   : > { %948 = vst [vmem:[%s1508_s8 + $0x8] sm:$0xff] %v916_v3  ;;  %964 = vst [vmem:[%s1508_s8 + $0x88] sm:$0xff] %v932_v4  ;;  %v1152_v9 = vadd.f32 %v1151_v7, %v1150_v5  ;;  %v1200_v10 = vadd.f32 %v1199_v8, %v1198_v6  ;;  %v1153_v11 = vpop.f32.mrb[6].mxu0  ;;  %v1201_v12 = vpop.f32.mrb[6].mxu1 }
 0x105   : > { %v1154_v13 = vpop.f32.mrb[7].mxu0  ;;  %v1202_v14 = vpop.f32.mrb[7].mxu1 }
 0x106   : > { %v885_v15 = vadd.f32 %v1152_v9, %v1499_v51  ;;  %v901_v16 = vadd.f32 %v1200_v10, %v1499_v51  ;;  %v1155_v17 = vadd.f32 %v1154_v13, %v1153_v11  ;;  %v1203_v18 = vadd.f32 %v1202_v14, %v1201_v12 }
 0x108   : > { %v917_v19 = vmax.f32 %v885_v15, 0.0  ;;  %v933_v20 = vmax.f32 %v901_v16, 0.0  ;;  %v886_v21 = vadd.f32 %v1155_v17, %v1499_v51  ;;  %v902_v22 = vadd.f32 %v1203_v18, %v1499_v51 }
 0x10a   : > { %949 = vst [vmem:[%s1508_s8 + $0x10] sm:$0xff] %v917_v19  ;;  %965 = vst [vmem:[%s1508_s8 + $0x90] sm:$0xff] %v933_v20  ;;  %v918_v23 = vmax.f32 %v886_v21, 0.0  ;;  %v934_v24 = vmax.f32 %v902_v22, 0.0  ;;  %v1156_v25 = vpop.f32.mrb[8].mxu0  ;;  %v1204_v26 = vpop.f32.mrb[8].mxu1 }
 0x10b   : > { %v1157_v27 = vpop.f32.mrb[9].mxu0  ;;  %v1205_v28 = vpop.f32.mrb[9].mxu1 }
 0x10c   : > { %950 = vst [vmem:[%s1508_s8 + $0x18] sm:$0xff] %v918_v23  ;;  %966 = vst [vmem:[%s1508_s8 + $0x98] sm:$0xff] %v934_v24  ;;  %v1158_v29 = vadd.f32 %v1157_v27, %v1156_v25  ;;  %v1206_v30 = vadd.f32 %v1205_v28, %v1204_v26  ;;  %v1159_v31 = vpop.f32.mrb[10].mxu0  ;;  %v1207_v32 = vpop.f32.mrb[10].mxu1 }
 0x10d   : > { %v1160_v33 = vpop.f32.mrb[11].mxu0  ;;  %v1208_v34 = vpop.f32.mrb[11].mxu1 }
 0x10e   : > { %v887_v35 = vadd.f32 %v1158_v29, %v1499_v51  ;;  %v903_v36 = vadd.f32 %v1206_v30, %v1499_v51  ;;  %v1161_v37 = vadd.f32 %v1160_v33, %v1159_v31  ;;  %v1209_v38 = vadd.f32 %v1208_v34, %v1207_v32 }
 0x110   : > { %v919_v39 = vmax.f32 %v887_v35, 0.0  ;;  %v935_v40 = vmax.f32 %v903_v36, 0.0  ;;  %v888_v41 = vadd.f32 %v1161_v37, %v1499_v51  ;;  %v904_v42 = vadd.f32 %v1209_v38, %v1499_v51 }
 0x112   : > { %951 = vst [vmem:[%s1508_s8 + $0x20] sm:$0xff] %v919_v39  ;;  %967 = vst [vmem:[%s1508_s8 + $0xa0] sm:$0xff] %v935_v40  ;;  %v920_v43 = vmax.f32 %v888_v41, 0.0  ;;  %v936_v44 = vmax.f32 %v904_v42, 0.0  ;;  %v1162_v45 = vpop.f32.mrb[12].mxu0  ;;  %v1210_v46 = vpop.f32.mrb[12].mxu1 }
 0x113   : > { %v1163_v47 = vpop.f32.mrb[13].mxu0  ;;  %v1211_v48 = vpop.f32.mrb[13].mxu1 }
 0x114   : > { %952 = vst [vmem:[%s1508_s8 + $0x28] sm:$0xff] %v920_v43  ;;  %968 = vst [vmem:[%s1508_s8 + $0xa8] sm:$0xff] %v936_v44  ;;  %v1164_v49 = vadd.f32 %v1163_v47, %v1162_v45  ;;  %v1212_v50 = vadd.f32 %v1211_v48, %v1210_v46  ;;  %v1165_v52 = vpop.f32.mrb[14].mxu0  ;;  %v1213_v53 = vpop.f32.mrb[14].mxu1 }
 0x115   : > { %v1166_v54 = vpop.f32.mrb[15].mxu0  ;;  %v1214_v55 = vpop.f32.mrb[15].mxu1 }
 0x116   : > { %v889_v56 = vadd.f32 %v1164_v49, %v1499_v51  ;;  %v905_v57 = vadd.f32 %v1212_v50, %v1499_v51  ;;  %v1167_v58 = vadd.f32 %v1166_v54, %v1165_v52  ;;  %v1215_v59 = vadd.f32 %v1214_v55, %v1213_v53 }
 0x118   : > { %v921_v60 = vmax.f32 %v889_v56, 0.0  ;;  %v937_v61 = vmax.f32 %v905_v57, 0.0  ;;  %v890_v62 = vadd.f32 %v1167_v58, %v1499_v51  ;;  %v906_v63 = vadd.f32 %v1215_v59, %v1499_v51 }
 0x11a   : > { %953 = vst [vmem:[%s1508_s8 + $0x30] sm:$0xff] %v921_v60  ;;  %969 = vst [vmem:[%s1508_s8 + $0xb0] sm:$0xff] %v937_v61  ;;  %v922_v0 = vmax.f32 %v890_v62, 0.0  ;;  %v938_v1 = vmax.f32 %v906_v63, 0.0  ;;  %v1168_v2 = vpop.f32.mrb[16].mxu0  ;;  %v1216_v3 = vpop.f32.mrb[16].mxu1 }
 0x11b   : > { %v1169_v4 = vpop.f32.mrb[17].mxu0  ;;  %v1217_v5 = vpop.f32.mrb[17].mxu1 }
 0x11c   : > { %954 = vst [vmem:[%s1508_s8 + $0x38] sm:$0xff] %v922_v0  ;;  %970 = vst [vmem:[%s1508_s8 + $0xb8] sm:$0xff] %v938_v1  ;;  %v1170_v6 = vadd.f32 %v1169_v4, %v1168_v2  ;;  %v1218_v7 = vadd.f32 %v1217_v5, %v1216_v3  ;;  %v1171_v8 = vpop.f32.mrb[18].mxu0  ;;  %v1219_v9 = vpop.f32.mrb[18].mxu1 }
 0x11d   : > { %v1172_v10 = vpop.f32.mrb[19].mxu0  ;;  %v1220_v11 = vpop.f32.mrb[19].mxu1 }
 0x11e   : > { %v891_v12 = vadd.f32 %v1170_v6, %v1499_v51  ;;  %v907_v13 = vadd.f32 %v1218_v7, %v1499_v51  ;;  %v1173_v14 = vadd.f32 %v1172_v10, %v1171_v8  ;;  %v1221_v15 = vadd.f32 %v1220_v11, %v1219_v9 }
 0x120   : > { %v923_v16 = vmax.f32 %v891_v12, 0.0  ;;  %v939_v17 = vmax.f32 %v907_v13, 0.0  ;;  %v892_v18 = vadd.f32 %v1173_v14, %v1499_v51  ;;  %v908_v19 = vadd.f32 %v1221_v15, %v1499_v51 }
 0x122   : > { %955 = vst [vmem:[%s1508_s8 + $0x40] sm:$0xff] %v923_v16  ;;  %971 = vst [vmem:[%s1508_s8 + $0xc0] sm:$0xff] %v939_v17  ;;  %v924_v20 = vmax.f32 %v892_v18, 0.0  ;;  %v940_v21 = vmax.f32 %v908_v19, 0.0  ;;  %v1174_v22 = vpop.f32.mrb[20].mxu0  ;;  %v1222_v23 = vpop.f32.mrb[20].mxu1 }
 0x123   : > { %v1175_v24 = vpop.f32.mrb[21].mxu0  ;;  %v1223_v25 = vpop.f32.mrb[21].mxu1 }
 0x124   : > { %956 = vst [vmem:[%s1508_s8 + $0x48] sm:$0xff] %v924_v20  ;;  %972 = vst [vmem:[%s1508_s8 + $0xc8] sm:$0xff] %v940_v21  ;;  %v1176_v26 = vadd.f32 %v1175_v24, %v1174_v22  ;;  %v1224_v27 = vadd.f32 %v1223_v25, %v1222_v23  ;;  %v1177_v28 = vpop.f32.mrb[22].mxu0  ;;  %v1225_v29 = vpop.f32.mrb[22].mxu1 }
 0x125   : > { %v1178_v30 = vpop.f32.mrb[23].mxu0  ;;  %v1226_v31 = vpop.f32.mrb[23].mxu1 }
 0x126   : > { %v893_v32 = vadd.f32 %v1176_v26, %v1499_v51  ;;  %v909_v33 = vadd.f32 %v1224_v27, %v1499_v51  ;;  %v1179_v34 = vadd.f32 %v1178_v30, %v1177_v28  ;;  %v1227_v35 = vadd.f32 %v1226_v31, %v1225_v29 }
 0x128   : > { %v925_v36 = vmax.f32 %v893_v32, 0.0  ;;  %v941_v37 = vmax.f32 %v909_v33, 0.0  ;;  %v894_v38 = vadd.f32 %v1179_v34, %v1499_v51  ;;  %v910_v39 = vadd.f32 %v1227_v35, %v1499_v51 }
 0x12a   : > { %957 = vst [vmem:[%s1508_s8 + $0x50] sm:$0xff] %v925_v36  ;;  %973 = vst [vmem:[%s1508_s8 + $0xd0] sm:$0xff] %v941_v37  ;;  %v926_v40 = vmax.f32 %v894_v38, 0.0  ;;  %v942_v41 = vmax.f32 %v910_v39, 0.0  ;;  %v1180_v42 = vpop.f32.mrb[24].mxu0  ;;  %v1228_v43 = vpop.f32.mrb[24].mxu1 }
 0x12b   : > { %v1181_v44 = vpop.f32.mrb[25].mxu0  ;;  %v1229_v45 = vpop.f32.mrb[25].mxu1 }
 0x12c   : > { %958 = vst [vmem:[%s1508_s8 + $0x58] sm:$0xff] %v926_v40  ;;  %974 = vst [vmem:[%s1508_s8 + $0xd8] sm:$0xff] %v942_v41  ;;  %v1182_v46 = vadd.f32 %v1181_v44, %v1180_v42  ;;  %v1230_v47 = vadd.f32 %v1229_v45, %v1228_v43  ;;  %v1183_v48 = vpop.f32.mrb[26].mxu0  ;;  %v1231_v49 = vpop.f32.mrb[26].mxu1 }
 0x12d   : > { %v1184_v50 = vpop.f32.mrb[27].mxu0  ;;  %v1232_v52 = vpop.f32.mrb[27].mxu1 }
 0x12e   : > { %v895_v53 = vadd.f32 %v1182_v46, %v1499_v51  ;;  %v911_v54 = vadd.f32 %v1230_v47, %v1499_v51  ;;  %v1185_v55 = vadd.f32 %v1184_v50, %v1183_v48  ;;  %v1233_v56 = vadd.f32 %v1232_v52, %v1231_v49 }
 0x130   : > { %v927_v57 = vmax.f32 %v895_v53, 0.0  ;;  %v943_v58 = vmax.f32 %v911_v54, 0.0  ;;  %v896_v59 = vadd.f32 %v1185_v55, %v1499_v51  ;;  %v912_v60 = vadd.f32 %v1233_v56, %v1499_v51 }
 0x132   : > { %959 = vst [vmem:[%s1508_s8 + $0x60] sm:$0xff] %v927_v57  ;;  %975 = vst [vmem:[%s1508_s8 + $0xe0] sm:$0xff] %v943_v58  ;;  %v928_v61 = vmax.f32 %v896_v59, 0.0  ;;  %v944_v62 = vmax.f32 %v912_v60, 0.0  ;;  %v1186_v63 = vpop.f32.mrb[28].mxu0  ;;  %v1234_v0 = vpop.f32.mrb[28].mxu1 }
 0x133   : > { %v1187_v1 = vpop.f32.mrb[29].mxu0  ;;  %v1235_v2 = vpop.f32.mrb[29].mxu1 }
 0x134   : > { %960 = vst [vmem:[%s1508_s8 + $0x68] sm:$0xff] %v928_v61  ;;  %976 = vst [vmem:[%s1508_s8 + $0xe8] sm:$0xff] %v944_v62  ;;  %v1188_v3 = vadd.f32 %v1187_v1, %v1186_v63  ;;  %v1236_v4 = vadd.f32 %v1235_v2, %v1234_v0  ;;  %v1189_v5 = vpop.f32.mrb[30].mxu0  ;;  %v1237_v6 = vpop.f32.mrb[30].mxu1 }
 0x135   : > { %v1190_v7 = vpop.f32.mrb[31].mxu0  ;;  %v1238_v8 = vpop.f32.mrb[31].mxu1 }
 0x136   : > { %v897_v9 = vadd.f32 %v1188_v3, %v1499_v51  ;;  %v913_v10 = vadd.f32 %v1236_v4, %v1499_v51  ;;  %v1191_v11 = vadd.f32 %v1190_v7, %v1189_v5  ;;  %v1239_v12 = vadd.f32 %v1238_v8, %v1237_v6 }
 0x138   : > { %v929_v13 = vmax.f32 %v897_v9, 0.0  ;;  %v945_v14 = vmax.f32 %v913_v10, 0.0  ;;  %v898_v15 = vadd.f32 %v1191_v11, %v1499_v51  ;;  %v914_v16 = vadd.f32 %v1239_v12, %v1499_v51 }
 0x13a   : > { %961 = vst [vmem:[%s1508_s8 + $0x70] sm:$0xff] %v929_v13  ;;  %977 = vst [vmem:[%s1508_s8 + $0xf0] sm:$0xff] %v945_v14  ;;  %v930_v17 = vmax.f32 %v898_v15, 0.0  ;;  %v946_v18 = vmax.f32 %v914_v16, 0.0 }
 0x13c   : > { %962 = vst [vmem:[%s1508_s8 + $0x78] sm:$0xff] %v930_v17  ;;  %978 = vst [vmem:[%s1508_s8 + $0xf8] sm:$0xff] %v946_v18 }
 0x13d PF: > { %s13_s14 = sadd.s32 1, %s1366_s14   ;;  %s1585_s12 = smov %s1362_s13 }
 0x13e   : > { %p10_p5 = scmp.ge.s32.totalorder %s13_s14, 4   ;;  %s1586_s13 = smov %s1588_s15 }
 0x140   :  { %12 = sbr.rel (!%p10_p5) target bundleno = 2 (0x2), region = 73 }

// kernel: resnet_forward.30
= control target key start
LH: loop header
LB: loop body
LE: loop exit
PB: predicated region body
PF: predicated region fallthrough
CT: control target
= control target key end

     0   :  { %s2320_s1 = inlined_call_operand.vmem [shape: bf16[896,128], index: 1, kind: input, shape index: {}]   ;;  %s2321_s0 = inlined_call_operand.vmem [shape: bf16[128,896], index: 0, kind: input, shape index: {}]   ;;  %s2322_s2 = inlined_call_operand.vmem [shape: f32[1,128], index: 2, kind: input, shape index: {}]   ;;  %s2323_s3 = inlined_call_operand.vmem [shape: f32[128,128], index: 3, kind: output, shape index: {}]  }
   0x1   :  { %v1702_v0 = vld [vmem:[%s2320_s1 + $0x40] sm:$0xff]   ;;  %v1706_v4 = vld [vmem:[%s2320_s1 + $0x48] sm:$0xff]   ;;  %v1710_v8 = vld [vmem:[%s2320_s1 + $0x50] sm:$0xff]  }
   0x2   :  { %v1703_v1 = vld [vmem:[%s2320_s1 + $0xc0] sm:$0xff]   ;;  %1462 = vmatprep.subr.bf16.mxu0 %v1702_v0  ;;  %v1707_v5 = vld [vmem:[%s2320_s1 + $0xc8] sm:$0xff]   ;;  %v1711_v9 = vld [vmem:[%s2320_s1 + $0xd0] sm:$0xff]  }
   0x3   :  { %v1704_v2 = vld [vmem:[%s2320_s1] sm:$0xff]   ;;  %1526 = vmatprep.subr.bf16.mxu1 %v1703_v1  ;;  %v1708_v6 = vld [vmem:[%s2320_s1 + $0x8] sm:$0xff]   ;;  %v1712_v10 = vld [vmem:[%s2320_s1 + $0x10] sm:$0xff]  }
   0x4   :  { %v1705_v3 = vld [vmem:[%s2320_s1 + $0x80] sm:$0xff]   ;;  %1463 = vmatpush3.bf16.msra.mxu0 %v1704_v2  ;;  %v1709_v7 = vld [vmem:[%s2320_s1 + $0x88] sm:$0xff]   ;;  %v1713_v11 = vld [vmem:[%s2320_s1 + $0x90] sm:$0xff]  }
   0x5   :  { %1527 = vmatpush3.bf16.msra.mxu1 %v1705_v3  ;;  %1464 = vmatprep.subr.bf16.mxu0 %v1706_v4  ;;  %v1714_v12 = vld [vmem:[%s2320_s1 + $0x58] sm:$0xff]   ;;  %v1718_v16 = vld [vmem:[%s2320_s1 + $0x60] sm:$0xff]   ;;  %v1722_v20 = vld [vmem:[%s2320_s1 + $0x68] sm:$0xff]  }
   0x6   :  { %1528 = vmatprep.subr.bf16.mxu1 %v1707_v5  ;;  %v1715_v13 = vld [vmem:[%s2320_s1 + $0xd8] sm:$0xff]   ;;  %v1719_v17 = vld [vmem:[%s2320_s1 + $0xe0] sm:$0xff]   ;;  %v1723_v21 = vld [vmem:[%s2320_s1 + $0xe8] sm:$0xff]  }
   0x7   :  { %v1716_v14 = vld [vmem:[%s2320_s1 + $0x18] sm:$0xff]   ;;  %v1720_v18 = vld [vmem:[%s2320_s1 + $0x20] sm:$0xff]   ;;  %v1724_v22 = vld [vmem:[%s2320_s1 + $0x28] sm:$0xff]  }
   0x8   :  { %1465 = vmatpush3.bf16.msra.mxu0 %v1708_v6  ;;  %v1717_v15 = vld [vmem:[%s2320_s1 + $0x98] sm:$0xff]   ;;  %v1721_v19 = vld [vmem:[%s2320_s1 + $0xa0] sm:$0xff]   ;;  %v1725_v23 = vld [vmem:[%s2320_s1 + $0xa8] sm:$0xff]  }
   0x9   :  { %1529 = vmatpush3.bf16.msra.mxu1 %v1709_v7  ;;  %1466 = vmatprep.subr.bf16.mxu0 %v1710_v8  ;;  %v1726_v24 = vld [vmem:[%s2320_s1 + $0x70] sm:$0xff]   ;;  %v1730_v28 = vld [vmem:[%s2320_s1 + $0x78] sm:$0xff]   ;;  %v1736_v33 = vld [vmem:[%s2321_s0 + $0x4] ss:$28 sps:$4 sm:$0xff]  }
   0xa   :  { %1530 = vmatprep.subr.bf16.mxu1 %v1711_v9  ;;  %v1727_v25 = vld [vmem:[%s2320_s1 + $0xf0] sm:$0xff]   ;;  %v1731_v29 = vld [vmem:[%s2320_s1 + $0xf8] sm:$0xff]   ;;  %v1737_v34 = vld [vmem:[%s2321_s0 + $0x8] ss:$28 sps:$4 sm:$0xff]   ;;  %883 = vmatprep.mubr.bf16.mxu0 %v1736_v33 }
   0xb   :  { %v1728_v26 = vld [vmem:[%s2320_s1 + $0x30] sm:$0xff]   ;;  %v1732_v30 = vld [vmem:[%s2320_s1 + $0x38] sm:$0xff]   ;;  %v1739_v35 = vld [vmem:[%s2321_s0 + $0xc] ss:$28 sps:$4 sm:$0xff]  }
   0xc   :  { %1467 = vmatpush3.bf16.msra.mxu0 %v1712_v10  ;;  %v1729_v27 = vld [vmem:[%s2320_s1 + $0xb0] sm:$0xff]   ;;  %v1733_v31 = vld [vmem:[%s2320_s1 + $0xb8] sm:$0xff]   ;;  %v1740_v36 = vld [vmem:[%s2320_s1 + $0x140] sm:$0xff]   ;;  %980 = vmatprep.mubr.bf16.mxu1 %v1739_v35 }
   0xd   :  { %1531 = vmatpush3.bf16.msra.mxu1 %v1713_v11  ;;  %1468 = vmatprep.subr.bf16.mxu0 %v1714_v12  ;;  %v1734_v32 = vld [vmem:[%s2321_s0] ss:$28 sps:$4 sm:$0xff]   ;;  %v1746_v40 = vld [vmem:[%s2321_s0 + $0x38] ss:$28 sps:$4 sm:$0xff]   ;;  %v1748_v42 = vld [vmem:[%s2320_s1 + $0x148] sm:$0xff]  }
   0xe   :  { %1532 = vmatprep.subr.bf16.mxu1 %v1715_v13  ;;  %v1741_v37 = vld [vmem:[%s2320_s1 + $0x100] sm:$0xff]   ;;  %v1742_v38 = vld [vmem:[%s2321_s0 + $0x3c] ss:$28 sps:$4 sm:$0xff]   ;;  %v1749_v43 = vld [vmem:[%s2320_s1 + $0x108] sm:$0xff]  }
   0xf   :  { %v1744_v39 = vld [vmem:[%s2321_s0 + $0x44] ss:$28 sps:$4 sm:$0xff]   ;;  %v1750_v44 = vld [vmem:[%s2321_s0 + $0x74] ss:$28 sps:$4 sm:$0xff]   ;;  %v1752_v45 = vld [vmem:[%s2321_s0 + $0x7c] ss:$28 sps:$4 sm:$0xff]  }
  0x10   :  { %1469 = vmatpush3.bf16.msra.mxu0 %v1716_v14  ;;  %v1747_v41 = vld [vmem:[%s2321_s0 + $0x40] ss:$28 sps:$4 sm:$0xff]   ;;  %v1756_v46 = vld [vmem:[%s2320_s1 + $0x150] sm:$0xff]   ;;  %v1758_v50 = vld [vmem:[%s2321_s0 + $0xac] ss:$28 sps:$4 sm:$0xff]  }
  0x11   :  { %1533 = vmatpush3.bf16.msra.mxu1 %v1717_v15  ;;  %1470 = vmatprep.subr.bf16.mxu0 %v1718_v16  ;;  %v1757_v47 = vld [vmem:[%s2320_s1 + $0x110] sm:$0xff]   ;;  %v1764_v52 = vld [vmem:[%s2320_s1 + $0x158] sm:$0xff]   ;;  %v1762_v54 = vld [vmem:[%s2321_s0 + $0xa8] ss:$28 sps:$4 sm:$0xff]  }
  0x12   :  { %1534 = vmatprep.subr.bf16.mxu1 %v1719_v17  ;;  %v1754_v48 = vld [vmem:[%s2321_s0 + $0x70] ss:$28 sps:$4 sm:$0xff]   ;;  %v1755_v49 = vld [vmem:[%s2321_s0 + $0x78] ss:$28 sps:$4 sm:$0xff]   ;;  %v1772_v55 = vld [vmem:[%s2320_s1 + $0x160] sm:$0xff]  }
  0x13   :  { %v1760_v51 = vld [vmem:[%s2321_s0 + $0xb4] ss:$28 sps:$4 sm:$0xff]   ;;  %v1765_v53 = vld [vmem:[%s2320_s1 + $0x118] sm:$0xff]   ;;  %v1773_v57 = vld [vmem:[%s2320_s1 + $0x120] sm:$0xff]  }
  0x14   :  { %1471 = vmatpush3.bf16.msra.mxu0 %v1720_v18  ;;  %v1763_v56 = vld [vmem:[%s2321_s0 + $0xb0] ss:$28 sps:$4 sm:$0xff]   ;;  %v1774_v58 = vld [vmem:[%s2320_s1 + $0x180] sm:$0xff]   ;;  %v1775_v3 = vld [vmem:[%s2321_s0 + $0x11c] ss:$28 sps:$4 sm:$0xff]  }
  0x15   :  { %1535 = vmatpush3.bf16.msra.mxu1 %v1721_v19  ;;  %1472 = vmatprep.subr.bf16.mxu0 %v1722_v20  ;;  %v1766_v59 = vld [vmem:[%s2321_s0 + $0xe4] ss:$28 sps:$4 sm:$0xff]   ;;  %v1768_v60 = vld [vmem:[%s2321_s0 + $0xec] ss:$28 sps:$4 sm:$0xff]   ;;  %v1784_v0 = vld [vmem:[%s2320_s1 + $0x190] sm:$0xff]  }
  0x16   :  { %1536 = vmatprep.subr.bf16.mxu1 %v1723_v21  ;;  %v1781_v61 = vld [vmem:[%s2320_s1 + $0x168] sm:$0xff]   ;;  %v1770_v1 = vld [vmem:[%s2321_s0 + $0xe0] ss:$28 sps:$4 sm:$0xff]   ;;  %v1791_v5 = vld [vmem:[%s2320_s1 + $0x170] sm:$0xff]  }
  0x17   :  { %v1782_v62 = vld [vmem:[%s2320_s1 + $0x188] sm:$0xff]   ;;  %v1777_v4 = vld [vmem:[%s2321_s0 + $0x124] ss:$28 sps:$4 sm:$0xff]   ;;  %v1792_v6 = vld [vmem:[%s2320_s1 + $0x198] sm:$0xff]  }
  0x18   :  { %1473 = vmatpush3.bf16.msra.mxu0 %v1724_v22  ;;  %v1783_v63 = vld [vmem:[%s2320_s1 + $0x128] sm:$0xff]   ;;  %v1793_v7 = vld [vmem:[%s2320_s1 + $0x130] sm:$0xff]   ;;  %v1794_v8 = vld [vmem:[%s2320_s1 + $0x1a0] sm:$0xff]  }
  0x19   :  { %1537 = vmatpush3.bf16.msra.mxu1 %v1725_v23  ;;  %1474 = vmatprep.subr.bf16.mxu0 %v1726_v24  ;;  %v1771_v2 = vld [vmem:[%s2321_s0 + $0xe8] ss:$28 sps:$4 sm:$0xff]   ;;  %v1779_v9 = vld [vmem:[%s2321_s0 + $0x118] ss:$28 sps:$4 sm:$0xff]   ;;  %v1780_v10 = vld [vmem:[%s2321_s0 + $0x120] ss:$28 sps:$4 sm:$0xff]  }
  0x1a   :  { %1538 = vmatprep.subr.bf16.mxu1 %v1727_v25  ;;  %v1785_v11 = vld [vmem:[%s2321_s0 + $0x154] ss:$28 sps:$4 sm:$0xff]   ;;  %v1787_v12 = vld [vmem:[%s2321_s0 + $0x15c] ss:$28 sps:$4 sm:$0xff]   ;;  %v1802_v14 = vld [vmem:[%s2320_s1 + $0x1a8] sm:$0xff]  }
  0x1b   :  { %v1801_v13 = vld [vmem:[%s2320_s1 + $0x178] sm:$0xff]   ;;  %v1804_v16 = vld [vmem:[%s2320_s1 + $0x1b0] sm:$0xff]   ;;  %v1795_v19 = vld [vmem:[%s2321_s0 + $0x18c] ss:$28 sps:$4 sm:$0xff]  }
  0x1c   :  { %1475 = vmatpush3.bf16.msra.mxu0 %v1728_v26  ;;  %v1803_v15 = vld [vmem:[%s2320_s1 + $0x138] sm:$0xff]   ;;  %v1789_v17 = vld [vmem:[%s2321_s0 + $0x150] ss:$28 sps:$4 sm:$0xff]   ;;  %v1799_v22 = vld [vmem:[%s2321_s0 + $0x188] ss:$28 sps:$4 sm:$0xff]  }
  0x1d   :  { %1539 = vmatpush3.bf16.msra.mxu1 %v1729_v27  ;;  %1476 = vmatprep.subr.bf16.mxu0 %v1730_v28  ;;  %v1790_v18 = vld [vmem:[%s2321_s0 + $0x158] ss:$28 sps:$4 sm:$0xff]   ;;  %v1800_v23 = vld [vmem:[%s2321_s0 + $0x190] ss:$28 sps:$4 sm:$0xff]  }
  0x1e   :  { %1540 = vmatprep.subr.bf16.mxu1 %v1731_v29  ;;  %v1797_v20 = vld [vmem:[%s2321_s0 + $0x194] ss:$28 sps:$4 sm:$0xff]   ;;  %v1808_v21 = vld [vmem:[%s2320_s1 + $0x1b8] sm:$0xff]   ;;  %v1811_v28 = vld [vmem:[%s2321_s0 + $0x4c] ss:$28 sps:$4 sm:$0xff]  }
  0x1f   :  { %v1807_v24 = vld [vmem:[%s2321_s0 + $0x14] ss:$28 sps:$4 sm:$0xff]   ;;  %v1817_v29 = vld [vmem:[%s2321_s0 + $0x88] ss:$28 sps:$4 sm:$0xff]   ;;  %v1819_v35 = vld [vmem:[%s2321_s0 + $0xbc] ss:$28 sps:$4 sm:$0xff]  }
  0x20   :  { %1477 = vmatpush3.bf16.msra.mxu0 %v1732_v30  ;;  %v1809_v25 = vld [vmem:[%s2321_s0 + $0x18] ss:$28 sps:$4 sm:$0xff]   ;;  %v1805_v26 = vld [vmem:[%s2321_s0 + $0x10] ss:$28 sps:$4 sm:$0xff]   ;;  %v1813_v30 = vld [vmem:[%s2321_s0 + $0x48] ss:$28 sps:$4 sm:$0xff]  }
  0x21   :  { %1541 = vmatpush3.bf16.msra.mxu1 %v1733_v31  ;;  %1590 = vmatprep.subr.bf16.mxu0 %v1740_v36  ;;  %v1810_v27 = vld [vmem:[%s2321_s0 + $0x50] ss:$28 sps:$4 sm:$0xff]   ;;  %v1814_v31 = vld [vmem:[%s2321_s0 + $0x84] ss:$28 sps:$4 sm:$0xff]   ;;  %v1825_v33 = vld [vmem:[%s2321_s0 + $0xf8] ss:$28 sps:$4 sm:$0xff]  }
  0x22   :  { %1670 = vmatprep.subr.bf16.mxu1 %v1774_v58  ;;  %v1826_v36 = vld [vmem:[%s2321_s0 + $0x130] ss:$28 sps:$4 sm:$0xff]  }
  0x23   :  { %884 = vmatmul.mubr.bf16.vlgmr.msra.gmra.mrb[0].mxu0 %v1734_v32  ;;  %v1818_v32 = vld [vmem:[%s2321_s0 + $0xc0] ss:$28 sps:$4 sm:$0xff]  }
  0x24   :  { %981 = vmatmul.mubr.bf16.vlgmr.msra.gmra.mrb[0].mxu1 %v1737_v34  ;;  %1591 = vmatpush3.bf16.msra.mxu0 %v1741_v37  ;;  %v1816_v34 = vld [vmem:[%s2321_s0 + $0x80] ss:$28 sps:$4 sm:$0xff]   ;;  %v1833_v37 = vld [vmem:[%s2321_s0 + $0x168] ss:$28 sps:$4 sm:$0xff]  }
  0x25   :  { %891 = vmatprep.mubr.bf16.mxu0 %v1742_v38  ;;  %988 = vmatprep.mubr.bf16.mxu1 %v1744_v39  ;;  %v1821_v38 = vld [vmem:[%s2321_s0 + $0xb8] ss:$28 sps:$4 sm:$0xff]  }
  0x26   :  { %1592 = vmatprep.subr.bf16.mxu0 %v1748_v42  ;;  %1671 = vmatpush3.bf16.msra.mxu1 %v1774_v58  ;;  %v1822_v39 = vld [vmem:[%s2321_s0 + $0xf4] ss:$28 sps:$4 sm:$0xff]   ;;  %v1827_v42 = vld [vmem:[%s2321_s0 + $0x12c] ss:$28 sps:$4 sm:$0xff]  }
  0x27   :  { %1672 = vmatprep.subr.bf16.mxu1 %v1782_v62 }
  0x28   :  { %1593 = vmatpush3.bf16.msra.mxu0 %v1749_v43  ;;  %v1829_v43 = vld [vmem:[%s2321_s0 + $0x128] ss:$28 sps:$4 sm:$0xff]  }
  0x29   :  { %1594 = vmatprep.subr.bf16.mxu0 %v1756_v46  ;;  %v1835_v46 = vld [vmem:[%s2321_s0 + $0x19c] ss:$28 sps:$4 sm:$0xff]  }
  0x2a   :  { %1673 = vmatpush3.bf16.msra.mxu1 %v1782_v62 }
  0x2b   :  { %892 = vmatmul.mubr.bf16.gmra.mrb[4].mxu0 %v1746_v40  ;;  %1674 = vmatprep.subr.bf16.mxu1 %v1784_v0  ;;  %v1834_v40 = vld [vmem:[%s2321_s0 + $0x1a0] ss:$28 sps:$4 sm:$0xff]  }
  0x2c   :  { %989 = vmatmul.mubr.bf16.gmra.mrb[4].mxu1 %v1747_v41  ;;  %899 = vmatprep.mubr.bf16.mxu0 %v1750_v44  ;;  %v1824_v41 = vld [vmem:[%s2321_s0 + $0xf0] ss:$28 sps:$4 sm:$0xff]   ;;  %v1830_v44 = vld [vmem:[%s2321_s0 + $0x164] ss:$28 sps:$4 sm:$0xff]  }
  0x2d   :  { %996 = vmatprep.mubr.bf16.mxu1 %v1752_v45  ;;  %1595 = vmatpush3.bf16.msra.mxu0 %v1757_v47  ;;  %v1832_v45 = vld [vmem:[%s2321_s0 + $0x160] ss:$28 sps:$4 sm:$0xff]   ;;  %v1837_v47 = vld [vmem:[%s2321_s0 + $0x198] ss:$28 sps:$4 sm:$0xff]  }
  0x2e   :  { %1596 = vmatprep.subr.bf16.mxu0 %v1764_v52  ;;  %1675 = vmatpush3.bf16.msra.mxu1 %v1784_v0 }
  0x2f   :  { %1676 = vmatprep.subr.bf16.mxu1 %v1792_v6 }
  0x31   :  { %1597 = vmatpush3.bf16.msra.mxu0 %v1765_v53 }
  0x32   :  { %1598 = vmatprep.subr.bf16.mxu0 %v1772_v55  ;;  %1677 = vmatpush3.bf16.msra.mxu1 %v1792_v6 }
  0x33   :  { %900 = vmatmul.mubr.bf16.gmra.mrb[8].mxu0 %v1754_v48  ;;  %1678 = vmatprep.subr.bf16.mxu1 %v1794_v8 }
  0x34   :  { %997 = vmatmul.mubr.bf16.gmra.mrb[8].mxu1 %v1755_v49  ;;  %907 = vmatprep.mubr.bf16.mxu0 %v1758_v50 }
  0x35   :  { %1004 = vmatprep.mubr.bf16.mxu1 %v1760_v51  ;;  %1599 = vmatpush3.bf16.msra.mxu0 %v1773_v57 }
  0x36   :  { %1600 = vmatprep.subr.bf16.mxu0 %v1781_v61  ;;  %1679 = vmatpush3.bf16.msra.mxu1 %v1794_v8 }
  0x37   :  { %1680 = vmatprep.subr.bf16.mxu1 %v1802_v14 }
  0x39   :  { %1601 = vmatpush3.bf16.msra.mxu0 %v1783_v63 }
  0x3a   :  { %1602 = vmatprep.subr.bf16.mxu0 %v1791_v5  ;;  %1681 = vmatpush3.bf16.msra.mxu1 %v1802_v14 }
  0x3b   :  { %908 = vmatmul.mubr.bf16.gmra.mrb[12].mxu0 %v1762_v54  ;;  %1682 = vmatprep.subr.bf16.mxu1 %v1804_v16 }
  0x3c   :  { %1005 = vmatmul.mubr.bf16.gmra.mrb[12].mxu1 %v1763_v56  ;;  %915 = vmatprep.mubr.bf16.mxu0 %v1766_v59 }
  0x3d   :  { %1012 = vmatprep.mubr.bf16.mxu1 %v1768_v60  ;;  %1603 = vmatpush3.bf16.msra.mxu0 %v1793_v7 }
  0x3e   :  { %1604 = vmatprep.subr.bf16.mxu0 %v1801_v13  ;;  %1683 = vmatpush3.bf16.msra.mxu1 %v1804_v16 }
  0x3f   :  { %1684 = vmatprep.subr.bf16.mxu1 %v1808_v21 }
  0x41   :  { %1605 = vmatpush3.bf16.msra.mxu0 %v1803_v15 }
  0x42   :  { %1685 = vmatpush3.bf16.msra.mxu1 %v1808_v21 }
  0x43   :  { %916 = vmatmul.mubr.bf16.gmra.mrb[16].mxu0 %v1770_v1 }
  0x44   :  { %1013 = vmatmul.mubr.bf16.gmra.mrb[16].mxu1 %v1771_v2  ;;  %923 = vmatprep.mubr.bf16.mxu0 %v1775_v3 }
  0x45   :  { %1020 = vmatprep.mubr.bf16.mxu1 %v1777_v4 }
  0x4b   :  { %924 = vmatmul.mubr.bf16.gmra.mrb[20].mxu0 %v1779_v9 }
  0x4c   :  { %1021 = vmatmul.mubr.bf16.gmra.mrb[20].mxu1 %v1780_v10  ;;  %931 = vmatprep.mubr.bf16.mxu0 %v1785_v11 }
  0x4d   :  { %1028 = vmatprep.mubr.bf16.mxu1 %v1787_v12 }
  0x53   :  { %932 = vmatmul.mubr.bf16.gmra.mrb[24].mxu0 %v1789_v17 }
  0x54   :  { %1029 = vmatmul.mubr.bf16.gmra.mrb[24].mxu1 %v1790_v18  ;;  %939 = vmatprep.mubr.bf16.mxu0 %v1795_v19 }
  0x55   :  { %1036 = vmatprep.mubr.bf16.mxu1 %v1797_v20 }
  0x5b   :  { %940 = vmatmul.mubr.bf16.gmra.mrb[28].mxu0 %v1799_v22 }
  0x5c   :  { %1037 = vmatmul.mubr.bf16.gmra.mrb[28].mxu1 %v1800_v23  ;;  %1077 = vmatprep.mubr.bf16.mxu0 %v1807_v24 }
  0x5d   :  { %1686 = vmatprep.mubr.bf16.mxu1 %v1809_v25 }
  0x63   :  { %1078 = vmatmul.mubr.bf16.vlgmr.msra.gmra.mrb[32].mxu0 %v1805_v26 }
  0x64   :  { %1687 = vmatmul.mubr.bf16.vlgmr.msra.gmra.mrb[32].mxu1 %v1810_v27  ;;  %1085 = vmatprep.mubr.bf16.mxu0 %v1811_v28 }
  0x65   :  { %1690 = vmatprep.mubr.bf16.mxu1 %v1817_v29 }
  0x6b   :  { %1086 = vmatmul.mubr.bf16.gmra.mrb[36].mxu0 %v1813_v30 }
  0x6c   :  { %1093 = vmatprep.mubr.bf16.mxu0 %v1814_v31  ;;  %1691 = vmatmul.mubr.bf16.gmra.mrb[36].mxu1 %v1818_v32 }
  0x6d   :  { %1694 = vmatprep.mubr.bf16.mxu1 %v1825_v33 }
  0x73   :  { %1094 = vmatmul.mubr.bf16.gmra.mrb[40].mxu0 %v1816_v34 }
  0x74   :  { %1101 = vmatprep.mubr.bf16.mxu0 %v1819_v35  ;;  %1695 = vmatmul.mubr.bf16.gmra.mrb[40].mxu1 %v1826_v36 }
  0x75   :  { %1698 = vmatprep.mubr.bf16.mxu1 %v1833_v37 }
  0x7b   :  { %1102 = vmatmul.mubr.bf16.gmra.mrb[44].mxu0 %v1821_v38 }
  0x7c   :  { %1109 = vmatprep.mubr.bf16.mxu0 %v1822_v39  ;;  %1699 = vmatmul.mubr.bf16.gmra.mrb[44].mxu1 %v1834_v40 }
  0x83   :  { %1110 = vmatmul.mubr.bf16.gmra.mrb[48].mxu0 %v1824_v41 }
  0x84   :  { %1117 = vmatprep.mubr.bf16.mxu0 %v1827_v42 }
  0x8b   :  { %1118 = vmatmul.mubr.bf16.gmra.mrb[52].mxu0 %v1829_v43 }
  0x8c   :  { %1125 = vmatprep.mubr.bf16.mxu0 %v1830_v44 }
  0x93   :  { %1126 = vmatmul.mubr.bf16.gmra.mrb[56].mxu0 %v1832_v45 }
  0x94   :  { %1133 = vmatprep.mubr.bf16.mxu0 %v1835_v46 }
  0x9b   :  { %1134 = vmatmul.mubr.bf16.gmra.mrb[60].mxu0 %v1837_v47 }
  0xf6   :  { %v1478_v48 = vpop.f32.mrb[0].mxu0 }
  0xf7   :  { %v1542_v49 = vpop.f32.mrb[0].mxu1  ;;  %v1479_v50 = vpop.f32.mrb[1].mxu0 }
  0xf8   :  { %v1480_v51 = vadd.f32 %v1479_v50, %v1478_v48  ;;  %v1543_v52 = vpop.f32.mrb[1].mxu1  ;;  %v1481_v53 = vpop.f32.mrb[2].mxu0 }
  0xf9   :  { %v1544_v54 = vadd.f32 %v1543_v52, %v1542_v49  ;;  %v1545_v55 = vpop.f32.mrb[2].mxu1  ;;  %v1482_v56 = vpop.f32.mrb[3].mxu0 }
  0xfa   :  { %v1483_v57 = vadd.f32 %v1482_v56, %v1481_v53  ;;  %v1546_v58 = vpop.f32.mrb[3].mxu1 }
  0xfb   :  { %v2194_v59 = vadd.f32 %v1544_v54, %v1480_v51  ;;  %v1547_v60 = vadd.f32 %v1546_v58, %v1545_v55 }
  0xfd   :  { %v2196_v61 = vadd.f32 %v1547_v60, %v1483_v57 }
  0xfe   :  { %v1484_v62 = vpop.f32.mrb[4].mxu0 }
  0xff   :  { %v1548_v63 = vpop.f32.mrb[4].mxu1  ;;  %v1485_v0 = vpop.f32.mrb[5].mxu0 }
 0x100   :  { %v1486_v1 = vadd.f32 %v1485_v0, %v1484_v62  ;;  %v1549_v2 = vpop.f32.mrb[5].mxu1  ;;  %v1487_v3 = vpop.f32.mrb[6].mxu0 }
 0x101   :  { %v1550_v4 = vadd.f32 %v1549_v2, %v1548_v63  ;;  %v1551_v5 = vpop.f32.mrb[6].mxu1  ;;  %v1488_v6 = vpop.f32.mrb[7].mxu0 }
 0x102   :  { %v1489_v7 = vadd.f32 %v1488_v6, %v1487_v3  ;;  %v1552_v8 = vpop.f32.mrb[7].mxu1 }
 0x103   :  { %v2198_v9 = vadd.f32 %v1550_v4, %v1486_v1  ;;  %v1553_v10 = vadd.f32 %v1552_v8, %v1551_v5 }
 0x105   :  { %v2200_v11 = vadd.f32 %v1553_v10, %v1489_v7 }
 0x106   :  { %v1490_v12 = vpop.f32.mrb[8].mxu0 }
 0x107   :  { %v1554_v13 = vpop.f32.mrb[8].mxu1  ;;  %v1491_v14 = vpop.f32.mrb[9].mxu0 }
 0x108   :  { %v1492_v15 = vadd.f32 %v1491_v14, %v1490_v12  ;;  %v1555_v16 = vpop.f32.mrb[9].mxu1  ;;  %v1493_v17 = vpop.f32.mrb[10].mxu0 }
 0x109   :  { %v1556_v18 = vadd.f32 %v1555_v16, %v1554_v13  ;;  %v1557_v19 = vpop.f32.mrb[10].mxu1  ;;  %v1494_v20 = vpop.f32.mrb[11].mxu0 }
 0x10a   :  { %v1495_v21 = vadd.f32 %v1494_v20, %v1493_v17  ;;  %v1558_v22 = vpop.f32.mrb[11].mxu1 }
 0x10b   :  { %v2202_v23 = vadd.f32 %v1556_v18, %v1492_v15  ;;  %v1559_v24 = vadd.f32 %v1558_v22, %v1557_v19 }
 0x10d   :  { %v2204_v25 = vadd.f32 %v1559_v24, %v1495_v21 }
 0x10e   :  { %v1496_v26 = vpop.f32.mrb[12].mxu0 }
 0x10f   :  { %v1560_v27 = vpop.f32.mrb[12].mxu1  ;;  %v1497_v28 = vpop.f32.mrb[13].mxu0 }
 0x110   :  { %v1498_v29 = vadd.f32 %v1497_v28, %v1496_v26  ;;  %v1561_v30 = vpop.f32.mrb[13].mxu1  ;;  %v1499_v31 = vpop.f32.mrb[14].mxu0 }
 0x111   :  { %v1562_v32 = vadd.f32 %v1561_v30, %v1560_v27  ;;  %v1563_v33 = vpop.f32.mrb[14].mxu1  ;;  %v1500_v34 = vpop.f32.mrb[15].mxu0 }
 0x112   :  { %v1501_v35 = vadd.f32 %v1500_v34, %v1499_v31  ;;  %v1564_v36 = vpop.f32.mrb[15].mxu1 }
 0x113   :  { %v2206_v37 = vadd.f32 %v1562_v32, %v1498_v29  ;;  %v1565_v38 = vadd.f32 %v1564_v36, %v1563_v33 }
 0x115   :  { %v2208_v39 = vadd.f32 %v1565_v38, %v1501_v35 }
 0x116   :  { %v1502_v40 = vpop.f32.mrb[16].mxu0 }
 0x117   :  { %v1566_v41 = vpop.f32.mrb[16].mxu1  ;;  %v1503_v42 = vpop.f32.mrb[17].mxu0 }
 0x118   :  { %v1504_v43 = vadd.f32 %v1503_v42, %v1502_v40  ;;  %v1567_v44 = vpop.f32.mrb[17].mxu1  ;;  %v1505_v45 = vpop.f32.mrb[18].mxu0 }
 0x119   :  { %v1568_v46 = vadd.f32 %v1567_v44, %v1566_v41  ;;  %v1569_v47 = vpop.f32.mrb[18].mxu1  ;;  %v1506_v48 = vpop.f32.mrb[19].mxu0 }
 0x11a   :  { %v1507_v49 = vadd.f32 %v1506_v48, %v1505_v45  ;;  %v1570_v50 = vpop.f32.mrb[19].mxu1 }
 0x11b   :  { %v2210_v51 = vadd.f32 %v1568_v46, %v1504_v43  ;;  %v1571_v52 = vadd.f32 %v1570_v50, %v1569_v47 }
 0x11d   :  { %v2212_v53 = vadd.f32 %v1571_v52, %v1507_v49  ;;  %v2230_v52 = vld [vmem:[%s2322_s2] ss:$0 sm:$0xff] }
 0x11e   :  { %v1508_v54 = vpop.f32.mrb[20].mxu0 }
 0x11f   :  { %v1572_v55 = vpop.f32.mrb[20].mxu1  ;;  %v1509_v56 = vpop.f32.mrb[21].mxu0 }
 0x120   :  { %v1510_v57 = vadd.f32 %v1509_v56, %v1508_v54  ;;  %v1573_v58 = vpop.f32.mrb[21].mxu1  ;;  %v1511_v60 = vpop.f32.mrb[22].mxu0 }
 0x121   :  { %v1574_v62 = vadd.f32 %v1573_v58, %v1572_v55  ;;  %v1575_v63 = vpop.f32.mrb[22].mxu1  ;;  %v1512_v0 = vpop.f32.mrb[23].mxu0 }
 0x122   :  { %v1513_v1 = vadd.f32 %v1512_v0, %v1511_v60  ;;  %v1576_v2 = vpop.f32.mrb[23].mxu1 }
 0x123   :  { %v2214_v3 = vadd.f32 %v1574_v62, %v1510_v57  ;;  %v1577_v4 = vadd.f32 %v1576_v2, %v1575_v63 }
 0x125   :  { %v2216_v5 = vadd.f32 %v1577_v4, %v1513_v1 }
 0x126   :  { %v1514_v6 = vpop.f32.mrb[24].mxu0 }
 0x127   :  { %v1578_v7 = vpop.f32.mrb[24].mxu1  ;;  %v1515_v8 = vpop.f32.mrb[25].mxu0 }
 0x128   :  { %v1516_v10 = vadd.f32 %v1515_v8, %v1514_v6  ;;  %v1579_v12 = vpop.f32.mrb[25].mxu1  ;;  %v1517_v13 = vpop.f32.mrb[26].mxu0 }
 0x129   :  { %v1580_v14 = vadd.f32 %v1579_v12, %v1578_v7  ;;  %v1581_v15 = vpop.f32.mrb[26].mxu1  ;;  %v1518_v16 = vpop.f32.mrb[27].mxu0 }
 0x12a   :  { %v1519_v17 = vadd.f32 %v1518_v16, %v1517_v13  ;;  %v1582_v18 = vpop.f32.mrb[27].mxu1 }
 0x12b   :  { %v2218_v19 = vadd.f32 %v1580_v14, %v1516_v10  ;;  %v1583_v20 = vadd.f32 %v1582_v18, %v1581_v15 }
 0x12d   :  { %v2220_v21 = vadd.f32 %v1583_v20, %v1519_v17 }
 0x12e   :  { %v1520_v22 = vpop.f32.mrb[28].mxu0 }
 0x12f   :  { %v1584_v24 = vpop.f32.mrb[28].mxu1  ;;  %v1521_v26 = vpop.f32.mrb[29].mxu0 }
 0x130   :  { %v1522_v27 = vadd.f32 %v1521_v26, %v1520_v22  ;;  %v1585_v28 = vpop.f32.mrb[29].mxu1  ;;  %v1523_v29 = vpop.f32.mrb[30].mxu0 }
 0x131   :  { %v1586_v30 = vadd.f32 %v1585_v28, %v1584_v24  ;;  %v1587_v31 = vpop.f32.mrb[30].mxu1  ;;  %v1524_v32 = vpop.f32.mrb[31].mxu0 }
 0x132   :  { %v1525_v33 = vadd.f32 %v1524_v32, %v1523_v29  ;;  %v1588_v34 = vpop.f32.mrb[31].mxu1 }
 0x133   :  { %v2222_v35 = vadd.f32 %v1586_v30, %v1522_v27  ;;  %v1589_v36 = vadd.f32 %v1588_v34, %v1587_v31 }
 0x135   :  { %v2224_v38 = vadd.f32 %v1589_v36, %v1525_v33 }
 0x136   :  { %v1606_v40 = vpop.f32.mrb[32].mxu0 }
 0x137   :  { %v1607_v41 = vpop.f32.mrb[33].mxu0  ;;  %v1688_v42 = vpop.f32.mrb[32].mxu1 }
 0x138   :  { %v1608_v43 = vadd.f32 %v1607_v41, %v1606_v40  ;;  %v1609_v44 = vpop.f32.mrb[34].mxu0  ;;  %v1176_v45 = vpop.f32.mrb[33].mxu1 }
 0x139   :  { %v1610_v46 = vpop.f32.mrb[35].mxu0  ;;  %v1689_v47 = vpop.f32.mrb[34].mxu1 }
 0x13a   :  { %v1611_v48 = vadd.f32 %v1610_v46, %v1609_v44  ;;  %v1080_v49 = vadd.f32 %v1608_v43, %v2194_v59  ;;  %v1179_v50 = vpop.f32.mrb[35].mxu1 }
 0x13c   :  { %v1177_v54 = vadd.f32 %v1176_v45, %v1080_v49  ;;  %v1083_v55 = vadd.f32 %v1611_v48, %v2196_v61 }
 0x13e   :  { %v1297_v56 = vadd.f32 %v2230_v52, %v1177_v54  ;;  %v1180_v57 = vadd.f32 %v1179_v50, %v1083_v55  ;;  %v1612_v58 = vpop.f32.mrb[36].mxu0 }
 0x13f   :  { %v1613_v60 = vpop.f32.mrb[37].mxu0  ;;  %v1692_v62 = vpop.f32.mrb[36].mxu1 }
 0x140   :  { %v1313_v63 = vmax.f32 %v1297_v56, 0.0  ;;  %v1298_v0 = vadd.f32 %v2230_v52, %v1180_v57  ;;  %v1614_v1 = vadd.f32 %v1613_v60, %v1612_v58  ;;  %v1615_v59 = vpop.f32.mrb[38].mxu0  ;;  %v1192_v2 = vpop.f32.mrb[37].mxu1 }
 0x141   :  { %v1616_v4 = vpop.f32.mrb[39].mxu0  ;;  %v1693_v6 = vpop.f32.mrb[38].mxu1 }
 0x142   :  { %1329 = vst [vmem:[%s2323_s3] sm:$0xff] %v1313_v63  ;;  %v1314_v7 = vmax.f32 %v1298_v0, 0.0  ;;  %v1088_v61 = vadd.f32 %v1614_v1, %v2198_v9  ;;  %v1617_v8 = vadd.f32 %v1616_v4, %v1615_v59  ;;  %v1195_v10 = vpop.f32.mrb[39].mxu1 }
 0x144   :  { %1330 = vst [vmem:[%s2323_s3 + $0x8] sm:$0xff] %v1314_v7  ;;  %v1185_v12 = vadd.f32 %v1688_v42, %v1088_v61  ;;  %v1091_v13 = vadd.f32 %v1617_v8, %v2200_v11 }
 0x146   :  { %v1299_v14 = vadd.f32 %v2230_v52, %v1185_v12  ;;  %v1188_v15 = vadd.f32 %v1689_v47, %v1091_v13  ;;  %v1618_v16 = vpop.f32.mrb[40].mxu0 }
 0x147   :  { %v1619_v17 = vpop.f32.mrb[41].mxu0  ;;  %v2244_v18 = vpop.f32.mrb[40].mxu1 }
 0x148   :  { %v1315_v20 = vmax.f32 %v1299_v14, 0.0  ;;  %v1300_v22 = vadd.f32 %v2230_v52, %v1188_v15  ;;  %v1620_v9 = vadd.f32 %v1619_v17, %v1618_v16  ;;  %v1621_v24 = vpop.f32.mrb[42].mxu0  ;;  %v1208_v26 = vpop.f32.mrb[41].mxu1 }
 0x149   :  { %v1622_v27 = vpop.f32.mrb[43].mxu0  ;;  %v1697_v28 = vpop.f32.mrb[42].mxu1 }
 0x14a   :  { %1331 = vst [vmem:[%s2323_s3 + $0x10] sm:$0xff] %v1315_v20  ;;  %v1316_v11 = vmax.f32 %v1300_v22, 0.0  ;;  %v1623_v29 = vadd.f32 %v1622_v27, %v1621_v24  ;;  %v1096_v30 = vadd.f32 %v1620_v9, %v2202_v23  ;;  %v1211_v31 = vpop.f32.mrb[43].mxu1 }
 0x14c   :  { %1332 = vst [vmem:[%s2323_s3 + $0x18] sm:$0xff] %v1316_v11  ;;  %v1193_v32 = vadd.f32 %v1192_v2, %v1096_v30  ;;  %v1099_v33 = vadd.f32 %v1623_v29, %v2204_v25 }
 0x14e   :  { %v1301_v34 = vadd.f32 %v2230_v52, %v1193_v32  ;;  %v1196_v36 = vadd.f32 %v1195_v10, %v1099_v33  ;;  %v1624_v40 = vpop.f32.mrb[44].mxu0 }
 0x14f   :  { %v1625_v41 = vpop.f32.mrb[45].mxu0  ;;  %v2256_v42 = vpop.f32.mrb[44].mxu1 }
 0x150   :  { %v1317_v43 = vmax.f32 %v1301_v34, 0.0  ;;  %v1302_v44 = vadd.f32 %v2230_v52, %v1196_v36  ;;  %v1626_v45 = vadd.f32 %v1625_v41, %v1624_v40  ;;  %v1627_v23 = vpop.f32.mrb[46].mxu0  ;;  %v1224_v46 = vpop.f32.mrb[45].mxu1 }
 0x151   :  { %v1628_v47 = vpop.f32.mrb[47].mxu0  ;;  %v2259_v48 = vpop.f32.mrb[46].mxu1 }
 0x152   :  { %1333 = vst [vmem:[%s2323_s3 + $0x20] sm:$0xff] %v1317_v43  ;;  %v1318_v25 = vmax.f32 %v1302_v44, 0.0  ;;  %v1104_v49 = vadd.f32 %v1626_v45, %v2206_v37  ;;  %v1629_v50 = vadd.f32 %v1628_v47, %v1627_v23  ;;  %v1227_v54 = vpop.f32.mrb[47].mxu1 }
 0x154   :  { %1334 = vst [vmem:[%s2323_s3 + $0x28] sm:$0xff] %v1318_v25  ;;  %v1201_v55 = vadd.f32 %v1692_v62, %v1104_v49  ;;  %v1107_v56 = vadd.f32 %v1629_v50, %v2208_v39 }
 0x156   :  { %v1303_v57 = vadd.f32 %v2230_v52, %v1201_v55  ;;  %v1204_v58 = vadd.f32 %v1693_v6, %v1107_v56  ;;  %v1630_v60 = vpop.f32.mrb[48].mxu0 }
 0x157   :  { %v1631_v63 = vpop.f32.mrb[49].mxu0 }
 0x158   :  { %v1319_v0 = vmax.f32 %v1303_v57, 0.0  ;;  %v1304_v1 = vadd.f32 %v2230_v52, %v1204_v58  ;;  %v1632_v59 = vadd.f32 %v1631_v63, %v1630_v60  ;;  %v1633_v2 = vpop.f32.mrb[50].mxu0 }
 0x159   :  { %v1634_v37 = vpop.f32.mrb[51].mxu0 }
 0x15a   :  { %1335 = vst [vmem:[%s2323_s3 + $0x30] sm:$0xff] %v1319_v0  ;;  %v1320_v4 = vmax.f32 %v1304_v1, 0.0  ;;  %v1635_v7 = vadd.f32 %v1634_v37, %v1633_v2  ;;  %v1112_v62 = vadd.f32 %v1632_v59, %v2210_v51 }
 0x15c   :  { %1336 = vst [vmem:[%s2323_s3 + $0x38] sm:$0xff] %v1320_v4  ;;  %v1209_v39 = vadd.f32 %v1208_v26, %v1112_v62  ;;  %v1115_v6 = vadd.f32 %v1635_v7, %v2212_v53 }
 0x15e   :  { %v1305_v61 = vadd.f32 %v2230_v52, %v1209_v39  ;;  %v1212_v8 = vadd.f32 %v1211_v31, %v1115_v6  ;;  %v1636_v10 = vpop.f32.mrb[52].mxu0 }
 0x15f   :  { %v1637_v12 = vpop.f32.mrb[53].mxu0 }
 0x160   :  { %v1321_v13 = vmax.f32 %v1305_v61, 0.0  ;;  %v1306_v14 = vadd.f32 %v2230_v52, %v1212_v8  ;;  %v1638_v15 = vadd.f32 %v1637_v12, %v1636_v10  ;;  %v1639_v16 = vpop.f32.mrb[54].mxu0 }
 0x161   :  { %v1640_v17 = vpop.f32.mrb[55].mxu0 }
 0x162   :  { %1337 = vst [vmem:[%s2323_s3 + $0x40] sm:$0xff] %v1321_v13  ;;  %v1322_v51 = vmax.f32 %v1306_v14, 0.0  ;;  %v1120_v20 = vadd.f32 %v1638_v15, %v2214_v3  ;;  %v1641_v22 = vadd.f32 %v1640_v17, %v1639_v16 }
 0x164   :  { %1338 = vst [vmem:[%s2323_s3 + $0x48] sm:$0xff] %v1322_v51  ;;  %v1217_v53 = vadd.f32 %v2244_v18, %v1120_v20  ;;  %v1123_v9 = vadd.f32 %v1641_v22, %v2216_v5 }
 0x166   :  { %v1307_v24 = vadd.f32 %v2230_v52, %v1217_v53  ;;  %v1220_v26 = vadd.f32 %v1697_v28, %v1123_v9  ;;  %v1642_v27 = vpop.f32.mrb[56].mxu0 }
 0x167   :  { %v1643_v11 = vpop.f32.mrb[57].mxu0 }
 0x168   :  { %v1323_v29 = vmax.f32 %v1307_v24, 0.0  ;;  %v1308_v30 = vadd.f32 %v2230_v52, %v1220_v26  ;;  %v1644_v31 = vadd.f32 %v1643_v11, %v1642_v27  ;;  %v1645_v32 = vpop.f32.mrb[58].mxu0 }
 0x169   :  { %v1646_v3 = vpop.f32.mrb[59].mxu0 }
 0x16a   :  { %1339 = vst [vmem:[%s2323_s3 + $0x50] sm:$0xff] %v1323_v29  ;;  %v1324_v33 = vmax.f32 %v1308_v30, 0.0  ;;  %v1647_v34 = vadd.f32 %v1646_v3, %v1645_v32  ;;  %v1128_v18 = vadd.f32 %v1644_v31, %v2218_v19 }
 0x16c   :  { %1340 = vst [vmem:[%s2323_s3 + $0x58] sm:$0xff] %v1324_v33  ;;  %v1225_v5 = vadd.f32 %v1224_v46, %v1128_v18  ;;  %v1131_v28 = vadd.f32 %v1647_v34, %v2220_v21 }
 0x16e   :  { %v1309_v36 = vadd.f32 %v2230_v52, %v1225_v5  ;;  %v1228_v40 = vadd.f32 %v1227_v54, %v1131_v28  ;;  %v1648_v41 = vpop.f32.mrb[60].mxu0 }
 0x16f   :  { %v1649_v43 = vpop.f32.mrb[61].mxu0 }
 0x170   :  { %v1325_v44 = vmax.f32 %v1309_v36, 0.0  ;;  %v1310_v45 = vadd.f32 %v2230_v52, %v1228_v40  ;;  %v1650_v23 = vadd.f32 %v1649_v43, %v1648_v41  ;;  %v1651_v47 = vpop.f32.mrb[62].mxu0 }
 0x171   :  { %v1652_v25 = vpop.f32.mrb[63].mxu0 }
 0x172   :  { %1341 = vst [vmem:[%s2323_s3 + $0x60] sm:$0xff] %v1325_v44  ;;  %v1326_v19 = vmax.f32 %v1310_v45, 0.0  ;;  %v1136_v46 = vadd.f32 %v1650_v23, %v2222_v35  ;;  %v1653_v49 = vadd.f32 %v1652_v25, %v1651_v47 }
 0x174   :  { %1342 = vst [vmem:[%s2323_s3 + $0x68] sm:$0xff] %v1326_v19  ;;  %v1233_v21 = vadd.f32 %v2256_v42, %v1136_v46  ;;  %v1139_v50 = vadd.f32 %v1653_v49, %v2224_v38 }
 0x176   :  { %v1311_v54 = vadd.f32 %v2230_v52, %v1233_v21  ;;  %v1236_v55 = vadd.f32 %v2259_v48, %v1139_v50 }
 0x178   :  { %v1327_v56 = vmax.f32 %v1311_v54, 0.0  ;;  %v1312_v57 = vadd.f32 %v2230_v52, %v1236_v55 }
 0x17a   :  { %1343 = vst [vmem:[%s2323_s3 + $0x70] sm:$0xff] %v1327_v56  ;;  %v1328_v35 = vmax.f32 %v1312_v57, 0.0 }
 0x17c   :  { %1344 = vst [vmem:[%s2323_s3 + $0x78] sm:$0xff] %v1328_v35 }

// kernel: resnet_forward.31
= control target key start
LH: loop header
LB: loop body
LE: loop exit
PB: predicated region body
PF: predicated region fallthrough
CT: control target
= control target key end

     0   :  { %s1056_s1 = inlined_call_operand.vmem [shape: bf16[640,128], index: 1, kind: input, shape index: {}]   ;;  %s1057_s0 = inlined_call_operand.vmem [shape: bf16[32,640], index: 0, kind: input, shape index: {}]   ;;  %s1058_s2 = inlined_call_operand.vmem [shape: f32[1,128], index: 2, kind: input, shape index: {}]   ;;  %s1059_s3 = inlined_call_operand.vmem [shape: f32[1,128], index: 3, kind: input, shape index: {}]   ;;  %s1060_s4 = inlined_call_operand.vmem [shape: f32[32,128], index: 4, kind: output, shape index: {}]  }
   0x1   :  { %v807_v0 = vld [vmem:[%s1056_s1 + $0x40] sm:$0xff]   ;;  %v811_v4 = vld [vmem:[%s1056_s1 + $0x48] sm:$0xff]   ;;  %v815_v8 = vld [vmem:[%s1056_s1 + $0x50] sm:$0xff]  }
   0x2   :  { %v808_v1 = vld [vmem:[%s1056_s1 + $0xc0] sm:$0xff]   ;;  %721 = vmatprep.subr.bf16.mxu0 %v807_v0  ;;  %v812_v5 = vld [vmem:[%s1056_s1 + $0xc8] sm:$0xff]   ;;  %v816_v9 = vld [vmem:[%s1056_s1 + $0xd0] sm:$0xff]  }
   0x3   :  { %v809_v2 = vld [vmem:[%s1056_s1] sm:$0xff]   ;;  %749 = vmatprep.subr.bf16.mxu1 %v808_v1  ;;  %v813_v6 = vld [vmem:[%s1056_s1 + $0x8] sm:$0xff]   ;;  %v817_v10 = vld [vmem:[%s1056_s1 + $0x10] sm:$0xff]  }
   0x4   :  { %v810_v3 = vld [vmem:[%s1056_s1 + $0x80] sm:$0xff]   ;;  %722 = vmatpush3.bf16.msra.mxu0 %v809_v2  ;;  %v814_v7 = vld [vmem:[%s1056_s1 + $0x88] sm:$0xff]   ;;  %v818_v11 = vld [vmem:[%s1056_s1 + $0x90] sm:$0xff]  }
   0x5   :  { %750 = vmatpush3.bf16.msra.mxu1 %v810_v3  ;;  %723 = vmatprep.subr.bf16.mxu0 %v811_v4  ;;  %v819_v12 = vld [vmem:[%s1056_s1 + $0x58] sm:$0xff]   ;;  %v823_v16 = vld [vmem:[%s1056_s1 + $0x60] sm:$0xff]   ;;  %v827_v20 = vld [vmem:[%s1056_s1 + $0x68] sm:$0xff]  }
   0x6   :  { %751 = vmatprep.subr.bf16.mxu1 %v812_v5  ;;  %v820_v13 = vld [vmem:[%s1056_s1 + $0xd8] sm:$0xff]   ;;  %v824_v17 = vld [vmem:[%s1056_s1 + $0xe0] sm:$0xff]   ;;  %v828_v21 = vld [vmem:[%s1056_s1 + $0xe8] sm:$0xff]  }
   0x7   :  { %v821_v14 = vld [vmem:[%s1056_s1 + $0x18] sm:$0xff]   ;;  %v825_v18 = vld [vmem:[%s1056_s1 + $0x20] sm:$0xff]   ;;  %v829_v22 = vld [vmem:[%s1056_s1 + $0x28] sm:$0xff]  }
   0x8   :  { %724 = vmatpush3.bf16.msra.mxu0 %v813_v6  ;;  %v822_v15 = vld [vmem:[%s1056_s1 + $0x98] sm:$0xff]   ;;  %v826_v19 = vld [vmem:[%s1056_s1 + $0xa0] sm:$0xff]   ;;  %v830_v23 = vld [vmem:[%s1056_s1 + $0xa8] sm:$0xff]  }
   0x9   :  { %752 = vmatpush3.bf16.msra.mxu1 %v814_v7  ;;  %725 = vmatprep.subr.bf16.mxu0 %v815_v8  ;;  %v831_v24 = vld [vmem:[%s1056_s1 + $0x70] sm:$0xff]   ;;  %v835_v28 = vld [vmem:[%s1056_s1 + $0x78] sm:$0xff]   ;;  %v844_v35 = vld [vmem:[%s1057_s0 + $0xc] ss:$20 sps:$4 sm:$0xff]  }
   0xa   :  { %753 = vmatprep.subr.bf16.mxu1 %v816_v9  ;;  %v832_v25 = vld [vmem:[%s1056_s1 + $0xf0] sm:$0xff]   ;;  %v836_v29 = vld [vmem:[%s1056_s1 + $0xf8] sm:$0xff]   ;;  %v845_v36 = vld [vmem:[%s1056_s1 + $0x100] sm:$0xff]   ;;  %495 = vmatprep.mubr.bf16.mxu1 %v844_v35 }
   0xb   :  { %v833_v26 = vld [vmem:[%s1056_s1 + $0x30] sm:$0xff]   ;;  %v837_v30 = vld [vmem:[%s1056_s1 + $0x38] sm:$0xff]   ;;  %v846_v37 = vld [vmem:[%s1056_s1 + $0x108] sm:$0xff]  }
   0xc   :  { %726 = vmatpush3.bf16.msra.mxu0 %v817_v10  ;;  %v834_v27 = vld [vmem:[%s1056_s1 + $0xb0] sm:$0xff]   ;;  %v838_v31 = vld [vmem:[%s1056_s1 + $0xb8] sm:$0xff]   ;;  %v850_v39 = vld [vmem:[%s1057_s0 + $0x2c] ss:$20 sps:$4 sm:$0xff]  }
   0xd   :  { %754 = vmatpush3.bf16.msra.mxu1 %v818_v11  ;;  %727 = vmatprep.subr.bf16.mxu0 %v819_v12  ;;  %v839_v32 = vld [vmem:[%s1057_s0] ss:$20 sps:$4 sm:$0xff]   ;;  %v841_v33 = vld [vmem:[%s1057_s0 + $0x4] ss:$20 sps:$4 sm:$0xff]   ;;  %v842_v34 = vld [vmem:[%s1057_s0 + $0x8] ss:$20 sps:$4 sm:$0xff]  }
   0xe   :  { %755 = vmatprep.subr.bf16.mxu1 %v820_v13  ;;  %446 = vmatprep.mubr.bf16.mxu0 %v841_v33  ;;  %v847_v38 = vld [vmem:[%s1056_s1 + $0x110] sm:$0xff]   ;;  %v848_v41 = vld [vmem:[%s1056_s1 + $0x118] sm:$0xff]   ;;  %v849_v45 = vld [vmem:[%s1056_s1 + $0x120] sm:$0xff]  }
   0xf   :  { %v852_v40 = vld [vmem:[%s1057_s0 + $0x34] ss:$20 sps:$4 sm:$0xff]   ;;  %v856_v43 = vld [vmem:[%s1057_s0 + $0x30] ss:$20 sps:$4 sm:$0xff]   ;;  %v858_v48 = vld [vmem:[%s1056_s1 + $0x138] sm:$0xff]  }
  0x10   :  { %728 = vmatpush3.bf16.msra.mxu0 %v821_v14  ;;  %v855_v42 = vld [vmem:[%s1057_s0 + $0x28] ss:$20 sps:$4 sm:$0xff]   ;;  %v859_v44 = vld [vmem:[%s1057_s0 + $0x10] ss:$20 sps:$4 sm:$0xff]   ;;  %v860_v49 = vld [vmem:[%s1057_s0 + $0x38] ss:$20 sps:$4 sm:$0xff]  }
  0x11   :  { %756 = vmatpush3.bf16.msra.mxu1 %v822_v15  ;;  %729 = vmatprep.subr.bf16.mxu0 %v823_v16  ;;  %v854_v46 = vld [vmem:[%s1056_s1 + $0x128] sm:$0xff]   ;;  %v857_v47 = vld [vmem:[%s1056_s1 + $0x130] sm:$0xff]  }
  0x12   :  { %757 = vmatprep.subr.bf16.mxu1 %v824_v17 }
  0x14   :  { %730 = vmatpush3.bf16.msra.mxu0 %v825_v18 }
  0x15   :  { %758 = vmatpush3.bf16.msra.mxu1 %v826_v19  ;;  %731 = vmatprep.subr.bf16.mxu0 %v827_v20 }
  0x16   :  { %759 = vmatprep.subr.bf16.mxu1 %v828_v21 }
  0x18   :  { %732 = vmatpush3.bf16.msra.mxu0 %v829_v22 }
  0x19   :  { %760 = vmatpush3.bf16.msra.mxu1 %v830_v23  ;;  %733 = vmatprep.subr.bf16.mxu0 %v831_v24 }
  0x1a   :  { %761 = vmatprep.subr.bf16.mxu1 %v832_v25 }
  0x1c   :  { %734 = vmatpush3.bf16.msra.mxu0 %v833_v26 }
  0x1d   :  { %762 = vmatpush3.bf16.msra.mxu1 %v834_v27  ;;  %735 = vmatprep.subr.bf16.mxu0 %v835_v28 }
  0x1e   :  { %763 = vmatprep.subr.bf16.mxu1 %v836_v29 }
  0x20   :  { %736 = vmatpush3.bf16.msra.mxu0 %v837_v30 }
  0x21   :  { %764 = vmatpush3.bf16.msra.mxu1 %v838_v31  ;;  %787 = vmatprep.subr.bf16.mxu0 %v845_v36 }
  0x23   :  { %447 = vmatmul.mubr.bf16.vlgmr.msra.gmra.mrb[0].mxu0 %v839_v32 }
  0x24   :  { %496 = vmatmul.mubr.bf16.vlgmr.msra.gmra.mrb[0].mxu1 %v842_v34  ;;  %788 = vmatpush3.bf16.msra.mxu0 %v845_v36 }
  0x25   :  { %789 = vmatprep.subr.bf16.mxu0 %v846_v37  ;;  %454 = vmatprep.mubr.bf16.mxu0 %v850_v39 }
  0x26   :  { %503 = vmatprep.mubr.bf16.mxu1 %v852_v40 }
  0x28   :  { %790 = vmatpush3.bf16.msra.mxu0 %v846_v37 }
  0x29   :  { %791 = vmatprep.subr.bf16.mxu0 %v847_v38 }
  0x2b   :  { %455 = vmatmul.mubr.bf16.gmra.mrb[4].mxu0 %v855_v42 }
  0x2c   :  { %504 = vmatmul.mubr.bf16.gmra.mrb[4].mxu1 %v856_v43  ;;  %792 = vmatpush3.bf16.msra.mxu0 %v847_v38 }
  0x2d   :  { %793 = vmatprep.subr.bf16.mxu0 %v848_v41  ;;  %803 = vmatprep.mubr.bf16.mxu0 %v859_v44 }
  0x30   :  { %794 = vmatpush3.bf16.msra.mxu0 %v848_v41 }
  0x31   :  { %795 = vmatprep.subr.bf16.mxu0 %v849_v45 }
  0x34   :  { %796 = vmatpush3.bf16.msra.mxu0 %v849_v45 }
  0x35   :  { %797 = vmatprep.subr.bf16.mxu0 %v854_v46 }
  0x38   :  { %798 = vmatpush3.bf16.msra.mxu0 %v854_v46 }
  0x39   :  { %799 = vmatprep.subr.bf16.mxu0 %v857_v47 }
  0x3c   :  { %800 = vmatpush3.bf16.msra.mxu0 %v857_v47 }
  0x3d   :  { %801 = vmatprep.subr.bf16.mxu0 %v858_v48 }
  0x40   :  { %802 = vmatpush3.bf16.msra.mxu0 %v858_v48 }
  0x43   :  { %804 = vmatmul.mubr.bf16.vlgmr.msra.gmra.mrb[8].mxu0 %v860_v49 }
  0xf6   :  { %v737_v50 = vpop.f32.mrb[0].mxu0 }
  0xf7   :  { %v765_v51 = vpop.f32.mrb[0].mxu1  ;;  %v738_v52 = vpop.f32.mrb[1].mxu0 }
  0xf8   :  { %v739_v53 = vadd.f32 %v738_v52, %v737_v50  ;;  %v766_v54 = vpop.f32.mrb[1].mxu1  ;;  %v740_v55 = vpop.f32.mrb[2].mxu0  ;;  %v719_v52 = vld [vmem:[%s1058_s2] ss:$0 sm:$0xff] }
  0xf9   :  { %v767_v56 = vadd.f32 %v766_v54, %v765_v51  ;;  %v768_v57 = vpop.f32.mrb[2].mxu1  ;;  %v741_v58 = vpop.f32.mrb[3].mxu0 }
  0xfa   :  { %v742_v59 = vadd.f32 %v741_v58, %v740_v55  ;;  %v769_v60 = vpop.f32.mrb[3].mxu1 }
  0xfb   :  { %v770_v61 = vadd.f32 %v769_v60, %v768_v57  ;;  %v498_v62 = vadd.f32 %v767_v56, %v739_v53  ;;  %v720_v57 = vld [vmem:[%s1059_s3] ss:$0 sm:$0xff] }
  0xfd   :  { %v501_v63 = vadd.f32 %v770_v61, %v742_v59 }
  0xfe   :  { %v743_v0 = vpop.f32.mrb[4].mxu0 }
  0xff   :  { %v771_v1 = vpop.f32.mrb[4].mxu1  ;;  %v744_v2 = vpop.f32.mrb[5].mxu0 }
 0x100   :  { %v745_v3 = vadd.f32 %v744_v2, %v743_v0  ;;  %v772_v4 = vpop.f32.mrb[5].mxu1  ;;  %v746_v5 = vpop.f32.mrb[6].mxu0 }
 0x101   :  { %v773_v6 = vadd.f32 %v772_v4, %v771_v1  ;;  %v774_v7 = vpop.f32.mrb[6].mxu1  ;;  %v747_v8 = vpop.f32.mrb[7].mxu0 }
 0x102   :  { %v748_v9 = vadd.f32 %v747_v8, %v746_v5  ;;  %v775_v10 = vpop.f32.mrb[7].mxu1 }
 0x103   :  { %v776_v11 = vadd.f32 %v775_v10, %v774_v7  ;;  %v506_v12 = vadd.f32 %v773_v6, %v745_v3 }
 0x105   :  { %v509_v13 = vadd.f32 %v776_v11, %v748_v9 }
 0x116   :  { %v805_v14 = vpop.f32.mrb[8].mxu0 }
 0x117   :  { %v555_v15 = vadd.f32 %v805_v14, %v506_v12  ;;  %v546_v16 = vpop.f32.mrb[9].mxu0 }
 0x118   :  { %v547_v17 = vadd.f32 %v546_v16, %v498_v62  ;;  %v806_v18 = vpop.f32.mrb[10].mxu0 }
 0x119   :  { %v558_v19 = vadd.f32 %v806_v18, %v509_v13  ;;  %v549_v20 = vpop.f32.mrb[11].mxu0 }
 0x11a   :  { %v550_v21 = vadd.f32 %v549_v20, %v501_v63 }
 0x11c   :  { %v597_v22 = vadd.f32 %v550_v21, %v547_v17 }
 0x11e   :  { %v598_v23 = vadd.f32 %v597_v22, %v555_v15 }
 0x120   :  { %v599_v24 = vadd.f32 %v598_v23, %v558_v19 }
 0x122   :  { %v600_v25 = vrot.slane %v599_v24, 4 }
 0x124   :  { %v601_v26 = vadd.f32 %v600_v25, %v599_v24 }
 0x126   :  { %v602_v27 = vrot.slane %v601_v26, 2 }
 0x128   :  { %v603_v28 = vadd.f32 %v602_v27, %v601_v26 }
 0x12a   :  { %v604_v29 = vrot.slane %v603_v28, 1 }
 0x12c   :  { %v605_v30 = vadd.f32 %v604_v29, %v603_v28 }
 0x12e   :  { %v606_v31 = vmul.f32 0.03125, %v605_v30 }
 0x130   :  { %v607_v32 = vsub.f32 %v547_v17, %v606_v31  ;;  %v608_v33 = vsub.f32 %v550_v21, %v606_v31  ;;  %v609_v34 = vsub.f32 %v555_v15, %v606_v31  ;;  %v610_v35 = vsub.f32 %v558_v19, %v606_v31 }
 0x132   :  { %v615_v36 = vmul.f32 %v607_v32, %v607_v32  ;;  %v616_v37 = vmul.f32 %v608_v33, %v608_v33  ;;  %v617_v38 = vmul.f32 %v609_v34, %v609_v34  ;;  %v618_v40 = vmul.f32 %v610_v35, %v610_v35 }
 0x134   :  { %v619_v39 = vadd.f32 %v616_v37, %v615_v36 }
 0x136   :  { %v620_v41 = vadd.f32 %v619_v39, %v617_v38 }
 0x138   :  { %v621_v42 = vadd.f32 %v620_v41, %v618_v40 }
 0x13a   :  { %v622_v43 = vrot.slane %v621_v42, 4 }
 0x13c   :  { %v623_v44 = vadd.f32 %v622_v43, %v621_v42 }
 0x13e   :  { %v624_v45 = vrot.slane %v623_v44, 2 }
 0x140   :  { %v625_v46 = vadd.f32 %v624_v45, %v623_v44 }
 0x142   :  { %v626_v47 = vrot.slane %v625_v46, 1 }
 0x144   :  { %v627_v48 = vadd.f32 %v626_v47, %v625_v46 }
 0x146   :  { %v628_v49 = vmul.f32 0.03125, %v627_v48 }
 0x148   :  { %v629_v50 = vadd.f32 1e-05, %v628_v49 }
 0x14a   :  { %861 = vrsqrt.f32 %v629_v50 }
 0x154   :  { %v862_v51 = vpop.eup %861 }
 0x155   :  { %v631_v53 = vmul.f32 %v862_v51, %v607_v32  ;;  %v632_v54 = vmul.f32 %v862_v51, %v608_v33  ;;  %v633_v55 = vmul.f32 %v862_v51, %v609_v34  ;;  %v634_v56 = vmul.f32 %v862_v51, %v610_v35 }
 0x157   :  { %v642_v58 = vmul.f32 %v719_v52, %v631_v53  ;;  %v643_v59 = vmul.f32 %v719_v52, %v632_v54  ;;  %v644_v60 = vmul.f32 %v719_v52, %v633_v55  ;;  %v645_v61 = vmul.f32 %v719_v52, %v634_v56 }
 0x159   :  { %v653_v62 = vadd.f32 %v720_v57, %v642_v58  ;;  %v654_v63 = vadd.f32 %v720_v57, %v643_v59  ;;  %v655_v0 = vadd.f32 %v720_v57, %v644_v60  ;;  %v656_v1 = vadd.f32 %v720_v57, %v645_v61 }
 0x15b   :  { %v657_v2 = vmax.f32 %v653_v62, 0.0  ;;  %v658_v3 = vmax.f32 %v654_v63, 0.0  ;;  %v659_v4 = vmax.f32 %v655_v0, 0.0  ;;  %v660_v5 = vmax.f32 %v656_v1, 0.0 }
 0x15d   :  { %661 = vst [vmem:[%s1060_s4] sm:$0xff] %v657_v2  ;;  %662 = vst [vmem:[%s1060_s4 + $0x8] sm:$0xff] %v658_v3 }
 0x15e   :  { %663 = vst [vmem:[%s1060_s4 + $0x10] sm:$0xff] %v659_v4  ;;  %664 = vst [vmem:[%s1060_s4 + $0x18] sm:$0xff] %v660_v5 }

// kernel: resnet_forward.32
= control target key start
LH: loop header
LB: loop body
LE: loop exit
PB: predicated region body
PF: predicated region fallthrough
CT: control target
= control target key end

     0   :  { %s306_s1 = inlined_call_operand.vmem [shape: bf16[128,128], index: 1, kind: input, shape index: {}]   ;;  %s307_s0 = inlined_call_operand.vmem [shape: bf16[32,128], index: 0, kind: input, shape index: {}]   ;;  %s308_s2 = inlined_call_operand.vmem [shape: f32[1,128], index: 2, kind: input, shape index: {}]   ;;  %s309_s3 = inlined_call_operand.vmem [shape: f32[32,128], index: 3, kind: output, shape index: {}]  }
   0x1   :  { %v231_v0 = vld [vmem:[%s306_s1] sm:$0xff]   ;;  %v232_v1 = vld [vmem:[%s306_s1 + $0x8] sm:$0xff]   ;;  %v233_v2 = vld [vmem:[%s306_s1 + $0x10] sm:$0xff]  }
   0x2   :  { %211 = vmatprep.subr.bf16.mxu0 %v231_v0  ;;  %v234_v3 = vld [vmem:[%s306_s1 + $0x18] sm:$0xff]   ;;  %v239_v4 = vld [vmem:[%s307_s0] sm:$0xff]   ;;  %v236_v6 = vld [vmem:[%s306_s1 + $0x28] sm:$0xff]  }
   0x3   :  { %212 = vmatpush3.bf16.msra.mxu0 %v231_v0  ;;  %227 = vmatprep.mubr.bf16.mxu0 %v239_v4  ;;  %v235_v5 = vld [vmem:[%s306_s1 + $0x20] sm:$0xff]   ;;  %v237_v7 = vld [vmem:[%s306_s1 + $0x30] sm:$0xff]   ;;  %v238_v8 = vld [vmem:[%s306_s1 + $0x38] sm:$0xff]  }
   0x4   :  { %213 = vmatprep.subr.bf16.mxu0 %v232_v1  ;;  %v240_v9 = vld [vmem:[%s307_s0 + $0x8] sm:$0xff]   ;;  %v200_v10 = vld [vmem:[%s308_s2] ss:$0 sm:$0xff] }
   0x7   :  { %214 = vmatpush3.bf16.msra.mxu0 %v232_v1 }
   0x8   :  { %215 = vmatprep.subr.bf16.mxu0 %v233_v2 }
   0xb   :  { %216 = vmatpush3.bf16.msra.mxu0 %v233_v2 }
   0xc   :  { %217 = vmatprep.subr.bf16.mxu0 %v234_v3 }
   0xf   :  { %218 = vmatpush3.bf16.msra.mxu0 %v234_v3 }
  0x10   :  { %219 = vmatprep.subr.bf16.mxu0 %v235_v5 }
  0x13   :  { %220 = vmatpush3.bf16.msra.mxu0 %v235_v5 }
  0x14   :  { %221 = vmatprep.subr.bf16.mxu0 %v236_v6 }
  0x17   :  { %222 = vmatpush3.bf16.msra.mxu0 %v236_v6 }
  0x18   :  { %223 = vmatprep.subr.bf16.mxu0 %v237_v7 }
  0x1b   :  { %224 = vmatpush3.bf16.msra.mxu0 %v237_v7 }
  0x1c   :  { %225 = vmatprep.subr.bf16.mxu0 %v238_v8 }
  0x1f   :  { %226 = vmatpush3.bf16.msra.mxu0 %v238_v8 }
  0x22   :  { %228 = vmatmul.mubr.bf16.vlgmr.msra.gmra.mrb[0].mxu0 %v240_v9 }
  0xf5   :  { %v229_v11 = vpop.f32.mrb[0].mxu0 }
  0xf6   :  { %v180_v12 = vadd.f32 %v229_v11, %v200_v10  ;;  %v141_v13 = vpop.f32.mrb[1].mxu0 }
  0xf7   :  { %v178_v14 = vadd.f32 %v200_v10, %v141_v13  ;;  %v230_v15 = vpop.f32.mrb[2].mxu0 }
  0xf8   :  { %184 = vst [vmem:[%s309_s3 + $0x10] sm:$0xff] %v180_v12  ;;  %v181_v16 = vadd.f32 %v230_v15, %v200_v10  ;;  %v144_v17 = vpop.f32.mrb[3].mxu0 }
  0xf9   :  { %182 = vst [vmem:[%s309_s3] sm:$0xff] %v178_v14  ;;  %v179_v18 = vadd.f32 %v200_v10, %v144_v17 }
  0xfa   :  { %185 = vst [vmem:[%s309_s3 + $0x18] sm:$0xff] %v181_v16 }
  0xfb   :  { %183 = vst [vmem:[%s309_s3 + $0x8] sm:$0xff] %v179_v18 }

// kernel: resnet_forward.33
= control target key start
LH: loop header
LB: loop body
LE: loop exit
PB: predicated region body
PF: predicated region fallthrough
CT: control target
= control target key end

     0   :  { %s1742_s1 = inlined_call_operand.vmem [shape: bf16[1152,128], index: 1, kind: input, shape index: {}]   ;;  %s1743_s0 = inlined_call_operand.vmem [shape: bf16[32,1152], index: 0, kind: input, shape index: {}]   ;;  %s1744_s2 = inlined_call_operand.vmem [shape: f32[1,128], index: 2, kind: input, shape index: {}]   ;;  %s1745_s3 = inlined_call_operand.vmem [shape: f32[1,128], index: 3, kind: input, shape index: {}]   ;;  %s1746_s4 = inlined_call_operand.vmem [shape: f32[32,128], index: 4, kind: input, shape index: {}]   ;;  %s1747_s5 = inlined_call_operand.vmem [shape: f32[32,128], index: 5, kind: output, shape index: {}]  }
   0x1   :  { %v1312_v0 = vld [vmem:[%s1742_s1 + $0x40] sm:$0xff]   ;;  %v1316_v4 = vld [vmem:[%s1742_s1 + $0x48] sm:$0xff]   ;;  %v1320_v8 = vld [vmem:[%s1742_s1 + $0x50] sm:$0xff]  }
   0x2   :  { %v1313_v1 = vld [vmem:[%s1742_s1 + $0xc0] sm:$0xff]   ;;  %1170 = vmatprep.subr.bf16.mxu0 %v1312_v0  ;;  %v1317_v5 = vld [vmem:[%s1742_s1 + $0xc8] sm:$0xff]   ;;  %v1321_v9 = vld [vmem:[%s1742_s1 + $0xd0] sm:$0xff]  }
   0x3   :  { %v1314_v2 = vld [vmem:[%s1742_s1] sm:$0xff]   ;;  %1198 = vmatprep.subr.bf16.mxu1 %v1313_v1  ;;  %v1318_v6 = vld [vmem:[%s1742_s1 + $0x8] sm:$0xff]   ;;  %v1322_v10 = vld [vmem:[%s1742_s1 + $0x10] sm:$0xff]  }
   0x4   :  { %v1315_v3 = vld [vmem:[%s1742_s1 + $0x80] sm:$0xff]   ;;  %1171 = vmatpush3.bf16.msra.mxu0 %v1314_v2  ;;  %v1319_v7 = vld [vmem:[%s1742_s1 + $0x88] sm:$0xff]   ;;  %v1323_v11 = vld [vmem:[%s1742_s1 + $0x90] sm:$0xff]  }
   0x5   :  { %1199 = vmatpush3.bf16.msra.mxu1 %v1315_v3  ;;  %1172 = vmatprep.subr.bf16.mxu0 %v1316_v4  ;;  %v1324_v12 = vld [vmem:[%s1742_s1 + $0x58] sm:$0xff]   ;;  %v1328_v16 = vld [vmem:[%s1742_s1 + $0x60] sm:$0xff]   ;;  %v1332_v20 = vld [vmem:[%s1742_s1 + $0x68] sm:$0xff]  }
   0x6   :  { %1200 = vmatprep.subr.bf16.mxu1 %v1317_v5  ;;  %v1325_v13 = vld [vmem:[%s1742_s1 + $0xd8] sm:$0xff]   ;;  %v1329_v17 = vld [vmem:[%s1742_s1 + $0xe0] sm:$0xff]   ;;  %v1333_v21 = vld [vmem:[%s1742_s1 + $0xe8] sm:$0xff]  }
   0x7   :  { %v1326_v14 = vld [vmem:[%s1742_s1 + $0x18] sm:$0xff]   ;;  %v1330_v18 = vld [vmem:[%s1742_s1 + $0x20] sm:$0xff]   ;;  %v1334_v22 = vld [vmem:[%s1742_s1 + $0x28] sm:$0xff]  }
   0x8   :  { %1173 = vmatpush3.bf16.msra.mxu0 %v1318_v6  ;;  %v1327_v15 = vld [vmem:[%s1742_s1 + $0x98] sm:$0xff]   ;;  %v1331_v19 = vld [vmem:[%s1742_s1 + $0xa0] sm:$0xff]   ;;  %v1335_v23 = vld [vmem:[%s1742_s1 + $0xa8] sm:$0xff]  }
   0x9   :  { %1201 = vmatpush3.bf16.msra.mxu1 %v1319_v7  ;;  %1174 = vmatprep.subr.bf16.mxu0 %v1320_v8  ;;  %v1336_v24 = vld [vmem:[%s1742_s1 + $0x70] sm:$0xff]   ;;  %v1340_v28 = vld [vmem:[%s1742_s1 + $0x78] sm:$0xff]   ;;  %v1344_v32 = vld [vmem:[%s1743_s0] ss:$36 sps:$4 sm:$0xff]  }
   0xa   :  { %1202 = vmatprep.subr.bf16.mxu1 %v1321_v9  ;;  %v1337_v25 = vld [vmem:[%s1742_s1 + $0xf0] sm:$0xff]   ;;  %v1341_v29 = vld [vmem:[%s1742_s1 + $0xf8] sm:$0xff]   ;;  %v1346_v33 = vld [vmem:[%s1743_s0 + $0x4] ss:$36 sps:$4 sm:$0xff]  }
   0xb   :  { %v1338_v26 = vld [vmem:[%s1742_s1 + $0x30] sm:$0xff]   ;;  %v1342_v30 = vld [vmem:[%s1742_s1 + $0x38] sm:$0xff]   ;;  %v1347_v34 = vld [vmem:[%s1743_s0 + $0x8] ss:$36 sps:$4 sm:$0xff]   ;;  %753 = vmatprep.mubr.bf16.mxu0 %v1346_v33 }
   0xc   :  { %1175 = vmatpush3.bf16.msra.mxu0 %v1322_v10  ;;  %v1339_v27 = vld [vmem:[%s1742_s1 + $0xb0] sm:$0xff]   ;;  %v1343_v31 = vld [vmem:[%s1742_s1 + $0xb8] sm:$0xff]   ;;  %v1350_v36 = vld [vmem:[%s1742_s1 + $0x140] sm:$0xff]  }
   0xd   :  { %1203 = vmatpush3.bf16.msra.mxu1 %v1323_v11  ;;  %1176 = vmatprep.subr.bf16.mxu0 %v1324_v12  ;;  %v1349_v35 = vld [vmem:[%s1743_s0 + $0xc] ss:$36 sps:$4 sm:$0xff]   ;;  %v1351_v37 = vld [vmem:[%s1742_s1 + $0x100] sm:$0xff]   ;;  %v1362_v48 = vld [vmem:[%s1742_s1 + $0x158] sm:$0xff]  }
   0xe   :  { %1204 = vmatprep.subr.bf16.mxu1 %v1325_v13  ;;  %802 = vmatprep.mubr.bf16.mxu1 %v1349_v35  ;;  %v1352_v38 = vld [vmem:[%s1742_s1 + $0x1c0] sm:$0xff]   ;;  %v1354_v40 = vld [vmem:[%s1742_s1 + $0x148] sm:$0xff]   ;;  %v1358_v44 = vld [vmem:[%s1742_s1 + $0x150] sm:$0xff]  }
   0xf   :  { %v1353_v39 = vld [vmem:[%s1742_s1 + $0x180] sm:$0xff]   ;;  %v1355_v41 = vld [vmem:[%s1742_s1 + $0x108] sm:$0xff]   ;;  %v1359_v45 = vld [vmem:[%s1742_s1 + $0x110] sm:$0xff]  }
  0x10   :  { %1177 = vmatpush3.bf16.msra.mxu0 %v1326_v14  ;;  %v1356_v42 = vld [vmem:[%s1742_s1 + $0x1c8] sm:$0xff]   ;;  %v1360_v46 = vld [vmem:[%s1742_s1 + $0x1d0] sm:$0xff]   ;;  %v1363_v49 = vld [vmem:[%s1742_s1 + $0x118] sm:$0xff]  }
  0x11   :  { %1205 = vmatpush3.bf16.msra.mxu1 %v1327_v15  ;;  %1178 = vmatprep.subr.bf16.mxu0 %v1328_v16  ;;  %v1357_v43 = vld [vmem:[%s1742_s1 + $0x188] sm:$0xff]   ;;  %v1361_v47 = vld [vmem:[%s1742_s1 + $0x190] sm:$0xff]   ;;  %v1364_v50 = vld [vmem:[%s1742_s1 + $0x1d8] sm:$0xff]  }
  0x12   :  { %1206 = vmatprep.subr.bf16.mxu1 %v1329_v17  ;;  %v1365_v51 = vld [vmem:[%s1742_s1 + $0x198] sm:$0xff]   ;;  %v1366_v52 = vld [vmem:[%s1742_s1 + $0x160] sm:$0xff]   ;;  %v1370_v56 = vld [vmem:[%s1742_s1 + $0x168] sm:$0xff]  }
  0x13   :  { %v1367_v53 = vld [vmem:[%s1742_s1 + $0x120] sm:$0xff]   ;;  %v1371_v57 = vld [vmem:[%s1743_s0 + $0x4c] ss:$36 sps:$4 sm:$0xff]   ;;  %v1373_v58 = vld [vmem:[%s1743_s0 + $0x54] ss:$36 sps:$4 sm:$0xff]  }
  0x14   :  { %1179 = vmatpush3.bf16.msra.mxu0 %v1330_v18  ;;  %v1368_v54 = vld [vmem:[%s1742_s1 + $0x1e0] sm:$0xff]   ;;  %v1375_v59 = vld [vmem:[%s1742_s1 + $0x128] sm:$0xff]   ;;  %v1377_v61 = vld [vmem:[%s1743_s0 + $0x50] ss:$36 sps:$4 sm:$0xff]  }
  0x15   :  { %1207 = vmatpush3.bf16.msra.mxu1 %v1331_v19  ;;  %1180 = vmatprep.subr.bf16.mxu0 %v1332_v20  ;;  %v1369_v55 = vld [vmem:[%s1742_s1 + $0x1a0] sm:$0xff]   ;;  %v1376_v60 = vld [vmem:[%s1743_s0 + $0x48] ss:$36 sps:$4 sm:$0xff]   ;;  %v1380_v0 = vld [vmem:[%s1742_s1 + $0x170] sm:$0xff]  }
  0x16   :  { %1208 = vmatprep.subr.bf16.mxu1 %v1333_v21  ;;  %v1378_v62 = vld [vmem:[%s1742_s1 + $0x1e8] sm:$0xff]   ;;  %v1381_v1 = vld [vmem:[%s1742_s1 + $0x130] sm:$0xff]   ;;  %v1384_v4 = vld [vmem:[%s1742_s1 + $0x178] sm:$0xff]  }
  0x17   :  { %v1379_v63 = vld [vmem:[%s1742_s1 + $0x1a8] sm:$0xff]   ;;  %v1382_v2 = vld [vmem:[%s1742_s1 + $0x1f0] sm:$0xff]   ;;  %v1385_v5 = vld [vmem:[%s1742_s1 + $0x138] sm:$0xff]  }
  0x18   :  { %1181 = vmatpush3.bf16.msra.mxu0 %v1334_v22  ;;  %v1383_v3 = vld [vmem:[%s1742_s1 + $0x1b0] sm:$0xff]   ;;  %v1386_v6 = vld [vmem:[%s1742_s1 + $0x1f8] sm:$0xff]   ;;  %v1391_v10 = vld [vmem:[%s1742_s1 + $0x200] sm:$0xff]  }
  0x19   :  { %1209 = vmatpush3.bf16.msra.mxu1 %v1335_v23  ;;  %1182 = vmatprep.subr.bf16.mxu0 %v1336_v24  ;;  %v1387_v7 = vld [vmem:[%s1743_s0 + $0x10] ss:$36 sps:$4 sm:$0xff]   ;;  %v1390_v9 = vld [vmem:[%s1742_s1 + $0x1b8] sm:$0xff]   ;;  %v1395_v13 = vld [vmem:[%s1742_s1 + $0x208] sm:$0xff]  }
  0x1a   :  { %1210 = vmatprep.subr.bf16.mxu1 %v1337_v25  ;;  %v1389_v8 = vld [vmem:[%s1743_s0 + $0x14] ss:$36 sps:$4 sm:$0xff]   ;;  %v1394_v12 = vld [vmem:[%s1743_s0 + $0x1c] ss:$36 sps:$4 sm:$0xff]   ;;  %v1400_v17 = vld [vmem:[%s1743_s0 + $0x64] ss:$36 sps:$4 sm:$0xff]  }
  0x1b   :  { %v1392_v11 = vld [vmem:[%s1743_s0 + $0x18] ss:$36 sps:$4 sm:$0xff]   ;;  %v1399_v16 = vld [vmem:[%s1742_s1 + $0x210] sm:$0xff]   ;;  %v1402_v18 = vld [vmem:[%s1743_s0 + $0x60] ss:$36 sps:$4 sm:$0xff]  }
  0x1c   :  { %1183 = vmatpush3.bf16.msra.mxu0 %v1338_v26  ;;  %v1396_v14 = vld [vmem:[%s1743_s0 + $0x5c] ss:$36 sps:$4 sm:$0xff]   ;;  %v1405_v22 = vld [vmem:[%s1742_s1 + $0x228] sm:$0xff]   ;;  %v1406_v23 = vld [vmem:[%s1742_s1 + $0x230] sm:$0xff]  }
  0x1d   :  { %1211 = vmatpush3.bf16.msra.mxu1 %v1339_v27  ;;  %1184 = vmatprep.subr.bf16.mxu0 %v1340_v28  ;;  %v1398_v15 = vld [vmem:[%s1743_s0 + $0x58] ss:$36 sps:$4 sm:$0xff]   ;;  %v1404_v20 = vld [vmem:[%s1742_s1 + $0x220] sm:$0xff]   ;;  %v1409_v25 = vld [vmem:[%s1743_s0 + $0x68] ss:$36 sps:$4 sm:$0xff]  }
  0x1e   :  { %1212 = vmatprep.subr.bf16.mxu1 %v1341_v29  ;;  %v1403_v19 = vld [vmem:[%s1742_s1 + $0x218] sm:$0xff]   ;;  %v1408_v21 = vld [vmem:[%s1743_s0 + $0x20] ss:$36 sps:$4 sm:$0xff]  }
  0x1f   :  { %v1407_v24 = vld [vmem:[%s1742_s1 + $0x238] sm:$0xff]  }
  0x20   :  { %1185 = vmatpush3.bf16.msra.mxu0 %v1342_v30 }
  0x21   :  { %1213 = vmatpush3.bf16.msra.mxu1 %v1343_v31  ;;  %1226 = vmatprep.subr.bf16.mxu0 %v1350_v36 }
  0x22   :  { %1254 = vmatprep.subr.bf16.mxu1 %v1352_v38 }
  0x23   :  { %754 = vmatmul.mubr.bf16.vlgmr.msra.gmra.mrb[0].mxu0 %v1344_v32 }
  0x24   :  { %803 = vmatmul.mubr.bf16.vlgmr.msra.gmra.mrb[0].mxu1 %v1347_v34  ;;  %1227 = vmatpush3.bf16.msra.mxu0 %v1351_v37 }
  0x25   :  { %1255 = vmatpush3.bf16.msra.mxu1 %v1353_v39  ;;  %1228 = vmatprep.subr.bf16.mxu0 %v1354_v40 }
  0x26   :  { %1256 = vmatprep.subr.bf16.mxu1 %v1356_v42  ;;  %761 = vmatprep.mubr.bf16.mxu0 %v1371_v57 }
  0x27   :  { %810 = vmatprep.mubr.bf16.mxu1 %v1373_v58 }
  0x28   :  { %1229 = vmatpush3.bf16.msra.mxu0 %v1355_v41 }
  0x29   :  { %1257 = vmatpush3.bf16.msra.mxu1 %v1357_v43  ;;  %1230 = vmatprep.subr.bf16.mxu0 %v1358_v44 }
  0x2a   :  { %1258 = vmatprep.subr.bf16.mxu1 %v1360_v46 }
  0x2b   :  { %762 = vmatmul.mubr.bf16.gmra.mrb[4].mxu0 %v1376_v60 }
  0x2c   :  { %1231 = vmatpush3.bf16.msra.mxu0 %v1359_v45  ;;  %811 = vmatmul.mubr.bf16.gmra.mrb[4].mxu1 %v1377_v61 }
  0x2d   :  { %1259 = vmatpush3.bf16.msra.mxu1 %v1361_v47  ;;  %1232 = vmatprep.subr.bf16.mxu0 %v1362_v48 }
  0x2e   :  { %1260 = vmatprep.subr.bf16.mxu1 %v1364_v50  ;;  %851 = vmatprep.mubr.bf16.mxu0 %v1389_v8 }
  0x2f   :  { %900 = vmatprep.mubr.bf16.mxu1 %v1394_v12 }
  0x30   :  { %1233 = vmatpush3.bf16.msra.mxu0 %v1363_v49 }
  0x31   :  { %1261 = vmatpush3.bf16.msra.mxu1 %v1365_v51  ;;  %1234 = vmatprep.subr.bf16.mxu0 %v1366_v52 }
  0x32   :  { %1262 = vmatprep.subr.bf16.mxu1 %v1368_v54 }
  0x34   :  { %1235 = vmatpush3.bf16.msra.mxu0 %v1367_v53 }
  0x35   :  { %1263 = vmatpush3.bf16.msra.mxu1 %v1369_v55  ;;  %1236 = vmatprep.subr.bf16.mxu0 %v1370_v56 }
  0x36   :  { %1264 = vmatprep.subr.bf16.mxu1 %v1378_v62 }
  0x38   :  { %1237 = vmatpush3.bf16.msra.mxu0 %v1375_v59 }
  0x39   :  { %1265 = vmatpush3.bf16.msra.mxu1 %v1379_v63  ;;  %1238 = vmatprep.subr.bf16.mxu0 %v1380_v0 }
  0x3a   :  { %1266 = vmatprep.subr.bf16.mxu1 %v1382_v2 }
  0x3c   :  { %1239 = vmatpush3.bf16.msra.mxu0 %v1381_v1 }
  0x3d   :  { %1267 = vmatpush3.bf16.msra.mxu1 %v1383_v3  ;;  %1240 = vmatprep.subr.bf16.mxu0 %v1384_v4 }
  0x3e   :  { %1268 = vmatprep.subr.bf16.mxu1 %v1386_v6 }
  0x40   :  { %1241 = vmatpush3.bf16.msra.mxu0 %v1385_v5 }
  0x41   :  { %1269 = vmatpush3.bf16.msra.mxu1 %v1390_v9  ;;  %1292 = vmatprep.subr.bf16.mxu0 %v1391_v10 }
  0x43   :  { %852 = vmatmul.mubr.bf16.vlgmr.msra.gmra.mrb[8].mxu0 %v1387_v7 }
  0x44   :  { %1293 = vmatpush3.bf16.msra.mxu0 %v1391_v10  ;;  %901 = vmatmul.mubr.bf16.vlgmr.msra.gmra.mrb[8].mxu1 %v1392_v11 }
  0x45   :  { %1294 = vmatprep.subr.bf16.mxu0 %v1395_v13  ;;  %859 = vmatprep.mubr.bf16.mxu0 %v1396_v14 }
  0x46   :  { %908 = vmatprep.mubr.bf16.mxu1 %v1400_v17 }
  0x48   :  { %1295 = vmatpush3.bf16.msra.mxu0 %v1395_v13 }
  0x49   :  { %1296 = vmatprep.subr.bf16.mxu0 %v1399_v16 }
  0x4b   :  { %860 = vmatmul.mubr.bf16.gmra.mrb[12].mxu0 %v1398_v15 }
  0x4c   :  { %1297 = vmatpush3.bf16.msra.mxu0 %v1399_v16  ;;  %909 = vmatmul.mubr.bf16.gmra.mrb[12].mxu1 %v1402_v18 }
  0x4d   :  { %1298 = vmatprep.subr.bf16.mxu0 %v1403_v19  ;;  %1308 = vmatprep.mubr.bf16.mxu0 %v1408_v21 }
  0x50   :  { %1299 = vmatpush3.bf16.msra.mxu0 %v1403_v19 }
  0x51   :  { %1300 = vmatprep.subr.bf16.mxu0 %v1404_v20 }
  0x54   :  { %1301 = vmatpush3.bf16.msra.mxu0 %v1404_v20 }
  0x55   :  { %1302 = vmatprep.subr.bf16.mxu0 %v1405_v22 }
  0x58   :  { %1303 = vmatpush3.bf16.msra.mxu0 %v1405_v22 }
  0x59   :  { %1304 = vmatprep.subr.bf16.mxu0 %v1406_v23 }
  0x5c   :  { %1305 = vmatpush3.bf16.msra.mxu0 %v1406_v23 }
  0x5d   :  { %1306 = vmatprep.subr.bf16.mxu0 %v1407_v24 }
  0x60   :  { %1307 = vmatpush3.bf16.msra.mxu0 %v1407_v24 }
  0x63   :  { %1309 = vmatmul.mubr.bf16.vlgmr.msra.gmra.mrb[16].mxu0 %v1409_v25 }
  0xf6   :  { %v1186_v26 = vpop.f32.mrb[0].mxu0 }
  0xf7   :  { %v1214_v27 = vpop.f32.mrb[0].mxu1  ;;  %v1187_v28 = vpop.f32.mrb[1].mxu0 }
  0xf8   :  { %v1188_v29 = vadd.f32 %v1187_v28, %v1186_v26  ;;  %v1215_v30 = vpop.f32.mrb[1].mxu1  ;;  %v1189_v31 = vpop.f32.mrb[2].mxu0 }
  0xf9   :  { %v1216_v32 = vadd.f32 %v1215_v30, %v1214_v27  ;;  %v1217_v33 = vpop.f32.mrb[2].mxu1  ;;  %v1190_v34 = vpop.f32.mrb[3].mxu0 }
  0xfa   :  { %v1191_v35 = vadd.f32 %v1190_v34, %v1189_v31  ;;  %v1218_v36 = vpop.f32.mrb[3].mxu1 }
  0xfb   :  { %v805_v37 = vadd.f32 %v1216_v32, %v1188_v29  ;;  %v1219_v38 = vadd.f32 %v1218_v36, %v1217_v33 }
  0xfd   :  { %v808_v39 = vadd.f32 %v1219_v38, %v1191_v35 }
  0xfe   :  { %v1192_v40 = vpop.f32.mrb[4].mxu0 }
  0xff   :  { %v1220_v41 = vpop.f32.mrb[4].mxu1  ;;  %v1193_v42 = vpop.f32.mrb[5].mxu0 }
 0x100   :  { %v1221_v43 = vpop.f32.mrb[5].mxu1  ;;  %v1194_v44 = vadd.f32 %v1193_v42, %v1192_v40  ;;  %v1195_v46 = vpop.f32.mrb[6].mxu0 }
 0x101   :  { %v1222_v45 = vadd.f32 %v1221_v43, %v1220_v41  ;;  %v1223_v47 = vpop.f32.mrb[6].mxu1  ;;  %v1196_v48 = vpop.f32.mrb[7].mxu0 }
 0x102   :  { %v1224_v49 = vpop.f32.mrb[7].mxu1  ;;  %v1197_v51 = vadd.f32 %v1196_v48, %v1195_v46 }
 0x103   :  { %v813_v50 = vadd.f32 %v1222_v45, %v1194_v44  ;;  %v1225_v52 = vadd.f32 %v1224_v49, %v1223_v47 }
 0x105   :  { %v816_v53 = vadd.f32 %v1225_v52, %v1197_v51 }
 0x116   :  { %v1242_v54 = vpop.f32.mrb[8].mxu0 }
 0x117   :  { %v1243_v55 = vpop.f32.mrb[9].mxu0  ;;  %v1270_v58 = vpop.f32.mrb[8].mxu1 }
 0x118   :  { %v1244_v56 = vadd.f32 %v1243_v55, %v1242_v54  ;;  %v1245_v57 = vpop.f32.mrb[10].mxu0  ;;  %v1271_v62 = vpop.f32.mrb[9].mxu1 }
 0x119   :  { %v1246_v59 = vpop.f32.mrb[11].mxu0  ;;  %v1272_v63 = vadd.f32 %v1271_v62, %v1270_v58  ;;  %v1273_v0 = vpop.f32.mrb[10].mxu1 }
 0x11a   :  { %v854_v60 = vadd.f32 %v1244_v56, %v805_v37  ;;  %v1247_v61 = vadd.f32 %v1246_v59, %v1245_v57  ;;  %v1274_v2 = vpop.f32.mrb[11].mxu1 }
 0x11b   :  { %v1275_v3 = vadd.f32 %v1274_v2, %v1273_v0 }
 0x11c   :  { %v857_v1 = vadd.f32 %v1247_v61, %v808_v39  ;;  %v903_v4 = vadd.f32 %v1272_v63, %v854_v60  ;;  %v1168_v60 = vld [vmem:[%s1744_s2] ss:$0 sm:$0xff] }
 0x11e   :  { %v1248_v5 = vpop.f32.mrb[12].mxu0  ;;  %v906_v7 = vadd.f32 %v1275_v3, %v857_v1  ;;  %v1169_v1 = vld [vmem:[%s1745_s3] ss:$0 sm:$0xff] }
 0x11f   :  { %v1249_v6 = vpop.f32.mrb[13].mxu0  ;;  %v1276_v10 = vpop.f32.mrb[12].mxu1 }
 0x120   :  { %v1250_v8 = vadd.f32 %v1249_v6, %v1248_v5  ;;  %v1251_v9 = vpop.f32.mrb[14].mxu0  ;;  %v1277_v14 = vpop.f32.mrb[13].mxu1  ;;  %v1062_v6 = vld [vmem:[%s1746_s4] sm:$0xff] }
 0x121   :  { %v1252_v11 = vpop.f32.mrb[15].mxu0  ;;  %v1278_v15 = vadd.f32 %v1277_v14, %v1276_v10  ;;  %v1279_v16 = vpop.f32.mrb[14].mxu1 }
 0x122   :  { %v862_v12 = vadd.f32 %v1250_v8, %v813_v50  ;;  %v1253_v13 = vadd.f32 %v1252_v11, %v1251_v9  ;;  %v1280_v18 = vpop.f32.mrb[15].mxu1  ;;  %v1064_v8 = vld [vmem:[%s1746_s4 + $0x10] sm:$0xff]  ;;  %v1065_v9 = vld [vmem:[%s1746_s4 + $0x18] sm:$0xff] }
 0x123   :  { %v1281_v19 = vadd.f32 %v1280_v18, %v1279_v16 }
 0x124   :  { %v865_v17 = vadd.f32 %v1253_v13, %v816_v53  ;;  %v911_v20 = vadd.f32 %v1278_v15, %v862_v12 }
 0x126   :  { %v914_v21 = vadd.f32 %v1281_v19, %v865_v17 }
 0x136   :  { %v1310_v22 = vpop.f32.mrb[16].mxu0 }
 0x137   :  { %v960_v23 = vadd.f32 %v1310_v22, %v911_v20  ;;  %v951_v24 = vpop.f32.mrb[17].mxu0 }
 0x138   :  { %v952_v25 = vadd.f32 %v951_v24, %v903_v4  ;;  %v1311_v26 = vpop.f32.mrb[18].mxu0 }
 0x139   :  { %v963_v27 = vadd.f32 %v1311_v26, %v914_v21  ;;  %v954_v28 = vpop.f32.mrb[19].mxu0 }
 0x13a   :  { %v955_v29 = vadd.f32 %v954_v28, %v906_v7  ;;  %v1063_v7 = vld [vmem:[%s1746_s4 + $0x8] sm:$0xff] }
 0x13c   :  { %v1002_v30 = vadd.f32 %v955_v29, %v952_v25 }
 0x13e   :  { %v1003_v31 = vadd.f32 %v1002_v30, %v960_v23 }
 0x140   :  { %v1004_v32 = vadd.f32 %v1003_v31, %v963_v27 }
 0x142   :  { %v1005_v33 = vrot.slane %v1004_v32, 4 }
 0x144   :  { %v1006_v34 = vadd.f32 %v1005_v33, %v1004_v32 }
 0x146   :  { %v1007_v35 = vrot.slane %v1006_v34, 2 }
 0x148   :  { %v1008_v36 = vadd.f32 %v1007_v35, %v1006_v34 }
 0x14a   :  { %v1009_v37 = vrot.slane %v1008_v36, 1 }
 0x14c   :  { %v1010_v38 = vadd.f32 %v1009_v37, %v1008_v36 }
 0x14e   :  { %v1011_v39 = vmul.f32 0.03125, %v1010_v38 }
 0x150   :  { %v1012_v40 = vsub.f32 %v952_v25, %v1011_v39  ;;  %v1013_v41 = vsub.f32 %v955_v29, %v1011_v39  ;;  %v1014_v42 = vsub.f32 %v960_v23, %v1011_v39  ;;  %v1015_v43 = vsub.f32 %v963_v27, %v1011_v39 }
 0x152   :  { %v1020_v44 = vmul.f32 %v1012_v40, %v1012_v40  ;;  %v1021_v45 = vmul.f32 %v1013_v41, %v1013_v41  ;;  %v1022_v46 = vmul.f32 %v1014_v42, %v1014_v42  ;;  %v1023_v48 = vmul.f32 %v1015_v43, %v1015_v43 }
 0x154   :  { %v1024_v47 = vadd.f32 %v1021_v45, %v1020_v44 }
 0x156   :  { %v1025_v49 = vadd.f32 %v1024_v47, %v1022_v46 }
 0x158   :  { %v1026_v50 = vadd.f32 %v1025_v49, %v1023_v48 }
 0x15a   :  { %v1027_v51 = vrot.slane %v1026_v50, 4 }
 0x15c   :  { %v1028_v52 = vadd.f32 %v1027_v51, %v1026_v50 }
 0x15e   :  { %v1029_v53 = vrot.slane %v1028_v52, 2 }
 0x160   :  { %v1030_v54 = vadd.f32 %v1029_v53, %v1028_v52 }
 0x162   :  { %v1031_v55 = vrot.slane %v1030_v54, 1 }
 0x164   :  { %v1032_v56 = vadd.f32 %v1031_v55, %v1030_v54 }
 0x166   :  { %v1033_v57 = vmul.f32 0.03125, %v1032_v56 }
 0x168   :  { %v1034_v58 = vadd.f32 1e-05, %v1033_v57 }
 0x16a   :  { %1410 = vrsqrt.f32 %v1034_v58 }
 0x174   :  { %v1411_v59 = vpop.eup %1410 }
 0x175   :  { %v1036_v61 = vmul.f32 %v1411_v59, %v1012_v40  ;;  %v1037_v62 = vmul.f32 %v1411_v59, %v1013_v41  ;;  %v1038_v63 = vmul.f32 %v1411_v59, %v1014_v42  ;;  %v1039_v0 = vmul.f32 %v1411_v59, %v1015_v43 }
 0x177   :  { %v1047_v2 = vmul.f32 %v1168_v60, %v1036_v61  ;;  %v1048_v3 = vmul.f32 %v1168_v60, %v1037_v62  ;;  %v1049_v4 = vmul.f32 %v1168_v60, %v1038_v63  ;;  %v1050_v5 = vmul.f32 %v1168_v60, %v1039_v0 }
 0x179   :  { %v1058_v10 = vadd.f32 %v1169_v1, %v1047_v2  ;;  %v1059_v11 = vadd.f32 %v1169_v1, %v1048_v3  ;;  %v1060_v12 = vadd.f32 %v1169_v1, %v1049_v4  ;;  %v1061_v13 = vadd.f32 %v1169_v1, %v1050_v5 }
 0x17b   :  { %v1066_v14 = vadd.f32 %v1062_v6, %v1058_v10  ;;  %v1067_v15 = vadd.f32 %v1063_v7, %v1059_v11  ;;  %v1068_v16 = vadd.f32 %v1064_v8, %v1060_v12  ;;  %v1069_v17 = vadd.f32 %v1065_v9, %v1061_v13 }
 0x17d   :  { %1070 = vst [vmem:[%s1747_s5] sm:$0xff] %v1066_v14  ;;  %1071 = vst [vmem:[%s1747_s5 + $0x8] sm:$0xff] %v1067_v15 }
 0x17e   :  { %1072 = vst [vmem:[%s1747_s5 + $0x10] sm:$0xff] %v1068_v16  ;;  %1073 = vst [vmem:[%s1747_s5 + $0x18] sm:$0xff] %v1069_v17 }

// kernel: resnet_forward.34
= control target key start
LH: loop header
LB: loop body
LE: loop exit
PB: predicated region body
PF: predicated region fallthrough
CT: control target
= control target key end

     0   :  { %s1718_s1 = inlined_call_operand.vmem [shape: bf16[1152,128], index: 1, kind: input, shape index: {}]   ;;  %s1719_s0 = inlined_call_operand.vmem [shape: bf16[32,1152], index: 0, kind: input, shape index: {}]   ;;  %s1720_s2 = inlined_call_operand.vmem [shape: f32[1,128], index: 2, kind: input, shape index: {}]   ;;  %s1721_s3 = inlined_call_operand.vmem [shape: f32[1,128], index: 3, kind: input, shape index: {}]   ;;  %s1722_s4 = inlined_call_operand.vmem [shape: f32[32,128], index: 4, kind: output, shape index: {}]  }
   0x1   :  { %v1305_v0 = vld [vmem:[%s1718_s1 + $0x40] sm:$0xff]   ;;  %v1309_v4 = vld [vmem:[%s1718_s1 + $0x48] sm:$0xff]   ;;  %v1313_v8 = vld [vmem:[%s1718_s1 + $0x50] sm:$0xff]  }
   0x2   :  { %v1306_v1 = vld [vmem:[%s1718_s1 + $0xc0] sm:$0xff]   ;;  %1163 = vmatprep.subr.bf16.mxu0 %v1305_v0  ;;  %v1310_v5 = vld [vmem:[%s1718_s1 + $0xc8] sm:$0xff]   ;;  %v1314_v9 = vld [vmem:[%s1718_s1 + $0xd0] sm:$0xff]  }
   0x3   :  { %v1307_v2 = vld [vmem:[%s1718_s1] sm:$0xff]   ;;  %1191 = vmatprep.subr.bf16.mxu1 %v1306_v1  ;;  %v1311_v6 = vld [vmem:[%s1718_s1 + $0x8] sm:$0xff]   ;;  %v1315_v10 = vld [vmem:[%s1718_s1 + $0x10] sm:$0xff]  }
   0x4   :  { %v1308_v3 = vld [vmem:[%s1718_s1 + $0x80] sm:$0xff]   ;;  %1164 = vmatpush3.bf16.msra.mxu0 %v1307_v2  ;;  %v1312_v7 = vld [vmem:[%s1718_s1 + $0x88] sm:$0xff]   ;;  %v1316_v11 = vld [vmem:[%s1718_s1 + $0x90] sm:$0xff]  }
   0x5   :  { %1192 = vmatpush3.bf16.msra.mxu1 %v1308_v3  ;;  %1165 = vmatprep.subr.bf16.mxu0 %v1309_v4  ;;  %v1317_v12 = vld [vmem:[%s1718_s1 + $0x58] sm:$0xff]   ;;  %v1321_v16 = vld [vmem:[%s1718_s1 + $0x60] sm:$0xff]   ;;  %v1325_v20 = vld [vmem:[%s1718_s1 + $0x68] sm:$0xff]  }
   0x6   :  { %1193 = vmatprep.subr.bf16.mxu1 %v1310_v5  ;;  %v1318_v13 = vld [vmem:[%s1718_s1 + $0xd8] sm:$0xff]   ;;  %v1322_v17 = vld [vmem:[%s1718_s1 + $0xe0] sm:$0xff]   ;;  %v1326_v21 = vld [vmem:[%s1718_s1 + $0xe8] sm:$0xff]  }
   0x7   :  { %v1319_v14 = vld [vmem:[%s1718_s1 + $0x18] sm:$0xff]   ;;  %v1323_v18 = vld [vmem:[%s1718_s1 + $0x20] sm:$0xff]   ;;  %v1327_v22 = vld [vmem:[%s1718_s1 + $0x28] sm:$0xff]  }
   0x8   :  { %1166 = vmatpush3.bf16.msra.mxu0 %v1311_v6  ;;  %v1320_v15 = vld [vmem:[%s1718_s1 + $0x98] sm:$0xff]   ;;  %v1324_v19 = vld [vmem:[%s1718_s1 + $0xa0] sm:$0xff]   ;;  %v1328_v23 = vld [vmem:[%s1718_s1 + $0xa8] sm:$0xff]  }
   0x9   :  { %1194 = vmatpush3.bf16.msra.mxu1 %v1312_v7  ;;  %1167 = vmatprep.subr.bf16.mxu0 %v1313_v8  ;;  %v1329_v24 = vld [vmem:[%s1718_s1 + $0x70] sm:$0xff]   ;;  %v1333_v28 = vld [vmem:[%s1718_s1 + $0x78] sm:$0xff]   ;;  %v1337_v32 = vld [vmem:[%s1719_s0] ss:$36 sps:$4 sm:$0xff]  }
   0xa   :  { %1195 = vmatprep.subr.bf16.mxu1 %v1314_v9  ;;  %v1330_v25 = vld [vmem:[%s1718_s1 + $0xf0] sm:$0xff]   ;;  %v1334_v29 = vld [vmem:[%s1718_s1 + $0xf8] sm:$0xff]   ;;  %v1339_v33 = vld [vmem:[%s1719_s0 + $0x4] ss:$36 sps:$4 sm:$0xff]  }
   0xb   :  { %v1331_v26 = vld [vmem:[%s1718_s1 + $0x30] sm:$0xff]   ;;  %v1335_v30 = vld [vmem:[%s1718_s1 + $0x38] sm:$0xff]   ;;  %v1340_v34 = vld [vmem:[%s1719_s0 + $0x8] ss:$36 sps:$4 sm:$0xff]   ;;  %750 = vmatprep.mubr.bf16.mxu0 %v1339_v33 }
   0xc   :  { %1168 = vmatpush3.bf16.msra.mxu0 %v1315_v10  ;;  %v1332_v27 = vld [vmem:[%s1718_s1 + $0xb0] sm:$0xff]   ;;  %v1336_v31 = vld [vmem:[%s1718_s1 + $0xb8] sm:$0xff]   ;;  %v1343_v36 = vld [vmem:[%s1718_s1 + $0x140] sm:$0xff]  }
   0xd   :  { %1196 = vmatpush3.bf16.msra.mxu1 %v1316_v11  ;;  %1169 = vmatprep.subr.bf16.mxu0 %v1317_v12  ;;  %v1342_v35 = vld [vmem:[%s1719_s0 + $0xc] ss:$36 sps:$4 sm:$0xff]   ;;  %v1344_v37 = vld [vmem:[%s1718_s1 + $0x100] sm:$0xff]   ;;  %v1355_v48 = vld [vmem:[%s1718_s1 + $0x158] sm:$0xff]  }
   0xe   :  { %1197 = vmatprep.subr.bf16.mxu1 %v1318_v13  ;;  %799 = vmatprep.mubr.bf16.mxu1 %v1342_v35  ;;  %v1345_v38 = vld [vmem:[%s1718_s1 + $0x1c0] sm:$0xff]   ;;  %v1347_v40 = vld [vmem:[%s1718_s1 + $0x148] sm:$0xff]   ;;  %v1351_v44 = vld [vmem:[%s1718_s1 + $0x150] sm:$0xff]  }
   0xf   :  { %v1346_v39 = vld [vmem:[%s1718_s1 + $0x180] sm:$0xff]   ;;  %v1348_v41 = vld [vmem:[%s1718_s1 + $0x108] sm:$0xff]   ;;  %v1352_v45 = vld [vmem:[%s1718_s1 + $0x110] sm:$0xff]  }
  0x10   :  { %1170 = vmatpush3.bf16.msra.mxu0 %v1319_v14  ;;  %v1349_v42 = vld [vmem:[%s1718_s1 + $0x1c8] sm:$0xff]   ;;  %v1353_v46 = vld [vmem:[%s1718_s1 + $0x1d0] sm:$0xff]   ;;  %v1356_v49 = vld [vmem:[%s1718_s1 + $0x118] sm:$0xff]  }
  0x11   :  { %1198 = vmatpush3.bf16.msra.mxu1 %v1320_v15  ;;  %1171 = vmatprep.subr.bf16.mxu0 %v1321_v16  ;;  %v1350_v43 = vld [vmem:[%s1718_s1 + $0x188] sm:$0xff]   ;;  %v1354_v47 = vld [vmem:[%s1718_s1 + $0x190] sm:$0xff]   ;;  %v1357_v50 = vld [vmem:[%s1718_s1 + $0x1d8] sm:$0xff]  }
  0x12   :  { %1199 = vmatprep.subr.bf16.mxu1 %v1322_v17  ;;  %v1358_v51 = vld [vmem:[%s1718_s1 + $0x198] sm:$0xff]   ;;  %v1359_v52 = vld [vmem:[%s1718_s1 + $0x160] sm:$0xff]   ;;  %v1363_v56 = vld [vmem:[%s1718_s1 + $0x168] sm:$0xff]  }
  0x13   :  { %v1360_v53 = vld [vmem:[%s1718_s1 + $0x120] sm:$0xff]   ;;  %v1364_v57 = vld [vmem:[%s1719_s0 + $0x4c] ss:$36 sps:$4 sm:$0xff]   ;;  %v1366_v58 = vld [vmem:[%s1719_s0 + $0x54] ss:$36 sps:$4 sm:$0xff]  }
  0x14   :  { %1172 = vmatpush3.bf16.msra.mxu0 %v1323_v18  ;;  %v1361_v54 = vld [vmem:[%s1718_s1 + $0x1e0] sm:$0xff]   ;;  %v1368_v59 = vld [vmem:[%s1718_s1 + $0x128] sm:$0xff]   ;;  %v1370_v61 = vld [vmem:[%s1719_s0 + $0x50] ss:$36 sps:$4 sm:$0xff]  }
  0x15   :  { %1200 = vmatpush3.bf16.msra.mxu1 %v1324_v19  ;;  %1173 = vmatprep.subr.bf16.mxu0 %v1325_v20  ;;  %v1362_v55 = vld [vmem:[%s1718_s1 + $0x1a0] sm:$0xff]   ;;  %v1369_v60 = vld [vmem:[%s1719_s0 + $0x48] ss:$36 sps:$4 sm:$0xff]   ;;  %v1373_v0 = vld [vmem:[%s1718_s1 + $0x170] sm:$0xff]  }
  0x16   :  { %1201 = vmatprep.subr.bf16.mxu1 %v1326_v21  ;;  %v1371_v62 = vld [vmem:[%s1718_s1 + $0x1e8] sm:$0xff]   ;;  %v1374_v1 = vld [vmem:[%s1718_s1 + $0x130] sm:$0xff]   ;;  %v1377_v4 = vld [vmem:[%s1718_s1 + $0x178] sm:$0xff]  }
  0x17   :  { %v1372_v63 = vld [vmem:[%s1718_s1 + $0x1a8] sm:$0xff]   ;;  %v1375_v2 = vld [vmem:[%s1718_s1 + $0x1f0] sm:$0xff]   ;;  %v1378_v5 = vld [vmem:[%s1718_s1 + $0x138] sm:$0xff]  }
  0x18   :  { %1174 = vmatpush3.bf16.msra.mxu0 %v1327_v22  ;;  %v1376_v3 = vld [vmem:[%s1718_s1 + $0x1b0] sm:$0xff]   ;;  %v1379_v6 = vld [vmem:[%s1718_s1 + $0x1f8] sm:$0xff]   ;;  %v1384_v10 = vld [vmem:[%s1718_s1 + $0x200] sm:$0xff]  }
  0x19   :  { %1202 = vmatpush3.bf16.msra.mxu1 %v1328_v23  ;;  %1175 = vmatprep.subr.bf16.mxu0 %v1329_v24  ;;  %v1380_v7 = vld [vmem:[%s1719_s0 + $0x10] ss:$36 sps:$4 sm:$0xff]   ;;  %v1383_v9 = vld [vmem:[%s1718_s1 + $0x1b8] sm:$0xff]   ;;  %v1388_v13 = vld [vmem:[%s1718_s1 + $0x208] sm:$0xff]  }
  0x1a   :  { %1203 = vmatprep.subr.bf16.mxu1 %v1330_v25  ;;  %v1382_v8 = vld [vmem:[%s1719_s0 + $0x14] ss:$36 sps:$4 sm:$0xff]   ;;  %v1387_v12 = vld [vmem:[%s1719_s0 + $0x1c] ss:$36 sps:$4 sm:$0xff]   ;;  %v1393_v17 = vld [vmem:[%s1719_s0 + $0x64] ss:$36 sps:$4 sm:$0xff]  }
  0x1b   :  { %v1385_v11 = vld [vmem:[%s1719_s0 + $0x18] ss:$36 sps:$4 sm:$0xff]   ;;  %v1392_v16 = vld [vmem:[%s1718_s1 + $0x210] sm:$0xff]   ;;  %v1395_v18 = vld [vmem:[%s1719_s0 + $0x60] ss:$36 sps:$4 sm:$0xff]  }
  0x1c   :  { %1176 = vmatpush3.bf16.msra.mxu0 %v1331_v26  ;;  %v1389_v14 = vld [vmem:[%s1719_s0 + $0x5c] ss:$36 sps:$4 sm:$0xff]   ;;  %v1398_v22 = vld [vmem:[%s1718_s1 + $0x228] sm:$0xff]   ;;  %v1399_v23 = vld [vmem:[%s1718_s1 + $0x230] sm:$0xff]  }
  0x1d   :  { %1204 = vmatpush3.bf16.msra.mxu1 %v1332_v27  ;;  %1177 = vmatprep.subr.bf16.mxu0 %v1333_v28  ;;  %v1391_v15 = vld [vmem:[%s1719_s0 + $0x58] ss:$36 sps:$4 sm:$0xff]   ;;  %v1397_v20 = vld [vmem:[%s1718_s1 + $0x220] sm:$0xff]   ;;  %v1402_v25 = vld [vmem:[%s1719_s0 + $0x68] ss:$36 sps:$4 sm:$0xff]  }
  0x1e   :  { %1205 = vmatprep.subr.bf16.mxu1 %v1334_v29  ;;  %v1396_v19 = vld [vmem:[%s1718_s1 + $0x218] sm:$0xff]   ;;  %v1401_v21 = vld [vmem:[%s1719_s0 + $0x20] ss:$36 sps:$4 sm:$0xff]  }
  0x1f   :  { %v1400_v24 = vld [vmem:[%s1718_s1 + $0x238] sm:$0xff]  }
  0x20   :  { %1178 = vmatpush3.bf16.msra.mxu0 %v1335_v30 }
  0x21   :  { %1206 = vmatpush3.bf16.msra.mxu1 %v1336_v31  ;;  %1219 = vmatprep.subr.bf16.mxu0 %v1343_v36 }
  0x22   :  { %1247 = vmatprep.subr.bf16.mxu1 %v1345_v38 }
  0x23   :  { %751 = vmatmul.mubr.bf16.vlgmr.msra.gmra.mrb[0].mxu0 %v1337_v32 }
  0x24   :  { %800 = vmatmul.mubr.bf16.vlgmr.msra.gmra.mrb[0].mxu1 %v1340_v34  ;;  %1220 = vmatpush3.bf16.msra.mxu0 %v1344_v37 }
  0x25   :  { %1248 = vmatpush3.bf16.msra.mxu1 %v1346_v39  ;;  %1221 = vmatprep.subr.bf16.mxu0 %v1347_v40 }
  0x26   :  { %1249 = vmatprep.subr.bf16.mxu1 %v1349_v42  ;;  %758 = vmatprep.mubr.bf16.mxu0 %v1364_v57 }
  0x27   :  { %807 = vmatprep.mubr.bf16.mxu1 %v1366_v58 }
  0x28   :  { %1222 = vmatpush3.bf16.msra.mxu0 %v1348_v41 }
  0x29   :  { %1250 = vmatpush3.bf16.msra.mxu1 %v1350_v43  ;;  %1223 = vmatprep.subr.bf16.mxu0 %v1351_v44 }
  0x2a   :  { %1251 = vmatprep.subr.bf16.mxu1 %v1353_v46 }
  0x2b   :  { %759 = vmatmul.mubr.bf16.gmra.mrb[4].mxu0 %v1369_v60 }
  0x2c   :  { %1224 = vmatpush3.bf16.msra.mxu0 %v1352_v45  ;;  %808 = vmatmul.mubr.bf16.gmra.mrb[4].mxu1 %v1370_v61 }
  0x2d   :  { %1252 = vmatpush3.bf16.msra.mxu1 %v1354_v47  ;;  %1225 = vmatprep.subr.bf16.mxu0 %v1355_v48 }
  0x2e   :  { %1253 = vmatprep.subr.bf16.mxu1 %v1357_v50  ;;  %848 = vmatprep.mubr.bf16.mxu0 %v1382_v8 }
  0x2f   :  { %897 = vmatprep.mubr.bf16.mxu1 %v1387_v12 }
  0x30   :  { %1226 = vmatpush3.bf16.msra.mxu0 %v1356_v49 }
  0x31   :  { %1254 = vmatpush3.bf16.msra.mxu1 %v1358_v51  ;;  %1227 = vmatprep.subr.bf16.mxu0 %v1359_v52 }
  0x32   :  { %1255 = vmatprep.subr.bf16.mxu1 %v1361_v54 }
  0x34   :  { %1228 = vmatpush3.bf16.msra.mxu0 %v1360_v53 }
  0x35   :  { %1256 = vmatpush3.bf16.msra.mxu1 %v1362_v55  ;;  %1229 = vmatprep.subr.bf16.mxu0 %v1363_v56 }
  0x36   :  { %1257 = vmatprep.subr.bf16.mxu1 %v1371_v62 }
  0x38   :  { %1230 = vmatpush3.bf16.msra.mxu0 %v1368_v59 }
  0x39   :  { %1258 = vmatpush3.bf16.msra.mxu1 %v1372_v63  ;;  %1231 = vmatprep.subr.bf16.mxu0 %v1373_v0 }
  0x3a   :  { %1259 = vmatprep.subr.bf16.mxu1 %v1375_v2 }
  0x3c   :  { %1232 = vmatpush3.bf16.msra.mxu0 %v1374_v1 }
  0x3d   :  { %1260 = vmatpush3.bf16.msra.mxu1 %v1376_v3  ;;  %1233 = vmatprep.subr.bf16.mxu0 %v1377_v4 }
  0x3e   :  { %1261 = vmatprep.subr.bf16.mxu1 %v1379_v6 }
  0x40   :  { %1234 = vmatpush3.bf16.msra.mxu0 %v1378_v5 }
  0x41   :  { %1262 = vmatpush3.bf16.msra.mxu1 %v1383_v9  ;;  %1285 = vmatprep.subr.bf16.mxu0 %v1384_v10 }
  0x43   :  { %849 = vmatmul.mubr.bf16.vlgmr.msra.gmra.mrb[8].mxu0 %v1380_v7 }
  0x44   :  { %1286 = vmatpush3.bf16.msra.mxu0 %v1384_v10  ;;  %898 = vmatmul.mubr.bf16.vlgmr.msra.gmra.mrb[8].mxu1 %v1385_v11 }
  0x45   :  { %1287 = vmatprep.subr.bf16.mxu0 %v1388_v13  ;;  %856 = vmatprep.mubr.bf16.mxu0 %v1389_v14 }
  0x46   :  { %905 = vmatprep.mubr.bf16.mxu1 %v1393_v17 }
  0x48   :  { %1288 = vmatpush3.bf16.msra.mxu0 %v1388_v13 }
  0x49   :  { %1289 = vmatprep.subr.bf16.mxu0 %v1392_v16 }
  0x4b   :  { %857 = vmatmul.mubr.bf16.gmra.mrb[12].mxu0 %v1391_v15 }
  0x4c   :  { %1290 = vmatpush3.bf16.msra.mxu0 %v1392_v16  ;;  %906 = vmatmul.mubr.bf16.gmra.mrb[12].mxu1 %v1395_v18 }
  0x4d   :  { %1291 = vmatprep.subr.bf16.mxu0 %v1396_v19  ;;  %1301 = vmatprep.mubr.bf16.mxu0 %v1401_v21 }
  0x50   :  { %1292 = vmatpush3.bf16.msra.mxu0 %v1396_v19 }
  0x51   :  { %1293 = vmatprep.subr.bf16.mxu0 %v1397_v20 }
  0x54   :  { %1294 = vmatpush3.bf16.msra.mxu0 %v1397_v20 }
  0x55   :  { %1295 = vmatprep.subr.bf16.mxu0 %v1398_v22 }
  0x58   :  { %1296 = vmatpush3.bf16.msra.mxu0 %v1398_v22 }
  0x59   :  { %1297 = vmatprep.subr.bf16.mxu0 %v1399_v23 }
  0x5c   :  { %1298 = vmatpush3.bf16.msra.mxu0 %v1399_v23 }
  0x5d   :  { %1299 = vmatprep.subr.bf16.mxu0 %v1400_v24 }
  0x60   :  { %1300 = vmatpush3.bf16.msra.mxu0 %v1400_v24 }
  0x63   :  { %1302 = vmatmul.mubr.bf16.vlgmr.msra.gmra.mrb[16].mxu0 %v1402_v25 }
  0xf6   :  { %v1179_v26 = vpop.f32.mrb[0].mxu0 }
  0xf7   :  { %v1207_v27 = vpop.f32.mrb[0].mxu1  ;;  %v1180_v28 = vpop.f32.mrb[1].mxu0 }
  0xf8   :  { %v1181_v29 = vadd.f32 %v1180_v28, %v1179_v26  ;;  %v1208_v30 = vpop.f32.mrb[1].mxu1  ;;  %v1182_v31 = vpop.f32.mrb[2].mxu0 }
  0xf9   :  { %v1209_v32 = vadd.f32 %v1208_v30, %v1207_v27  ;;  %v1210_v33 = vpop.f32.mrb[2].mxu1  ;;  %v1183_v34 = vpop.f32.mrb[3].mxu0 }
  0xfa   :  { %v1184_v35 = vadd.f32 %v1183_v34, %v1182_v31  ;;  %v1211_v36 = vpop.f32.mrb[3].mxu1 }
  0xfb   :  { %v802_v37 = vadd.f32 %v1209_v32, %v1181_v29  ;;  %v1212_v38 = vadd.f32 %v1211_v36, %v1210_v33 }
  0xfd   :  { %v805_v39 = vadd.f32 %v1212_v38, %v1184_v35 }
  0xfe   :  { %v1185_v40 = vpop.f32.mrb[4].mxu0 }
  0xff   :  { %v1213_v41 = vpop.f32.mrb[4].mxu1  ;;  %v1186_v42 = vpop.f32.mrb[5].mxu0 }
 0x100   :  { %v1214_v43 = vpop.f32.mrb[5].mxu1  ;;  %v1187_v44 = vadd.f32 %v1186_v42, %v1185_v40  ;;  %v1188_v46 = vpop.f32.mrb[6].mxu0 }
 0x101   :  { %v1215_v45 = vadd.f32 %v1214_v43, %v1213_v41  ;;  %v1216_v47 = vpop.f32.mrb[6].mxu1  ;;  %v1189_v48 = vpop.f32.mrb[7].mxu0 }
 0x102   :  { %v1217_v49 = vpop.f32.mrb[7].mxu1  ;;  %v1190_v51 = vadd.f32 %v1189_v48, %v1188_v46 }
 0x103   :  { %v810_v50 = vadd.f32 %v1215_v45, %v1187_v44  ;;  %v1218_v52 = vadd.f32 %v1217_v49, %v1216_v47 }
 0x105   :  { %v813_v53 = vadd.f32 %v1218_v52, %v1190_v51 }
 0x116   :  { %v1235_v54 = vpop.f32.mrb[8].mxu0 }
 0x117   :  { %v1236_v55 = vpop.f32.mrb[9].mxu0  ;;  %v1263_v58 = vpop.f32.mrb[8].mxu1 }
 0x118   :  { %v1237_v56 = vadd.f32 %v1236_v55, %v1235_v54  ;;  %v1238_v57 = vpop.f32.mrb[10].mxu0  ;;  %v1264_v62 = vpop.f32.mrb[9].mxu1 }
 0x119   :  { %v1239_v59 = vpop.f32.mrb[11].mxu0  ;;  %v1265_v63 = vadd.f32 %v1264_v62, %v1263_v58  ;;  %v1266_v0 = vpop.f32.mrb[10].mxu1 }
 0x11a   :  { %v851_v60 = vadd.f32 %v1237_v56, %v802_v37  ;;  %v1240_v61 = vadd.f32 %v1239_v59, %v1238_v57  ;;  %v1267_v2 = vpop.f32.mrb[11].mxu1 }
 0x11b   :  { %v1268_v3 = vadd.f32 %v1267_v2, %v1266_v0 }
 0x11c   :  { %v854_v1 = vadd.f32 %v1240_v61, %v805_v39  ;;  %v900_v4 = vadd.f32 %v1265_v63, %v851_v60  ;;  %v1161_v60 = vld [vmem:[%s1720_s2] ss:$0 sm:$0xff] }
 0x11e   :  { %v1241_v5 = vpop.f32.mrb[12].mxu0  ;;  %v903_v7 = vadd.f32 %v1268_v3, %v854_v1  ;;  %v1162_v1 = vld [vmem:[%s1721_s3] ss:$0 sm:$0xff] }
 0x11f   :  { %v1242_v6 = vpop.f32.mrb[13].mxu0  ;;  %v1269_v10 = vpop.f32.mrb[12].mxu1 }
 0x120   :  { %v1243_v8 = vadd.f32 %v1242_v6, %v1241_v5  ;;  %v1244_v9 = vpop.f32.mrb[14].mxu0  ;;  %v1270_v14 = vpop.f32.mrb[13].mxu1 }
 0x121   :  { %v1245_v11 = vpop.f32.mrb[15].mxu0  ;;  %v1271_v15 = vadd.f32 %v1270_v14, %v1269_v10  ;;  %v1272_v16 = vpop.f32.mrb[14].mxu1 }
 0x122   :  { %v859_v12 = vadd.f32 %v1243_v8, %v810_v50  ;;  %v1246_v13 = vadd.f32 %v1245_v11, %v1244_v9  ;;  %v1273_v18 = vpop.f32.mrb[15].mxu1 }
 0x123   :  { %v1274_v19 = vadd.f32 %v1273_v18, %v1272_v16 }
 0x124   :  { %v862_v17 = vadd.f32 %v1246_v13, %v813_v53  ;;  %v908_v20 = vadd.f32 %v1271_v15, %v859_v12 }
 0x126   :  { %v911_v21 = vadd.f32 %v1274_v19, %v862_v17 }
 0x136   :  { %v1303_v22 = vpop.f32.mrb[16].mxu0 }
 0x137   :  { %v957_v23 = vadd.f32 %v1303_v22, %v908_v20  ;;  %v948_v24 = vpop.f32.mrb[17].mxu0 }
 0x138   :  { %v949_v25 = vadd.f32 %v948_v24, %v900_v4  ;;  %v1304_v26 = vpop.f32.mrb[18].mxu0 }
 0x139   :  { %v960_v27 = vadd.f32 %v1304_v26, %v911_v21  ;;  %v951_v28 = vpop.f32.mrb[19].mxu0 }
 0x13a   :  { %v952_v29 = vadd.f32 %v951_v28, %v903_v7 }
 0x13c   :  { %v999_v30 = vadd.f32 %v952_v29, %v949_v25 }
 0x13e   :  { %v1000_v31 = vadd.f32 %v999_v30, %v957_v23 }
 0x140   :  { %v1001_v32 = vadd.f32 %v1000_v31, %v960_v27 }
 0x142   :  { %v1002_v33 = vrot.slane %v1001_v32, 4 }
 0x144   :  { %v1003_v34 = vadd.f32 %v1002_v33, %v1001_v32 }
 0x146   :  { %v1004_v35 = vrot.slane %v1003_v34, 2 }
 0x148   :  { %v1005_v36 = vadd.f32 %v1004_v35, %v1003_v34 }
 0x14a   :  { %v1006_v37 = vrot.slane %v1005_v36, 1 }
 0x14c   :  { %v1007_v38 = vadd.f32 %v1006_v37, %v1005_v36 }
 0x14e   :  { %v1008_v39 = vmul.f32 0.03125, %v1007_v38 }
 0x150   :  { %v1009_v40 = vsub.f32 %v949_v25, %v1008_v39  ;;  %v1010_v41 = vsub.f32 %v952_v29, %v1008_v39  ;;  %v1011_v42 = vsub.f32 %v957_v23, %v1008_v39  ;;  %v1012_v43 = vsub.f32 %v960_v27, %v1008_v39 }
 0x152   :  { %v1017_v44 = vmul.f32 %v1009_v40, %v1009_v40  ;;  %v1018_v45 = vmul.f32 %v1010_v41, %v1010_v41  ;;  %v1019_v46 = vmul.f32 %v1011_v42, %v1011_v42  ;;  %v1020_v48 = vmul.f32 %v1012_v43, %v1012_v43 }
 0x154   :  { %v1021_v47 = vadd.f32 %v1018_v45, %v1017_v44 }
 0x156   :  { %v1022_v49 = vadd.f32 %v1021_v47, %v1019_v46 }
 0x158   :  { %v1023_v50 = vadd.f32 %v1022_v49, %v1020_v48 }
 0x15a   :  { %v1024_v51 = vrot.slane %v1023_v50, 4 }
 0x15c   :  { %v1025_v52 = vadd.f32 %v1024_v51, %v1023_v50 }
 0x15e   :  { %v1026_v53 = vrot.slane %v1025_v52, 2 }
 0x160   :  { %v1027_v54 = vadd.f32 %v1026_v53, %v1025_v52 }
 0x162   :  { %v1028_v55 = vrot.slane %v1027_v54, 1 }
 0x164   :  { %v1029_v56 = vadd.f32 %v1028_v55, %v1027_v54 }
 0x166   :  { %v1030_v57 = vmul.f32 0.03125, %v1029_v56 }
 0x168   :  { %v1031_v58 = vadd.f32 1e-05, %v1030_v57 }
 0x16a   :  { %1403 = vrsqrt.f32 %v1031_v58 }
 0x174   :  { %v1404_v59 = vpop.eup %1403 }
 0x175   :  { %v1033_v61 = vmul.f32 %v1404_v59, %v1009_v40  ;;  %v1034_v62 = vmul.f32 %v1404_v59, %v1010_v41  ;;  %v1035_v63 = vmul.f32 %v1404_v59, %v1011_v42  ;;  %v1036_v0 = vmul.f32 %v1404_v59, %v1012_v43 }
 0x177   :  { %v1044_v2 = vmul.f32 %v1161_v60, %v1033_v61  ;;  %v1045_v3 = vmul.f32 %v1161_v60, %v1034_v62  ;;  %v1046_v4 = vmul.f32 %v1161_v60, %v1035_v63  ;;  %v1047_v5 = vmul.f32 %v1161_v60, %v1036_v0 }
 0x179   :  { %v1055_v6 = vadd.f32 %v1162_v1, %v1044_v2  ;;  %v1056_v7 = vadd.f32 %v1162_v1, %v1045_v3  ;;  %v1057_v8 = vadd.f32 %v1162_v1, %v1046_v4  ;;  %v1058_v9 = vadd.f32 %v1162_v1, %v1047_v5 }
 0x17b   :  { %v1059_v10 = vmax.f32 %v1055_v6, 0.0  ;;  %v1060_v11 = vmax.f32 %v1056_v7, 0.0  ;;  %v1061_v12 = vmax.f32 %v1057_v8, 0.0  ;;  %v1062_v13 = vmax.f32 %v1058_v9, 0.0 }
 0x17d   :  { %1063 = vst [vmem:[%s1722_s4] sm:$0xff] %v1059_v10  ;;  %1064 = vst [vmem:[%s1722_s4 + $0x8] sm:$0xff] %v1060_v11 }
 0x17e   :  { %1065 = vst [vmem:[%s1722_s4 + $0x10] sm:$0xff] %v1061_v12  ;;  %1066 = vst [vmem:[%s1722_s4 + $0x18] sm:$0xff] %v1062_v13 }

// kernel: resnet_forward.49
= control target key start
LH: loop header
LB: loop body
LE: loop exit
PB: predicated region body
PF: predicated region fallthrough
CT: control target
= control target key end

     0   :  { %s759_s1 = inlined_call_operand.vmem [shape: bf16[512,128], index: 1, kind: input, shape index: {}]   ;;  %s760_s0 = inlined_call_operand.vmem [shape: bf16[32,512], index: 0, kind: input, shape index: {}]   ;;  %s761_s2 = inlined_call_operand.vmem [shape: f32[1,128], index: 2, kind: input, shape index: {}]   ;;  %s762_s3 = inlined_call_operand.vmem [shape: f32[32,128], index: 3, kind: output, shape index: {}]  }
   0x1   :  { %v560_v0 = vld [vmem:[%s759_s1 + $0x40] sm:$0xff]   ;;  %v564_v4 = vld [vmem:[%s759_s1 + $0x48] sm:$0xff]   ;;  %v568_v8 = vld [vmem:[%s759_s1 + $0x50] sm:$0xff]  }
   0x2   :  { %v561_v1 = vld [vmem:[%s759_s1 + $0xc0] sm:$0xff]   ;;  %504 = vmatprep.subr.bf16.mxu0 %v560_v0  ;;  %v565_v5 = vld [vmem:[%s759_s1 + $0xc8] sm:$0xff]   ;;  %v569_v9 = vld [vmem:[%s759_s1 + $0xd0] sm:$0xff]  }
   0x3   :  { %v562_v2 = vld [vmem:[%s759_s1] sm:$0xff]   ;;  %532 = vmatprep.subr.bf16.mxu1 %v561_v1  ;;  %v566_v6 = vld [vmem:[%s759_s1 + $0x8] sm:$0xff]   ;;  %v570_v10 = vld [vmem:[%s759_s1 + $0x10] sm:$0xff]  }
   0x4   :  { %v563_v3 = vld [vmem:[%s759_s1 + $0x80] sm:$0xff]   ;;  %505 = vmatpush3.bf16.msra.mxu0 %v562_v2  ;;  %v567_v7 = vld [vmem:[%s759_s1 + $0x88] sm:$0xff]   ;;  %v571_v11 = vld [vmem:[%s759_s1 + $0x90] sm:$0xff]  }
   0x5   :  { %533 = vmatpush3.bf16.msra.mxu1 %v563_v3  ;;  %506 = vmatprep.subr.bf16.mxu0 %v564_v4  ;;  %v572_v12 = vld [vmem:[%s759_s1 + $0x58] sm:$0xff]   ;;  %v576_v16 = vld [vmem:[%s759_s1 + $0x60] sm:$0xff]   ;;  %v580_v20 = vld [vmem:[%s759_s1 + $0x68] sm:$0xff]  }
   0x6   :  { %534 = vmatprep.subr.bf16.mxu1 %v565_v5  ;;  %v573_v13 = vld [vmem:[%s759_s1 + $0xd8] sm:$0xff]   ;;  %v577_v17 = vld [vmem:[%s759_s1 + $0xe0] sm:$0xff]   ;;  %v581_v21 = vld [vmem:[%s759_s1 + $0xe8] sm:$0xff]  }
   0x7   :  { %v574_v14 = vld [vmem:[%s759_s1 + $0x18] sm:$0xff]   ;;  %v578_v18 = vld [vmem:[%s759_s1 + $0x20] sm:$0xff]   ;;  %v582_v22 = vld [vmem:[%s759_s1 + $0x28] sm:$0xff]  }
   0x8   :  { %507 = vmatpush3.bf16.msra.mxu0 %v566_v6  ;;  %v575_v15 = vld [vmem:[%s759_s1 + $0x98] sm:$0xff]   ;;  %v579_v19 = vld [vmem:[%s759_s1 + $0xa0] sm:$0xff]   ;;  %v583_v23 = vld [vmem:[%s759_s1 + $0xa8] sm:$0xff]  }
   0x9   :  { %535 = vmatpush3.bf16.msra.mxu1 %v567_v7  ;;  %508 = vmatprep.subr.bf16.mxu0 %v568_v8  ;;  %v584_v24 = vld [vmem:[%s759_s1 + $0x70] sm:$0xff]   ;;  %v588_v28 = vld [vmem:[%s759_s1 + $0x78] sm:$0xff]   ;;  %v503_v49 = vld [vmem:[%s761_s2] ss:$0 sm:$0xff] }
   0xa   :  { %536 = vmatprep.subr.bf16.mxu1 %v569_v9  ;;  %v585_v25 = vld [vmem:[%s759_s1 + $0xf0] sm:$0xff]   ;;  %v589_v29 = vld [vmem:[%s759_s1 + $0xf8] sm:$0xff]  }
   0xb   :  { %v586_v26 = vld [vmem:[%s759_s1 + $0x30] sm:$0xff]   ;;  %v590_v30 = vld [vmem:[%s759_s1 + $0x38] sm:$0xff]  }
   0xc   :  { %509 = vmatpush3.bf16.msra.mxu0 %v570_v10  ;;  %v587_v27 = vld [vmem:[%s759_s1 + $0xb0] sm:$0xff]   ;;  %v591_v31 = vld [vmem:[%s759_s1 + $0xb8] sm:$0xff]  }
   0xd   :  { %537 = vmatpush3.bf16.msra.mxu1 %v571_v11  ;;  %510 = vmatprep.subr.bf16.mxu0 %v572_v12  ;;  %v592_v32 = vld [vmem:[%s760_s0] ss:$16 sps:$4 sm:$0xff]   ;;  %v594_v33 = vld [vmem:[%s760_s0 + $0x4] ss:$16 sps:$4 sm:$0xff]   ;;  %v595_v34 = vld [vmem:[%s760_s0 + $0x8] ss:$16 sps:$4 sm:$0xff]  }
   0xe   :  { %538 = vmatprep.subr.bf16.mxu1 %v573_v13  ;;  %v597_v35 = vld [vmem:[%s760_s0 + $0xc] ss:$16 sps:$4 sm:$0xff]   ;;  %363 = vmatprep.mubr.bf16.mxu0 %v594_v33  ;;  %v598_v36 = vld [vmem:[%s760_s0 + $0x24] ss:$16 sps:$4 sm:$0xff]   ;;  %v602_v38 = vld [vmem:[%s760_s0 + $0x20] ss:$16 sps:$4 sm:$0xff]  }
   0xf   :  { %412 = vmatprep.mubr.bf16.mxu1 %v597_v35  ;;  %v600_v37 = vld [vmem:[%s760_s0 + $0x2c] ss:$16 sps:$4 sm:$0xff]   ;;  %v603_v39 = vld [vmem:[%s760_s0 + $0x28] ss:$16 sps:$4 sm:$0xff]  }
  0x10   :  { %511 = vmatpush3.bf16.msra.mxu0 %v574_v14 }
  0x11   :  { %539 = vmatpush3.bf16.msra.mxu1 %v575_v15  ;;  %512 = vmatprep.subr.bf16.mxu0 %v576_v16 }
  0x12   :  { %540 = vmatprep.subr.bf16.mxu1 %v577_v17 }
  0x14   :  { %513 = vmatpush3.bf16.msra.mxu0 %v578_v18 }
  0x15   :  { %541 = vmatpush3.bf16.msra.mxu1 %v579_v19  ;;  %514 = vmatprep.subr.bf16.mxu0 %v580_v20 }
  0x16   :  { %542 = vmatprep.subr.bf16.mxu1 %v581_v21 }
  0x18   :  { %515 = vmatpush3.bf16.msra.mxu0 %v582_v22 }
  0x19   :  { %543 = vmatpush3.bf16.msra.mxu1 %v583_v23  ;;  %516 = vmatprep.subr.bf16.mxu0 %v584_v24 }
  0x1a   :  { %544 = vmatprep.subr.bf16.mxu1 %v585_v25 }
  0x1c   :  { %517 = vmatpush3.bf16.msra.mxu0 %v586_v26 }
  0x1d   :  { %545 = vmatpush3.bf16.msra.mxu1 %v587_v27  ;;  %518 = vmatprep.subr.bf16.mxu0 %v588_v28 }
  0x1e   :  { %546 = vmatprep.subr.bf16.mxu1 %v589_v29 }
  0x20   :  { %519 = vmatpush3.bf16.msra.mxu0 %v590_v30 }
  0x21   :  { %547 = vmatpush3.bf16.msra.mxu1 %v591_v31 }
  0x23   :  { %364 = vmatmul.mubr.bf16.vlgmr.msra.gmra.mrb[0].mxu0 %v592_v32 }
  0x24   :  { %413 = vmatmul.mubr.bf16.vlgmr.msra.gmra.mrb[0].mxu1 %v595_v34  ;;  %371 = vmatprep.mubr.bf16.mxu0 %v598_v36 }
  0x25   :  { %420 = vmatprep.mubr.bf16.mxu1 %v600_v37 }
  0x2b   :  { %372 = vmatmul.mubr.bf16.gmra.mrb[4].mxu0 %v602_v38 }
  0x2c   :  { %421 = vmatmul.mubr.bf16.gmra.mrb[4].mxu1 %v603_v39 }
  0xf6   :  { %v520_v40 = vpop.f32.mrb[0].mxu0 }
  0xf7   :  { %v548_v41 = vpop.f32.mrb[0].mxu1  ;;  %v521_v42 = vpop.f32.mrb[1].mxu0 }
  0xf8   :  { %v522_v43 = vadd.f32 %v521_v42, %v520_v40  ;;  %v549_v44 = vpop.f32.mrb[1].mxu1  ;;  %v523_v45 = vpop.f32.mrb[2].mxu0 }
  0xf9   :  { %v550_v46 = vadd.f32 %v549_v44, %v548_v41  ;;  %v551_v47 = vpop.f32.mrb[2].mxu1  ;;  %v524_v48 = vpop.f32.mrb[3].mxu0 }
  0xfa   :  { %v525_v50 = vadd.f32 %v524_v48, %v523_v45  ;;  %v552_v51 = vpop.f32.mrb[3].mxu1 }
  0xfb   :  { %v415_v52 = vadd.f32 %v550_v46, %v522_v43  ;;  %v553_v53 = vadd.f32 %v552_v51, %v551_v47 }
  0xfd   :  { %v451_v54 = vadd.f32 %v503_v49, %v415_v52  ;;  %v418_v55 = vadd.f32 %v553_v53, %v525_v50 }
  0xfe   :  { %v526_v56 = vpop.f32.mrb[4].mxu0 }
  0xff   :  { %455 = vst [vmem:[%s762_s3] sm:$0xff] %v451_v54  ;;  %v452_v57 = vadd.f32 %v503_v49, %v418_v55  ;;  %v554_v58 = vpop.f32.mrb[4].mxu1  ;;  %v527_v59 = vpop.f32.mrb[5].mxu0 }
 0x100   :  { %v528_v60 = vadd.f32 %v527_v59, %v526_v56  ;;  %v555_v61 = vpop.f32.mrb[5].mxu1  ;;  %v529_v62 = vpop.f32.mrb[6].mxu0 }
 0x101   :  { %456 = vst [vmem:[%s762_s3 + $0x8] sm:$0xff] %v452_v57  ;;  %v556_v63 = vadd.f32 %v555_v61, %v554_v58  ;;  %v557_v0 = vpop.f32.mrb[6].mxu1  ;;  %v530_v1 = vpop.f32.mrb[7].mxu0 }
 0x102   :  { %v531_v2 = vadd.f32 %v530_v1, %v529_v62  ;;  %v558_v3 = vpop.f32.mrb[7].mxu1 }
 0x103   :  { %v423_v4 = vadd.f32 %v556_v63, %v528_v60  ;;  %v559_v5 = vadd.f32 %v558_v3, %v557_v0 }
 0x105   :  { %v453_v6 = vadd.f32 %v503_v49, %v423_v4  ;;  %v426_v7 = vadd.f32 %v559_v5, %v531_v2 }
 0x107   :  { %457 = vst [vmem:[%s762_s3 + $0x10] sm:$0xff] %v453_v6  ;;  %v454_v8 = vadd.f32 %v503_v49, %v426_v7 }
 0x109   :  { %458 = vst [vmem:[%s762_s3 + $0x18] sm:$0xff] %v454_v8 }

// kernel: resnet_forward.48
= control target key start
LH: loop header
LB: loop body
LE: loop exit
PB: predicated region body
PF: predicated region fallthrough
CT: control target
= control target key end

     0   :  { %s444_s1 = inlined_call_operand.vmem [shape: bf16[256,128], index: 1, kind: input, shape index: {}]   ;;  %s445_s0 = inlined_call_operand.vmem [shape: bf16[32,256], index: 0, kind: input, shape index: {}]   ;;  %s446_s2 = inlined_call_operand.vmem [shape: f32[1,128], index: 2, kind: input, shape index: {}]   ;;  %s447_s3 = inlined_call_operand.vmem [shape: f32[32,128], index: 3, kind: output, shape index: {}]  }
   0x1   :  { %v327_v0 = vld [vmem:[%s444_s1 + $0x40] sm:$0xff]   ;;  %v329_v2 = vld [vmem:[%s444_s1 + $0x48] sm:$0xff]   ;;  %v331_v4 = vld [vmem:[%s444_s1 + $0x50] sm:$0xff]  }
   0x2   :  { %v328_v1 = vld [vmem:[%s444_s1] sm:$0xff]   ;;  %283 = vmatprep.subr.bf16.mxu0 %v327_v0  ;;  %311 = vmatprep.subr.bf16.mxu1 %v327_v0  ;;  %v330_v3 = vld [vmem:[%s444_s1 + $0x8] sm:$0xff]   ;;  %v332_v5 = vld [vmem:[%s444_s1 + $0x10] sm:$0xff]  }
   0x3   :  { %284 = vmatpush3.bf16.msra.mxu0 %v328_v1  ;;  %319 = vmatpush3.bf16.msra.mxu1 %v328_v1  ;;  %v333_v6 = vld [vmem:[%s444_s1 + $0x58] sm:$0xff]   ;;  %v335_v8 = vld [vmem:[%s444_s1 + $0x60] sm:$0xff]   ;;  %v337_v10 = vld [vmem:[%s444_s1 + $0x68] sm:$0xff]  }
   0x4   :  { %285 = vmatprep.subr.bf16.mxu0 %v329_v2  ;;  %312 = vmatprep.subr.bf16.mxu1 %v329_v2  ;;  %v334_v7 = vld [vmem:[%s444_s1 + $0x18] sm:$0xff]   ;;  %v336_v9 = vld [vmem:[%s444_s1 + $0x20] sm:$0xff]   ;;  %v338_v13 = vld [vmem:[%s444_s1 + $0x28] sm:$0xff]  }
   0x5   :  { %v345_v11 = vld [vmem:[%s445_s0 + $0x4] ss:$8 sps:$4 sm:$0xff]   ;;  %v348_v12 = vld [vmem:[%s445_s0 + $0x14] ss:$8 sps:$4 sm:$0xff]   ;;  %v343_v18 = vld [vmem:[%s445_s0] ss:$8 sps:$4 sm:$0xff]  }
   0x6   :  { %v339_v14 = vld [vmem:[%s444_s1 + $0x70] sm:$0xff]   ;;  %211 = vmatprep.mubr.bf16.mxu0 %v345_v11  ;;  %219 = vmatprep.mubr.bf16.mxu1 %v348_v12  ;;  %v341_v16 = vld [vmem:[%s444_s1 + $0x78] sm:$0xff]   ;;  %v282_v23 = vld [vmem:[%s446_s2] ss:$0 sm:$0xff] }
   0x7   :  { %286 = vmatpush3.bf16.msra.mxu0 %v330_v3  ;;  %320 = vmatpush3.bf16.msra.mxu1 %v330_v3  ;;  %v340_v15 = vld [vmem:[%s444_s1 + $0x30] sm:$0xff]   ;;  %v342_v17 = vld [vmem:[%s444_s1 + $0x38] sm:$0xff]  }
   0x8   :  { %287 = vmatprep.subr.bf16.mxu0 %v331_v4  ;;  %313 = vmatprep.subr.bf16.mxu1 %v331_v4  ;;  %v346_v19 = vld [vmem:[%s445_s0 + $0x10] ss:$8 sps:$4 sm:$0xff]  }
   0xb   :  { %288 = vmatpush3.bf16.msra.mxu0 %v332_v5  ;;  %321 = vmatpush3.bf16.msra.mxu1 %v332_v5 }
   0xc   :  { %289 = vmatprep.subr.bf16.mxu0 %v333_v6  ;;  %314 = vmatprep.subr.bf16.mxu1 %v333_v6 }
   0xf   :  { %290 = vmatpush3.bf16.msra.mxu0 %v334_v7  ;;  %322 = vmatpush3.bf16.msra.mxu1 %v334_v7 }
  0x10   :  { %291 = vmatprep.subr.bf16.mxu0 %v335_v8  ;;  %315 = vmatprep.subr.bf16.mxu1 %v335_v8 }
  0x13   :  { %292 = vmatpush3.bf16.msra.mxu0 %v336_v9  ;;  %323 = vmatpush3.bf16.msra.mxu1 %v336_v9 }
  0x14   :  { %293 = vmatprep.subr.bf16.mxu0 %v337_v10  ;;  %316 = vmatprep.subr.bf16.mxu1 %v337_v10 }
  0x17   :  { %294 = vmatpush3.bf16.msra.mxu0 %v338_v13  ;;  %324 = vmatpush3.bf16.msra.mxu1 %v338_v13 }
  0x18   :  { %295 = vmatprep.subr.bf16.mxu0 %v339_v14  ;;  %317 = vmatprep.subr.bf16.mxu1 %v339_v14 }
  0x1b   :  { %296 = vmatpush3.bf16.msra.mxu0 %v340_v15  ;;  %325 = vmatpush3.bf16.msra.mxu1 %v340_v15 }
  0x1c   :  { %297 = vmatprep.subr.bf16.mxu0 %v341_v16  ;;  %318 = vmatprep.subr.bf16.mxu1 %v341_v16 }
  0x1f   :  { %298 = vmatpush3.bf16.msra.mxu0 %v342_v17  ;;  %326 = vmatpush3.bf16.msra.mxu1 %v342_v17 }
  0x22   :  { %212 = vmatmul.mubr.bf16.vlgmr.msra.gmra.mrb[0].mxu0 %v343_v18  ;;  %220 = vmatmul.mubr.bf16.vlgmr.msra.gmra.mrb[0].mxu1 %v346_v19 }
  0xf5   :  { %v299_v20 = vpop.f32.mrb[0].mxu0  ;;  %v305_v21 = vpop.f32.mrb[0].mxu1 }
  0xf6   :  { %v300_v22 = vpop.f32.mrb[1].mxu0  ;;  %v306_v24 = vpop.f32.mrb[1].mxu1 }
  0xf7   :  { %v301_v25 = vadd.f32 %v300_v22, %v299_v20  ;;  %v307_v26 = vadd.f32 %v306_v24, %v305_v21  ;;  %v302_v27 = vpop.f32.mrb[2].mxu0  ;;  %v308_v28 = vpop.f32.mrb[2].mxu1 }
  0xf8   :  { %v303_v29 = vpop.f32.mrb[3].mxu0  ;;  %v309_v30 = vpop.f32.mrb[3].mxu1 }
  0xf9   :  { %v250_v31 = vadd.f32 %v301_v25, %v282_v23  ;;  %v252_v32 = vadd.f32 %v307_v26, %v282_v23  ;;  %v304_v33 = vadd.f32 %v303_v29, %v302_v27  ;;  %v310_v34 = vadd.f32 %v309_v30, %v308_v28 }
  0xfb   :  { %254 = vst [vmem:[%s447_s3] sm:$0xff] %v250_v31  ;;  %256 = vst [vmem:[%s447_s3 + $0x10] sm:$0xff] %v252_v32  ;;  %v251_v35 = vadd.f32 %v304_v33, %v282_v23  ;;  %v253_v36 = vadd.f32 %v310_v34, %v282_v23 }
  0xfd   :  { %255 = vst [vmem:[%s447_s3 + $0x8] sm:$0xff] %v251_v35  ;;  %257 = vst [vmem:[%s447_s3 + $0x18] sm:$0xff] %v253_v36 }

// kernel: resnet_forward.50
= control target key start
LH: loop header
LB: loop body
LE: loop exit
PB: predicated region body
PF: predicated region fallthrough
CT: control target
= control target key end

     0   :  { %vm30_vm0 = vcmask 523264   ;;  %s493_s0 = inlined_call_operand.vmem [shape: f32[128,64], index: 0, kind: input, shape index: {}]   ;;  %s494_s1 = inlined_call_operand.vmem [shape: f32[1,64], index: 1, kind: input, shape index: {}]   ;;  %s495_s2 = inlined_call_operand.vmem [shape: f32[1,64], index: 2, kind: input, shape index: {}]   ;;  %s496_s3 = inlined_call_operand.vmem [shape: f32[128,64], index: 3, kind: output, shape index: {}]  }
   0x1   :  { %v14_v0 = vld [vmem:[%s493_s0] sm:$0xff]  ;;  %v15_v1 = vld [vmem:[%s493_s0 + $0x8] sm:$0xff]  ;;  %v16_v2 = vld [vmem:[%s493_s0 + $0x10] sm:$0xff] }
   0x2   :  { %v17_v3 = vld [vmem:[%s493_s0 + $0x18] sm:$0xff]  ;;  %v31_v4 = vsel %vm30_vm0, %v14_v0, 0.0  ;;  %v32_v5 = vsel %vm30_vm0, %v15_v1, 0.0  ;;  %v34_v6 = vsel %vm30_vm0, %v16_v2, 0.0  ;;  %v18_v7 = vld [vmem:[%s493_s0 + $0x20] sm:$0xff]  ;;  %v19_v10 = vld [vmem:[%s493_s0 + $0x28] sm:$0xff] }
   0x3   :  { %v33_v8 = vadd.f32 %v32_v5, %v31_v4  ;;  %v36_v9 = vsel %vm30_vm0, %v17_v3, 0.0  ;;  %v38_v12 = vsel %vm30_vm0, %v18_v7, 0.0  ;;  %v20_v13 = vld [vmem:[%s493_s0 + $0x30] sm:$0xff]  ;;  %v40_v15 = vsel %vm30_vm0, %v19_v10, 0.0  ;;  %v21_v16 = vld [vmem:[%s493_s0 + $0x38] sm:$0xff]  ;;  %v22_v19 = vld [vmem:[%s493_s0 + $0x40] sm:$0xff] }
   0x4   :  { %v42_v18 = vsel %vm30_vm0, %v20_v13, 0.0  ;;  %v44_v21 = vsel %vm30_vm0, %v21_v16, 0.0  ;;  %v23_v22 = vld [vmem:[%s493_s0 + $0x48] sm:$0xff]  ;;  %v46_v24 = vsel %vm30_vm0, %v22_v19, 0.0  ;;  %v24_v25 = vld [vmem:[%s493_s0 + $0x50] sm:$0xff]  ;;  %v25_v28 = vld [vmem:[%s493_s0 + $0x58] sm:$0xff] }
   0x5   :  { %v35_v11 = vadd.f32 %v34_v6, %v33_v8  ;;  %v48_v27 = vsel %vm30_vm0, %v23_v22, 0.0  ;;  %v50_v30 = vsel %vm30_vm0, %v24_v25, 0.0  ;;  %v26_v31 = vld [vmem:[%s493_s0 + $0x60] sm:$0xff]  ;;  %v52_v33 = vsel %vm30_vm0, %v25_v28, 0.0  ;;  %v27_v34 = vld [vmem:[%s493_s0 + $0x68] sm:$0xff]  ;;  %v28_v37 = vld [vmem:[%s493_s0 + $0x70] sm:$0xff] }
   0x6   :  { %v54_v36 = vsel %vm30_vm0, %v26_v31, 0.0  ;;  %v56_v39 = vsel %vm30_vm0, %v27_v34, 0.0  ;;  %v29_v40 = vld [vmem:[%s493_s0 + $0x78] sm:$0xff]  ;;  %v58_v42 = vsel %vm30_vm0, %v28_v37, 0.0 }
   0x7   :  { %v37_v14 = vadd.f32 %v36_v9, %v35_v11  ;;  %v60_v44 = vsel %vm30_vm0, %v29_v40, 0.0 }
   0x9   :  { %v39_v17 = vadd.f32 %v38_v12, %v37_v14 }
   0xb   :  { %v41_v20 = vadd.f32 %v40_v15, %v39_v17 }
   0xd   :  { %v43_v23 = vadd.f32 %v42_v18, %v41_v20 }
   0xf   :  { %v45_v26 = vadd.f32 %v44_v21, %v43_v23 }
  0x11   :  { %v47_v29 = vadd.f32 %v46_v24, %v45_v26 }
  0x13   :  { %v49_v32 = vadd.f32 %v48_v27, %v47_v29 }
  0x15   :  { %v51_v35 = vadd.f32 %v50_v30, %v49_v32 }
  0x17   :  { %v53_v38 = vadd.f32 %v52_v33, %v51_v35 }
  0x19   :  { %v55_v41 = vadd.f32 %v54_v36, %v53_v38 }
  0x1b   :  { %v57_v43 = vadd.f32 %v56_v39, %v55_v41 }
  0x1d   :  { %v59_v45 = vadd.f32 %v58_v42, %v57_v43 }
  0x1f   :  { %v61_v46 = vadd.f32 %v60_v44, %v59_v45 }
  0x21   :  { %v62_v47 = vrot.slane %v61_v46, 4 }
  0x23   :  { %v63_v48 = vadd.f32 %v62_v47, %v61_v46 }
  0x25   :  { %v64_v49 = vrot.slane %v63_v48, 2 }
  0x27   :  { %v65_v50 = vadd.f32 %v64_v49, %v63_v48 }
  0x29   :  { %v66_v51 = vrot.slane %v65_v50, 1 }
  0x2b   :  { %v67_v52 = vadd.f32 %v66_v51, %v65_v50 }
  0x2d   :  { %v68_v53 = vmul.f32 0.0078125, %v67_v52 }
  0x2f   :  { %v327_v54 = vsub.f32 %v14_v0, %v68_v53  ;;  %v329_v55 = vsub.f32 %v15_v1, %v68_v53  ;;  %v331_v56 = vsub.f32 %v16_v2, %v68_v53  ;;  %v333_v57 = vsub.f32 %v17_v3, %v68_v53 }
  0x30   :  { %v335_v58 = vsub.f32 %v18_v7, %v68_v53  ;;  %v343_v62 = vsub.f32 %v19_v10, %v68_v53  ;;  %v347_v0 = vsub.f32 %v20_v13, %v68_v53  ;;  %v354_v6 = vsub.f32 %v21_v16, %v68_v53 }
  0x31   :  { %v85_v59 = vmul.f32 %v327_v54, %v327_v54  ;;  %v86_v60 = vmul.f32 %v329_v55, %v329_v55  ;;  %v87_v61 = vmul.f32 %v331_v56, %v331_v56  ;;  %v88_v63 = vmul.f32 %v333_v57, %v333_v57 }
  0x32   :  { %v89_v1 = vmul.f32 %v335_v58, %v335_v58  ;;  %v90_v7 = vmul.f32 %v343_v62, %v343_v62  ;;  %v359_v10 = vsub.f32 %v22_v19, %v68_v53  ;;  %v91_v11 = vmul.f32 %v347_v0, %v347_v0 }
  0x33   :  { %v101_v2 = vsel %vm30_vm0, %v85_v59, 0.0  ;;  %v102_v3 = vsel %vm30_vm0, %v86_v60, 0.0  ;;  %v104_v4 = vsel %vm30_vm0, %v87_v61, 0.0  ;;  %v106_v8 = vsel %vm30_vm0, %v88_v63, 0.0 }
  0x34   :  { %v103_v5 = vadd.f32 %v102_v3, %v101_v2  ;;  %v108_v12 = vsel %vm30_vm0, %v89_v1, 0.0  ;;  %v364_v14 = vsub.f32 %v23_v22, %v68_v53  ;;  %v92_v15 = vmul.f32 %v354_v6, %v354_v6 }
  0x35   :  { %v110_v16 = vsel %vm30_vm0, %v90_v7, 0.0  ;;  %v369_v18 = vsub.f32 %v24_v25, %v68_v53  ;;  %v93_v19 = vmul.f32 %v359_v10, %v359_v10  ;;  %v112_v20 = vsel %vm30_vm0, %v91_v11, 0.0 }
  0x36   :  { %v105_v9 = vadd.f32 %v104_v4, %v103_v5  ;;  %v374_v23 = vsub.f32 %v25_v28, %v68_v53  ;;  %v94_v22 = vmul.f32 %v364_v14, %v364_v14  ;;  %v114_v24 = vsel %vm30_vm0, %v92_v15, 0.0  ;;  %v239_v5 = vld [vmem:[%s494_s1] ss:$0 sm:$0xff] }
  0x37   :  { %v379_v27 = vsub.f32 %v26_v31, %v68_v53  ;;  %v95_v25 = vmul.f32 %v369_v18, %v369_v18  ;;  %v116_v29 = vsel %vm30_vm0, %v93_v19, 0.0  ;;  %v384_v32 = vsub.f32 %v27_v34, %v68_v53 }
  0x38   :  { %v107_v13 = vadd.f32 %v106_v8, %v105_v9  ;;  %v96_v28 = vmul.f32 %v374_v23, %v374_v23  ;;  %v118_v33 = vsel %vm30_vm0, %v94_v22, 0.0  ;;  %v389_v36 = vsub.f32 %v28_v37, %v68_v53 }
  0x39   :  { %v97_v31 = vmul.f32 %v379_v27, %v379_v27  ;;  %v120_v38 = vsel %vm30_vm0, %v95_v25, 0.0  ;;  %v394_v41 = vsub.f32 %v29_v40, %v68_v53  ;;  %v98_v34 = vmul.f32 %v384_v32, %v384_v32 }
  0x3a   :  { %v109_v17 = vadd.f32 %v108_v12, %v107_v13  ;;  %v122_v42 = vsel %vm30_vm0, %v96_v28, 0.0  ;;  %v99_v44 = vmul.f32 %v389_v36, %v389_v36  ;;  %v240_v12 = vld [vmem:[%s495_s2] ss:$0 sm:$0xff] }
  0x3b   :  { %v124_v37 = vsel %vm30_vm0, %v97_v31, 0.0  ;;  %v100_v46 = vmul.f32 %v394_v41, %v394_v41  ;;  %v126_v47 = vsel %vm30_vm0, %v98_v34, 0.0 }
  0x3c   :  { %v111_v21 = vadd.f32 %v110_v16, %v109_v17  ;;  %v128_v40 = vsel %vm30_vm0, %v99_v44, 0.0 }
  0x3d   :  { %v130_v50 = vsel %vm30_vm0, %v100_v46, 0.0 }
  0x3e   :  { %v113_v26 = vadd.f32 %v112_v20, %v111_v21 }
  0x40   :  { %v115_v30 = vadd.f32 %v114_v24, %v113_v26 }
  0x42   :  { %v117_v35 = vadd.f32 %v116_v29, %v115_v30 }
  0x44   :  { %v119_v39 = vadd.f32 %v118_v33, %v117_v35 }
  0x46   :  { %v121_v43 = vadd.f32 %v120_v38, %v119_v39 }
  0x48   :  { %v123_v45 = vadd.f32 %v122_v42, %v121_v43 }
  0x4a   :  { %v125_v48 = vadd.f32 %v124_v37, %v123_v45 }
  0x4c   :  { %v127_v49 = vadd.f32 %v126_v47, %v125_v48 }
  0x4e   :  { %v129_v51 = vadd.f32 %v128_v40, %v127_v49 }
  0x50   :  { %v131_v52 = vadd.f32 %v130_v50, %v129_v51 }
  0x52   :  { %v132_v53 = vrot.slane %v131_v52, 4 }
  0x54   :  { %v133_v59 = vadd.f32 %v132_v53, %v131_v52 }
  0x56   :  { %v134_v60 = vrot.slane %v133_v59, 2 }
  0x58   :  { %v135_v61 = vadd.f32 %v134_v60, %v133_v59 }
  0x5a   :  { %v136_v63 = vrot.slane %v135_v61, 1 }
  0x5c   :  { %v137_v1 = vadd.f32 %v136_v63, %v135_v61 }
  0x5e   :  { %v138_v2 = vmul.f32 0.0078125, %v137_v1 }
  0x60   :  { %v139_v3 = vadd.f32 1e-05, %v138_v2 }
  0x62   :  { %241 = vrsqrt.f32 %v139_v3 }
  0x6c   :  { %v242_v4 = vpop.eup %241 }
  0x6d   :  { %v141_v7 = vmul.f32 %v242_v4, %v327_v54  ;;  %v142_v8 = vmul.f32 %v242_v4, %v329_v55  ;;  %v143_v9 = vmul.f32 %v242_v4, %v331_v56  ;;  %v144_v11 = vmul.f32 %v242_v4, %v333_v57 }
  0x6e   :  { %v145_v13 = vmul.f32 %v242_v4, %v335_v58  ;;  %v146_v15 = vmul.f32 %v242_v4, %v343_v62  ;;  %v147_v16 = vmul.f32 %v242_v4, %v347_v0  ;;  %v148_v17 = vmul.f32 %v242_v4, %v354_v6 }
  0x6f   :  { %v164_v19 = vmul.f32 %v239_v5, %v141_v7  ;;  %v165_v54 = vmul.f32 %v239_v5, %v142_v8  ;;  %v166_v20 = vmul.f32 %v239_v5, %v143_v9  ;;  %v167_v55 = vmul.f32 %v239_v5, %v144_v11 }
  0x70   :  { %v168_v21 = vmul.f32 %v239_v5, %v145_v13  ;;  %v169_v56 = vmul.f32 %v239_v5, %v146_v15  ;;  %v170_v22 = vmul.f32 %v239_v5, %v147_v16  ;;  %v171_v57 = vmul.f32 %v239_v5, %v148_v17 }
  0x71   :  { %v187_v24 = vadd.f32 %v240_v12, %v164_v19  ;;  %v188_v26 = vadd.f32 %v240_v12, %v165_v54  ;;  %v189_v25 = vadd.f32 %v240_v12, %v166_v20  ;;  %v190_v29 = vadd.f32 %v240_v12, %v167_v55 }
  0x72   :  { %v191_v30 = vadd.f32 %v240_v12, %v168_v21  ;;  %v192_v58 = vadd.f32 %v240_v12, %v169_v56  ;;  %v193_v28 = vadd.f32 %v240_v12, %v170_v22  ;;  %v194_v62 = vadd.f32 %v240_v12, %v171_v57 }
  0x73   :  { %v203_v33 = vmax.f32 %v187_v24, 0.0  ;;  %v204_v0 = vmax.f32 %v188_v26, 0.0  ;;  %v205_v35 = vmax.f32 %v189_v25, 0.0  ;;  %v206_v6 = vmax.f32 %v190_v29, 0.0 }
  0x74   :  { %v207_v31 = vmax.f32 %v191_v30, 0.0  ;;  %v208_v38 = vmax.f32 %v192_v58, 0.0  ;;  %v209_v39 = vmax.f32 %v193_v28, 0.0  ;;  %v210_v34 = vmax.f32 %v194_v62, 0.0 }
  0x75   :  { %219 = vst.msk [vmem:[%s496_s3] sm:$0xff] %vm30_vm0, %v203_v33  ;;  %220 = vst.msk [vmem:[%s496_s3 + $0x8] sm:$0xff] %vm30_vm0, %v204_v0  ;;  %v149_v42 = vmul.f32 %v242_v4, %v359_v10  ;;  %v150_v43 = vmul.f32 %v242_v4, %v364_v14  ;;  %v151_v44 = vmul.f32 %v242_v4, %v369_v18 }
  0x76   :  { %221 = vst.msk [vmem:[%s496_s3 + $0x10] sm:$0xff] %vm30_vm0, %v205_v35  ;;  %222 = vst.msk [vmem:[%s496_s3 + $0x18] sm:$0xff] %vm30_vm0, %v206_v6  ;;  %v152_v37 = vmul.f32 %v242_v4, %v374_v23  ;;  %v153_v10 = vmul.f32 %v242_v4, %v379_v27  ;;  %v154_v14 = vmul.f32 %v242_v4, %v384_v32 }
  0x77   :  { %223 = vst.msk [vmem:[%s496_s3 + $0x20] sm:$0xff] %vm30_vm0, %v207_v31  ;;  %224 = vst.msk [vmem:[%s496_s3 + $0x28] sm:$0xff] %vm30_vm0, %v208_v38  ;;  %v155_v18 = vmul.f32 %v242_v4, %v389_v36  ;;  %v156_v23 = vmul.f32 %v242_v4, %v394_v41  ;;  %v172_v45 = vmul.f32 %v239_v5, %v149_v42 }
  0x78   :  { %225 = vst.msk [vmem:[%s496_s3 + $0x30] sm:$0xff] %vm30_vm0, %v209_v39  ;;  %226 = vst.msk [vmem:[%s496_s3 + $0x38] sm:$0xff] %vm30_vm0, %v210_v34  ;;  %v173_v46 = vmul.f32 %v239_v5, %v150_v43  ;;  %v174_v47 = vmul.f32 %v239_v5, %v151_v44  ;;  %v175_v48 = vmul.f32 %v239_v5, %v152_v37 }
  0x79   :  { %v176_v40 = vmul.f32 %v239_v5, %v153_v10  ;;  %v177_v49 = vmul.f32 %v239_v5, %v154_v14  ;;  %v178_v50 = vmul.f32 %v239_v5, %v155_v18  ;;  %v179_v51 = vmul.f32 %v239_v5, %v156_v23 }
  0x7a   :  { %v195_v52 = vadd.f32 %v240_v12, %v172_v45  ;;  %v196_v53 = vadd.f32 %v240_v12, %v173_v46  ;;  %v197_v59 = vadd.f32 %v240_v12, %v174_v47  ;;  %v198_v60 = vadd.f32 %v240_v12, %v175_v48 }
  0x7b   :  { %v199_v61 = vadd.f32 %v240_v12, %v176_v40  ;;  %v200_v27 = vadd.f32 %v240_v12, %v177_v49  ;;  %v201_v63 = vadd.f32 %v240_v12, %v178_v50  ;;  %v202_v32 = vadd.f32 %v240_v12, %v179_v51 }
  0x7c   :  { %v211_v1 = vmax.f32 %v195_v52, 0.0  ;;  %v212_v36 = vmax.f32 %v196_v53, 0.0  ;;  %v213_v2 = vmax.f32 %v197_v59, 0.0  ;;  %v214_v41 = vmax.f32 %v198_v60, 0.0 }
  0x7d   :  { %v215_v3 = vmax.f32 %v199_v61, 0.0  ;;  %v216_v4 = vmax.f32 %v200_v27, 0.0  ;;  %v217_v7 = vmax.f32 %v201_v63, 0.0  ;;  %v218_v8 = vmax.f32 %v202_v32, 0.0 }
  0x7e   :  { %227 = vst.msk [vmem:[%s496_s3 + $0x40] sm:$0xff] %vm30_vm0, %v211_v1  ;;  %228 = vst.msk [vmem:[%s496_s3 + $0x48] sm:$0xff] %vm30_vm0, %v212_v36 }
  0x7f   :  { %229 = vst.msk [vmem:[%s496_s3 + $0x50] sm:$0xff] %vm30_vm0, %v213_v2  ;;  %230 = vst.msk [vmem:[%s496_s3 + $0x58] sm:$0xff] %vm30_vm0, %v214_v41 }
  0x80   :  { %231 = vst.msk [vmem:[%s496_s3 + $0x60] sm:$0xff] %vm30_vm0, %v215_v3  ;;  %232 = vst.msk [vmem:[%s496_s3 + $0x68] sm:$0xff] %vm30_vm0, %v216_v4 }
  0x81   :  { %233 = vst.msk [vmem:[%s496_s3 + $0x70] sm:$0xff] %vm30_vm0, %v217_v7  ;;  %234 = vst.msk [vmem:[%s496_s3 + $0x78] sm:$0xff] %vm30_vm0, %v218_v8 }

// kernel: resnet_forward.52
= control target key start
LH: loop header
LB: loop body
LE: loop exit
PB: predicated region body
PF: predicated region fallthrough
CT: control target
= control target key end

     0   :  { %s2032_s1 = inlined_call_operand.vmem [shape: bf16[640,128], index: 1, kind: input, shape index: {}]   ;;  %s2033_s0 = inlined_call_operand.vmem [shape: bf16[128,640], index: 0, kind: input, shape index: {}]   ;;  %s2034_s2 = inlined_call_operand.vmem [shape: f32[1,128], index: 2, kind: input, shape index: {}]   ;;  %s2035_s3 = inlined_call_operand.vmem [shape: f32[1,128], index: 3, kind: input, shape index: {}]   ;;  %s2036_s4 = inlined_call_operand.vmem [shape: f32[128,128], index: 4, kind: input, shape index: {}]   ;;  %s2037_s5 = inlined_call_operand.vmem [shape: f32[128,128], index: 5, kind: output, shape index: {}]  }
   0x1   :  { %v1538_v0 = vld [vmem:[%s2032_s1 + $0x40] sm:$0xff]   ;;  %v1542_v4 = vld [vmem:[%s2032_s1 + $0x48] sm:$0xff]   ;;  %v1546_v8 = vld [vmem:[%s2032_s1 + $0x50] sm:$0xff]  }
   0x2   :  { %v1539_v1 = vld [vmem:[%s2032_s1 + $0xc0] sm:$0xff]   ;;  %1346 = vmatprep.subr.bf16.mxu0 %v1538_v0  ;;  %v1543_v5 = vld [vmem:[%s2032_s1 + $0xc8] sm:$0xff]   ;;  %v1547_v9 = vld [vmem:[%s2032_s1 + $0xd0] sm:$0xff]  }
   0x3   :  { %v1540_v2 = vld [vmem:[%s2032_s1] sm:$0xff]   ;;  %1410 = vmatprep.subr.bf16.mxu1 %v1539_v1  ;;  %v1544_v6 = vld [vmem:[%s2032_s1 + $0x8] sm:$0xff]   ;;  %v1548_v10 = vld [vmem:[%s2032_s1 + $0x10] sm:$0xff]  }
   0x4   :  { %v1541_v3 = vld [vmem:[%s2032_s1 + $0x80] sm:$0xff]   ;;  %1347 = vmatpush3.bf16.msra.mxu0 %v1540_v2  ;;  %v1545_v7 = vld [vmem:[%s2032_s1 + $0x88] sm:$0xff]   ;;  %v1549_v11 = vld [vmem:[%s2032_s1 + $0x90] sm:$0xff]  }
   0x5   :  { %1411 = vmatpush3.bf16.msra.mxu1 %v1541_v3  ;;  %1348 = vmatprep.subr.bf16.mxu0 %v1542_v4  ;;  %v1550_v12 = vld [vmem:[%s2032_s1 + $0x58] sm:$0xff]   ;;  %v1554_v16 = vld [vmem:[%s2032_s1 + $0x60] sm:$0xff]   ;;  %v1558_v20 = vld [vmem:[%s2032_s1 + $0x68] sm:$0xff]  }
   0x6   :  { %1412 = vmatprep.subr.bf16.mxu1 %v1543_v5  ;;  %v1551_v13 = vld [vmem:[%s2032_s1 + $0xd8] sm:$0xff]   ;;  %v1555_v17 = vld [vmem:[%s2032_s1 + $0xe0] sm:$0xff]   ;;  %v1559_v21 = vld [vmem:[%s2032_s1 + $0xe8] sm:$0xff]  }
   0x7   :  { %v1552_v14 = vld [vmem:[%s2032_s1 + $0x18] sm:$0xff]   ;;  %v1556_v18 = vld [vmem:[%s2032_s1 + $0x20] sm:$0xff]   ;;  %v1560_v22 = vld [vmem:[%s2032_s1 + $0x28] sm:$0xff]  }
   0x8   :  { %1349 = vmatpush3.bf16.msra.mxu0 %v1544_v6  ;;  %v1553_v15 = vld [vmem:[%s2032_s1 + $0x98] sm:$0xff]   ;;  %v1557_v19 = vld [vmem:[%s2032_s1 + $0xa0] sm:$0xff]   ;;  %v1561_v23 = vld [vmem:[%s2032_s1 + $0xa8] sm:$0xff]  }
   0x9   :  { %1413 = vmatpush3.bf16.msra.mxu1 %v1545_v7  ;;  %1350 = vmatprep.subr.bf16.mxu0 %v1546_v8  ;;  %v1562_v24 = vld [vmem:[%s2032_s1 + $0x70] sm:$0xff]   ;;  %v1566_v28 = vld [vmem:[%s2032_s1 + $0x78] sm:$0xff]   ;;  %v1575_v35 = vld [vmem:[%s2033_s0 + $0xc] ss:$20 sps:$4 sm:$0xff]  }
   0xa   :  { %1414 = vmatprep.subr.bf16.mxu1 %v1547_v9  ;;  %v1563_v25 = vld [vmem:[%s2032_s1 + $0xf0] sm:$0xff]   ;;  %v1567_v29 = vld [vmem:[%s2032_s1 + $0xf8] sm:$0xff]   ;;  %v1576_v36 = vld [vmem:[%s2032_s1 + $0x100] sm:$0xff]   ;;  %762 = vmatprep.mubr.bf16.mxu1 %v1575_v35 }
   0xb   :  { %v1564_v26 = vld [vmem:[%s2032_s1 + $0x30] sm:$0xff]   ;;  %v1568_v30 = vld [vmem:[%s2032_s1 + $0x38] sm:$0xff]   ;;  %v1577_v37 = vld [vmem:[%s2033_s0 + $0x2c] ss:$20 sps:$4 sm:$0xff]  }
   0xc   :  { %1351 = vmatpush3.bf16.msra.mxu0 %v1548_v10  ;;  %v1565_v27 = vld [vmem:[%s2032_s1 + $0xb0] sm:$0xff]   ;;  %v1569_v31 = vld [vmem:[%s2032_s1 + $0xb8] sm:$0xff]   ;;  %v1583_v39 = vld [vmem:[%s2032_s1 + $0x108] sm:$0xff]  }
   0xd   :  { %1415 = vmatpush3.bf16.msra.mxu1 %v1549_v11  ;;  %1352 = vmatprep.subr.bf16.mxu0 %v1550_v12  ;;  %v1570_v32 = vld [vmem:[%s2033_s0] ss:$20 sps:$4 sm:$0xff]   ;;  %v1572_v33 = vld [vmem:[%s2033_s0 + $0x4] ss:$20 sps:$4 sm:$0xff]   ;;  %v1573_v34 = vld [vmem:[%s2033_s0 + $0x8] ss:$20 sps:$4 sm:$0xff]  }
   0xe   :  { %1416 = vmatprep.subr.bf16.mxu1 %v1551_v13  ;;  %665 = vmatprep.mubr.bf16.mxu0 %v1572_v33  ;;  %v1579_v38 = vld [vmem:[%s2033_s0 + $0x34] ss:$20 sps:$4 sm:$0xff]   ;;  %v1582_v41 = vld [vmem:[%s2033_s0 + $0x30] ss:$20 sps:$4 sm:$0xff]   ;;  %v1597_v45 = vld [vmem:[%s2032_s1 + $0x118] sm:$0xff]  }
   0xf   :  { %v1581_v40 = vld [vmem:[%s2033_s0 + $0x28] ss:$20 sps:$4 sm:$0xff]   ;;  %v1590_v44 = vld [vmem:[%s2032_s1 + $0x110] sm:$0xff]   ;;  %v1589_v47 = vld [vmem:[%s2033_s0 + $0x58] ss:$20 sps:$4 sm:$0xff]  }
  0x10   :  { %1353 = vmatpush3.bf16.msra.mxu0 %v1552_v14  ;;  %v1584_v42 = vld [vmem:[%s2033_s0 + $0x54] ss:$20 sps:$4 sm:$0xff]   ;;  %v1586_v43 = vld [vmem:[%s2033_s0 + $0x5c] ss:$20 sps:$4 sm:$0xff]   ;;  %v1593_v49 = vld [vmem:[%s2033_s0 + $0x84] ss:$20 sps:$4 sm:$0xff]  }
  0x11   :  { %1417 = vmatpush3.bf16.msra.mxu1 %v1553_v15  ;;  %1354 = vmatprep.subr.bf16.mxu0 %v1554_v16  ;;  %v1588_v46 = vld [vmem:[%s2033_s0 + $0x50] ss:$20 sps:$4 sm:$0xff]   ;;  %v1611_v51 = vld [vmem:[%s2032_s1 + $0x128] sm:$0xff]   ;;  %v1596_v53 = vld [vmem:[%s2033_s0 + $0x80] ss:$20 sps:$4 sm:$0xff]  }
  0x12   :  { %1418 = vmatprep.subr.bf16.mxu1 %v1555_v17  ;;  %v1591_v48 = vld [vmem:[%s2033_s0 + $0x7c] ss:$20 sps:$4 sm:$0xff]   ;;  %v1604_v50 = vld [vmem:[%s2032_s1 + $0x120] sm:$0xff]   ;;  %v1595_v52 = vld [vmem:[%s2033_s0 + $0x78] ss:$20 sps:$4 sm:$0xff]  }
  0x13   :  { %v1598_v54 = vld [vmem:[%s2033_s0 + $0xa4] ss:$20 sps:$4 sm:$0xff]   ;;  %v1618_v55 = vld [vmem:[%s2032_s1 + $0x130] sm:$0xff]   ;;  %v1600_v56 = vld [vmem:[%s2033_s0 + $0xac] ss:$20 sps:$4 sm:$0xff]  }
  0x14   :  { %1355 = vmatpush3.bf16.msra.mxu0 %v1556_v18  ;;  %v1625_v57 = vld [vmem:[%s2032_s1 + $0x138] sm:$0xff]   ;;  %v1602_v58 = vld [vmem:[%s2033_s0 + $0xa0] ss:$20 sps:$4 sm:$0xff]   ;;  %v1610_v63 = vld [vmem:[%s2033_s0 + $0xd0] ss:$20 sps:$4 sm:$0xff]  }
  0x15   :  { %1419 = vmatpush3.bf16.msra.mxu1 %v1557_v19  ;;  %1356 = vmatprep.subr.bf16.mxu0 %v1558_v20  ;;  %v1603_v59 = vld [vmem:[%s2033_s0 + $0xa8] ss:$20 sps:$4 sm:$0xff]   ;;  %v1605_v60 = vld [vmem:[%s2033_s0 + $0xcc] ss:$20 sps:$4 sm:$0xff]   ;;  %v1616_v2 = vld [vmem:[%s2033_s0 + $0xf0] ss:$20 sps:$4 sm:$0xff]  }
  0x16   :  { %1420 = vmatprep.subr.bf16.mxu1 %v1559_v21  ;;  %v1607_v61 = vld [vmem:[%s2033_s0 + $0xd4] ss:$20 sps:$4 sm:$0xff]   ;;  %v1614_v1 = vld [vmem:[%s2033_s0 + $0xfc] ss:$20 sps:$4 sm:$0xff]   ;;  %v1617_v3 = vld [vmem:[%s2033_s0 + $0xf8] ss:$20 sps:$4 sm:$0xff]  }
  0x17   :  { %v1609_v62 = vld [vmem:[%s2033_s0 + $0xc8] ss:$20 sps:$4 sm:$0xff]   ;;  %v1621_v5 = vld [vmem:[%s2033_s0 + $0x124] ss:$20 sps:$4 sm:$0xff]   ;;  %v1624_v7 = vld [vmem:[%s2033_s0 + $0x120] ss:$20 sps:$4 sm:$0xff]  }
  0x18   :  { %1357 = vmatpush3.bf16.msra.mxu0 %v1560_v22  ;;  %v1612_v0 = vld [vmem:[%s2033_s0 + $0xf4] ss:$20 sps:$4 sm:$0xff]   ;;  %v1619_v4 = vld [vmem:[%s2033_s0 + $0x11c] ss:$20 sps:$4 sm:$0xff]   ;;  %v1623_v6 = vld [vmem:[%s2033_s0 + $0x118] ss:$20 sps:$4 sm:$0xff]  }
  0x19   :  { %1421 = vmatpush3.bf16.msra.mxu1 %v1561_v23  ;;  %1358 = vmatprep.subr.bf16.mxu0 %v1562_v24  ;;  %v1626_v8 = vld [vmem:[%s2033_s0 + $0x10] ss:$20 sps:$4 sm:$0xff]   ;;  %v1628_v10 = vld [vmem:[%s2033_s0 + $0x38] ss:$20 sps:$4 sm:$0xff]   ;;  %v1630_v12 = vld [vmem:[%s2033_s0 + $0x60] ss:$20 sps:$4 sm:$0xff]  }
  0x1a   :  { %1422 = vmatprep.subr.bf16.mxu1 %v1563_v25  ;;  %v1627_v9 = vld [vmem:[%s2033_s0 + $0xb0] ss:$20 sps:$4 sm:$0xff]   ;;  %v1629_v11 = vld [vmem:[%s2033_s0 + $0xd8] ss:$20 sps:$4 sm:$0xff]   ;;  %v1631_v13 = vld [vmem:[%s2033_s0 + $0x100] ss:$20 sps:$4 sm:$0xff]  }
  0x1b   :  { %v1632_v14 = vld [vmem:[%s2033_s0 + $0x88] ss:$20 sps:$4 sm:$0xff]  }
  0x1c   :  { %1359 = vmatpush3.bf16.msra.mxu0 %v1564_v26  ;;  %v1633_v15 = vld [vmem:[%s2033_s0 + $0x128] ss:$20 sps:$4 sm:$0xff]  }
  0x1d   :  { %1423 = vmatpush3.bf16.msra.mxu1 %v1565_v27  ;;  %1360 = vmatprep.subr.bf16.mxu0 %v1566_v28 }
  0x1e   :  { %1424 = vmatprep.subr.bf16.mxu1 %v1567_v29 }
  0x20   :  { %1361 = vmatpush3.bf16.msra.mxu0 %v1568_v30 }
  0x21   :  { %1425 = vmatpush3.bf16.msra.mxu1 %v1569_v31  ;;  %1490 = vmatprep.subr.bf16.mxu0 %v1576_v36 }
  0x22   :  { %1522 = vmatprep.subr.bf16.mxu1 %v1576_v36 }
  0x23   :  { %666 = vmatmul.mubr.bf16.vlgmr.msra.gmra.mrb[0].mxu0 %v1570_v32 }
  0x24   :  { %763 = vmatmul.mubr.bf16.vlgmr.msra.gmra.mrb[0].mxu1 %v1573_v34  ;;  %1491 = vmatpush3.bf16.msra.mxu0 %v1576_v36 }
  0x25   :  { %673 = vmatprep.mubr.bf16.mxu0 %v1577_v37  ;;  %770 = vmatprep.mubr.bf16.mxu1 %v1579_v38 }
  0x26   :  { %1530 = vmatpush3.bf16.msra.mxu1 %v1576_v36  ;;  %1492 = vmatprep.subr.bf16.mxu0 %v1583_v39 }
  0x27   :  { %1523 = vmatprep.subr.bf16.mxu1 %v1583_v39 }
  0x28   :  { %1493 = vmatpush3.bf16.msra.mxu0 %v1583_v39 }
  0x29   :  { %1494 = vmatprep.subr.bf16.mxu0 %v1590_v44 }
  0x2a   :  { %1531 = vmatpush3.bf16.msra.mxu1 %v1583_v39 }
  0x2b   :  { %674 = vmatmul.mubr.bf16.gmra.mrb[4].mxu0 %v1581_v40  ;;  %1524 = vmatprep.subr.bf16.mxu1 %v1590_v44 }
  0x2c   :  { %771 = vmatmul.mubr.bf16.gmra.mrb[4].mxu1 %v1582_v41  ;;  %681 = vmatprep.mubr.bf16.mxu0 %v1584_v42 }
  0x2d   :  { %778 = vmatprep.mubr.bf16.mxu1 %v1586_v43  ;;  %1495 = vmatpush3.bf16.msra.mxu0 %v1590_v44 }
  0x2e   :  { %1496 = vmatprep.subr.bf16.mxu0 %v1597_v45  ;;  %1532 = vmatpush3.bf16.msra.mxu1 %v1590_v44 }
  0x2f   :  { %1525 = vmatprep.subr.bf16.mxu1 %v1597_v45 }
  0x31   :  { %1497 = vmatpush3.bf16.msra.mxu0 %v1597_v45 }
  0x32   :  { %1498 = vmatprep.subr.bf16.mxu0 %v1604_v50  ;;  %1533 = vmatpush3.bf16.msra.mxu1 %v1597_v45 }
  0x33   :  { %682 = vmatmul.mubr.bf16.gmra.mrb[8].mxu0 %v1588_v46  ;;  %1526 = vmatprep.subr.bf16.mxu1 %v1604_v50 }
  0x34   :  { %779 = vmatmul.mubr.bf16.gmra.mrb[8].mxu1 %v1589_v47  ;;  %689 = vmatprep.mubr.bf16.mxu0 %v1591_v48 }
  0x35   :  { %786 = vmatprep.mubr.bf16.mxu1 %v1593_v49  ;;  %1499 = vmatpush3.bf16.msra.mxu0 %v1604_v50 }
  0x36   :  { %1500 = vmatprep.subr.bf16.mxu0 %v1611_v51  ;;  %1534 = vmatpush3.bf16.msra.mxu1 %v1604_v50 }
  0x37   :  { %1527 = vmatprep.subr.bf16.mxu1 %v1611_v51 }
  0x39   :  { %1501 = vmatpush3.bf16.msra.mxu0 %v1611_v51 }
  0x3a   :  { %1502 = vmatprep.subr.bf16.mxu0 %v1618_v55  ;;  %1535 = vmatpush3.bf16.msra.mxu1 %v1611_v51 }
  0x3b   :  { %690 = vmatmul.mubr.bf16.gmra.mrb[12].mxu0 %v1595_v52  ;;  %1528 = vmatprep.subr.bf16.mxu1 %v1618_v55 }
  0x3c   :  { %787 = vmatmul.mubr.bf16.gmra.mrb[12].mxu1 %v1596_v53  ;;  %697 = vmatprep.mubr.bf16.mxu0 %v1598_v54 }
  0x3d   :  { %794 = vmatprep.mubr.bf16.mxu1 %v1600_v56  ;;  %1503 = vmatpush3.bf16.msra.mxu0 %v1618_v55 }
  0x3e   :  { %1504 = vmatprep.subr.bf16.mxu0 %v1625_v57  ;;  %1536 = vmatpush3.bf16.msra.mxu1 %v1618_v55 }
  0x3f   :  { %1529 = vmatprep.subr.bf16.mxu1 %v1625_v57 }
  0x41   :  { %1505 = vmatpush3.bf16.msra.mxu0 %v1625_v57 }
  0x42   :  { %1537 = vmatpush3.bf16.msra.mxu1 %v1625_v57 }
  0x43   :  { %698 = vmatmul.mubr.bf16.gmra.mrb[16].mxu0 %v1602_v58 }
  0x44   :  { %795 = vmatmul.mubr.bf16.gmra.mrb[16].mxu1 %v1603_v59  ;;  %705 = vmatprep.mubr.bf16.mxu0 %v1605_v60 }
  0x45   :  { %802 = vmatprep.mubr.bf16.mxu1 %v1607_v61 }
  0x4b   :  { %706 = vmatmul.mubr.bf16.gmra.mrb[20].mxu0 %v1609_v62 }
  0x4c   :  { %803 = vmatmul.mubr.bf16.gmra.mrb[20].mxu1 %v1610_v63  ;;  %713 = vmatprep.mubr.bf16.mxu0 %v1612_v0 }
  0x4d   :  { %810 = vmatprep.mubr.bf16.mxu1 %v1614_v1 }
  0x53   :  { %714 = vmatmul.mubr.bf16.gmra.mrb[24].mxu0 %v1616_v2 }
  0x54   :  { %811 = vmatmul.mubr.bf16.gmra.mrb[24].mxu1 %v1617_v3  ;;  %721 = vmatprep.mubr.bf16.mxu0 %v1619_v4 }
  0x55   :  { %818 = vmatprep.mubr.bf16.mxu1 %v1621_v5 }
  0x5b   :  { %722 = vmatmul.mubr.bf16.gmra.mrb[28].mxu0 %v1623_v6 }
  0x5c   :  { %819 = vmatmul.mubr.bf16.gmra.mrb[28].mxu1 %v1624_v7  ;;  %1506 = vmatprep.mubr.bf16.mxu0 %v1626_v8 }
  0x5d   :  { %1514 = vmatprep.mubr.bf16.mxu1 %v1627_v9 }
  0x63   :  { %1507 = vmatmul.mubr.bf16.vlgmr.msra.gmra.mrb[32].mxu0 %v1628_v10 }
  0x64   :  { %1515 = vmatmul.mubr.bf16.vlgmr.msra.gmra.mrb[32].mxu1 %v1629_v11  ;;  %1510 = vmatprep.mubr.bf16.mxu0 %v1630_v12 }
  0x65   :  { %1518 = vmatprep.mubr.bf16.mxu1 %v1631_v13 }
  0x6b   :  { %1511 = vmatmul.mubr.bf16.gmra.mrb[36].mxu0 %v1632_v14 }
  0x6c   :  { %1519 = vmatmul.mubr.bf16.gmra.mrb[36].mxu1 %v1633_v15 }
  0xf6   :  { %v1362_v16 = vpop.f32.mrb[0].mxu0 }
  0xf7   :  { %v1426_v17 = vpop.f32.mrb[0].mxu1  ;;  %v1363_v18 = vpop.f32.mrb[1].mxu0 }
  0xf8   :  { %v1364_v19 = vadd.f32 %v1363_v18, %v1362_v16  ;;  %v1427_v20 = vpop.f32.mrb[1].mxu1  ;;  %v1365_v21 = vpop.f32.mrb[2].mxu0 }
  0xf9   :  { %v1428_v22 = vadd.f32 %v1427_v20, %v1426_v17  ;;  %v1429_v23 = vpop.f32.mrb[2].mxu1  ;;  %v1366_v24 = vpop.f32.mrb[3].mxu0 }
  0xfa   :  { %v1367_v25 = vadd.f32 %v1366_v24, %v1365_v21  ;;  %v1430_v26 = vpop.f32.mrb[3].mxu1 }
  0xfb   :  { %v1431_v27 = vadd.f32 %v1430_v26, %v1429_v23  ;;  %v1906_v28 = vadd.f32 %v1428_v22, %v1364_v19 }
  0xfd   :  { %v1908_v29 = vadd.f32 %v1431_v27, %v1367_v25 }
  0xfe   :  { %v1368_v30 = vpop.f32.mrb[4].mxu0 }
  0xff   :  { %v1432_v31 = vpop.f32.mrb[4].mxu1  ;;  %v1369_v32 = vpop.f32.mrb[5].mxu0 }
 0x100   :  { %v1370_v33 = vadd.f32 %v1369_v32, %v1368_v30  ;;  %v1433_v34 = vpop.f32.mrb[5].mxu1  ;;  %v1371_v35 = vpop.f32.mrb[6].mxu0 }
 0x101   :  { %v1434_v36 = vadd.f32 %v1433_v34, %v1432_v31  ;;  %v1435_v37 = vpop.f32.mrb[6].mxu1  ;;  %v1372_v38 = vpop.f32.mrb[7].mxu0 }
 0x102   :  { %v1373_v39 = vadd.f32 %v1372_v38, %v1371_v35  ;;  %v1436_v40 = vpop.f32.mrb[7].mxu1 }
 0x103   :  { %v1437_v41 = vadd.f32 %v1436_v40, %v1435_v37  ;;  %v1910_v42 = vadd.f32 %v1434_v36, %v1370_v33 }
 0x105   :  { %v1912_v43 = vadd.f32 %v1437_v41, %v1373_v39 }
 0x106   :  { %v1374_v44 = vpop.f32.mrb[8].mxu0 }
 0x107   :  { %v1438_v45 = vpop.f32.mrb[8].mxu1  ;;  %v1375_v46 = vpop.f32.mrb[9].mxu0 }
 0x108   :  { %v1376_v47 = vadd.f32 %v1375_v46, %v1374_v44  ;;  %v1439_v48 = vpop.f32.mrb[9].mxu1  ;;  %v1377_v49 = vpop.f32.mrb[10].mxu0 }
 0x109   :  { %v1440_v50 = vadd.f32 %v1439_v48, %v1438_v45  ;;  %v1441_v51 = vpop.f32.mrb[10].mxu1  ;;  %v1378_v52 = vpop.f32.mrb[11].mxu0 }
 0x10a   :  { %v1379_v53 = vadd.f32 %v1378_v52, %v1377_v49  ;;  %v1442_v54 = vpop.f32.mrb[11].mxu1 }
 0x10b   :  { %v1443_v55 = vadd.f32 %v1442_v54, %v1441_v51  ;;  %v1914_v56 = vadd.f32 %v1440_v50, %v1376_v47 }
 0x10d   :  { %v1916_v57 = vadd.f32 %v1443_v55, %v1379_v53 }
 0x10e   :  { %v1380_v58 = vpop.f32.mrb[12].mxu0 }
 0x10f   :  { %v1444_v59 = vpop.f32.mrb[12].mxu1  ;;  %v1381_v60 = vpop.f32.mrb[13].mxu0 }
 0x110   :  { %v1382_v61 = vadd.f32 %v1381_v60, %v1380_v58  ;;  %v1445_v62 = vpop.f32.mrb[13].mxu1  ;;  %v1383_v63 = vpop.f32.mrb[14].mxu0 }
 0x111   :  { %v1446_v0 = vadd.f32 %v1445_v62, %v1444_v59  ;;  %v1447_v1 = vpop.f32.mrb[14].mxu1  ;;  %v1384_v2 = vpop.f32.mrb[15].mxu0 }
 0x112   :  { %v1385_v3 = vadd.f32 %v1384_v2, %v1383_v63  ;;  %v1448_v4 = vpop.f32.mrb[15].mxu1 }
 0x113   :  { %v1449_v5 = vadd.f32 %v1448_v4, %v1447_v1  ;;  %v1918_v6 = vadd.f32 %v1446_v0, %v1382_v61 }
 0x115   :  { %v1920_v7 = vadd.f32 %v1449_v5, %v1385_v3 }
 0x116   :  { %v1386_v8 = vpop.f32.mrb[16].mxu0 }
 0x117   :  { %v1450_v9 = vpop.f32.mrb[16].mxu1  ;;  %v1387_v10 = vpop.f32.mrb[17].mxu0 }
 0x118   :  { %v1388_v11 = vadd.f32 %v1387_v10, %v1386_v8  ;;  %v1451_v12 = vpop.f32.mrb[17].mxu1  ;;  %v1389_v13 = vpop.f32.mrb[18].mxu0 }
 0x119   :  { %v1452_v14 = vadd.f32 %v1451_v12, %v1450_v9  ;;  %v1453_v15 = vpop.f32.mrb[18].mxu1  ;;  %v1390_v16 = vpop.f32.mrb[19].mxu0 }
 0x11a   :  { %v1391_v17 = vadd.f32 %v1390_v16, %v1389_v13  ;;  %v1454_v18 = vpop.f32.mrb[19].mxu1 }
 0x11b   :  { %v1455_v19 = vadd.f32 %v1454_v18, %v1453_v15  ;;  %v797_v20 = vadd.f32 %v1452_v14, %v1388_v11 }
 0x11d   :  { %v800_v21 = vadd.f32 %v1455_v19, %v1391_v17 }
 0x11e   :  { %v1392_v22 = vpop.f32.mrb[20].mxu0 }
 0x11f   :  { %v1456_v23 = vpop.f32.mrb[20].mxu1  ;;  %v1393_v24 = vpop.f32.mrb[21].mxu0 }
 0x120   :  { %v1394_v25 = vadd.f32 %v1393_v24, %v1392_v22  ;;  %v1457_v26 = vpop.f32.mrb[21].mxu1  ;;  %v1395_v27 = vpop.f32.mrb[22].mxu0 }
 0x121   :  { %v1458_v30 = vadd.f32 %v1457_v26, %v1456_v23  ;;  %v1459_v31 = vpop.f32.mrb[22].mxu1  ;;  %v1396_v32 = vpop.f32.mrb[23].mxu0 }
 0x122   :  { %v1397_v33 = vadd.f32 %v1396_v32, %v1395_v27  ;;  %v1460_v34 = vpop.f32.mrb[23].mxu1 }
 0x123   :  { %v1461_v35 = vadd.f32 %v1460_v34, %v1459_v31  ;;  %v805_v36 = vadd.f32 %v1458_v30, %v1394_v25 }
 0x125   :  { %v808_v37 = vadd.f32 %v1461_v35, %v1397_v33 }
 0x126   :  { %v1398_v38 = vpop.f32.mrb[24].mxu0 }
 0x127   :  { %v1462_v39 = vpop.f32.mrb[24].mxu1  ;;  %v1399_v40 = vpop.f32.mrb[25].mxu0 }
 0x128   :  { %v1400_v41 = vadd.f32 %v1399_v40, %v1398_v38  ;;  %v1463_v44 = vpop.f32.mrb[25].mxu1  ;;  %v1401_v45 = vpop.f32.mrb[26].mxu0 }
 0x129   :  { %v1464_v46 = vadd.f32 %v1463_v44, %v1462_v39  ;;  %v1465_v47 = vpop.f32.mrb[26].mxu1  ;;  %v1402_v48 = vpop.f32.mrb[27].mxu0 }
 0x12a   :  { %v1403_v49 = vadd.f32 %v1402_v48, %v1401_v45  ;;  %v1466_v50 = vpop.f32.mrb[27].mxu1 }
 0x12b   :  { %v1467_v51 = vadd.f32 %v1466_v50, %v1465_v47  ;;  %v813_v52 = vadd.f32 %v1464_v46, %v1400_v41 }
 0x12d   :  { %v816_v53 = vadd.f32 %v1467_v51, %v1403_v49 }
 0x12e   :  { %v1404_v54 = vpop.f32.mrb[28].mxu0 }
 0x12f   :  { %v1468_v55 = vpop.f32.mrb[28].mxu1  ;;  %v1405_v58 = vpop.f32.mrb[29].mxu0 }
 0x130   :  { %v1406_v59 = vadd.f32 %v1405_v58, %v1404_v54  ;;  %v1469_v60 = vpop.f32.mrb[29].mxu1  ;;  %v1407_v61 = vpop.f32.mrb[30].mxu0 }
 0x131   :  { %v1470_v62 = vadd.f32 %v1469_v60, %v1468_v55  ;;  %v1471_v63 = vpop.f32.mrb[30].mxu1  ;;  %v1408_v0 = vpop.f32.mrb[31].mxu0 }
 0x132   :  { %v1409_v1 = vadd.f32 %v1408_v0, %v1407_v61  ;;  %v1472_v2 = vpop.f32.mrb[31].mxu1 }
 0x133   :  { %v1473_v3 = vadd.f32 %v1472_v2, %v1471_v63  ;;  %v821_v4 = vadd.f32 %v1470_v62, %v1406_v59 }
 0x135   :  { %v824_v5 = vadd.f32 %v1473_v3, %v1409_v1 }
 0x136   :  { %v1508_v8 = vpop.f32.mrb[32].mxu0 }
 0x137   :  { %v870_v9 = vadd.f32 %v1508_v8, %v1910_v42  ;;  %v1516_v10 = vpop.f32.mrb[32].mxu1  ;;  %v861_v11 = vpop.f32.mrb[33].mxu0 }
 0x138   :  { %v902_v12 = vadd.f32 %v1516_v10, %v805_v36  ;;  %v862_v13 = vadd.f32 %v861_v11, %v1906_v28  ;;  %v893_v14 = vpop.f32.mrb[33].mxu1  ;;  %v1509_v15 = vpop.f32.mrb[34].mxu0 }
 0x139   :  { %v894_v16 = vadd.f32 %v893_v14, %v797_v20  ;;  %v873_v17 = vadd.f32 %v1509_v15, %v1912_v43  ;;  %v1517_v18 = vpop.f32.mrb[34].mxu1  ;;  %v864_v19 = vpop.f32.mrb[35].mxu0 }
 0x13a   :  { %v905_v22 = vadd.f32 %v1517_v18, %v808_v37  ;;  %v865_v23 = vadd.f32 %v864_v19, %v1908_v29  ;;  %v896_v24 = vpop.f32.mrb[35].mxu1 }
 0x13b   :  { %v897_v25 = vadd.f32 %v896_v24, %v800_v21 }
 0x13c   :  { %v1056_v26 = vadd.f32 %v865_v23, %v862_v13 }
 0x13e   :  { %v1057_v27 = vadd.f32 %v1056_v26, %v870_v9  ;;  %v1512_v42 = vpop.f32.mrb[36].mxu0 }
 0x13f   :  { %v886_v30 = vadd.f32 %v1512_v42, %v1918_v6  ;;  %v1520_v31 = vpop.f32.mrb[36].mxu1  ;;  %v877_v32 = vpop.f32.mrb[37].mxu0 }
 0x140   :  { %v918_v28 = vadd.f32 %v1520_v31, %v821_v4  ;;  %v878_v33 = vadd.f32 %v877_v32, %v1914_v56  ;;  %v1058_v20 = vadd.f32 %v1057_v27, %v873_v17  ;;  %v909_v34 = vpop.f32.mrb[37].mxu1  ;;  %v1513_v43 = vpop.f32.mrb[38].mxu0 }
 0x141   :  { %v910_v35 = vadd.f32 %v909_v34, %v813_v52  ;;  %v889_v36 = vadd.f32 %v1513_v43, %v1920_v7  ;;  %v1521_v37 = vpop.f32.mrb[38].mxu1  ;;  %v880_v29 = vpop.f32.mrb[39].mxu0 }
 0x142   :  { %v1059_v38 = vadd.f32 %v1058_v20, %v878_v33  ;;  %v921_v21 = vadd.f32 %v1521_v37, %v824_v5  ;;  %v881_v39 = vadd.f32 %v880_v29, %v1916_v57  ;;  %v912_v40 = vpop.f32.mrb[39].mxu1 }
 0x143   :  { %v913_v41 = vadd.f32 %v912_v40, %v816_v53 }
 0x144   :  { %v1060_v6 = vadd.f32 %v1059_v38, %v881_v39 }
 0x146   :  { %v1061_v44 = vadd.f32 %v1060_v6, %v886_v30 }
 0x148   :  { %v1062_v45 = vadd.f32 %v1061_v44, %v889_v36 }
 0x14a   :  { %v1063_v46 = vadd.f32 %v1062_v45, %v894_v16 }
 0x14c   :  { %v1064_v47 = vadd.f32 %v1063_v46, %v897_v25 }
 0x14e   :  { %v1065_v56 = vadd.f32 %v1064_v47, %v902_v12 }
 0x150   :  { %v1066_v48 = vadd.f32 %v1065_v56, %v905_v22 }
 0x152   :  { %v1067_v49 = vadd.f32 %v1066_v48, %v910_v35 }
 0x154   :  { %v1068_v50 = vadd.f32 %v1067_v49, %v913_v41 }
 0x156   :  { %v1069_v51 = vadd.f32 %v1068_v50, %v918_v28 }
 0x158   :  { %v1070_v52 = vadd.f32 %v1069_v51, %v921_v21 }
 0x15a   :  { %v1071_v7 = vrot.slane %v1070_v52, 4 }
 0x15c   :  { %v1072_v54 = vadd.f32 %v1071_v7, %v1070_v52 }
 0x15e   :  { %v1073_v55 = vrot.slane %v1072_v54, 2 }
 0x160   :  { %v1074_v58 = vadd.f32 %v1073_v55, %v1072_v54 }
 0x162   :  { %v1075_v59 = vrot.slane %v1074_v58, 1 }
 0x164   :  { %v1076_v60 = vadd.f32 %v1075_v59, %v1074_v58 }
 0x166   :  { %v1077_v57 = vmul.f32 0.0078125, %v1076_v60 }
 0x168   :  { %v1078_v61 = vsub.f32 %v862_v13, %v1077_v57  ;;  %v1079_v53 = vsub.f32 %v865_v23, %v1077_v57  ;;  %v1080_v62 = vsub.f32 %v870_v9, %v1077_v57  ;;  %v1081_v63 = vsub.f32 %v873_v17, %v1077_v57 }
 0x169   :  { %v1082_v0 = vsub.f32 %v878_v33, %v1077_v57  ;;  %v1083_v1 = vsub.f32 %v881_v39, %v1077_v57  ;;  %v1084_v2 = vsub.f32 %v886_v30, %v1077_v57  ;;  %v1085_v3 = vsub.f32 %v889_v36, %v1077_v57 }
 0x16a   :  { %v1086_v4 = vsub.f32 %v894_v16, %v1077_v57  ;;  %v1087_v5 = vsub.f32 %v897_v25, %v1077_v57  ;;  %v1088_v8 = vsub.f32 %v902_v12, %v1077_v57  ;;  %v1089_v10 = vsub.f32 %v905_v22, %v1077_v57 }
 0x16b   :  { %v1090_v11 = vsub.f32 %v910_v35, %v1077_v57  ;;  %v1091_v14 = vsub.f32 %v913_v41, %v1077_v57  ;;  %v1092_v15 = vsub.f32 %v918_v28, %v1077_v57  ;;  %v1093_v18 = vsub.f32 %v921_v21, %v1077_v57 }
 0x16c   :  { %v1110_v19 = vmul.f32 %v1078_v61, %v1078_v61  ;;  %v1111_v24 = vmul.f32 %v1079_v53, %v1079_v53  ;;  %v1112_v26 = vmul.f32 %v1080_v62, %v1080_v62  ;;  %v1113_v13 = vmul.f32 %v1081_v63, %v1081_v63 }
 0x16d   :  { %v1114_v9 = vmul.f32 %v1082_v0, %v1082_v0  ;;  %v1115_v42 = vmul.f32 %v1083_v1, %v1083_v1  ;;  %v1116_v30 = vmul.f32 %v1084_v2, %v1084_v2  ;;  %v1117_v16 = vmul.f32 %v1085_v3, %v1085_v3 }
 0x16e   :  { %v1126_v27 = vadd.f32 %v1111_v24, %v1110_v19  ;;  %v1118_v12 = vmul.f32 %v1086_v4, %v1086_v4  ;;  %v1119_v33 = vmul.f32 %v1087_v5, %v1087_v5  ;;  %v1120_v28 = vmul.f32 %v1088_v8, %v1088_v8  ;;  %v1344_v19 = vld [vmem:[%s2034_s2] ss:$0 sm:$0xff] }
 0x16f   :  { %v1121_v43 = vmul.f32 %v1089_v10, %v1089_v10  ;;  %v1122_v36 = vmul.f32 %v1090_v11, %v1090_v11  ;;  %v1123_v29 = vmul.f32 %v1091_v14, %v1091_v14  ;;  %v1124_v21 = vmul.f32 %v1092_v15, %v1092_v15 }
 0x170   :  { %v1127_v23 = vadd.f32 %v1126_v27, %v1112_v26  ;;  %v1125_v40 = vmul.f32 %v1093_v18, %v1093_v18 }
 0x172   :  { %v1128_v17 = vadd.f32 %v1127_v23, %v1113_v13 }
 0x174   :  { %v1129_v31 = vadd.f32 %v1128_v17, %v1114_v9 }
 0x176   :  { %v1130_v32 = vadd.f32 %v1129_v31, %v1115_v42  ;;  %v1345_v31 = vld [vmem:[%s2035_s3] ss:$0 sm:$0xff] }
 0x178   :  { %v1131_v25 = vadd.f32 %v1130_v32, %v1116_v30  ;;  %v1212_v30 = vld [vmem:[%s2036_s4] sm:$0xff] }
 0x17a   :  { %v1132_v22 = vadd.f32 %v1131_v25, %v1117_v16 }
 0x17c   :  { %v1133_v20 = vadd.f32 %v1132_v22, %v1118_v12  ;;  %v1213_v22 = vld [vmem:[%s2036_s4 + $0x8] sm:$0xff] }
 0x17e   :  { %v1134_v34 = vadd.f32 %v1133_v20, %v1119_v33  ;;  %v1214_v33 = vld [vmem:[%s2036_s4 + $0x10] sm:$0xff]  ;;  %v1215_v20 = vld [vmem:[%s2036_s4 + $0x18] sm:$0xff] }
 0x180   :  { %v1135_v35 = vadd.f32 %v1134_v34, %v1120_v28 }
 0x182   :  { %v1136_v37 = vadd.f32 %v1135_v35, %v1121_v43 }
 0x184   :  { %v1137_v38 = vadd.f32 %v1136_v37, %v1122_v36  ;;  %v1216_v36 = vld [vmem:[%s2036_s4 + $0x20] sm:$0xff]  ;;  %v1217_v37 = vld [vmem:[%s2036_s4 + $0x28] sm:$0xff] }
 0x186   :  { %v1138_v39 = vadd.f32 %v1137_v38, %v1123_v29  ;;  %v1218_v29 = vld [vmem:[%s2036_s4 + $0x30] sm:$0xff] }
 0x188   :  { %v1139_v41 = vadd.f32 %v1138_v39, %v1124_v21 }
 0x18a   :  { %v1140_v6 = vadd.f32 %v1139_v41, %v1125_v40  ;;  %v1219_v41 = vld [vmem:[%s2036_s4 + $0x38] sm:$0xff] }
 0x18c   :  { %v1141_v44 = vrot.slane %v1140_v6, 4 }
 0x18e   :  { %v1142_v45 = vadd.f32 %v1141_v44, %v1140_v6  ;;  %v1220_v6 = vld [vmem:[%s2036_s4 + $0x40] sm:$0xff]  ;;  %v1221_v44 = vld [vmem:[%s2036_s4 + $0x48] sm:$0xff] }
 0x190   :  { %v1143_v46 = vrot.slane %v1142_v45, 2 }
 0x192   :  { %v1144_v47 = vadd.f32 %v1143_v46, %v1142_v45 }
 0x194   :  { %v1145_v56 = vrot.slane %v1144_v47, 1 }
 0x196   :  { %v1146_v48 = vadd.f32 %v1145_v56, %v1144_v47 }
 0x198   :  { %v1147_v49 = vmul.f32 0.0078125, %v1146_v48  ;;  %v1222_v48 = vld [vmem:[%s2036_s4 + $0x50] sm:$0xff] }
 0x19a   :  { %v1148_v50 = vadd.f32 1e-05, %v1147_v49  ;;  %v1223_v49 = vld [vmem:[%s2036_s4 + $0x58] sm:$0xff] }
 0x19c   :  { %1634 = vrsqrt.f32 %v1148_v50  ;;  %v1224_v50 = vld [vmem:[%s2036_s4 + $0x60] sm:$0xff] }
 0x1a6   :  { %v1635_v51 = vpop.eup %1634 }
 0x1a7   :  { %v1150_v52 = vmul.f32 %v1635_v51, %v1078_v61  ;;  %v1151_v7 = vmul.f32 %v1635_v51, %v1079_v53  ;;  %v1152_v54 = vmul.f32 %v1635_v51, %v1080_v62  ;;  %v1153_v55 = vmul.f32 %v1635_v51, %v1081_v63 }
 0x1a8   :  { %v1154_v58 = vmul.f32 %v1635_v51, %v1082_v0  ;;  %v1155_v59 = vmul.f32 %v1635_v51, %v1083_v1  ;;  %v1156_v60 = vmul.f32 %v1635_v51, %v1084_v2  ;;  %v1157_v57 = vmul.f32 %v1635_v51, %v1085_v3 }
 0x1a9   :  { %v1158_v24 = vmul.f32 %v1635_v51, %v1086_v4  ;;  %v1159_v26 = vmul.f32 %v1635_v51, %v1087_v5  ;;  %v1160_v27 = vmul.f32 %v1635_v51, %v1088_v8  ;;  %v1161_v13 = vmul.f32 %v1635_v51, %v1089_v10 }
 0x1aa   :  { %v1162_v23 = vmul.f32 %v1635_v51, %v1090_v11  ;;  %v1163_v9 = vmul.f32 %v1635_v51, %v1091_v14  ;;  %v1164_v17 = vmul.f32 %v1635_v51, %v1092_v15  ;;  %v1165_v42 = vmul.f32 %v1635_v51, %v1093_v18  ;;  %v1225_v51 = vld [vmem:[%s2036_s4 + $0x68] sm:$0xff] }
 0x1ab   :  { %v1173_v61 = vmul.f32 %v1344_v19, %v1150_v52  ;;  %v1174_v53 = vmul.f32 %v1344_v19, %v1151_v7  ;;  %v1175_v62 = vmul.f32 %v1344_v19, %v1152_v54  ;;  %v1176_v63 = vmul.f32 %v1344_v19, %v1153_v55  ;;  %v1226_v52 = vld [vmem:[%s2036_s4 + $0x70] sm:$0xff]  ;;  %v1227_v7 = vld [vmem:[%s2036_s4 + $0x78] sm:$0xff] }
 0x1ac   :  { %v1177_v0 = vmul.f32 %v1344_v19, %v1154_v58  ;;  %v1178_v1 = vmul.f32 %v1344_v19, %v1155_v59  ;;  %v1179_v2 = vmul.f32 %v1344_v19, %v1156_v60  ;;  %v1180_v3 = vmul.f32 %v1344_v19, %v1157_v57 }
 0x1ad   :  { %v1181_v4 = vmul.f32 %v1344_v19, %v1158_v24  ;;  %v1182_v5 = vmul.f32 %v1344_v19, %v1159_v26  ;;  %v1183_v8 = vmul.f32 %v1344_v19, %v1160_v27  ;;  %v1184_v10 = vmul.f32 %v1344_v19, %v1161_v13 }
 0x1ae   :  { %v1185_v11 = vmul.f32 %v1344_v19, %v1162_v23  ;;  %v1186_v14 = vmul.f32 %v1344_v19, %v1163_v9  ;;  %v1187_v15 = vmul.f32 %v1344_v19, %v1164_v17  ;;  %v1188_v18 = vmul.f32 %v1344_v19, %v1165_v42 }
 0x1af   :  { %v1196_v32 = vadd.f32 %v1345_v31, %v1173_v61  ;;  %v1197_v16 = vadd.f32 %v1345_v31, %v1174_v53  ;;  %v1198_v25 = vadd.f32 %v1345_v31, %v1175_v62  ;;  %v1199_v12 = vadd.f32 %v1345_v31, %v1176_v63 }
 0x1b0   :  { %v1200_v28 = vadd.f32 %v1345_v31, %v1177_v0  ;;  %v1201_v34 = vadd.f32 %v1345_v31, %v1178_v1  ;;  %v1202_v43 = vadd.f32 %v1345_v31, %v1179_v2  ;;  %v1203_v35 = vadd.f32 %v1345_v31, %v1180_v3 }
 0x1b1   :  { %v1204_v38 = vadd.f32 %v1345_v31, %v1181_v4  ;;  %v1205_v21 = vadd.f32 %v1345_v31, %v1182_v5  ;;  %v1206_v39 = vadd.f32 %v1345_v31, %v1183_v8  ;;  %v1207_v40 = vadd.f32 %v1345_v31, %v1184_v10 }
 0x1b2   :  { %v1208_v45 = vadd.f32 %v1345_v31, %v1185_v11  ;;  %v1209_v46 = vadd.f32 %v1345_v31, %v1186_v14  ;;  %v1210_v47 = vadd.f32 %v1345_v31, %v1187_v15  ;;  %v1211_v56 = vadd.f32 %v1345_v31, %v1188_v18 }
 0x1b3   :  { %v1228_v54 = vadd.f32 %v1212_v30, %v1196_v32  ;;  %v1229_v55 = vadd.f32 %v1213_v22, %v1197_v16  ;;  %v1230_v58 = vadd.f32 %v1214_v33, %v1198_v25  ;;  %v1231_v59 = vadd.f32 %v1215_v20, %v1199_v12 }
 0x1b4   :  { %v1232_v60 = vadd.f32 %v1216_v36, %v1200_v28  ;;  %v1233_v57 = vadd.f32 %v1217_v37, %v1201_v34  ;;  %v1234_v19 = vadd.f32 %v1218_v29, %v1202_v43  ;;  %v1235_v24 = vadd.f32 %v1219_v41, %v1203_v35 }
 0x1b5   :  { %v1236_v26 = vadd.f32 %v1220_v6, %v1204_v38  ;;  %v1237_v27 = vadd.f32 %v1221_v44, %v1205_v21  ;;  %v1238_v13 = vadd.f32 %v1222_v48, %v1206_v39  ;;  %v1239_v23 = vadd.f32 %v1223_v49, %v1207_v40  ;;  %1244 = vst [vmem:[%s2037_s5] sm:$0xff] %v1228_v54 }
 0x1b6   :  { %1245 = vst [vmem:[%s2037_s5 + $0x8] sm:$0xff] %v1229_v55  ;;  %1246 = vst [vmem:[%s2037_s5 + $0x10] sm:$0xff] %v1230_v58  ;;  %v1240_v9 = vadd.f32 %v1224_v50, %v1208_v45  ;;  %v1241_v17 = vadd.f32 %v1225_v51, %v1209_v46  ;;  %v1242_v42 = vadd.f32 %v1226_v52, %v1210_v47 }
 0x1b7   :  { %1247 = vst [vmem:[%s2037_s5 + $0x18] sm:$0xff] %v1231_v59  ;;  %v1243_v61 = vadd.f32 %v1227_v7, %v1211_v56  ;;  %1248 = vst [vmem:[%s2037_s5 + $0x20] sm:$0xff] %v1232_v60 }
 0x1b8   :  { %1249 = vst [vmem:[%s2037_s5 + $0x28] sm:$0xff] %v1233_v57  ;;  %1250 = vst [vmem:[%s2037_s5 + $0x30] sm:$0xff] %v1234_v19 }
 0x1b9   :  { %1251 = vst [vmem:[%s2037_s5 + $0x38] sm:$0xff] %v1235_v24  ;;  %1252 = vst [vmem:[%s2037_s5 + $0x40] sm:$0xff] %v1236_v26 }
 0x1ba   :  { %1253 = vst [vmem:[%s2037_s5 + $0x48] sm:$0xff] %v1237_v27  ;;  %1254 = vst [vmem:[%s2037_s5 + $0x50] sm:$0xff] %v1238_v13 }
 0x1bb   :  { %1255 = vst [vmem:[%s2037_s5 + $0x58] sm:$0xff] %v1239_v23  ;;  %1256 = vst [vmem:[%s2037_s5 + $0x60] sm:$0xff] %v1240_v9 }
 0x1bc   :  { %1257 = vst [vmem:[%s2037_s5 + $0x68] sm:$0xff] %v1241_v17  ;;  %1258 = vst [vmem:[%s2037_s5 + $0x70] sm:$0xff] %v1242_v42 }
 0x1bd   :  { %1259 = vst [vmem:[%s2037_s5 + $0x78] sm:$0xff] %v1243_v61 }

// kernel: resnet_forward.56
= control target key start
LH: loop header
LB: loop body
LE: loop exit
PB: predicated region body
PF: predicated region fallthrough
CT: control target
= control target key end

     0   :  { %s820_s1 = inlined_call_operand.vmem [shape: bf16[256,128], index: 1, kind: input, shape index: {}]   ;;  %s821_s0 = inlined_call_operand.vmem [shape: bf16[128,256], index: 0, kind: input, shape index: {}]   ;;  %s822_s2 = inlined_call_operand.vmem [shape: f32[1,128], index: 2, kind: input, shape index: {}]   ;;  %s823_s3 = inlined_call_operand.vmem [shape: f32[128,128], index: 3, kind: output, shape index: {}]  }
   0x1   :  { %v595_v0 = vld [vmem:[%s820_s1 + $0x40] sm:$0xff]   ;;  %v597_v2 = vld [vmem:[%s820_s1 + $0x48] sm:$0xff]   ;;  %v599_v4 = vld [vmem:[%s820_s1 + $0x50] sm:$0xff]  }
   0x2   :  { %v596_v1 = vld [vmem:[%s820_s1] sm:$0xff]   ;;  %515 = vmatprep.subr.bf16.mxu0 %v595_v0  ;;  %579 = vmatprep.subr.bf16.mxu1 %v595_v0  ;;  %v598_v3 = vld [vmem:[%s820_s1 + $0x8] sm:$0xff]   ;;  %v600_v5 = vld [vmem:[%s820_s1 + $0x10] sm:$0xff]  }
   0x3   :  { %516 = vmatpush3.bf16.msra.mxu0 %v596_v1  ;;  %587 = vmatpush3.bf16.msra.mxu1 %v596_v1  ;;  %v601_v6 = vld [vmem:[%s820_s1 + $0x58] sm:$0xff]   ;;  %v603_v8 = vld [vmem:[%s820_s1 + $0x60] sm:$0xff]   ;;  %v605_v10 = vld [vmem:[%s820_s1 + $0x68] sm:$0xff]  }
   0x4   :  { %517 = vmatprep.subr.bf16.mxu0 %v597_v2  ;;  %580 = vmatprep.subr.bf16.mxu1 %v597_v2  ;;  %v602_v7 = vld [vmem:[%s820_s1 + $0x18] sm:$0xff]   ;;  %v604_v9 = vld [vmem:[%s820_s1 + $0x20] sm:$0xff]   ;;  %v606_v13 = vld [vmem:[%s820_s1 + $0x28] sm:$0xff]  }
   0x5   :  { %v613_v11 = vld [vmem:[%s821_s0 + $0x4] ss:$8 sps:$4 sm:$0xff]   ;;  %v607_v14 = vld [vmem:[%s820_s1 + $0x70] sm:$0xff]   ;;  %v609_v16 = vld [vmem:[%s820_s1 + $0x78] sm:$0xff]  }
   0x6   :  { %v616_v12 = vld [vmem:[%s821_s0 + $0x44] ss:$8 sps:$4 sm:$0xff]   ;;  %307 = vmatprep.mubr.bf16.mxu0 %v613_v11  ;;  %v608_v15 = vld [vmem:[%s820_s1 + $0x30] sm:$0xff]   ;;  %v610_v17 = vld [vmem:[%s820_s1 + $0x38] sm:$0xff]  }
   0x7   :  { %518 = vmatpush3.bf16.msra.mxu0 %v598_v3  ;;  %588 = vmatpush3.bf16.msra.mxu1 %v598_v3  ;;  %v611_v18 = vld [vmem:[%s821_s0] ss:$8 sps:$4 sm:$0xff]   ;;  %v617_v20 = vld [vmem:[%s821_s0 + $0x14] ss:$8 sps:$4 sm:$0xff]   ;;  %v621_v22 = vld [vmem:[%s821_s0 + $0x10] ss:$8 sps:$4 sm:$0xff]  }
   0x8   :  { %519 = vmatprep.subr.bf16.mxu0 %v599_v4  ;;  %581 = vmatprep.subr.bf16.mxu1 %v599_v4  ;;  %v614_v19 = vld [vmem:[%s821_s0 + $0x40] ss:$8 sps:$4 sm:$0xff]   ;;  %v619_v21 = vld [vmem:[%s821_s0 + $0x54] ss:$8 sps:$4 sm:$0xff]   ;;  %v622_v23 = vld [vmem:[%s821_s0 + $0x50] ss:$8 sps:$4 sm:$0xff]  }
   0x9   :  { %339 = vmatprep.mubr.bf16.mxu1 %v616_v12  ;;  %v623_v24 = vld [vmem:[%s821_s0 + $0x24] ss:$8 sps:$4 sm:$0xff]   ;;  %v627_v26 = vld [vmem:[%s821_s0 + $0x20] ss:$8 sps:$4 sm:$0xff]   ;;  %v629_v28 = vld [vmem:[%s821_s0 + $0x34] ss:$8 sps:$4 sm:$0xff]  }
   0xa   :  { %v625_v25 = vld [vmem:[%s821_s0 + $0x64] ss:$8 sps:$4 sm:$0xff]   ;;  %v628_v27 = vld [vmem:[%s821_s0 + $0x60] ss:$8 sps:$4 sm:$0xff]   ;;  %v631_v29 = vld [vmem:[%s821_s0 + $0x74] ss:$8 sps:$4 sm:$0xff]  }
   0xb   :  { %520 = vmatpush3.bf16.msra.mxu0 %v600_v5  ;;  %589 = vmatpush3.bf16.msra.mxu1 %v600_v5  ;;  %v633_v30 = vld [vmem:[%s821_s0 + $0x30] ss:$8 sps:$4 sm:$0xff]   ;;  %v754_v35 = vld [vmem:[%s822_s2] ss:$0 sm:$0xff] }
   0xc   :  { %521 = vmatprep.subr.bf16.mxu0 %v601_v6  ;;  %582 = vmatprep.subr.bf16.mxu1 %v601_v6  ;;  %v634_v31 = vld [vmem:[%s821_s0 + $0x70] ss:$8 sps:$4 sm:$0xff]  }
   0xf   :  { %522 = vmatpush3.bf16.msra.mxu0 %v602_v7  ;;  %590 = vmatpush3.bf16.msra.mxu1 %v602_v7 }
  0x10   :  { %523 = vmatprep.subr.bf16.mxu0 %v603_v8  ;;  %583 = vmatprep.subr.bf16.mxu1 %v603_v8 }
  0x13   :  { %524 = vmatpush3.bf16.msra.mxu0 %v604_v9  ;;  %591 = vmatpush3.bf16.msra.mxu1 %v604_v9 }
  0x14   :  { %525 = vmatprep.subr.bf16.mxu0 %v605_v10  ;;  %584 = vmatprep.subr.bf16.mxu1 %v605_v10 }
  0x17   :  { %526 = vmatpush3.bf16.msra.mxu0 %v606_v13  ;;  %592 = vmatpush3.bf16.msra.mxu1 %v606_v13 }
  0x18   :  { %527 = vmatprep.subr.bf16.mxu0 %v607_v14  ;;  %585 = vmatprep.subr.bf16.mxu1 %v607_v14 }
  0x1b   :  { %528 = vmatpush3.bf16.msra.mxu0 %v608_v15  ;;  %593 = vmatpush3.bf16.msra.mxu1 %v608_v15 }
  0x1c   :  { %529 = vmatprep.subr.bf16.mxu0 %v609_v16  ;;  %586 = vmatprep.subr.bf16.mxu1 %v609_v16 }
  0x1f   :  { %530 = vmatpush3.bf16.msra.mxu0 %v610_v17  ;;  %594 = vmatpush3.bf16.msra.mxu1 %v610_v17 }
  0x22   :  { %308 = vmatmul.mubr.bf16.vlgmr.msra.gmra.mrb[0].mxu0 %v611_v18  ;;  %340 = vmatmul.mubr.bf16.vlgmr.msra.gmra.mrb[0].mxu1 %v614_v19 }
  0x23   :  { %315 = vmatprep.mubr.bf16.mxu0 %v617_v20  ;;  %347 = vmatprep.mubr.bf16.mxu1 %v619_v21 }
  0x2a   :  { %316 = vmatmul.mubr.bf16.gmra.mrb[4].mxu0 %v621_v22  ;;  %348 = vmatmul.mubr.bf16.gmra.mrb[4].mxu1 %v622_v23 }
  0x2b   :  { %323 = vmatprep.mubr.bf16.mxu0 %v623_v24  ;;  %355 = vmatprep.mubr.bf16.mxu1 %v625_v25 }
  0x32   :  { %324 = vmatmul.mubr.bf16.gmra.mrb[8].mxu0 %v627_v26  ;;  %356 = vmatmul.mubr.bf16.gmra.mrb[8].mxu1 %v628_v27 }
  0x33   :  { %331 = vmatprep.mubr.bf16.mxu0 %v629_v28  ;;  %363 = vmatprep.mubr.bf16.mxu1 %v631_v29 }
  0x3a   :  { %332 = vmatmul.mubr.bf16.gmra.mrb[12].mxu0 %v633_v30  ;;  %364 = vmatmul.mubr.bf16.gmra.mrb[12].mxu1 %v634_v31 }
  0xf5   :  { %v531_v32 = vpop.f32.mrb[0].mxu0  ;;  %v555_v33 = vpop.f32.mrb[0].mxu1 }
  0xf6   :  { %v532_v34 = vpop.f32.mrb[1].mxu0  ;;  %v556_v36 = vpop.f32.mrb[1].mxu1 }
  0xf7   :  { %v533_v37 = vadd.f32 %v532_v34, %v531_v32  ;;  %v557_v38 = vadd.f32 %v556_v36, %v555_v33  ;;  %v534_v39 = vpop.f32.mrb[2].mxu0  ;;  %v558_v40 = vpop.f32.mrb[2].mxu1 }
  0xf8   :  { %v535_v41 = vpop.f32.mrb[3].mxu0  ;;  %v559_v42 = vpop.f32.mrb[3].mxu1 }
  0xf9   :  { %v430_v43 = vadd.f32 %v533_v37, %v754_v35  ;;  %v438_v44 = vadd.f32 %v557_v38, %v754_v35  ;;  %v536_v45 = vadd.f32 %v535_v41, %v534_v39  ;;  %v560_v46 = vadd.f32 %v559_v42, %v558_v40 }
  0xfb   :  { %v446_v47 = vmax.f32 %v430_v43, 0.0  ;;  %v454_v48 = vmax.f32 %v438_v44, 0.0  ;;  %v431_v49 = vadd.f32 %v536_v45, %v754_v35  ;;  %v439_v50 = vadd.f32 %v560_v46, %v754_v35 }
  0xfd   :  { %462 = vst [vmem:[%s823_s3] sm:$0xff] %v446_v47  ;;  %470 = vst [vmem:[%s823_s3 + $0x40] sm:$0xff] %v454_v48  ;;  %v447_v51 = vmax.f32 %v431_v49, 0.0  ;;  %v455_v52 = vmax.f32 %v439_v50, 0.0  ;;  %v537_v53 = vpop.f32.mrb[4].mxu0  ;;  %v561_v54 = vpop.f32.mrb[4].mxu1 }
  0xfe   :  { %v538_v55 = vpop.f32.mrb[5].mxu0  ;;  %v562_v56 = vpop.f32.mrb[5].mxu1 }
  0xff   :  { %463 = vst [vmem:[%s823_s3 + $0x8] sm:$0xff] %v447_v51  ;;  %471 = vst [vmem:[%s823_s3 + $0x48] sm:$0xff] %v455_v52  ;;  %v539_v57 = vadd.f32 %v538_v55, %v537_v53  ;;  %v563_v58 = vadd.f32 %v562_v56, %v561_v54  ;;  %v540_v59 = vpop.f32.mrb[6].mxu0  ;;  %v564_v60 = vpop.f32.mrb[6].mxu1 }
 0x100   :  { %v541_v61 = vpop.f32.mrb[7].mxu0  ;;  %v565_v62 = vpop.f32.mrb[7].mxu1 }
 0x101   :  { %v432_v63 = vadd.f32 %v539_v57, %v754_v35  ;;  %v440_v0 = vadd.f32 %v563_v58, %v754_v35  ;;  %v542_v1 = vadd.f32 %v541_v61, %v540_v59  ;;  %v566_v2 = vadd.f32 %v565_v62, %v564_v60 }
 0x103   :  { %v448_v3 = vmax.f32 %v432_v63, 0.0  ;;  %v456_v4 = vmax.f32 %v440_v0, 0.0  ;;  %v433_v5 = vadd.f32 %v542_v1, %v754_v35  ;;  %v441_v6 = vadd.f32 %v566_v2, %v754_v35 }
 0x105   :  { %464 = vst [vmem:[%s823_s3 + $0x10] sm:$0xff] %v448_v3  ;;  %472 = vst [vmem:[%s823_s3 + $0x50] sm:$0xff] %v456_v4  ;;  %v449_v7 = vmax.f32 %v433_v5, 0.0  ;;  %v457_v8 = vmax.f32 %v441_v6, 0.0  ;;  %v543_v9 = vpop.f32.mrb[8].mxu0  ;;  %v567_v10 = vpop.f32.mrb[8].mxu1 }
 0x106   :  { %v544_v11 = vpop.f32.mrb[9].mxu0  ;;  %v568_v12 = vpop.f32.mrb[9].mxu1 }
 0x107   :  { %465 = vst [vmem:[%s823_s3 + $0x18] sm:$0xff] %v449_v7  ;;  %473 = vst [vmem:[%s823_s3 + $0x58] sm:$0xff] %v457_v8  ;;  %v545_v13 = vadd.f32 %v544_v11, %v543_v9  ;;  %v569_v14 = vadd.f32 %v568_v12, %v567_v10  ;;  %v546_v15 = vpop.f32.mrb[10].mxu0  ;;  %v570_v16 = vpop.f32.mrb[10].mxu1 }
 0x108   :  { %v547_v17 = vpop.f32.mrb[11].mxu0  ;;  %v571_v18 = vpop.f32.mrb[11].mxu1 }
 0x109   :  { %v434_v19 = vadd.f32 %v545_v13, %v754_v35  ;;  %v442_v20 = vadd.f32 %v569_v14, %v754_v35  ;;  %v548_v21 = vadd.f32 %v547_v17, %v546_v15  ;;  %v572_v22 = vadd.f32 %v571_v18, %v570_v16 }
 0x10b   :  { %v450_v23 = vmax.f32 %v434_v19, 0.0  ;;  %v458_v24 = vmax.f32 %v442_v20, 0.0  ;;  %v435_v25 = vadd.f32 %v548_v21, %v754_v35  ;;  %v443_v26 = vadd.f32 %v572_v22, %v754_v35 }
 0x10d   :  { %466 = vst [vmem:[%s823_s3 + $0x20] sm:$0xff] %v450_v23  ;;  %474 = vst [vmem:[%s823_s3 + $0x60] sm:$0xff] %v458_v24  ;;  %v451_v27 = vmax.f32 %v435_v25, 0.0  ;;  %v459_v28 = vmax.f32 %v443_v26, 0.0  ;;  %v549_v29 = vpop.f32.mrb[12].mxu0  ;;  %v573_v30 = vpop.f32.mrb[12].mxu1 }
 0x10e   :  { %v550_v31 = vpop.f32.mrb[13].mxu0  ;;  %v574_v32 = vpop.f32.mrb[13].mxu1 }
 0x10f   :  { %467 = vst [vmem:[%s823_s3 + $0x28] sm:$0xff] %v451_v27  ;;  %475 = vst [vmem:[%s823_s3 + $0x68] sm:$0xff] %v459_v28  ;;  %v551_v33 = vadd.f32 %v550_v31, %v549_v29  ;;  %v575_v34 = vadd.f32 %v574_v32, %v573_v30  ;;  %v552_v36 = vpop.f32.mrb[14].mxu0  ;;  %v576_v37 = vpop.f32.mrb[14].mxu1 }
 0x110   :  { %v553_v38 = vpop.f32.mrb[15].mxu0  ;;  %v577_v39 = vpop.f32.mrb[15].mxu1 }
 0x111   :  { %v436_v40 = vadd.f32 %v551_v33, %v754_v35  ;;  %v444_v41 = vadd.f32 %v575_v34, %v754_v35  ;;  %v554_v42 = vadd.f32 %v553_v38, %v552_v36  ;;  %v578_v43 = vadd.f32 %v577_v39, %v576_v37 }
 0x113   :  { %v452_v44 = vmax.f32 %v436_v40, 0.0  ;;  %v460_v45 = vmax.f32 %v444_v41, 0.0  ;;  %v437_v46 = vadd.f32 %v554_v42, %v754_v35  ;;  %v445_v47 = vadd.f32 %v578_v43, %v754_v35 }
 0x115   :  { %468 = vst [vmem:[%s823_s3 + $0x30] sm:$0xff] %v452_v44  ;;  %476 = vst [vmem:[%s823_s3 + $0x70] sm:$0xff] %v460_v45  ;;  %v453_v48 = vmax.f32 %v437_v46, 0.0  ;;  %v461_v49 = vmax.f32 %v445_v47, 0.0 }
 0x117   :  { %469 = vst [vmem:[%s823_s3 + $0x38] sm:$0xff] %v453_v48  ;;  %477 = vst [vmem:[%s823_s3 + $0x78] sm:$0xff] %v461_v49 }

// kernel: resnet_forward.54
= control target key start
LH: loop header
LB: loop body
LE: loop exit
PB: predicated region body
PF: predicated region fallthrough
CT: control target
= control target key end

     0   :  { %s1157_s1 = inlined_call_operand.vmem [shape: bf16[384,128], index: 1, kind: input, shape index: {}]   ;;  %s1158_s0 = inlined_call_operand.vmem [shape: bf16[128,384], index: 0, kind: input, shape index: {}]   ;;  %s1159_s2 = inlined_call_operand.vmem [shape: f32[1,128], index: 2, kind: input, shape index: {}]   ;;  %s1160_s3 = inlined_call_operand.vmem [shape: f32[128,128], index: 3, kind: output, shape index: {}]  }
   0x1   :  { %v868_v0 = vld [vmem:[%s1157_s1 + $0x40] sm:$0xff]   ;;  %v871_v3 = vld [vmem:[%s1157_s1 + $0x48] sm:$0xff]   ;;  %v874_v6 = vld [vmem:[%s1157_s1 + $0x50] sm:$0xff]  }
   0x2   :  { %v869_v1 = vld [vmem:[%s1157_s1] sm:$0xff]   ;;  %756 = vmatprep.subr.bf16.mxu0 %v868_v0  ;;  %v872_v4 = vld [vmem:[%s1157_s1 + $0x8] sm:$0xff]   ;;  %v875_v7 = vld [vmem:[%s1157_s1 + $0x10] sm:$0xff]  }
   0x3   :  { %v870_v2 = vld [vmem:[%s1157_s1 + $0x80] sm:$0xff]   ;;  %757 = vmatpush3.bf16.msra.mxu0 %v869_v1  ;;  %v873_v5 = vld [vmem:[%s1157_s1 + $0x88] sm:$0xff]   ;;  %v876_v8 = vld [vmem:[%s1157_s1 + $0x90] sm:$0xff]  }
   0x4   :  { %836 = vmatprep.subr.bf16.mxu1 %v870_v2  ;;  %758 = vmatprep.subr.bf16.mxu0 %v871_v3  ;;  %v877_v9 = vld [vmem:[%s1157_s1 + $0x58] sm:$0xff]   ;;  %v880_v12 = vld [vmem:[%s1157_s1 + $0x60] sm:$0xff]   ;;  %v883_v15 = vld [vmem:[%s1157_s1 + $0x68] sm:$0xff]  }
   0x5   :  { %837 = vmatpush3.bf16.msra.mxu1 %v870_v2  ;;  %v878_v10 = vld [vmem:[%s1157_s1 + $0x18] sm:$0xff]   ;;  %v882_v13 = vld [vmem:[%s1157_s1 + $0xa0] sm:$0xff]   ;;  %v885_v16 = vld [vmem:[%s1157_s1 + $0xa8] sm:$0xff]  }
   0x6   :  { %838 = vmatprep.subr.bf16.mxu1 %v873_v5  ;;  %v879_v11 = vld [vmem:[%s1157_s1 + $0x98] sm:$0xff]   ;;  %v881_v14 = vld [vmem:[%s1157_s1 + $0x20] sm:$0xff]   ;;  %v884_v17 = vld [vmem:[%s1157_s1 + $0x28] sm:$0xff]  }
   0x7   :  { %759 = vmatpush3.bf16.msra.mxu0 %v872_v4  ;;  %v886_v18 = vld [vmem:[%s1157_s1 + $0x70] sm:$0xff]   ;;  %v889_v21 = vld [vmem:[%s1157_s1 + $0x78] sm:$0xff]   ;;  %v892_v26 = vld [vmem:[%s1158_s0] ss:$12 sps:$4 sm:$0xff]  }
   0x8   :  { %760 = vmatprep.subr.bf16.mxu0 %v874_v6  ;;  %v887_v19 = vld [vmem:[%s1157_s1 + $0x30] sm:$0xff]   ;;  %v891_v22 = vld [vmem:[%s1157_s1 + $0xb8] sm:$0xff]   ;;  %v896_v28 = vld [vmem:[%s1158_s0 + $0x20] ss:$12 sps:$4 sm:$0xff]  }
   0x9   :  { %839 = vmatpush3.bf16.msra.mxu1 %v873_v5  ;;  %v888_v20 = vld [vmem:[%s1157_s1 + $0xb0] sm:$0xff]   ;;  %v890_v25 = vld [vmem:[%s1157_s1 + $0x38] sm:$0xff]   ;;  %v912_v36 = vld [vmem:[%s1158_s0 + $0x80] ss:$12 sps:$4 sm:$0xff]  }
   0xa   :  { %840 = vmatprep.subr.bf16.mxu1 %v876_v8  ;;  %v894_v23 = vld [vmem:[%s1158_s0 + $0x4] ss:$12 sps:$4 sm:$0xff]   ;;  %v895_v24 = vld [vmem:[%s1158_s0 + $0x8] ss:$12 sps:$4 sm:$0xff]   ;;  %v905_v35 = vld [vmem:[%s1158_s0 + $0x4c] ss:$12 sps:$4 sm:$0xff]  }
   0xb   :  { %761 = vmatpush3.bf16.msra.mxu0 %v875_v7  ;;  %435 = vmatprep.mubr.bf16.mxu0 %v894_v23  ;;  %v897_v27 = vld [vmem:[%s1158_s0 + $0x1c] ss:$12 sps:$4 sm:$0xff]   ;;  %v903_v29 = vld [vmem:[%s1158_s0 + $0x38] ss:$12 sps:$4 sm:$0xff]   ;;  %v900_v31 = vld [vmem:[%s1158_s0 + $0x34] ss:$12 sps:$4 sm:$0xff]  }
   0xc   :  { %762 = vmatprep.subr.bf16.mxu0 %v877_v9  ;;  %852 = vmatprep.mubr.bf16.mxu1 %v895_v24  ;;  %v899_v30 = vld [vmem:[%s1158_s0 + $0x18] ss:$12 sps:$4 sm:$0xff]   ;;  %v904_v32 = vld [vmem:[%s1158_s0 + $0x50] ss:$12 sps:$4 sm:$0xff]   ;;  %v911_v33 = vld [vmem:[%s1158_s0 + $0x68] ss:$12 sps:$4 sm:$0xff]  }
   0xd   :  { %841 = vmatpush3.bf16.msra.mxu1 %v876_v8  ;;  %v902_v34 = vld [vmem:[%s1158_s0 + $0x30] ss:$12 sps:$4 sm:$0xff]   ;;  %v919_v37 = vld [vmem:[%s1158_s0 + $0x98] ss:$12 sps:$4 sm:$0xff]   ;;  %v907_v38 = vld [vmem:[%s1158_s0 + $0x48] ss:$12 sps:$4 sm:$0xff]  }
   0xe   :  { %842 = vmatprep.subr.bf16.mxu1 %v879_v11  ;;  %v908_v39 = vld [vmem:[%s1158_s0 + $0x64] ss:$12 sps:$4 sm:$0xff]   ;;  %v910_v41 = vld [vmem:[%s1158_s0 + $0x60] ss:$12 sps:$4 sm:$0xff]   ;;  %v913_v42 = vld [vmem:[%s1158_s0 + $0x7c] ss:$12 sps:$4 sm:$0xff]  }
   0xf   :  { %763 = vmatpush3.bf16.msra.mxu0 %v878_v10  ;;  %v920_v40 = vld [vmem:[%s1158_s0 + $0xb0] ss:$12 sps:$4 sm:$0xff]   ;;  %v915_v43 = vld [vmem:[%s1158_s0 + $0x78] ss:$12 sps:$4 sm:$0xff]   ;;  %v916_v44 = vld [vmem:[%s1158_s0 + $0x94] ss:$12 sps:$4 sm:$0xff]  }
  0x10   :  { %764 = vmatprep.subr.bf16.mxu0 %v880_v12  ;;  %v918_v45 = vld [vmem:[%s1158_s0 + $0x90] ss:$12 sps:$4 sm:$0xff]   ;;  %v921_v46 = vld [vmem:[%s1158_s0 + $0xac] ss:$12 sps:$4 sm:$0xff]   ;;  %v923_v47 = vld [vmem:[%s1158_s0 + $0xa8] ss:$12 sps:$4 sm:$0xff]  }
  0x11   :  { %843 = vmatpush3.bf16.msra.mxu1 %v879_v11  ;;  %v1091_v55 = vld [vmem:[%s1159_s2] ss:$0 sm:$0xff] }
  0x12   :  { %844 = vmatprep.subr.bf16.mxu1 %v882_v13 }
  0x13   :  { %765 = vmatpush3.bf16.msra.mxu0 %v881_v14 }
  0x14   :  { %766 = vmatprep.subr.bf16.mxu0 %v883_v15 }
  0x15   :  { %845 = vmatpush3.bf16.msra.mxu1 %v882_v13 }
  0x16   :  { %846 = vmatprep.subr.bf16.mxu1 %v885_v16 }
  0x17   :  { %767 = vmatpush3.bf16.msra.mxu0 %v884_v17 }
  0x18   :  { %768 = vmatprep.subr.bf16.mxu0 %v886_v18 }
  0x19   :  { %847 = vmatpush3.bf16.msra.mxu1 %v885_v16 }
  0x1a   :  { %848 = vmatprep.subr.bf16.mxu1 %v888_v20 }
  0x1b   :  { %769 = vmatpush3.bf16.msra.mxu0 %v887_v19 }
  0x1c   :  { %770 = vmatprep.subr.bf16.mxu0 %v889_v21 }
  0x1d   :  { %849 = vmatpush3.bf16.msra.mxu1 %v888_v20 }
  0x1e   :  { %850 = vmatprep.subr.bf16.mxu1 %v891_v22 }
  0x1f   :  { %771 = vmatpush3.bf16.msra.mxu0 %v890_v25 }
  0x21   :  { %851 = vmatpush3.bf16.msra.mxu1 %v891_v22 }
  0x22   :  { %436 = vmatmul.mubr.bf16.vlgmr.msra.gmra.mrb[0].mxu0 %v892_v26 }
  0x23   :  { %443 = vmatprep.mubr.bf16.mxu0 %v897_v27 }
  0x24   :  { %853 = vmatmul.mubr.bf16.vlgmr.msra.gmra.mrb[0].mxu1 %v896_v28 }
  0x25   :  { %856 = vmatprep.mubr.bf16.mxu1 %v903_v29 }
  0x2a   :  { %444 = vmatmul.mubr.bf16.gmra.mrb[4].mxu0 %v899_v30 }
  0x2b   :  { %451 = vmatprep.mubr.bf16.mxu0 %v900_v31 }
  0x2c   :  { %857 = vmatmul.mubr.bf16.gmra.mrb[4].mxu1 %v904_v32 }
  0x2d   :  { %860 = vmatprep.mubr.bf16.mxu1 %v911_v33 }
  0x32   :  { %452 = vmatmul.mubr.bf16.gmra.mrb[8].mxu0 %v902_v34 }
  0x33   :  { %459 = vmatprep.mubr.bf16.mxu0 %v905_v35 }
  0x34   :  { %861 = vmatmul.mubr.bf16.gmra.mrb[8].mxu1 %v912_v36 }
  0x35   :  { %864 = vmatprep.mubr.bf16.mxu1 %v919_v37 }
  0x3a   :  { %460 = vmatmul.mubr.bf16.gmra.mrb[12].mxu0 %v907_v38 }
  0x3b   :  { %467 = vmatprep.mubr.bf16.mxu0 %v908_v39 }
  0x3c   :  { %865 = vmatmul.mubr.bf16.gmra.mrb[12].mxu1 %v920_v40 }
  0x42   :  { %468 = vmatmul.mubr.bf16.gmra.mrb[16].mxu0 %v910_v41 }
  0x43   :  { %475 = vmatprep.mubr.bf16.mxu0 %v913_v42 }
  0x4a   :  { %476 = vmatmul.mubr.bf16.gmra.mrb[20].mxu0 %v915_v43 }
  0x4b   :  { %483 = vmatprep.mubr.bf16.mxu0 %v916_v44 }
  0x52   :  { %484 = vmatmul.mubr.bf16.gmra.mrb[24].mxu0 %v918_v45 }
  0x53   :  { %491 = vmatprep.mubr.bf16.mxu0 %v921_v46 }
  0x5a   :  { %492 = vmatmul.mubr.bf16.gmra.mrb[28].mxu0 %v923_v47 }
  0xf5   :  { %v772_v48 = vpop.f32.mrb[0].mxu0 }
  0xf6   :  { %v773_v49 = vpop.f32.mrb[1].mxu0 }
  0xf7   :  { %v774_v50 = vadd.f32 %v773_v49, %v772_v48  ;;  %v775_v51 = vpop.f32.mrb[2].mxu0  ;;  %v854_v52 = vpop.f32.mrb[0].mxu1 }
  0xf8   :  { %v776_v53 = vpop.f32.mrb[3].mxu0  ;;  %v534_v54 = vpop.f32.mrb[1].mxu1 }
  0xf9   :  { %v777_v56 = vadd.f32 %v776_v53, %v775_v51  ;;  %v535_v57 = vadd.f32 %v774_v50, %v534_v54  ;;  %v855_v58 = vpop.f32.mrb[2].mxu1 }
  0xfa   :  { %v537_v59 = vpop.f32.mrb[3].mxu1 }
  0xfb   :  { %v655_v60 = vadd.f32 %v1091_v55, %v535_v57  ;;  %v538_v61 = vadd.f32 %v777_v56, %v537_v59 }
  0xfd   :  { %v671_v62 = vmax.f32 %v655_v60, 0.0  ;;  %v656_v63 = vadd.f32 %v1091_v55, %v538_v61  ;;  %v778_v0 = vpop.f32.mrb[4].mxu0 }
  0xfe   :  { %v779_v1 = vpop.f32.mrb[5].mxu0 }
  0xff   :  { %687 = vst [vmem:[%s1160_s3] sm:$0xff] %v671_v62  ;;  %v672_v2 = vmax.f32 %v656_v63, 0.0  ;;  %v780_v3 = vadd.f32 %v779_v1, %v778_v0  ;;  %v781_v4 = vpop.f32.mrb[6].mxu0  ;;  %v858_v5 = vpop.f32.mrb[4].mxu1 }
 0x100   :  { %v782_v6 = vpop.f32.mrb[7].mxu0  ;;  %v550_v7 = vpop.f32.mrb[5].mxu1 }
 0x101   :  { %688 = vst [vmem:[%s1160_s3 + $0x8] sm:$0xff] %v672_v2  ;;  %v543_v8 = vadd.f32 %v854_v52, %v780_v3  ;;  %v783_v9 = vadd.f32 %v782_v6, %v781_v4  ;;  %v859_v10 = vpop.f32.mrb[6].mxu1 }
 0x102   :  { %v553_v11 = vpop.f32.mrb[7].mxu1 }
 0x103   :  { %v657_v12 = vadd.f32 %v1091_v55, %v543_v8  ;;  %v546_v13 = vadd.f32 %v855_v58, %v783_v9 }
 0x105   :  { %v673_v14 = vmax.f32 %v657_v12, 0.0  ;;  %v658_v15 = vadd.f32 %v1091_v55, %v546_v13  ;;  %v784_v16 = vpop.f32.mrb[8].mxu0 }
 0x106   :  { %v785_v17 = vpop.f32.mrb[9].mxu0 }
 0x107   :  { %689 = vst [vmem:[%s1160_s3 + $0x10] sm:$0xff] %v673_v14  ;;  %v674_v18 = vmax.f32 %v658_v15, 0.0  ;;  %v786_v19 = vadd.f32 %v785_v17, %v784_v16  ;;  %v787_v20 = vpop.f32.mrb[10].mxu0  ;;  %v862_v21 = vpop.f32.mrb[8].mxu1 }
 0x108   :  { %v788_v22 = vpop.f32.mrb[11].mxu0  ;;  %v566_v23 = vpop.f32.mrb[9].mxu1 }
 0x109   :  { %690 = vst [vmem:[%s1160_s3 + $0x18] sm:$0xff] %v674_v18  ;;  %v789_v24 = vadd.f32 %v788_v22, %v787_v20  ;;  %v551_v25 = vadd.f32 %v786_v19, %v550_v7  ;;  %v863_v26 = vpop.f32.mrb[10].mxu1 }
 0x10a   :  { %v569_v27 = vpop.f32.mrb[11].mxu1 }
 0x10b   :  { %v659_v28 = vadd.f32 %v1091_v55, %v551_v25  ;;  %v554_v29 = vadd.f32 %v789_v24, %v553_v11 }
 0x10d   :  { %v675_v30 = vmax.f32 %v659_v28, 0.0  ;;  %v660_v31 = vadd.f32 %v1091_v55, %v554_v29  ;;  %v790_v32 = vpop.f32.mrb[12].mxu0 }
 0x10e   :  { %v791_v33 = vpop.f32.mrb[13].mxu0 }
 0x10f   :  { %691 = vst [vmem:[%s1160_s3 + $0x20] sm:$0xff] %v675_v30  ;;  %v676_v34 = vmax.f32 %v660_v31, 0.0  ;;  %v792_v35 = vadd.f32 %v791_v33, %v790_v32  ;;  %v793_v36 = vpop.f32.mrb[14].mxu0  ;;  %v866_v37 = vpop.f32.mrb[12].mxu1 }
 0x110   :  { %v794_v38 = vpop.f32.mrb[15].mxu0  ;;  %v582_v39 = vpop.f32.mrb[13].mxu1 }
 0x111   :  { %692 = vst [vmem:[%s1160_s3 + $0x28] sm:$0xff] %v676_v34  ;;  %v559_v40 = vadd.f32 %v858_v5, %v792_v35  ;;  %v795_v41 = vadd.f32 %v794_v38, %v793_v36  ;;  %v867_v42 = vpop.f32.mrb[14].mxu1 }
 0x112   :  { %v585_v43 = vpop.f32.mrb[15].mxu1 }
 0x113   :  { %v661_v44 = vadd.f32 %v1091_v55, %v559_v40  ;;  %v562_v45 = vadd.f32 %v859_v10, %v795_v41 }
 0x115   :  { %v677_v46 = vmax.f32 %v661_v44, 0.0  ;;  %v662_v47 = vadd.f32 %v1091_v55, %v562_v45  ;;  %v796_v48 = vpop.f32.mrb[16].mxu0 }
 0x116   :  { %v797_v49 = vpop.f32.mrb[17].mxu0 }
 0x117   :  { %693 = vst [vmem:[%s1160_s3 + $0x30] sm:$0xff] %v677_v46  ;;  %v678_v50 = vmax.f32 %v662_v47, 0.0  ;;  %v798_v51 = vadd.f32 %v797_v49, %v796_v48  ;;  %v799_v52 = vpop.f32.mrb[18].mxu0 }
 0x118   :  { %v800_v53 = vpop.f32.mrb[19].mxu0 }
 0x119   :  { %694 = vst [vmem:[%s1160_s3 + $0x38] sm:$0xff] %v678_v50  ;;  %v801_v54 = vadd.f32 %v800_v53, %v799_v52  ;;  %v567_v56 = vadd.f32 %v798_v51, %v566_v23 }
 0x11b   :  { %v663_v57 = vadd.f32 %v1091_v55, %v567_v56  ;;  %v570_v58 = vadd.f32 %v801_v54, %v569_v27 }
 0x11d   :  { %v679_v59 = vmax.f32 %v663_v57, 0.0  ;;  %v664_v60 = vadd.f32 %v1091_v55, %v570_v58  ;;  %v802_v61 = vpop.f32.mrb[20].mxu0 }
 0x11e   :  { %v803_v62 = vpop.f32.mrb[21].mxu0 }
 0x11f   :  { %695 = vst [vmem:[%s1160_s3 + $0x40] sm:$0xff] %v679_v59  ;;  %v680_v63 = vmax.f32 %v664_v60, 0.0  ;;  %v804_v0 = vadd.f32 %v803_v62, %v802_v61  ;;  %v805_v1 = vpop.f32.mrb[22].mxu0 }
 0x120   :  { %v806_v2 = vpop.f32.mrb[23].mxu0 }
 0x121   :  { %696 = vst [vmem:[%s1160_s3 + $0x48] sm:$0xff] %v680_v63  ;;  %v575_v3 = vadd.f32 %v862_v21, %v804_v0  ;;  %v807_v4 = vadd.f32 %v806_v2, %v805_v1 }
 0x123   :  { %v665_v5 = vadd.f32 %v1091_v55, %v575_v3  ;;  %v578_v6 = vadd.f32 %v863_v26, %v807_v4 }
 0x125   :  { %v681_v7 = vmax.f32 %v665_v5, 0.0  ;;  %v666_v8 = vadd.f32 %v1091_v55, %v578_v6  ;;  %v808_v9 = vpop.f32.mrb[24].mxu0 }
 0x126   :  { %v809_v10 = vpop.f32.mrb[25].mxu0 }
 0x127   :  { %697 = vst [vmem:[%s1160_s3 + $0x50] sm:$0xff] %v681_v7  ;;  %v682_v11 = vmax.f32 %v666_v8, 0.0  ;;  %v810_v12 = vadd.f32 %v809_v10, %v808_v9  ;;  %v811_v13 = vpop.f32.mrb[26].mxu0 }
 0x128   :  { %v812_v14 = vpop.f32.mrb[27].mxu0 }
 0x129   :  { %698 = vst [vmem:[%s1160_s3 + $0x58] sm:$0xff] %v682_v11  ;;  %v813_v15 = vadd.f32 %v812_v14, %v811_v13  ;;  %v583_v16 = vadd.f32 %v810_v12, %v582_v39 }
 0x12b   :  { %v667_v17 = vadd.f32 %v1091_v55, %v583_v16  ;;  %v586_v18 = vadd.f32 %v813_v15, %v585_v43 }
 0x12d   :  { %v683_v19 = vmax.f32 %v667_v17, 0.0  ;;  %v668_v20 = vadd.f32 %v1091_v55, %v586_v18  ;;  %v814_v21 = vpop.f32.mrb[28].mxu0 }
 0x12e   :  { %v815_v22 = vpop.f32.mrb[29].mxu0 }
 0x12f   :  { %699 = vst [vmem:[%s1160_s3 + $0x60] sm:$0xff] %v683_v19  ;;  %v684_v23 = vmax.f32 %v668_v20, 0.0  ;;  %v816_v24 = vadd.f32 %v815_v22, %v814_v21  ;;  %v817_v25 = vpop.f32.mrb[30].mxu0 }
 0x130   :  { %v818_v26 = vpop.f32.mrb[31].mxu0 }
 0x131   :  { %700 = vst [vmem:[%s1160_s3 + $0x68] sm:$0xff] %v684_v23  ;;  %v591_v27 = vadd.f32 %v866_v37, %v816_v24  ;;  %v819_v28 = vadd.f32 %v818_v26, %v817_v25 }
 0x133   :  { %v669_v29 = vadd.f32 %v1091_v55, %v591_v27  ;;  %v594_v30 = vadd.f32 %v867_v42, %v819_v28 }
 0x135   :  { %v685_v31 = vmax.f32 %v669_v29, 0.0  ;;  %v670_v32 = vadd.f32 %v1091_v55, %v594_v30 }
 0x137   :  { %701 = vst [vmem:[%s1160_s3 + $0x70] sm:$0xff] %v685_v31  ;;  %v686_v33 = vmax.f32 %v670_v32, 0.0 }
 0x139   :  { %702 = vst [vmem:[%s1160_s3 + $0x78] sm:$0xff] %v686_v33 }

// kernel: resnet_forward.53
= control target key start
LH: loop header
LB: loop body
LE: loop exit
PB: predicated region body
PF: predicated region fallthrough
CT: control target
= control target key end

     0   :  { %s1759_s1 = inlined_call_operand.vmem [shape: bf16[640,128], index: 1, kind: input, shape index: {}]   ;;  %s1760_s0 = inlined_call_operand.vmem [shape: bf16[128,640], index: 0, kind: input, shape index: {}]   ;;  %s1761_s2 = inlined_call_operand.vmem [shape: f32[1,128], index: 2, kind: input, shape index: {}]   ;;  %s1762_s3 = inlined_call_operand.vmem [shape: f32[128,128], index: 3, kind: output, shape index: {}]  }
   0x1   :  { %v1301_v0 = vld [vmem:[%s1759_s1 + $0x40] sm:$0xff]   ;;  %v1305_v4 = vld [vmem:[%s1759_s1 + $0x48] sm:$0xff]   ;;  %v1309_v8 = vld [vmem:[%s1759_s1 + $0x50] sm:$0xff]  }
   0x2   :  { %v1302_v1 = vld [vmem:[%s1759_s1 + $0xc0] sm:$0xff]   ;;  %1109 = vmatprep.subr.bf16.mxu0 %v1301_v0  ;;  %v1306_v5 = vld [vmem:[%s1759_s1 + $0xc8] sm:$0xff]   ;;  %v1310_v9 = vld [vmem:[%s1759_s1 + $0xd0] sm:$0xff]  }
   0x3   :  { %v1303_v2 = vld [vmem:[%s1759_s1] sm:$0xff]   ;;  %1173 = vmatprep.subr.bf16.mxu1 %v1302_v1  ;;  %v1307_v6 = vld [vmem:[%s1759_s1 + $0x8] sm:$0xff]   ;;  %v1311_v10 = vld [vmem:[%s1759_s1 + $0x10] sm:$0xff]  }
   0x4   :  { %v1304_v3 = vld [vmem:[%s1759_s1 + $0x80] sm:$0xff]   ;;  %1110 = vmatpush3.bf16.msra.mxu0 %v1303_v2  ;;  %v1308_v7 = vld [vmem:[%s1759_s1 + $0x88] sm:$0xff]   ;;  %v1312_v11 = vld [vmem:[%s1759_s1 + $0x90] sm:$0xff]  }
   0x5   :  { %1174 = vmatpush3.bf16.msra.mxu1 %v1304_v3  ;;  %1111 = vmatprep.subr.bf16.mxu0 %v1305_v4  ;;  %v1313_v12 = vld [vmem:[%s1759_s1 + $0x58] sm:$0xff]   ;;  %v1317_v16 = vld [vmem:[%s1759_s1 + $0x60] sm:$0xff]   ;;  %v1321_v20 = vld [vmem:[%s1759_s1 + $0x68] sm:$0xff]  }
   0x6   :  { %1175 = vmatprep.subr.bf16.mxu1 %v1306_v5  ;;  %v1314_v13 = vld [vmem:[%s1759_s1 + $0xd8] sm:$0xff]   ;;  %v1318_v17 = vld [vmem:[%s1759_s1 + $0xe0] sm:$0xff]   ;;  %v1322_v21 = vld [vmem:[%s1759_s1 + $0xe8] sm:$0xff]  }
   0x7   :  { %v1315_v14 = vld [vmem:[%s1759_s1 + $0x18] sm:$0xff]   ;;  %v1319_v18 = vld [vmem:[%s1759_s1 + $0x20] sm:$0xff]   ;;  %v1323_v22 = vld [vmem:[%s1759_s1 + $0x28] sm:$0xff]  }
   0x8   :  { %1112 = vmatpush3.bf16.msra.mxu0 %v1307_v6  ;;  %v1316_v15 = vld [vmem:[%s1759_s1 + $0x98] sm:$0xff]   ;;  %v1320_v19 = vld [vmem:[%s1759_s1 + $0xa0] sm:$0xff]   ;;  %v1324_v23 = vld [vmem:[%s1759_s1 + $0xa8] sm:$0xff]  }
   0x9   :  { %1176 = vmatpush3.bf16.msra.mxu1 %v1308_v7  ;;  %1113 = vmatprep.subr.bf16.mxu0 %v1309_v8  ;;  %v1325_v24 = vld [vmem:[%s1759_s1 + $0x70] sm:$0xff]   ;;  %v1329_v28 = vld [vmem:[%s1759_s1 + $0x78] sm:$0xff]   ;;  %v1338_v35 = vld [vmem:[%s1760_s0 + $0xc] ss:$20 sps:$4 sm:$0xff]  }
   0xa   :  { %1177 = vmatprep.subr.bf16.mxu1 %v1310_v9  ;;  %v1326_v25 = vld [vmem:[%s1759_s1 + $0xf0] sm:$0xff]   ;;  %v1330_v29 = vld [vmem:[%s1759_s1 + $0xf8] sm:$0xff]   ;;  %v1339_v36 = vld [vmem:[%s1759_s1 + $0x100] sm:$0xff]   ;;  %756 = vmatprep.mubr.bf16.mxu1 %v1338_v35 }
   0xb   :  { %v1327_v26 = vld [vmem:[%s1759_s1 + $0x30] sm:$0xff]   ;;  %v1331_v30 = vld [vmem:[%s1759_s1 + $0x38] sm:$0xff]   ;;  %v1340_v37 = vld [vmem:[%s1760_s0 + $0x2c] ss:$20 sps:$4 sm:$0xff]  }
   0xc   :  { %1114 = vmatpush3.bf16.msra.mxu0 %v1311_v10  ;;  %v1328_v27 = vld [vmem:[%s1759_s1 + $0xb0] sm:$0xff]   ;;  %v1332_v31 = vld [vmem:[%s1759_s1 + $0xb8] sm:$0xff]   ;;  %v1346_v39 = vld [vmem:[%s1759_s1 + $0x108] sm:$0xff]  }
   0xd   :  { %1178 = vmatpush3.bf16.msra.mxu1 %v1312_v11  ;;  %1115 = vmatprep.subr.bf16.mxu0 %v1313_v12  ;;  %v1333_v32 = vld [vmem:[%s1760_s0] ss:$20 sps:$4 sm:$0xff]   ;;  %v1335_v33 = vld [vmem:[%s1760_s0 + $0x4] ss:$20 sps:$4 sm:$0xff]   ;;  %v1336_v34 = vld [vmem:[%s1760_s0 + $0x8] ss:$20 sps:$4 sm:$0xff]  }
   0xe   :  { %1179 = vmatprep.subr.bf16.mxu1 %v1314_v13  ;;  %659 = vmatprep.mubr.bf16.mxu0 %v1335_v33  ;;  %v1342_v38 = vld [vmem:[%s1760_s0 + $0x34] ss:$20 sps:$4 sm:$0xff]   ;;  %v1345_v41 = vld [vmem:[%s1760_s0 + $0x30] ss:$20 sps:$4 sm:$0xff]   ;;  %v1360_v45 = vld [vmem:[%s1759_s1 + $0x118] sm:$0xff]  }
   0xf   :  { %v1344_v40 = vld [vmem:[%s1760_s0 + $0x28] ss:$20 sps:$4 sm:$0xff]   ;;  %v1353_v44 = vld [vmem:[%s1759_s1 + $0x110] sm:$0xff]   ;;  %v1352_v47 = vld [vmem:[%s1760_s0 + $0x58] ss:$20 sps:$4 sm:$0xff]  }
  0x10   :  { %1116 = vmatpush3.bf16.msra.mxu0 %v1315_v14  ;;  %v1347_v42 = vld [vmem:[%s1760_s0 + $0x54] ss:$20 sps:$4 sm:$0xff]   ;;  %v1349_v43 = vld [vmem:[%s1760_s0 + $0x5c] ss:$20 sps:$4 sm:$0xff]   ;;  %v1356_v49 = vld [vmem:[%s1760_s0 + $0x84] ss:$20 sps:$4 sm:$0xff]  }
  0x11   :  { %1180 = vmatpush3.bf16.msra.mxu1 %v1316_v15  ;;  %1117 = vmatprep.subr.bf16.mxu0 %v1317_v16  ;;  %v1351_v46 = vld [vmem:[%s1760_s0 + $0x50] ss:$20 sps:$4 sm:$0xff]   ;;  %v1374_v51 = vld [vmem:[%s1759_s1 + $0x128] sm:$0xff]   ;;  %v1359_v53 = vld [vmem:[%s1760_s0 + $0x80] ss:$20 sps:$4 sm:$0xff]  }
  0x12   :  { %1181 = vmatprep.subr.bf16.mxu1 %v1318_v17  ;;  %v1354_v48 = vld [vmem:[%s1760_s0 + $0x7c] ss:$20 sps:$4 sm:$0xff]   ;;  %v1367_v50 = vld [vmem:[%s1759_s1 + $0x120] sm:$0xff]   ;;  %v1358_v52 = vld [vmem:[%s1760_s0 + $0x78] ss:$20 sps:$4 sm:$0xff]  }
  0x13   :  { %v1361_v54 = vld [vmem:[%s1760_s0 + $0xa4] ss:$20 sps:$4 sm:$0xff]   ;;  %v1381_v55 = vld [vmem:[%s1759_s1 + $0x130] sm:$0xff]   ;;  %v1363_v56 = vld [vmem:[%s1760_s0 + $0xac] ss:$20 sps:$4 sm:$0xff]  }
  0x14   :  { %1118 = vmatpush3.bf16.msra.mxu0 %v1319_v18  ;;  %v1388_v57 = vld [vmem:[%s1759_s1 + $0x138] sm:$0xff]   ;;  %v1365_v58 = vld [vmem:[%s1760_s0 + $0xa0] ss:$20 sps:$4 sm:$0xff]   ;;  %v1373_v63 = vld [vmem:[%s1760_s0 + $0xd0] ss:$20 sps:$4 sm:$0xff]  }
  0x15   :  { %1182 = vmatpush3.bf16.msra.mxu1 %v1320_v19  ;;  %1119 = vmatprep.subr.bf16.mxu0 %v1321_v20  ;;  %v1366_v59 = vld [vmem:[%s1760_s0 + $0xa8] ss:$20 sps:$4 sm:$0xff]   ;;  %v1368_v60 = vld [vmem:[%s1760_s0 + $0xcc] ss:$20 sps:$4 sm:$0xff]   ;;  %v1379_v2 = vld [vmem:[%s1760_s0 + $0xf0] ss:$20 sps:$4 sm:$0xff]  }
  0x16   :  { %1183 = vmatprep.subr.bf16.mxu1 %v1322_v21  ;;  %v1370_v61 = vld [vmem:[%s1760_s0 + $0xd4] ss:$20 sps:$4 sm:$0xff]   ;;  %v1377_v1 = vld [vmem:[%s1760_s0 + $0xfc] ss:$20 sps:$4 sm:$0xff]   ;;  %v1380_v3 = vld [vmem:[%s1760_s0 + $0xf8] ss:$20 sps:$4 sm:$0xff]  }
  0x17   :  { %v1372_v62 = vld [vmem:[%s1760_s0 + $0xc8] ss:$20 sps:$4 sm:$0xff]   ;;  %v1384_v5 = vld [vmem:[%s1760_s0 + $0x124] ss:$20 sps:$4 sm:$0xff]   ;;  %v1387_v7 = vld [vmem:[%s1760_s0 + $0x120] ss:$20 sps:$4 sm:$0xff]  }
  0x18   :  { %1120 = vmatpush3.bf16.msra.mxu0 %v1323_v22  ;;  %v1375_v0 = vld [vmem:[%s1760_s0 + $0xf4] ss:$20 sps:$4 sm:$0xff]   ;;  %v1382_v4 = vld [vmem:[%s1760_s0 + $0x11c] ss:$20 sps:$4 sm:$0xff]   ;;  %v1386_v6 = vld [vmem:[%s1760_s0 + $0x118] ss:$20 sps:$4 sm:$0xff]  }
  0x19   :  { %1184 = vmatpush3.bf16.msra.mxu1 %v1324_v23  ;;  %1121 = vmatprep.subr.bf16.mxu0 %v1325_v24  ;;  %v1389_v8 = vld [vmem:[%s1760_s0 + $0x10] ss:$20 sps:$4 sm:$0xff]   ;;  %v1391_v10 = vld [vmem:[%s1760_s0 + $0x38] ss:$20 sps:$4 sm:$0xff]   ;;  %v1393_v12 = vld [vmem:[%s1760_s0 + $0x60] ss:$20 sps:$4 sm:$0xff]  }
  0x1a   :  { %1185 = vmatprep.subr.bf16.mxu1 %v1326_v25  ;;  %v1390_v9 = vld [vmem:[%s1760_s0 + $0xb0] ss:$20 sps:$4 sm:$0xff]   ;;  %v1392_v11 = vld [vmem:[%s1760_s0 + $0xd8] ss:$20 sps:$4 sm:$0xff]   ;;  %v1394_v13 = vld [vmem:[%s1760_s0 + $0x100] ss:$20 sps:$4 sm:$0xff]  }
  0x1b   :  { %v1395_v14 = vld [vmem:[%s1760_s0 + $0x88] ss:$20 sps:$4 sm:$0xff]  }
  0x1c   :  { %1122 = vmatpush3.bf16.msra.mxu0 %v1327_v26  ;;  %v1396_v15 = vld [vmem:[%s1760_s0 + $0x128] ss:$20 sps:$4 sm:$0xff]  }
  0x1d   :  { %1186 = vmatpush3.bf16.msra.mxu1 %v1328_v27  ;;  %1123 = vmatprep.subr.bf16.mxu0 %v1329_v28 }
  0x1e   :  { %1187 = vmatprep.subr.bf16.mxu1 %v1330_v29 }
  0x20   :  { %1124 = vmatpush3.bf16.msra.mxu0 %v1331_v30 }
  0x21   :  { %1188 = vmatpush3.bf16.msra.mxu1 %v1332_v31  ;;  %1253 = vmatprep.subr.bf16.mxu0 %v1339_v36 }
  0x22   :  { %1285 = vmatprep.subr.bf16.mxu1 %v1339_v36 }
  0x23   :  { %660 = vmatmul.mubr.bf16.vlgmr.msra.gmra.mrb[0].mxu0 %v1333_v32 }
  0x24   :  { %757 = vmatmul.mubr.bf16.vlgmr.msra.gmra.mrb[0].mxu1 %v1336_v34  ;;  %1254 = vmatpush3.bf16.msra.mxu0 %v1339_v36 }
  0x25   :  { %1293 = vmatpush3.bf16.msra.mxu1 %v1339_v36  ;;  %667 = vmatprep.mubr.bf16.mxu0 %v1340_v37 }
  0x26   :  { %764 = vmatprep.mubr.bf16.mxu1 %v1342_v38  ;;  %1255 = vmatprep.subr.bf16.mxu0 %v1346_v39 }
  0x27   :  { %1286 = vmatprep.subr.bf16.mxu1 %v1346_v39 }
  0x28   :  { %1256 = vmatpush3.bf16.msra.mxu0 %v1346_v39 }
  0x29   :  { %1294 = vmatpush3.bf16.msra.mxu1 %v1346_v39  ;;  %1257 = vmatprep.subr.bf16.mxu0 %v1353_v44 }
  0x2a   :  { %1287 = vmatprep.subr.bf16.mxu1 %v1353_v44 }
  0x2b   :  { %668 = vmatmul.mubr.bf16.gmra.mrb[4].mxu0 %v1344_v40 }
  0x2c   :  { %765 = vmatmul.mubr.bf16.gmra.mrb[4].mxu1 %v1345_v41  ;;  %675 = vmatprep.mubr.bf16.mxu0 %v1347_v42 }
  0x2d   :  { %772 = vmatprep.mubr.bf16.mxu1 %v1349_v43  ;;  %1258 = vmatpush3.bf16.msra.mxu0 %v1353_v44 }
  0x2e   :  { %1295 = vmatpush3.bf16.msra.mxu1 %v1353_v44  ;;  %1259 = vmatprep.subr.bf16.mxu0 %v1360_v45 }
  0x2f   :  { %1288 = vmatprep.subr.bf16.mxu1 %v1360_v45 }
  0x31   :  { %1260 = vmatpush3.bf16.msra.mxu0 %v1360_v45 }
  0x32   :  { %1296 = vmatpush3.bf16.msra.mxu1 %v1360_v45  ;;  %1261 = vmatprep.subr.bf16.mxu0 %v1367_v50 }
  0x33   :  { %676 = vmatmul.mubr.bf16.gmra.mrb[8].mxu0 %v1351_v46  ;;  %1289 = vmatprep.subr.bf16.mxu1 %v1367_v50 }
  0x34   :  { %773 = vmatmul.mubr.bf16.gmra.mrb[8].mxu1 %v1352_v47  ;;  %683 = vmatprep.mubr.bf16.mxu0 %v1354_v48 }
  0x35   :  { %780 = vmatprep.mubr.bf16.mxu1 %v1356_v49  ;;  %1262 = vmatpush3.bf16.msra.mxu0 %v1367_v50 }
  0x36   :  { %1297 = vmatpush3.bf16.msra.mxu1 %v1367_v50  ;;  %1263 = vmatprep.subr.bf16.mxu0 %v1374_v51 }
  0x37   :  { %1290 = vmatprep.subr.bf16.mxu1 %v1374_v51 }
  0x39   :  { %1264 = vmatpush3.bf16.msra.mxu0 %v1374_v51 }
  0x3a   :  { %1298 = vmatpush3.bf16.msra.mxu1 %v1374_v51  ;;  %1265 = vmatprep.subr.bf16.mxu0 %v1381_v55 }
  0x3b   :  { %684 = vmatmul.mubr.bf16.gmra.mrb[12].mxu0 %v1358_v52  ;;  %1291 = vmatprep.subr.bf16.mxu1 %v1381_v55 }
  0x3c   :  { %781 = vmatmul.mubr.bf16.gmra.mrb[12].mxu1 %v1359_v53  ;;  %691 = vmatprep.mubr.bf16.mxu0 %v1361_v54 }
  0x3d   :  { %788 = vmatprep.mubr.bf16.mxu1 %v1363_v56  ;;  %1266 = vmatpush3.bf16.msra.mxu0 %v1381_v55 }
  0x3e   :  { %1299 = vmatpush3.bf16.msra.mxu1 %v1381_v55  ;;  %1267 = vmatprep.subr.bf16.mxu0 %v1388_v57 }
  0x3f   :  { %1292 = vmatprep.subr.bf16.mxu1 %v1388_v57 }
  0x41   :  { %1268 = vmatpush3.bf16.msra.mxu0 %v1388_v57 }
  0x42   :  { %1300 = vmatpush3.bf16.msra.mxu1 %v1388_v57 }
  0x43   :  { %692 = vmatmul.mubr.bf16.gmra.mrb[16].mxu0 %v1365_v58 }
  0x44   :  { %789 = vmatmul.mubr.bf16.gmra.mrb[16].mxu1 %v1366_v59  ;;  %699 = vmatprep.mubr.bf16.mxu0 %v1368_v60 }
  0x45   :  { %796 = vmatprep.mubr.bf16.mxu1 %v1370_v61 }
  0x4b   :  { %700 = vmatmul.mubr.bf16.gmra.mrb[20].mxu0 %v1372_v62 }
  0x4c   :  { %797 = vmatmul.mubr.bf16.gmra.mrb[20].mxu1 %v1373_v63  ;;  %707 = vmatprep.mubr.bf16.mxu0 %v1375_v0 }
  0x4d   :  { %804 = vmatprep.mubr.bf16.mxu1 %v1377_v1 }
  0x53   :  { %708 = vmatmul.mubr.bf16.gmra.mrb[24].mxu0 %v1379_v2 }
  0x54   :  { %805 = vmatmul.mubr.bf16.gmra.mrb[24].mxu1 %v1380_v3  ;;  %715 = vmatprep.mubr.bf16.mxu0 %v1382_v4 }
  0x55   :  { %812 = vmatprep.mubr.bf16.mxu1 %v1384_v5 }
  0x5b   :  { %716 = vmatmul.mubr.bf16.gmra.mrb[28].mxu0 %v1386_v6 }
  0x5c   :  { %813 = vmatmul.mubr.bf16.gmra.mrb[28].mxu1 %v1387_v7  ;;  %1269 = vmatprep.mubr.bf16.mxu0 %v1389_v8 }
  0x5d   :  { %1277 = vmatprep.mubr.bf16.mxu1 %v1390_v9 }
  0x63   :  { %1270 = vmatmul.mubr.bf16.vlgmr.msra.gmra.mrb[32].mxu0 %v1391_v10 }
  0x64   :  { %1278 = vmatmul.mubr.bf16.vlgmr.msra.gmra.mrb[32].mxu1 %v1392_v11  ;;  %1273 = vmatprep.mubr.bf16.mxu0 %v1393_v12 }
  0x65   :  { %1281 = vmatprep.mubr.bf16.mxu1 %v1394_v13 }
  0x6b   :  { %1274 = vmatmul.mubr.bf16.gmra.mrb[36].mxu0 %v1395_v14 }
  0x6c   :  { %1282 = vmatmul.mubr.bf16.gmra.mrb[36].mxu1 %v1396_v15 }
  0xf6   :  { %v1125_v16 = vpop.f32.mrb[0].mxu0 }
  0xf7   :  { %v1189_v17 = vpop.f32.mrb[0].mxu1  ;;  %v1126_v18 = vpop.f32.mrb[1].mxu0 }
  0xf8   :  { %v1127_v19 = vadd.f32 %v1126_v18, %v1125_v16  ;;  %v1190_v20 = vpop.f32.mrb[1].mxu1  ;;  %v1128_v21 = vpop.f32.mrb[2].mxu0 }
  0xf9   :  { %v1191_v22 = vadd.f32 %v1190_v20, %v1189_v17  ;;  %v1192_v23 = vpop.f32.mrb[2].mxu1  ;;  %v1129_v24 = vpop.f32.mrb[3].mxu0 }
  0xfa   :  { %v1130_v25 = vadd.f32 %v1129_v24, %v1128_v21  ;;  %v1193_v26 = vpop.f32.mrb[3].mxu1 }
  0xfb   :  { %v1194_v27 = vadd.f32 %v1193_v26, %v1192_v23  ;;  %v1657_v28 = vadd.f32 %v1191_v22, %v1127_v19 }
  0xfd   :  { %v1659_v29 = vadd.f32 %v1194_v27, %v1130_v25 }
  0xfe   :  { %v1131_v30 = vpop.f32.mrb[4].mxu0 }
  0xff   :  { %v1195_v31 = vpop.f32.mrb[4].mxu1  ;;  %v1132_v32 = vpop.f32.mrb[5].mxu0 }
 0x100   :  { %v1133_v33 = vadd.f32 %v1132_v32, %v1131_v30  ;;  %v1196_v34 = vpop.f32.mrb[5].mxu1  ;;  %v1134_v35 = vpop.f32.mrb[6].mxu0 }
 0x101   :  { %v1197_v36 = vadd.f32 %v1196_v34, %v1195_v31  ;;  %v1198_v37 = vpop.f32.mrb[6].mxu1  ;;  %v1135_v38 = vpop.f32.mrb[7].mxu0 }
 0x102   :  { %v1136_v39 = vadd.f32 %v1135_v38, %v1134_v35  ;;  %v1199_v40 = vpop.f32.mrb[7].mxu1 }
 0x103   :  { %v1200_v41 = vadd.f32 %v1199_v40, %v1198_v37  ;;  %v1661_v42 = vadd.f32 %v1197_v36, %v1133_v33 }
 0x105   :  { %v1663_v43 = vadd.f32 %v1200_v41, %v1136_v39 }
 0x106   :  { %v1137_v44 = vpop.f32.mrb[8].mxu0 }
 0x107   :  { %v1201_v45 = vpop.f32.mrb[8].mxu1  ;;  %v1138_v46 = vpop.f32.mrb[9].mxu0 }
 0x108   :  { %v1139_v47 = vadd.f32 %v1138_v46, %v1137_v44  ;;  %v1202_v48 = vpop.f32.mrb[9].mxu1  ;;  %v1140_v49 = vpop.f32.mrb[10].mxu0 }
 0x109   :  { %v1203_v50 = vadd.f32 %v1202_v48, %v1201_v45  ;;  %v1204_v51 = vpop.f32.mrb[10].mxu1  ;;  %v1141_v52 = vpop.f32.mrb[11].mxu0 }
 0x10a   :  { %v1142_v53 = vadd.f32 %v1141_v52, %v1140_v49  ;;  %v1205_v54 = vpop.f32.mrb[11].mxu1 }
 0x10b   :  { %v1206_v55 = vadd.f32 %v1205_v54, %v1204_v51  ;;  %v1665_v56 = vadd.f32 %v1203_v50, %v1139_v47 }
 0x10d   :  { %v1667_v57 = vadd.f32 %v1206_v55, %v1142_v53 }
 0x10e   :  { %v1143_v58 = vpop.f32.mrb[12].mxu0 }
 0x10f   :  { %v1207_v59 = vpop.f32.mrb[12].mxu1  ;;  %v1144_v60 = vpop.f32.mrb[13].mxu0 }
 0x110   :  { %v1145_v61 = vadd.f32 %v1144_v60, %v1143_v58  ;;  %v1208_v62 = vpop.f32.mrb[13].mxu1  ;;  %v1146_v63 = vpop.f32.mrb[14].mxu0 }
 0x111   :  { %v1209_v0 = vadd.f32 %v1208_v62, %v1207_v59  ;;  %v1210_v1 = vpop.f32.mrb[14].mxu1  ;;  %v1147_v2 = vpop.f32.mrb[15].mxu0 }
 0x112   :  { %v1148_v3 = vadd.f32 %v1147_v2, %v1146_v63  ;;  %v1211_v4 = vpop.f32.mrb[15].mxu1 }
 0x113   :  { %v1212_v5 = vadd.f32 %v1211_v4, %v1210_v1  ;;  %v1669_v6 = vadd.f32 %v1209_v0, %v1145_v61 }
 0x115   :  { %v1671_v7 = vadd.f32 %v1212_v5, %v1148_v3 }
 0x116   :  { %v1149_v8 = vpop.f32.mrb[16].mxu0 }
 0x117   :  { %v1213_v9 = vpop.f32.mrb[16].mxu1  ;;  %v1150_v10 = vpop.f32.mrb[17].mxu0 }
 0x118   :  { %v1151_v11 = vadd.f32 %v1150_v10, %v1149_v8  ;;  %v1214_v12 = vpop.f32.mrb[17].mxu1  ;;  %v1152_v13 = vpop.f32.mrb[18].mxu0 }
 0x119   :  { %v1215_v14 = vadd.f32 %v1214_v12, %v1213_v9  ;;  %v1216_v15 = vpop.f32.mrb[18].mxu1  ;;  %v1153_v16 = vpop.f32.mrb[19].mxu0  ;;  %v1682_v9 = vld [vmem:[%s1761_s2] ss:$0 sm:$0xff] }
 0x11a   :  { %v1154_v17 = vadd.f32 %v1153_v16, %v1152_v13  ;;  %v1217_v18 = vpop.f32.mrb[19].mxu1 }
 0x11b   :  { %v1218_v19 = vadd.f32 %v1217_v18, %v1216_v15  ;;  %v791_v20 = vadd.f32 %v1215_v14, %v1151_v11 }
 0x11d   :  { %v1673_v21 = vadd.f32 %v1218_v19, %v1154_v17 }
 0x11e   :  { %v1155_v22 = vpop.f32.mrb[20].mxu0 }
 0x11f   :  { %v1219_v23 = vpop.f32.mrb[20].mxu1  ;;  %v1156_v24 = vpop.f32.mrb[21].mxu0 }
 0x120   :  { %v1157_v25 = vadd.f32 %v1156_v24, %v1155_v22  ;;  %v1220_v26 = vpop.f32.mrb[21].mxu1  ;;  %v1158_v27 = vpop.f32.mrb[22].mxu0 }
 0x121   :  { %v1221_v30 = vadd.f32 %v1220_v26, %v1219_v23  ;;  %v1222_v31 = vpop.f32.mrb[22].mxu1  ;;  %v1159_v32 = vpop.f32.mrb[23].mxu0 }
 0x122   :  { %v1160_v33 = vadd.f32 %v1159_v32, %v1158_v27  ;;  %v1223_v34 = vpop.f32.mrb[23].mxu1 }
 0x123   :  { %v1224_v35 = vadd.f32 %v1223_v34, %v1222_v31  ;;  %v799_v36 = vadd.f32 %v1221_v30, %v1157_v25 }
 0x125   :  { %v802_v37 = vadd.f32 %v1224_v35, %v1160_v33 }
 0x126   :  { %v1161_v38 = vpop.f32.mrb[24].mxu0 }
 0x127   :  { %v1225_v39 = vpop.f32.mrb[24].mxu1  ;;  %v1162_v40 = vpop.f32.mrb[25].mxu0 }
 0x128   :  { %v1163_v41 = vadd.f32 %v1162_v40, %v1161_v38  ;;  %v1226_v44 = vpop.f32.mrb[25].mxu1  ;;  %v1164_v45 = vpop.f32.mrb[26].mxu0 }
 0x129   :  { %v1227_v46 = vadd.f32 %v1226_v44, %v1225_v39  ;;  %v1228_v47 = vpop.f32.mrb[26].mxu1  ;;  %v1165_v48 = vpop.f32.mrb[27].mxu0 }
 0x12a   :  { %v1166_v49 = vadd.f32 %v1165_v48, %v1164_v45  ;;  %v1229_v50 = vpop.f32.mrb[27].mxu1 }
 0x12b   :  { %v1230_v51 = vadd.f32 %v1229_v50, %v1228_v47  ;;  %v1675_v52 = vadd.f32 %v1227_v46, %v1163_v41 }
 0x12d   :  { %v1677_v53 = vadd.f32 %v1230_v51, %v1166_v49 }
 0x12e   :  { %v1167_v54 = vpop.f32.mrb[28].mxu0 }
 0x12f   :  { %v1231_v55 = vpop.f32.mrb[28].mxu1  ;;  %v1168_v58 = vpop.f32.mrb[29].mxu0 }
 0x130   :  { %v1169_v59 = vadd.f32 %v1168_v58, %v1167_v54  ;;  %v1232_v60 = vpop.f32.mrb[29].mxu1  ;;  %v1170_v61 = vpop.f32.mrb[30].mxu0 }
 0x131   :  { %v1233_v62 = vadd.f32 %v1232_v60, %v1231_v55  ;;  %v1234_v63 = vpop.f32.mrb[30].mxu1  ;;  %v1171_v0 = vpop.f32.mrb[31].mxu0 }
 0x132   :  { %v1172_v1 = vadd.f32 %v1171_v0, %v1170_v61  ;;  %v1235_v2 = vpop.f32.mrb[31].mxu1 }
 0x133   :  { %v1236_v3 = vadd.f32 %v1235_v2, %v1234_v63  ;;  %v815_v4 = vadd.f32 %v1233_v62, %v1169_v59 }
 0x135   :  { %v818_v5 = vadd.f32 %v1236_v3, %v1172_v1 }
 0x136   :  { %v1271_v8 = vpop.f32.mrb[32].mxu0 }
 0x137   :  { %v864_v10 = vadd.f32 %v1271_v8, %v1661_v42  ;;  %v1279_v11 = vpop.f32.mrb[32].mxu1  ;;  %v855_v12 = vpop.f32.mrb[33].mxu0 }
 0x138   :  { %v896_v13 = vadd.f32 %v1279_v11, %v799_v36  ;;  %v856_v14 = vadd.f32 %v855_v12, %v1657_v28  ;;  %v887_v15 = vpop.f32.mrb[33].mxu1  ;;  %v1272_v16 = vpop.f32.mrb[34].mxu0 }
 0x139   :  { %v978_v17 = vadd.f32 %v1682_v9, %v864_v10  ;;  %v888_v18 = vadd.f32 %v887_v15, %v791_v20  ;;  %v867_v19 = vadd.f32 %v1272_v16, %v1663_v43  ;;  %v1280_v22 = vpop.f32.mrb[34].mxu1  ;;  %v858_v23 = vpop.f32.mrb[35].mxu0 }
 0x13a   :  { %v986_v24 = vadd.f32 %v1682_v9, %v896_v13  ;;  %v976_v25 = vadd.f32 %v1682_v9, %v856_v14  ;;  %v899_v26 = vadd.f32 %v1280_v22, %v802_v37  ;;  %v859_v42 = vadd.f32 %v858_v23, %v1659_v29  ;;  %v890_v27 = vpop.f32.mrb[35].mxu1 }
 0x13b   :  { %v994_v30 = vmax.f32 %v978_v17, 0.0  ;;  %v984_v28 = vadd.f32 %v1682_v9, %v888_v18  ;;  %v979_v31 = vadd.f32 %v1682_v9, %v867_v19  ;;  %v891_v32 = vadd.f32 %v890_v27, %v1673_v21 }
 0x13c   :  { %v1002_v20 = vmax.f32 %v986_v24, 0.0  ;;  %v992_v33 = vmax.f32 %v976_v25, 0.0  ;;  %v987_v43 = vadd.f32 %v1682_v9, %v899_v26  ;;  %v977_v34 = vadd.f32 %v1682_v9, %v859_v42 }
 0x13d   :  { %1010 = vst [vmem:[%s1762_s3 + $0x10] sm:$0xff] %v994_v30  ;;  %v1000_v35 = vmax.f32 %v984_v28, 0.0  ;;  %v995_v29 = vmax.f32 %v979_v31, 0.0  ;;  %v985_v36 = vadd.f32 %v1682_v9, %v891_v32 }
 0x13e   :  { %1018 = vst [vmem:[%s1762_s3 + $0x50] sm:$0xff] %v1002_v20  ;;  %1008 = vst [vmem:[%s1762_s3] sm:$0xff] %v992_v33  ;;  %v1003_v21 = vmax.f32 %v987_v43, 0.0  ;;  %v993_v37 = vmax.f32 %v977_v34, 0.0  ;;  %v1275_v38 = vpop.f32.mrb[36].mxu0 }
 0x13f   :  { %1016 = vst [vmem:[%s1762_s3 + $0x40] sm:$0xff] %v1000_v35  ;;  %1011 = vst [vmem:[%s1762_s3 + $0x18] sm:$0xff] %v995_v29  ;;  %v1001_v39 = vmax.f32 %v985_v36, 0.0  ;;  %v880_v40 = vadd.f32 %v1275_v38, %v1669_v6  ;;  %v1283_v41 = vpop.f32.mrb[36].mxu1  ;;  %v871_v44 = vpop.f32.mrb[37].mxu0 }
 0x140   :  { %1019 = vst [vmem:[%s1762_s3 + $0x58] sm:$0xff] %v1003_v21  ;;  %1009 = vst [vmem:[%s1762_s3 + $0x8] sm:$0xff] %v993_v37  ;;  %v912_v45 = vadd.f32 %v1283_v41, %v815_v4  ;;  %v872_v46 = vadd.f32 %v871_v44, %v1665_v56  ;;  %v903_v47 = vpop.f32.mrb[37].mxu1  ;;  %v1276_v48 = vpop.f32.mrb[38].mxu0 }
 0x141   :  { %1017 = vst [vmem:[%s1762_s3 + $0x48] sm:$0xff] %v1001_v39  ;;  %v982_v6 = vadd.f32 %v1682_v9, %v880_v40  ;;  %v904_v49 = vadd.f32 %v903_v47, %v1675_v52  ;;  %v883_v50 = vadd.f32 %v1276_v48, %v1671_v7  ;;  %v1284_v51 = vpop.f32.mrb[38].mxu1  ;;  %v874_v54 = vpop.f32.mrb[39].mxu0 }
 0x142   :  { %v990_v55 = vadd.f32 %v1682_v9, %v912_v45  ;;  %v980_v58 = vadd.f32 %v1682_v9, %v872_v46  ;;  %v915_v59 = vadd.f32 %v1284_v51, %v818_v5  ;;  %v875_v56 = vadd.f32 %v874_v54, %v1667_v57  ;;  %v906_v60 = vpop.f32.mrb[39].mxu1 }
 0x143   :  { %v998_v61 = vmax.f32 %v982_v6, 0.0  ;;  %v988_v62 = vadd.f32 %v1682_v9, %v904_v49  ;;  %v983_v63 = vadd.f32 %v1682_v9, %v883_v50  ;;  %v907_v0 = vadd.f32 %v906_v60, %v1677_v53 }
 0x144   :  { %v1006_v52 = vmax.f32 %v990_v55, 0.0  ;;  %v996_v1 = vmax.f32 %v980_v58, 0.0  ;;  %v991_v7 = vadd.f32 %v1682_v9, %v915_v59  ;;  %v981_v2 = vadd.f32 %v1682_v9, %v875_v56 }
 0x145   :  { %1014 = vst [vmem:[%s1762_s3 + $0x30] sm:$0xff] %v998_v61  ;;  %v1004_v3 = vmax.f32 %v988_v62, 0.0  ;;  %v999_v57 = vmax.f32 %v983_v63, 0.0  ;;  %v989_v4 = vadd.f32 %v1682_v9, %v907_v0 }
 0x146   :  { %1022 = vst [vmem:[%s1762_s3 + $0x70] sm:$0xff] %v1006_v52  ;;  %1012 = vst [vmem:[%s1762_s3 + $0x20] sm:$0xff] %v996_v1  ;;  %v1007_v53 = vmax.f32 %v991_v7, 0.0  ;;  %v997_v5 = vmax.f32 %v981_v2, 0.0 }
 0x147   :  { %1020 = vst [vmem:[%s1762_s3 + $0x60] sm:$0xff] %v1004_v3  ;;  %1015 = vst [vmem:[%s1762_s3 + $0x38] sm:$0xff] %v999_v57  ;;  %v1005_v8 = vmax.f32 %v989_v4, 0.0 }
 0x148   :  { %1023 = vst [vmem:[%s1762_s3 + $0x78] sm:$0xff] %v1007_v53  ;;  %1013 = vst [vmem:[%s1762_s3 + $0x28] sm:$0xff] %v997_v5 }
 0x149   :  { %1021 = vst [vmem:[%s1762_s3 + $0x68] sm:$0xff] %v1005_v8 }

// kernel: resnet_forward.57
= control target key start
LH: loop header
LB: loop body
LE: loop exit
PB: predicated region body
PF: predicated region fallthrough
CT: control target
= control target key end

     0   :  { %s5705_s12 = smov 0   ;;  %s5707_s13 = smov 0   ;;  %s6894_s0 = inlined_call_operand.vmem [shape: bf16[512,1664], index: 0, kind: input, shape index: {}]   ;;  %s6895_s1 = inlined_call_operand.vmem [shape: bf16[1664,128], index: 1, kind: input, shape index: {}]   ;;  %s6896_s2 = inlined_call_operand.vmem [shape: f32[1,128], index: 2, kind: input, shape index: {}]   ;;  %s6897_s3 = inlined_call_operand.vmem [shape: f32[512,128], index: 3, kind: output, shape index: {}]  }
   0x1   :  { %s5709_s14 = smov 0  }
   0x2 LB: > { %s25_s15 = sadd.s32 1, %s5679_s13  ;;  %p3988_p0 = scmp.ge.s32.totalorder %s5683_s14, 1  ;;  %s5683_s14 = sphi %s5709_s14, %s13_s14   ;;  %s5679_s13 = sphi %s5707_s13, %s6899_s13   ;;  %s5675_s12 = sphi %s5705_s12, %s6898_s12  }
   0x3   : > { %p27_p1 = scmp.ge.s32.totalorder %s25_s15, 2  ;;  %p169_p2 = scmp.lt.s32.totalorder %s5683_s14, 3 }
   0x5   : > { %s6901_s15 = smov (%p27_p1, %s25_s15), 0  ;;  %p170_p3 = pnand %p3988_p0, %p169_p2 }
   0x6   : > { %v5125_v0 = vld [vmem:[%s6895_s1 + $0x40] sm:$0xff] (!%p170_p3)   ;;  %s3989_s18 = sshll.u32 (!%p170_p3), %s5675_s12, 5  ;;  %v5127_v2 = vld [vmem:[%s6895_s1 + $0x48] sm:$0xff] (!%p170_p3)   ;;  %v5129_v4 = vld [vmem:[%s6895_s1 + $0x50] sm:$0xff] (!%p170_p3)  }
   0x7   : > { %173 = sbr.rel (%p170_p3) target bundleno = 700 (0x2bc), region = 32  ;;  %v5126_v1 = vld [vmem:[%s6895_s1] sm:$0xff] (!%p170_p3)   ;;  %4340 = vmatprep.subr.bf16.mxu0 (!%p170_p3), %v5125_v0  ;;  %5084 = vmatprep.subr.bf16.mxu1 (!%p170_p3), %v5125_v0  ;;  %p205_p4 = scmp.lt.s32.totalorder (!%p170_p3), %s3989_s18, 63  ;;  %v5128_v3 = vld [vmem:[%s6895_s1 + $0x8] sm:$0xff] (!%p170_p3)   ;;  %v5130_v5 = vld [vmem:[%s6895_s1 + $0x10] sm:$0xff] (!%p170_p3)  }
   0x8   : > { %4341 = vmatpush3.bf16.msra.mxu0 (!%p170_p3), %v5126_v1  ;;  %5092 = vmatpush3.bf16.msra.mxu1 (!%p170_p3), %v5126_v1  ;;  %v5131_v6 = vld [vmem:[%s6895_s1 + $0x58] sm:$0xff] (!%p170_p3)   ;;  %v5133_v8 = vld [vmem:[%s6895_s1 + $0x60] sm:$0xff] (!%p170_p3)   ;;  %v5135_v10 = vld [vmem:[%s6895_s1 + $0x68] sm:$0xff] (!%p170_p3)  }
   0x9   : > { %4342 = vmatprep.subr.bf16.mxu0 (!%p170_p3), %v5127_v2  ;;  %5085 = vmatprep.subr.bf16.mxu1 (!%p170_p3), %v5127_v2  ;;  %v5132_v7 = vld [vmem:[%s6895_s1 + $0x18] sm:$0xff] (!%p170_p3)   ;;  %v5134_v9 = vld [vmem:[%s6895_s1 + $0x20] sm:$0xff] (!%p170_p3)   ;;  %v5136_v13 = vld [vmem:[%s6895_s1 + $0x28] sm:$0xff] (!%p170_p3)  }
   0xa   : > { %v5137_v14 = vld [vmem:[%s6895_s1 + $0x70] sm:$0xff] (!%p170_p3)   ;;  %v5139_v16 = vld [vmem:[%s6895_s1 + $0x78] sm:$0xff] (!%p170_p3)   ;;  %v5147_v18 = vld [vmem:[%s6895_s1 + $0xc0] sm:$0xff] (!%p170_p3)  }
   0xb   : > { %v5138_v15 = vld [vmem:[%s6895_s1 + $0x30] sm:$0xff] (!%p170_p3)   ;;  %v5140_v17 = vld [vmem:[%s6895_s1 + $0x38] sm:$0xff] (!%p170_p3)   ;;  %v5150_v21 = vld [vmem:[%s6895_s1 + $0x140] sm:$0xff] (!%p170_p3)  }
   0xc   : > { %4343 = vmatpush3.bf16.msra.mxu0 (!%p170_p3), %v5128_v3  ;;  %5093 = vmatpush3.bf16.msra.mxu1 (!%p170_p3), %v5128_v3  ;;  %v5148_v22 = vld [vmem:[%s6895_s1 + $0x80] sm:$0xff] (!%p170_p3)   ;;  %v5149_v23 = vld [vmem:[%s6895_s1 + $0xc8] sm:$0xff] (!%p170_p3)   ;;  %v5159_v31 = vld [vmem:[%s6895_s1 + $0xd0] sm:$0xff] (!%p170_p3)  }
   0xd   : > { %4344 = vmatprep.subr.bf16.mxu0 (!%p170_p3), %v5129_v4  ;;  %5086 = vmatprep.subr.bf16.mxu1 (!%p170_p3), %v5129_v4  ;;  %v5152_v24 = vld [vmem:[%s6895_s1 + $0x100] sm:$0xff] (!%p170_p3)   ;;  %v5151_v27 = vld [vmem:[%s6895_s1 + $0x88] sm:$0xff] (!%p170_p3)   ;;  %v5160_v32 = vld [vmem:[%s6895_s1 + $0x90] sm:$0xff] (!%p170_p3)  }
   0xe   : > { %s6903_s18 = smov (!%p205_p4, %s3989_s18), 63  ;;  %v5170_v28 = vld [vmem:[%s6895_s1 + $0x148] sm:$0xff]   ;;  %v5161_v34 = vld [vmem:[%s6895_s1 + $0xd8] sm:$0xff]   ;;  %v5169_v40 = vld [vmem:[%s6895_s1 + $0xe0] sm:$0xff]  }
   0xf   : > { %s5100_s4 = smul.u32 52, %s6903_s18  ;;  %v5172_v33 = vld [vmem:[%s6895_s1 + $0x108] sm:$0xff]   ;;  %v5162_v37 = vld [vmem:[%s6895_s1 + $0x98] sm:$0xff]   ;;  %v5171_v41 = vld [vmem:[%s6895_s1 + $0xa0] sm:$0xff]  }
  0x10   : > { %4345 = vmatpush3.bf16.msra.mxu0 %v5130_v5  ;;  %5094 = vmatpush3.bf16.msra.mxu1 %v5130_v5  ;;  %v5173_v42 = vld [vmem:[%s6895_s1 + $0xe8] sm:$0xff]   ;;  %v5184_v43 = vld [vmem:[%s6895_s1 + $0x150] sm:$0xff]   ;;  %v5183_v52 = vld [vmem:[%s6895_s1 + $0xf8] sm:$0xff]  }
  0x11   : > { %4346 = vmatprep.subr.bf16.mxu0 %v5131_v6  ;;  %5087 = vmatprep.subr.bf16.mxu1 %v5131_v6  ;;  %s5756_s11 = scalar_lea.vmem %s6894_s0, %s5100_s4  ;;  %v5186_v46 = vld [vmem:[%s6895_s1 + $0x110] sm:$0xff]   ;;  %v5174_v47 = vld [vmem:[%s6895_s1 + $0xa8] sm:$0xff]   ;;  %v5201_v55 = vld [vmem:[%s6895_s1 + $0x158] sm:$0xff]   ;;  %s3992_s4 = sshll.u32 %s6903_s18, 3 }
  0x12   : > { %v5143_v11 = vld [vmem:[%s5756_s11 + $0x4] ss:$52 sps:$4 sm:$0xff]   ;;  %v5141_v19 = vld [vmem:[%s5756_s11] ss:$52 sps:$4 sm:$0xff]   ;;  %v5157_v29 = vld [vmem:[%s5756_s11 + $0x68] ss:$52 sps:$4 sm:$0xff]   ;;  %s6806_s6 = scalar_lea.vmem %s6897_s3, %s3992_s4 }
  0x13   : > { %v5146_v12 = vld [vmem:[%s5756_s11 + $0x4e4] ss:$52 sps:$4 sm:$0xff]   ;;  %2440 = vmatprep.mubr.bf16.mxu0 %v5143_v11  ;;  %v5144_v20 = vld [vmem:[%s5756_s11 + $0x4e0] ss:$52 sps:$4 sm:$0xff]   ;;  %v5158_v30 = vld [vmem:[%s5756_s11 + $0x548] ss:$52 sps:$4 sm:$0xff]  }
  0x14   : > { %4347 = vmatpush3.bf16.msra.mxu0 %v5132_v7  ;;  %5095 = vmatpush3.bf16.msra.mxu1 %v5132_v7  ;;  %v5153_v25 = vld [vmem:[%s5756_s11 + $0x6c] ss:$52 sps:$4 sm:$0xff]   ;;  %v5163_v35 = vld [vmem:[%s5756_s11 + $0xd4] ss:$52 sps:$4 sm:$0xff]   ;;  %v5167_v38 = vld [vmem:[%s5756_s11 + $0xd0] ss:$52 sps:$4 sm:$0xff]  }
  0x15   : > { %4348 = vmatprep.subr.bf16.mxu0 %v5133_v8  ;;  %5088 = vmatprep.subr.bf16.mxu1 %v5133_v8  ;;  %v5155_v26 = vld [vmem:[%s5756_s11 + $0x54c] ss:$52 sps:$4 sm:$0xff]   ;;  %v5165_v36 = vld [vmem:[%s5756_s11 + $0x5b4] ss:$52 sps:$4 sm:$0xff]   ;;  %v5168_v39 = vld [vmem:[%s5756_s11 + $0x5b0] ss:$52 sps:$4 sm:$0xff]  }
  0x16   : > { %2536 = vmatprep.mubr.bf16.mxu1 %v5146_v12  ;;  %v5175_v44 = vld [vmem:[%s5756_s11 + $0x13c] ss:$52 sps:$4 sm:$0xff]   ;;  %v5179_v49 = vld [vmem:[%s5756_s11 + $0x138] ss:$52 sps:$4 sm:$0xff]   ;;  %v5192_v59 = vld [vmem:[%s5756_s11 + $0x1a0] ss:$52 sps:$4 sm:$0xff]  }
  0x17   : > { %v5177_v45 = vld [vmem:[%s5756_s11 + $0x61c] ss:$52 sps:$4 sm:$0xff]   ;;  %v5180_v50 = vld [vmem:[%s5756_s11 + $0x618] ss:$52 sps:$4 sm:$0xff]   ;;  %v5193_v60 = vld [vmem:[%s6895_s1 + $0x1c0] sm:$0xff]  }
  0x18   : > { %4349 = vmatpush3.bf16.msra.mxu0 %v5134_v9  ;;  %5096 = vmatpush3.bf16.msra.mxu1 %v5134_v9  ;;  %v5181_v48 = vld [vmem:[%s6895_s1 + $0xf0] sm:$0xff]   ;;  %v5187_v53 = vld [vmem:[%s5756_s11 + $0x1a4] ss:$52 sps:$4 sm:$0xff]   ;;  %v5191_v54 = vld [vmem:[%s5756_s11 + $0xc] ss:$52 sps:$4 sm:$0xff]  }
  0x19   : > { %4350 = vmatprep.subr.bf16.mxu0 %v5135_v10  ;;  %5089 = vmatprep.subr.bf16.mxu1 %v5135_v10  ;;  %v5182_v51 = vld [vmem:[%s6895_s1 + $0xb0] sm:$0xff]   ;;  %v5202_v56 = vld [vmem:[%s6895_s1 + $0x118] sm:$0xff]   ;;  %v5194_v61 = vld [vmem:[%s6895_s1 + $0x180] sm:$0xff]  }
  0x1a   : > { %v5185_v57 = vld [vmem:[%s6895_s1 + $0xb8] sm:$0xff]   ;;  %v5195_v62 = vld [vmem:[%s5756_s11 + $0x20c] ss:$52 sps:$4 sm:$0xff]   ;;  %v5197_v63 = vld [vmem:[%s5756_s11 + $0x74] ss:$52 sps:$4 sm:$0xff]  }
  0x1b   : > { %v5189_v58 = vld [vmem:[%s5756_s11 + $0x8] ss:$52 sps:$4 sm:$0xff]   ;;  %v5211_v0 = vld [vmem:[%s6895_s1 + $0x160] sm:$0xff]   ;;  %v5226_v9 = vld [vmem:[%s6895_s1 + $0x1d0] sm:$0xff]  }
  0x1c   : > { %4351 = vmatpush3.bf16.msra.mxu0 %v5136_v13  ;;  %5097 = vmatpush3.bf16.msra.mxu1 %v5136_v13  ;;  %v5209_v1 = vld [vmem:[%s6895_s1 + $0x1c8] sm:$0xff]   ;;  %v5212_v2 = vld [vmem:[%s6895_s1 + $0x120] sm:$0xff]   ;;  %v5205_v7 = vld [vmem:[%s5756_s11 + $0xdc] ss:$52 sps:$4 sm:$0xff]  }
  0x1d   : > { %4352 = vmatprep.subr.bf16.mxu0 %v5137_v14  ;;  %5090 = vmatprep.subr.bf16.mxu1 %v5137_v14  ;;  %v5210_v3 = vld [vmem:[%s6895_s1 + $0x188] sm:$0xff]   ;;  %v5200_v5 = vld [vmem:[%s5756_s11 + $0x70] ss:$52 sps:$4 sm:$0xff]  }
  0x1e   : > { %v5199_v4 = vld [vmem:[%s5756_s11 + $0x208] ss:$52 sps:$4 sm:$0xff]   ;;  %v5228_v11 = vld [vmem:[%s6895_s1 + $0x190] sm:$0xff]   ;;  %v5208_v13 = vld [vmem:[%s5756_s11 + $0xd8] ss:$52 sps:$4 sm:$0xff]  }
  0x1f   : > { %v5203_v6 = vld [vmem:[%s5756_s11 + $0x274] ss:$52 sps:$4 sm:$0xff]   ;;  %v5207_v12 = vld [vmem:[%s5756_s11 + $0x270] ss:$52 sps:$4 sm:$0xff]  }
  0x20   : > { %4353 = vmatpush3.bf16.msra.mxu0 %v5138_v15  ;;  %5098 = vmatpush3.bf16.msra.mxu1 %v5138_v15  ;;  %v5225_v8 = vld [vmem:[%s6895_s1 + $0x168] sm:$0xff]   ;;  %v5213_v14 = vld [vmem:[%s5756_s11 + $0x2dc] ss:$52 sps:$4 sm:$0xff]  }
  0x21   : > { %4354 = vmatprep.subr.bf16.mxu0 %v5139_v16  ;;  %5091 = vmatprep.subr.bf16.mxu1 %v5139_v16  ;;  %v5227_v10 = vld [vmem:[%s6895_s1 + $0x128] sm:$0xff]   ;;  %v5235_v15 = vld [vmem:[%s6895_s1 + $0x170] sm:$0xff]  }
  0x22   : > { %v5236_v16 = vld [vmem:[%s6895_s1 + $0x130] sm:$0xff]  }
  0x24   : > { %4355 = vmatpush3.bf16.msra.mxu0 %v5140_v17  ;;  %5099 = vmatpush3.bf16.msra.mxu1 %v5140_v17  ;;  %v5215_v17 = vld [vmem:[%s5756_s11 + $0x144] ss:$52 sps:$4 sm:$0xff]  }
  0x25   : > { %4452 = vmatprep.subr.bf16.mxu1 %v5147_v18  ;;  %4564 = vmatprep.subr.bf16.mxu0 %v5150_v21  ;;  %v5243_v18 = vld [vmem:[%s6895_s1 + $0x1d8] sm:$0xff]   ;;  %v5218_v21 = vld [vmem:[%s5756_s11 + $0x140] ss:$52 sps:$4 sm:$0xff]  }
  0x27   : > { %2441 = vmatmul.mubr.bf16.vlgmr.msra.gmra.mrb[0].mxu0 %v5141_v19  ;;  %2537 = vmatmul.mubr.bf16.vlgmr.msra.gmra.mrb[0].mxu1 %v5144_v20  ;;  %v5244_v19 = vld [vmem:[%s6895_s1 + $0x198] sm:$0xff]  }
  0x28   : > { %4453 = vmatpush3.bf16.msra.mxu1 %v5148_v22  ;;  %4565 = vmatpush3.bf16.msra.mxu0 %v5152_v24  ;;  %v5217_v20 = vld [vmem:[%s5756_s11 + $0x2d8] ss:$52 sps:$4 sm:$0xff]  }
  0x29   : > { %4454 = vmatprep.subr.bf16.mxu1 %v5149_v23  ;;  %2448 = vmatprep.mubr.bf16.mxu0 %v5153_v25  ;;  %v5219_v22 = vld [vmem:[%s5756_s11 + $0x344] ss:$52 sps:$4 sm:$0xff]   ;;  %v5221_v23 = vld [vmem:[%s5756_s11 + $0x1ac] ss:$52 sps:$4 sm:$0xff]  }
  0x2a   : > { %2544 = vmatprep.mubr.bf16.mxu1 %v5155_v26  ;;  %4566 = vmatprep.subr.bf16.mxu0 %v5170_v28  ;;  %v5251_v24 = vld [vmem:[%s6895_s1 + $0x178] sm:$0xff]   ;;  %v5259_v26 = vld [vmem:[%s6895_s1 + $0x1e0] sm:$0xff]  }
  0x2b   : > { %v5252_v25 = vld [vmem:[%s6895_s1 + $0x138] sm:$0xff]  }
  0x2c   : > { %4455 = vmatpush3.bf16.msra.mxu1 %v5151_v27  ;;  %4567 = vmatpush3.bf16.msra.mxu0 %v5172_v33  ;;  %v5223_v27 = vld [vmem:[%s5756_s11 + $0x340] ss:$52 sps:$4 sm:$0xff]   ;;  %v5224_v28 = vld [vmem:[%s5756_s11 + $0x1a8] ss:$52 sps:$4 sm:$0xff]  }
  0x2d   : > { %4456 = vmatprep.subr.bf16.mxu1 %v5159_v31  ;;  %4568 = vmatprep.subr.bf16.mxu0 %v5184_v43  ;;  %v5229_v31 = vld [vmem:[%s5756_s11 + $0x3ac] ss:$52 sps:$4 sm:$0xff]   ;;  %v5233_v33 = vld [vmem:[%s5756_s11 + $0x3a8] ss:$52 sps:$4 sm:$0xff]   ;;  %v5291_v43 = vld [vmem:[%s6895_s1 + $0x1f0] sm:$0xff]  }
  0x2f   : > { %2449 = vmatmul.mubr.bf16.gmra.mrb[4].mxu0 %v5157_v29  ;;  %2545 = vmatmul.mubr.bf16.gmra.mrb[4].mxu1 %v5158_v30  ;;  %v5260_v29 = vld [vmem:[%s6895_s1 + $0x1a0] sm:$0xff]  }
  0x30   : > { %4457 = vmatpush3.bf16.msra.mxu1 %v5160_v32  ;;  %2456 = vmatprep.mubr.bf16.mxu0 %v5163_v35  ;;  %v5261_v30 = vld [vmem:[%s6895_s1 + $0x240] sm:$0xff]   ;;  %v5231_v32 = vld [vmem:[%s5756_s11 + $0x214] ss:$52 sps:$4 sm:$0xff]  }
  0x31   : > { %4458 = vmatprep.subr.bf16.mxu1 %v5161_v34  ;;  %2552 = vmatprep.mubr.bf16.mxu1 %v5165_v36  ;;  %v5234_v34 = vld [vmem:[%s5756_s11 + $0x210] ss:$52 sps:$4 sm:$0xff]   ;;  %v5275_v35 = vld [vmem:[%s6895_s1 + $0x1e8] sm:$0xff]  }
  0x32   : > { %4569 = vmatpush3.bf16.msra.mxu0 %v5186_v46  ;;  %v5276_v36 = vld [vmem:[%s6895_s1 + $0x1a8] sm:$0xff]   ;;  %v5250_v46 = vld [vmem:[%s5756_s11 + $0x2e0] ss:$52 sps:$4 sm:$0xff]  }
  0x33   : > { %4570 = vmatprep.subr.bf16.mxu0 %v5201_v55  ;;  %v5265_v55 = vld [vmem:[%s5756_s11 + $0x7c] ss:$52 sps:$4 sm:$0xff]  }
  0x34   : > { %4459 = vmatpush3.bf16.msra.mxu1 %v5162_v37  ;;  %v5237_v37 = vld [vmem:[%s5756_s11 + $0x414] ss:$52 sps:$4 sm:$0xff]  }
  0x35   : > { %4460 = vmatprep.subr.bf16.mxu1 %v5169_v40  ;;  %v5242_v40 = vld [vmem:[%s5756_s11 + $0x278] ss:$52 sps:$4 sm:$0xff]  }
  0x36   : > { %4571 = vmatpush3.bf16.msra.mxu0 %v5202_v56  ;;  %v5277_v56 = vld [vmem:[%s6895_s1 + $0x248] sm:$0xff]  }
  0x37   : > { %2457 = vmatmul.mubr.bf16.gmra.mrb[8].mxu0 %v5167_v38  ;;  %2553 = vmatmul.mubr.bf16.gmra.mrb[8].mxu1 %v5168_v39  ;;  %v5239_v38 = vld [vmem:[%s5756_s11 + $0x27c] ss:$52 sps:$4 sm:$0xff]  }
  0x38   : > { %4461 = vmatpush3.bf16.msra.mxu1 %v5171_v41  ;;  %2464 = vmatprep.mubr.bf16.mxu0 %v5175_v44  ;;  %v5241_v39 = vld [vmem:[%s5756_s11 + $0x410] ss:$52 sps:$4 sm:$0xff]  }
  0x39   : > { %4462 = vmatprep.subr.bf16.mxu1 %v5173_v42  ;;  %2560 = vmatprep.mubr.bf16.mxu1 %v5177_v45  ;;  %v5245_v41 = vld [vmem:[%s5756_s11 + $0x47c] ss:$52 sps:$4 sm:$0xff]   ;;  %v5247_v42 = vld [vmem:[%s5756_s11 + $0x2e4] ss:$52 sps:$4 sm:$0xff]  }
  0x3a   : > { %4572 = vmatprep.subr.bf16.mxu0 %v5211_v0  ;;  %v5292_v44 = vld [vmem:[%s6895_s1 + $0x1b0] sm:$0xff]   ;;  %v5249_v45 = vld [vmem:[%s5756_s11 + $0x478] ss:$52 sps:$4 sm:$0xff]  }
  0x3b   : > { %4573 = vmatpush3.bf16.msra.mxu0 %v5212_v2  ;;  %v5294_v0 = vld [vmem:[%s6895_s1 + $0x210] sm:$0xff]   ;;  %v5273_v2 = vld [vmem:[%s5756_s11 + $0x418] ss:$52 sps:$4 sm:$0xff]  }
  0x3c   : > { %4463 = vmatpush3.bf16.msra.mxu1 %v5174_v47  ;;  %4574 = vmatprep.subr.bf16.mxu0 %v5225_v8  ;;  %v5253_v47 = vld [vmem:[%s5756_s11 + $0x34c] ss:$52 sps:$4 sm:$0xff]  }
  0x3d   : > { %4464 = vmatprep.subr.bf16.mxu1 %v5181_v48  ;;  %v5257_v48 = vld [vmem:[%s5756_s11 + $0x14] ss:$52 sps:$4 sm:$0xff]   ;;  %v5326_v8 = vld [vmem:[%s6895_s1 + $0x220] sm:$0xff]  }
  0x3f   : > { %2465 = vmatmul.mubr.bf16.gmra.mrb[12].mxu0 %v5179_v49  ;;  %2561 = vmatmul.mubr.bf16.gmra.mrb[12].mxu1 %v5180_v50  ;;  %v5307_v49 = vld [vmem:[%s6895_s1 + $0x1f8] sm:$0xff]  }
  0x40   : > { %4465 = vmatpush3.bf16.msra.mxu1 %v5182_v51  ;;  %2472 = vmatprep.mubr.bf16.mxu0 %v5187_v53  ;;  %v5308_v50 = vld [vmem:[%s6895_s1 + $0x1b8] sm:$0xff]   ;;  %v5255_v51 = vld [vmem:[%s5756_s11 + $0x10] ss:$52 sps:$4 sm:$0xff]  }
  0x41   : > { %4466 = vmatprep.subr.bf16.mxu1 %v5183_v52  ;;  %2601 = vmatprep.mubr.bf16.mxu1 %v5191_v54  ;;  %v5258_v52 = vld [vmem:[%s5756_s11 + $0x348] ss:$52 sps:$4 sm:$0xff]   ;;  %v5262_v53 = vld [vmem:[%s6895_s1 + $0x200] sm:$0xff]  }
  0x42   : > { %4575 = vmatpush3.bf16.msra.mxu0 %v5227_v10  ;;  %v5263_v54 = vld [vmem:[%s5756_s11 + $0x3b4] ss:$52 sps:$4 sm:$0xff]  }
  0x43   : > { %4576 = vmatprep.subr.bf16.mxu0 %v5235_v15  ;;  %v5283_v10 = vld [vmem:[%s5756_s11 + $0x480] ss:$52 sps:$4 sm:$0xff]  }
  0x44   : > { %4467 = vmatpush3.bf16.msra.mxu1 %v5185_v57  ;;  %v5323_v57 = vld [vmem:[%s6895_s1 + $0x2c0] sm:$0xff]   ;;  %v5287_v15 = vld [vmem:[%s5756_s11 + $0x1b4] ss:$52 sps:$4 sm:$0xff]  }
  0x45   : > { %4676 = vmatprep.subr.bf16.mxu1 %v5193_v60  ;;  %v5267_v60 = vld [vmem:[%s5756_s11 + $0x3b0] ss:$52 sps:$4 sm:$0xff]  }
  0x46   : > { %4577 = vmatpush3.bf16.msra.mxu0 %v5236_v16  ;;  %v5358_v16 = vld [vmem:[%s6895_s1 + $0x230] sm:$0xff]  }
  0x47   : > { %2473 = vmatmul.mubr.bf16.gmra.mrb[16].mxu0 %v5192_v59  ;;  %2602 = vmatmul.mubr.bf16.vlgmr.msra.gmra.mrb[16].mxu1 %v5189_v58  ;;  %v5278_v58 = vld [vmem:[%s6895_s1 + $0x208] sm:$0xff]   ;;  %v5293_v59 = vld [vmem:[%s6895_s1 + $0x250] sm:$0xff]  }
  0x48   : > { %4677 = vmatpush3.bf16.msra.mxu1 %v5194_v61  ;;  %2480 = vmatprep.mubr.bf16.mxu0 %v5195_v62  ;;  %v5268_v61 = vld [vmem:[%s5756_s11 + $0x78] ss:$52 sps:$4 sm:$0xff]   ;;  %v5269_v62 = vld [vmem:[%s5756_s11 + $0x41c] ss:$52 sps:$4 sm:$0xff]  }
  0x49   : > { %2609 = vmatprep.mubr.bf16.mxu1 %v5197_v63  ;;  %4678 = vmatprep.subr.bf16.mxu1 %v5209_v1  ;;  %v5271_v63 = vld [vmem:[%s5756_s11 + $0xe4] ss:$52 sps:$4 sm:$0xff]  }
  0x4a   : > { %4578 = vmatprep.subr.bf16.mxu0 %v5251_v24  ;;  %v5309_v1 = vld [vmem:[%s6895_s1 + $0x258] sm:$0xff]  }
  0x4b   : > { %4579 = vmatpush3.bf16.msra.mxu0 %v5252_v25  ;;  %v5300_v24 = vld [vmem:[%s5756_s11 + $0x218] ss:$52 sps:$4 sm:$0xff]   ;;  %v5301_v25 = vld [vmem:[%s5756_s11 + $0x5bc] ss:$52 sps:$4 sm:$0xff]  }
  0x4c   : > { %4679 = vmatpush3.bf16.msra.mxu1 %v5210_v3  ;;  %4788 = vmatprep.subr.bf16.mxu0 %v5261_v30  ;;  %v5310_v3 = vld [vmem:[%s6895_s1 + $0x218] sm:$0xff]  }
  0x4d   : > { %4680 = vmatprep.subr.bf16.mxu1 %v5226_v9  ;;  %v5341_v9 = vld [vmem:[%s6895_s1 + $0x268] sm:$0xff]   ;;  %v5311_v30 = vld [vmem:[%s5756_s11 + $0x624] ss:$52 sps:$4 sm:$0xff]  }
  0x4f   : > { %2481 = vmatmul.mubr.bf16.gmra.mrb[20].mxu0 %v5199_v4  ;;  %2610 = vmatmul.mubr.bf16.gmra.mrb[20].mxu1 %v5200_v5  ;;  %v5325_v4 = vld [vmem:[%s6895_s1 + $0x260] sm:$0xff]  }
  0x50   : > { %2488 = vmatprep.mubr.bf16.mxu0 %v5203_v6  ;;  %2617 = vmatprep.mubr.bf16.mxu1 %v5205_v7  ;;  %v5274_v5 = vld [vmem:[%s5756_s11 + $0xe0] ss:$52 sps:$4 sm:$0xff]   ;;  %v5279_v6 = vld [vmem:[%s5756_s11 + $0x484] ss:$52 sps:$4 sm:$0xff]  }
  0x51   : > { %4681 = vmatpush3.bf16.msra.mxu1 %v5228_v11  ;;  %v5281_v7 = vld [vmem:[%s5756_s11 + $0x14c] ss:$52 sps:$4 sm:$0xff]   ;;  %v5284_v11 = vld [vmem:[%s5756_s11 + $0x148] ss:$52 sps:$4 sm:$0xff]  }
  0x52   : > { %4682 = vmatprep.subr.bf16.mxu1 %v5243_v18  ;;  %v5290_v18 = vld [vmem:[%s5756_s11 + $0x1b0] ss:$52 sps:$4 sm:$0xff]  }
  0x55   : > { %4683 = vmatpush3.bf16.msra.mxu1 %v5244_v19  ;;  %v5295_v19 = vld [vmem:[%s5756_s11 + $0x554] ss:$52 sps:$4 sm:$0xff]  }
  0x56   : > { %4684 = vmatprep.subr.bf16.mxu1 %v5259_v26  ;;  %v5303_v26 = vld [vmem:[%s5756_s11 + $0x284] ss:$52 sps:$4 sm:$0xff]  }
  0x57   : > { %2489 = vmatmul.mubr.bf16.gmra.mrb[24].mxu0 %v5207_v12  ;;  %2618 = vmatmul.mubr.bf16.gmra.mrb[24].mxu1 %v5208_v13  ;;  %v5342_v12 = vld [vmem:[%s6895_s1 + $0x228] sm:$0xff]   ;;  %v5357_v13 = vld [vmem:[%s6895_s1 + $0x270] sm:$0xff]  }
  0x58   : > { %2496 = vmatprep.mubr.bf16.mxu0 %v5213_v14  ;;  %2625 = vmatprep.mubr.bf16.mxu1 %v5215_v17  ;;  %v5285_v14 = vld [vmem:[%s5756_s11 + $0x4ec] ss:$52 sps:$4 sm:$0xff]   ;;  %v5289_v17 = vld [vmem:[%s5756_s11 + $0x4e8] ss:$52 sps:$4 sm:$0xff]  }
  0x59   : > { %4685 = vmatpush3.bf16.msra.mxu1 %v5260_v29  ;;  %v5306_v29 = vld [vmem:[%s5756_s11 + $0x280] ss:$52 sps:$4 sm:$0xff]  }
  0x5a   : > { %4686 = vmatprep.subr.bf16.mxu1 %v5275_v35  ;;  %v5321_v35 = vld [vmem:[%s5756_s11 + $0x1c] ss:$52 sps:$4 sm:$0xff]  }
  0x5d   : > { %4687 = vmatpush3.bf16.msra.mxu1 %v5276_v36  ;;  %v5319_v36 = vld [vmem:[%s5756_s11 + $0x18] ss:$52 sps:$4 sm:$0xff]  }
  0x5e   : > { %4688 = vmatprep.subr.bf16.mxu1 %v5291_v43  ;;  %v5331_v43 = vld [vmem:[%s5756_s11 + $0x3b8] ss:$52 sps:$4 sm:$0xff]  }
  0x5f   : > { %2497 = vmatmul.mubr.bf16.gmra.mrb[28].mxu0 %v5217_v20  ;;  %2626 = vmatmul.mubr.bf16.gmra.mrb[28].mxu1 %v5218_v21  ;;  %v5297_v20 = vld [vmem:[%s5756_s11 + $0x21c] ss:$52 sps:$4 sm:$0xff]  }
  0x60   : > { %2504 = vmatprep.mubr.bf16.mxu0 %v5219_v22  ;;  %2633 = vmatprep.mubr.bf16.mxu1 %v5221_v23  ;;  %v5373_v21 = vld [vmem:[%s6895_s1 + $0x278] sm:$0xff]   ;;  %v5299_v23 = vld [vmem:[%s5756_s11 + $0x550] ss:$52 sps:$4 sm:$0xff]  }
  0x61   : > { %4689 = vmatpush3.bf16.msra.mxu1 %v5292_v44  ;;  %v5374_v22 = vld [vmem:[%s6895_s1 + $0x238] sm:$0xff]   ;;  %v5355_v44 = vld [vmem:[%s6895_s1 + $0x2d0] sm:$0xff]  }
  0x62   : > { %4690 = vmatprep.subr.bf16.mxu1 %v5307_v49  ;;  %v5371_v49 = vld [vmem:[%s6895_s1 + $0x2d8] sm:$0xff]  }
  0x65   : > { %4691 = vmatpush3.bf16.msra.mxu1 %v5308_v50  ;;  %v5372_v50 = vld [vmem:[%s6895_s1 + $0x298] sm:$0xff]  }
  0x66   : > { %4900 = vmatprep.subr.bf16.mxu1 %v5323_v57  ;;  %v5402_v57 = vld [vmem:[%s6895_s1 + $0x2e8] sm:$0xff]  }
  0x67   : > { %2505 = vmatmul.mubr.bf16.gmra.mrb[32].mxu0 %v5223_v27  ;;  %2634 = vmatmul.mubr.bf16.gmra.mrb[32].mxu1 %v5224_v28  ;;  %v6051_v27 = vld [vmem:[%s6895_s1 + $0x300] sm:$0xff]   ;;  %v5305_v28 = vld [vmem:[%s5756_s11 + $0x5b8] ss:$52 sps:$4 sm:$0xff]  }
  0x68   : > { %2512 = vmatprep.mubr.bf16.mxu0 %v5229_v31  ;;  %2641 = vmatprep.mubr.bf16.mxu1 %v5231_v32  ;;  %v5313_v31 = vld [vmem:[%s5756_s11 + $0x2ec] ss:$52 sps:$4 sm:$0xff]  }
  0x69   : > { %v5315_v32 = vld [vmem:[%s5756_s11 + $0x620] ss:$52 sps:$4 sm:$0xff]  }
  0x6f   : > { %2513 = vmatmul.mubr.bf16.gmra.mrb[36].mxu0 %v5233_v33  ;;  %2642 = vmatmul.mubr.bf16.gmra.mrb[36].mxu1 %v5234_v34  ;;  %v5316_v33 = vld [vmem:[%s5756_s11 + $0x2e8] ss:$52 sps:$4 sm:$0xff]  }
  0x70   : > { %2520 = vmatprep.mubr.bf16.mxu0 %v5237_v37  ;;  %2649 = vmatprep.mubr.bf16.mxu1 %v5239_v38  ;;  %v5317_v34 = vld [vmem:[%s5756_s11 + $0x354] ss:$52 sps:$4 sm:$0xff]   ;;  %v5322_v37 = vld [vmem:[%s5756_s11 + $0x350] ss:$52 sps:$4 sm:$0xff]  }
  0x71   : > { %v5324_v38 = vld [vmem:[%s6895_s1 + $0x280] sm:$0xff]  }
  0x77   : > { %2521 = vmatmul.mubr.bf16.gmra.mrb[40].mxu0 %v5241_v39  ;;  %2650 = vmatmul.mubr.bf16.gmra.mrb[40].mxu1 %v5242_v40  ;;  %v5327_v39 = vld [vmem:[%s5756_s11 + $0x3bc] ss:$52 sps:$4 sm:$0xff]   ;;  %v5329_v40 = vld [vmem:[%s5756_s11 + $0x84] ss:$52 sps:$4 sm:$0xff]  }
  0x78   : > { %2528 = vmatprep.mubr.bf16.mxu0 %v5245_v41  ;;  %2657 = vmatprep.mubr.bf16.mxu1 %v5247_v42  ;;  %v5339_v41 = vld [vmem:[%s6895_s1 + $0x2c8] sm:$0xff]  }
  0x79   : > { %v5340_v42 = vld [vmem:[%s6895_s1 + $0x288] sm:$0xff]  }
  0x7f   : > { %2529 = vmatmul.mubr.bf16.gmra.mrb[44].mxu0 %v5249_v45  ;;  %2658 = vmatmul.mubr.bf16.gmra.mrb[44].mxu1 %v5250_v46  ;;  %v5332_v45 = vld [vmem:[%s5756_s11 + $0x80] ss:$52 sps:$4 sm:$0xff]   ;;  %v5333_v46 = vld [vmem:[%s5756_s11 + $0x424] ss:$52 sps:$4 sm:$0xff]  }
  0x80   : > { %2665 = vmatprep.mubr.bf16.mxu1 %v5253_v47  ;;  %2762 = vmatprep.mubr.bf16.mxu0 %v5257_v48  ;;  %v5335_v47 = vld [vmem:[%s5756_s11 + $0xec] ss:$52 sps:$4 sm:$0xff]   ;;  %v5356_v48 = vld [vmem:[%s6895_s1 + $0x290] sm:$0xff]  }
  0x87   : > { %2666 = vmatmul.mubr.bf16.gmra.mrb[48].mxu1 %v5258_v52  ;;  %2763 = vmatmul.mubr.bf16.vlgmr.msra.gmra.mrb[48].mxu0 %v5255_v51  ;;  %v5387_v51 = vld [vmem:[%s6895_s1 + $0x2e0] sm:$0xff]  }
  0x88   : > { %4789 = vmatpush3.bf16.msra.mxu0 %v5262_v53  ;;  %2673 = vmatprep.mubr.bf16.mxu1 %v5263_v54  ;;  %v5337_v52 = vld [vmem:[%s5756_s11 + $0x420] ss:$52 sps:$4 sm:$0xff]   ;;  %v5338_v53 = vld [vmem:[%s5756_s11 + $0xe8] ss:$52 sps:$4 sm:$0xff]  }
  0x89   : > { %2770 = vmatprep.mubr.bf16.mxu0 %v5265_v55  ;;  %4790 = vmatprep.subr.bf16.mxu0 %v5277_v56  ;;  %v5343_v54 = vld [vmem:[%s5756_s11 + $0x48c] ss:$52 sps:$4 sm:$0xff]   ;;  %v5345_v55 = vld [vmem:[%s5756_s11 + $0x154] ss:$52 sps:$4 sm:$0xff]  }
  0x8a   : > { %v5388_v56 = vld [vmem:[%s6895_s1 + $0x2a0] sm:$0xff]  }
  0x8c   : > { %4791 = vmatpush3.bf16.msra.mxu0 %v5278_v58  ;;  %v5403_v58 = vld [vmem:[%s6895_s1 + $0x2a8] sm:$0xff]  }
  0x8d   : > { %4792 = vmatprep.subr.bf16.mxu0 %v5293_v59  ;;  %v5417_v59 = vld [vmem:[%s6895_s1 + $0x2f0] sm:$0xff]  }
  0x8f   : > { %2674 = vmatmul.mubr.bf16.gmra.mrb[52].mxu1 %v5267_v60  ;;  %2771 = vmatmul.mubr.bf16.gmra.mrb[52].mxu0 %v5268_v61  ;;  %v5347_v60 = vld [vmem:[%s5756_s11 + $0x488] ss:$52 sps:$4 sm:$0xff]   ;;  %v5348_v61 = vld [vmem:[%s5756_s11 + $0x150] ss:$52 sps:$4 sm:$0xff]  }
  0x90   : > { %2681 = vmatprep.mubr.bf16.mxu1 %v5269_v62  ;;  %2778 = vmatprep.mubr.bf16.mxu0 %v5271_v63  ;;  %v5349_v62 = vld [vmem:[%s5756_s11 + $0x4f4] ss:$52 sps:$4 sm:$0xff]   ;;  %v5351_v63 = vld [vmem:[%s5756_s11 + $0x1bc] ss:$52 sps:$4 sm:$0xff]  }
  0x91   : > { %4793 = vmatpush3.bf16.msra.mxu0 %v5294_v0  ;;  %v5418_v0 = vld [vmem:[%s6895_s1 + $0x2b0] sm:$0xff]  }
  0x92   : > { %4794 = vmatprep.subr.bf16.mxu0 %v5309_v1  ;;  %v5432_v1 = vld [vmem:[%s6895_s1 + $0x2f8] sm:$0xff]  }
  0x95   : > { %4795 = vmatpush3.bf16.msra.mxu0 %v5310_v3  ;;  %v5353_v3 = vld [vmem:[%s5756_s11 + $0x4f0] ss:$52 sps:$4 sm:$0xff]  }
  0x96   : > { %4796 = vmatprep.subr.bf16.mxu0 %v5325_v4  ;;  %v5354_v4 = vld [vmem:[%s5756_s11 + $0x1b8] ss:$52 sps:$4 sm:$0xff]  }
  0x97   : > { %2682 = vmatmul.mubr.bf16.gmra.mrb[56].mxu1 %v5273_v2  ;;  %2779 = vmatmul.mubr.bf16.gmra.mrb[56].mxu0 %v5274_v5  ;;  %v5433_v2 = vld [vmem:[%s6895_s1 + $0x2b8] sm:$0xff]  }
  0x98   : > { %2689 = vmatprep.mubr.bf16.mxu1 %v5279_v6  ;;  %2786 = vmatprep.mubr.bf16.mxu0 %v5281_v7  ;;  %v5359_v5 = vld [vmem:[%s5756_s11 + $0x55c] ss:$52 sps:$4 sm:$0xff]   ;;  %v5361_v6 = vld [vmem:[%s5756_s11 + $0x224] ss:$52 sps:$4 sm:$0xff]  }
  0x99   : > { %4797 = vmatpush3.bf16.msra.mxu0 %v5326_v8  ;;  %v5363_v7 = vld [vmem:[%s5756_s11 + $0x558] ss:$52 sps:$4 sm:$0xff]   ;;  %v5364_v8 = vld [vmem:[%s5756_s11 + $0x220] ss:$52 sps:$4 sm:$0xff]  }
  0x9a   : > { %4798 = vmatprep.subr.bf16.mxu0 %v5341_v9  ;;  %v5365_v9 = vld [vmem:[%s5756_s11 + $0x5c4] ss:$52 sps:$4 sm:$0xff]  }
  0x9d   : > { %4799 = vmatpush3.bf16.msra.mxu0 %v5342_v12  ;;  %v5370_v12 = vld [vmem:[%s5756_s11 + $0x288] ss:$52 sps:$4 sm:$0xff]  }
  0x9e   : > { %4800 = vmatprep.subr.bf16.mxu0 %v5357_v13  ;;  %v5375_v13 = vld [vmem:[%s5756_s11 + $0x62c] ss:$52 sps:$4 sm:$0xff]  }
  0x9f   : > { %2690 = vmatmul.mubr.bf16.gmra.mrb[60].mxu1 %v5283_v10  ;;  %2787 = vmatmul.mubr.bf16.gmra.mrb[60].mxu0 %v5284_v11  ;;  %v5367_v10 = vld [vmem:[%s5756_s11 + $0x28c] ss:$52 sps:$4 sm:$0xff]  }
  0xa0   : > { %2697 = vmatprep.mubr.bf16.mxu1 %v5285_v14  ;;  %2794 = vmatprep.mubr.bf16.mxu0 %v5287_v15  ;;  %v5369_v11 = vld [vmem:[%s5756_s11 + $0x5c0] ss:$52 sps:$4 sm:$0xff]  }
  0xa1   : > { %4801 = vmatpush3.bf16.msra.mxu0 %v5358_v16  ;;  %v5377_v14 = vld [vmem:[%s5756_s11 + $0x2f4] ss:$52 sps:$4 sm:$0xff]  }
  0xa2   : > { %4802 = vmatprep.subr.bf16.mxu0 %v5373_v21 }
  0xa5   : > { %4803 = vmatpush3.bf16.msra.mxu0 %v5374_v22 }
  0xa6   : > { %5036 = vmatprep.subr.bf16.mxu0 %v6051_v27 }
  0xa7   : > { %2698 = vmatmul.mubr.bf16.gmra.mrb[64].mxu1 %v5289_v17  ;;  %2795 = vmatmul.mubr.bf16.gmra.mrb[64].mxu0 %v5290_v18 }
  0xa8   : > { %2705 = vmatprep.mubr.bf16.mxu1 %v5295_v19  ;;  %2802 = vmatprep.mubr.bf16.mxu0 %v5297_v20  ;;  %v5379_v19 = vld [vmem:[%s5756_s11 + $0x628] ss:$52 sps:$4 sm:$0xff]   ;;  %v5380_v20 = vld [vmem:[%s5756_s11 + $0x2f0] ss:$52 sps:$4 sm:$0xff]  }
  0xaf   : > { %2706 = vmatmul.mubr.bf16.gmra.mrb[68].mxu1 %v5299_v23  ;;  %2803 = vmatmul.mubr.bf16.gmra.mrb[68].mxu0 %v5300_v24 }
  0xb0   : > { %2713 = vmatprep.mubr.bf16.mxu1 %v5301_v25  ;;  %2810 = vmatprep.mubr.bf16.mxu0 %v5303_v26  ;;  %v5381_v25 = vld [vmem:[%s5756_s11 + $0x35c] ss:$52 sps:$4 sm:$0xff]   ;;  %v5385_v26 = vld [vmem:[%s5756_s11 + $0x24] ss:$52 sps:$4 sm:$0xff]  }
  0xb7   : > { %2714 = vmatmul.mubr.bf16.gmra.mrb[72].mxu1 %v5305_v28  ;;  %2811 = vmatmul.mubr.bf16.gmra.mrb[72].mxu0 %v5306_v29 }
  0xb8   : > { %2721 = vmatprep.mubr.bf16.mxu1 %v5311_v30  ;;  %2818 = vmatprep.mubr.bf16.mxu0 %v5313_v31 }
  0xbf   : > { %2722 = vmatmul.mubr.bf16.gmra.mrb[76].mxu1 %v5315_v32  ;;  %2819 = vmatmul.mubr.bf16.gmra.mrb[76].mxu0 %v5316_v33 }
  0xc0   : > { %2826 = vmatprep.mubr.bf16.mxu0 %v5317_v34  ;;  %2923 = vmatprep.mubr.bf16.mxu1 %v5321_v35 }
  0xc7   : > { %2827 = vmatmul.mubr.bf16.gmra.mrb[80].mxu0 %v5322_v37  ;;  %2924 = vmatmul.mubr.bf16.vlgmr.msra.gmra.mrb[80].mxu1 %v5319_v36  ;;  %v5383_v36 = vld [vmem:[%s5756_s11 + $0x20] ss:$52 sps:$4 sm:$0xff]   ;;  %v5386_v37 = vld [vmem:[%s5756_s11 + $0x358] ss:$52 sps:$4 sm:$0xff]  }
  0xc8   : > { %4901 = vmatpush3.bf16.msra.mxu1 %v5324_v38  ;;  %2834 = vmatprep.mubr.bf16.mxu0 %v5327_v39 }
  0xc9   : > { %2931 = vmatprep.mubr.bf16.mxu1 %v5329_v40  ;;  %4902 = vmatprep.subr.bf16.mxu1 %v5339_v41 }
  0xcc   : > { %4903 = vmatpush3.bf16.msra.mxu1 %v5340_v42  ;;  %v5390_v42 = vld [vmem:[%s5756_s11 + $0x3c4] ss:$52 sps:$4 sm:$0xff]  }
  0xcd   : > { %4904 = vmatprep.subr.bf16.mxu1 %v5355_v44 }
  0xcf   : > { %2835 = vmatmul.mubr.bf16.gmra.mrb[84].mxu0 %v5331_v43  ;;  %2932 = vmatmul.mubr.bf16.gmra.mrb[84].mxu1 %v5332_v45  ;;  %v5392_v45 = vld [vmem:[%s5756_s11 + $0x8c] ss:$52 sps:$4 sm:$0xff]  }
  0xd0   : > { %2842 = vmatprep.mubr.bf16.mxu0 %v5333_v46  ;;  %2939 = vmatprep.mubr.bf16.mxu1 %v5335_v47  ;;  %v5404_v46 = vld [vmem:[%s6895_s1 + $0x308] sm:$0xff]  }
  0xd1   : > { %4905 = vmatpush3.bf16.msra.mxu1 %v5356_v48 }
  0xd2   : > { %4906 = vmatprep.subr.bf16.mxu1 %v5371_v49  ;;  %v5419_v49 = vld [vmem:[%s6895_s1 + $0x310] sm:$0xff]  }
  0xd5   : > { %4907 = vmatpush3.bf16.msra.mxu1 %v5372_v50 }
  0xd6   : > { %4908 = vmatprep.subr.bf16.mxu1 %v5387_v51 }
  0xd7   : > { %2843 = vmatmul.mubr.bf16.gmra.mrb[88].mxu0 %v5337_v52  ;;  %2940 = vmatmul.mubr.bf16.gmra.mrb[88].mxu1 %v5338_v53 }
  0xd8   : > { %2850 = vmatprep.mubr.bf16.mxu0 %v5343_v54  ;;  %2947 = vmatprep.mubr.bf16.mxu1 %v5345_v55  ;;  %v5394_v54 = vld [vmem:[%s5756_s11 + $0x3c0] ss:$52 sps:$4 sm:$0xff]   ;;  %v5395_v55 = vld [vmem:[%s5756_s11 + $0x88] ss:$52 sps:$4 sm:$0xff]  }
  0xd9   : > { %4909 = vmatpush3.bf16.msra.mxu1 %v5388_v56 }
  0xda   : > { %4910 = vmatprep.subr.bf16.mxu1 %v5402_v57 }
  0xdd   : > { %4911 = vmatpush3.bf16.msra.mxu1 %v5403_v58 }
  0xde   : > { %4912 = vmatprep.subr.bf16.mxu1 %v5417_v59  ;;  %v5396_v59 = vld [vmem:[%s5756_s11 + $0x42c] ss:$52 sps:$4 sm:$0xff]  }
  0xdf   : > { %2851 = vmatmul.mubr.bf16.gmra.mrb[92].mxu0 %v5347_v60  ;;  %2948 = vmatmul.mubr.bf16.gmra.mrb[92].mxu1 %v5348_v61  ;;  %v5398_v60 = vld [vmem:[%s5756_s11 + $0xf4] ss:$52 sps:$4 sm:$0xff]  }
  0xe0   : > { %2858 = vmatprep.mubr.bf16.mxu0 %v5349_v62  ;;  %2955 = vmatprep.mubr.bf16.mxu1 %v5351_v63 }
  0xe1   : > { %4913 = vmatpush3.bf16.msra.mxu1 %v5418_v0 }
  0xe2   : > { %4914 = vmatprep.subr.bf16.mxu1 %v5432_v1  ;;  %v5434_v1 = vld [vmem:[%s6895_s1 + $0x318] sm:$0xff]  }
  0xe5   : > { %4915 = vmatpush3.bf16.msra.mxu1 %v5433_v2 }
  0xe7   : > { %2859 = vmatmul.mubr.bf16.gmra.mrb[96].mxu0 %v5353_v3  ;;  %2956 = vmatmul.mubr.bf16.gmra.mrb[96].mxu1 %v5354_v4  ;;  %v5447_v4 = vld [vmem:[%s6895_s1 + $0x320] sm:$0xff]  }
  0xe8   : > { %2866 = vmatprep.mubr.bf16.mxu0 %v5359_v5  ;;  %2963 = vmatprep.mubr.bf16.mxu1 %v5361_v6 }
  0xef   : > { %2867 = vmatmul.mubr.bf16.gmra.mrb[100].mxu0 %v5363_v7  ;;  %2964 = vmatmul.mubr.bf16.gmra.mrb[100].mxu1 %v5364_v8  ;;  %v5400_v7 = vld [vmem:[%s5756_s11 + $0x428] ss:$52 sps:$4 sm:$0xff]   ;;  %v5401_v8 = vld [vmem:[%s5756_s11 + $0xf0] ss:$52 sps:$4 sm:$0xff]  }
  0xf0   : > { %2874 = vmatprep.mubr.bf16.mxu0 %v5365_v9  ;;  %2971 = vmatprep.mubr.bf16.mxu1 %v5367_v10 }
  0xf7   : > { %2875 = vmatmul.mubr.bf16.gmra.mrb[104].mxu0 %v5369_v11  ;;  %2972 = vmatmul.mubr.bf16.gmra.mrb[104].mxu1 %v5370_v12 }
  0xf8   : > { %2882 = vmatprep.mubr.bf16.mxu0 %v5375_v13  ;;  %2979 = vmatprep.mubr.bf16.mxu1 %v5377_v14  ;;  %v5405_v13 = vld [vmem:[%s5756_s11 + $0x494] ss:$52 sps:$4 sm:$0xff]   ;;  %v5407_v14 = vld [vmem:[%s5756_s11 + $0x15c] ss:$52 sps:$4 sm:$0xff]  }
  0xfa   : > { %v4428_v15 = vpop.f32.mrb[0].mxu1  ;;  %v4356_v16 = vpop.f32.mrb[0].mxu0 }
  0xfb   : > { %v4429_v17 = vpop.f32.mrb[1].mxu1  ;;  %v4357_v18 = vpop.f32.mrb[1].mxu0 }
  0xfc   : > { %v6137_v21 = vadd.f32 %v4429_v17, %v4428_v15  ;;  %v4431_v22 = vpop.f32.mrb[2].mxu1  ;;  %v6139_v23 = vadd.f32 %v4357_v18, %v4356_v16  ;;  %v4359_v24 = vpop.f32.mrb[2].mxu0 }
  0xfd   : > { %v4432_v28 = vpop.f32.mrb[3].mxu1  ;;  %v4360_v29 = vpop.f32.mrb[3].mxu0 }
  0xfe   : > { %v6143_v30 = vadd.f32 %v4432_v28, %v4431_v22  ;;  %v6145_v31 = vadd.f32 %v4360_v29, %v4359_v24  ;;  %v5473_v24 = vld [vmem:[%s6895_s1 + $0x330] sm:$0xff]   ;;  %v5410_v29 = vld [vmem:[%s5756_s11 + $0x158] ss:$52 sps:$4 sm:$0xff]  }
  0xff   : > { %2883 = vmatmul.mubr.bf16.gmra.mrb[108].mxu0 %v5379_v19  ;;  %2980 = vmatmul.mubr.bf16.gmra.mrb[108].mxu1 %v5380_v20  ;;  %v5460_v19 = vld [vmem:[%s6895_s1 + $0x328] sm:$0xff]   ;;  %v5409_v28 = vld [vmem:[%s5756_s11 + $0x490] ss:$52 sps:$4 sm:$0xff]  }
 0x100   : > { %2987 = vmatprep.mubr.bf16.mxu1 %v5381_v25  ;;  %3084 = vmatprep.mubr.bf16.mxu0 %v5385_v26 }
 0x102   : > { %v4434_v32 = vpop.f32.mrb[4].mxu1  ;;  %v4362_v33 = vpop.f32.mrb[4].mxu0 }
 0x103   : > { %v4435_v34 = vpop.f32.mrb[5].mxu1  ;;  %v4363_v35 = vpop.f32.mrb[5].mxu0 }
 0x104   : > { %v6149_v38 = vadd.f32 %v4435_v34, %v4434_v32  ;;  %v4437_v39 = vpop.f32.mrb[6].mxu1  ;;  %v6151_v40 = vadd.f32 %v4363_v35, %v4362_v33  ;;  %v4365_v41 = vpop.f32.mrb[6].mxu0 }
 0x105   : > { %v4438_v43 = vpop.f32.mrb[7].mxu1  ;;  %v4366_v44 = vpop.f32.mrb[7].mxu0 }
 0x106   : > { %v6158_v47 = vadd.f32 %v4438_v43, %v4437_v39  ;;  %v6160_v48 = vadd.f32 %v4366_v44, %v4365_v41 }
 0x107   : > { %2988 = vmatmul.mubr.bf16.gmra.mrb[112].mxu1 %v5386_v37  ;;  %3085 = vmatmul.mubr.bf16.vlgmr.msra.gmra.mrb[112].mxu0 %v5383_v36  ;;  %v5411_v36 = vld [vmem:[%s5756_s11 + $0x4fc] ss:$52 sps:$4 sm:$0xff]   ;;  %v5413_v37 = vld [vmem:[%s5756_s11 + $0x1c4] ss:$52 sps:$4 sm:$0xff]  }
 0x108   : > { %5037 = vmatpush3.bf16.msra.mxu0 %v6051_v27  ;;  %2995 = vmatprep.mubr.bf16.mxu1 %v5390_v42 }
 0x109   : > { %3092 = vmatprep.mubr.bf16.mxu0 %v5392_v45  ;;  %5038 = vmatprep.subr.bf16.mxu0 %v5404_v46  ;;  %v5486_v45 = vld [vmem:[%s6895_s1 + $0x338] sm:$0xff]  }
 0x10a   : > { %v4440_v50 = vpop.f32.mrb[8].mxu1  ;;  %v4368_v51 = vpop.f32.mrb[8].mxu0 }
 0x10b   : > { %v4441_v52 = vpop.f32.mrb[9].mxu1  ;;  %v4369_v53 = vpop.f32.mrb[9].mxu0 }
 0x10c   : > { %v6168_v56 = vadd.f32 %v4441_v52, %v4440_v50  ;;  %v4443_v57 = vpop.f32.mrb[10].mxu1  ;;  %v6170_v58 = vadd.f32 %v4369_v53, %v4368_v51  ;;  %v4371_v27 = vpop.f32.mrb[10].mxu0  ;;  %5039 = vmatpush3.bf16.msra.mxu0 %v5404_v46  ;;  %v5415_v52 = vld [vmem:[%s5756_s11 + $0x4f8] ss:$52 sps:$4 sm:$0xff]   ;;  %v5416_v53 = vld [vmem:[%s5756_s11 + $0x1c0] ss:$52 sps:$4 sm:$0xff]  }
 0x10d   : > { %v4444_v61 = vpop.f32.mrb[11].mxu1  ;;  %v4372_v62 = vpop.f32.mrb[11].mxu0  ;;  %5040 = vmatprep.subr.bf16.mxu0 %v5419_v49 }
 0x10e   : > { %v6174_v63 = vadd.f32 %v4444_v61, %v4443_v57  ;;  %v6176_v0 = vadd.f32 %v4372_v62, %v4371_v27 }
 0x10f   : > { %2996 = vmatmul.mubr.bf16.gmra.mrb[116].mxu1 %v5394_v54  ;;  %3093 = vmatmul.mubr.bf16.gmra.mrb[116].mxu0 %v5395_v55 }
 0x110   : > { %3003 = vmatprep.mubr.bf16.mxu1 %v5396_v59  ;;  %3100 = vmatprep.mubr.bf16.mxu0 %v5398_v60  ;;  %v5420_v59 = vld [vmem:[%s5756_s11 + $0x564] ss:$52 sps:$4 sm:$0xff]   ;;  %v5422_v60 = vld [vmem:[%s5756_s11 + $0x22c] ss:$52 sps:$4 sm:$0xff]  }
 0x111   : > { %5041 = vmatpush3.bf16.msra.mxu0 %v5419_v49 }
 0x112   : > { %v4446_v2 = vpop.f32.mrb[12].mxu1  ;;  %v4374_v3 = vpop.f32.mrb[12].mxu0  ;;  %5042 = vmatprep.subr.bf16.mxu0 %v5434_v1 }
 0x113   : > { %v4447_v5 = vpop.f32.mrb[13].mxu1  ;;  %v4375_v6 = vpop.f32.mrb[13].mxu0 }
 0x114   : > { %v6186_v9 = vadd.f32 %v4447_v5, %v4446_v2  ;;  %v4449_v10 = vpop.f32.mrb[14].mxu1  ;;  %v6188_v11 = vadd.f32 %v4375_v6, %v4374_v3  ;;  %v4377_v12 = vpop.f32.mrb[14].mxu0 }
 0x115   : > { %v4450_v15 = vpop.f32.mrb[15].mxu1  ;;  %v4378_v16 = vpop.f32.mrb[15].mxu0  ;;  %5043 = vmatpush3.bf16.msra.mxu0 %v5434_v1 }
 0x116   : > { %v6192_v17 = vadd.f32 %v4450_v15, %v4449_v10  ;;  %v6194_v18 = vadd.f32 %v4378_v16, %v4377_v12  ;;  %5044 = vmatprep.subr.bf16.mxu0 %v5447_v4  ;;  %v5425_v10 = vld [vmem:[%s5756_s11 + $0x228] ss:$52 sps:$4 sm:$0xff]   ;;  %v5426_v15 = vld [vmem:[%s5756_s11 + $0x5cc] ss:$52 sps:$4 sm:$0xff]  }
 0x117   : > { %3004 = vmatmul.mubr.bf16.gmra.mrb[120].mxu1 %v5400_v7  ;;  %3101 = vmatmul.mubr.bf16.gmra.mrb[120].mxu0 %v5401_v8  ;;  %v5424_v8 = vld [vmem:[%s5756_s11 + $0x560] ss:$52 sps:$4 sm:$0xff]  }
 0x118   : > { %3011 = vmatprep.mubr.bf16.mxu1 %v5405_v13  ;;  %3108 = vmatprep.mubr.bf16.mxu0 %v5407_v14  ;;  %v5428_v16 = vld [vmem:[%s5756_s11 + $0x294] ss:$52 sps:$4 sm:$0xff]  }
 0x119   : > { %5045 = vmatpush3.bf16.msra.mxu0 %v5447_v4 }
 0x11a   : > { %v4468_v20 = vpop.f32.mrb[16].mxu1  ;;  %v4380_v22 = vpop.f32.mrb[16].mxu0  ;;  %5046 = vmatprep.subr.bf16.mxu0 %v5460_v19 }
 0x11b   : > { %v4469_v25 = vpop.f32.mrb[17].mxu1  ;;  %v4381_v26 = vpop.f32.mrb[17].mxu0 }
 0x11c   : > { %v4470_v32 = vadd.f32 %v4469_v25, %v4468_v20  ;;  %v4471_v33 = vpop.f32.mrb[18].mxu1  ;;  %v6204_v34 = vadd.f32 %v4381_v26, %v4380_v22  ;;  %v4383_v35 = vpop.f32.mrb[18].mxu0 }
 0x11d   : > { %v4472_v39 = vpop.f32.mrb[19].mxu1  ;;  %v4384_v41 = vpop.f32.mrb[19].mxu0  ;;  %5047 = vmatpush3.bf16.msra.mxu0 %v5460_v19 }
 0x11e   : > { %v6209_v42 = vadd.f32 %v4470_v32, %v6139_v23  ;;  %v4473_v43 = vadd.f32 %v4472_v39, %v4471_v33  ;;  %v6211_v44 = vadd.f32 %v4384_v41, %v4383_v35  ;;  %5048 = vmatprep.subr.bf16.mxu0 %v5473_v24  ;;  %v5430_v33 = vld [vmem:[%s5756_s11 + $0x5c8] ss:$52 sps:$4 sm:$0xff]   ;;  %v5431_v35 = vld [vmem:[%s5756_s11 + $0x290] ss:$52 sps:$4 sm:$0xff]  }
 0x11f   : > { %3012 = vmatmul.mubr.bf16.gmra.mrb[124].mxu1 %v5409_v28  ;;  %3109 = vmatmul.mubr.bf16.gmra.mrb[124].mxu0 %v5410_v29  ;;  %v5435_v41 = vld [vmem:[%s5756_s11 + $0x634] ss:$52 sps:$4 sm:$0xff]  }
 0x120   : > { %v6217_v46 = vadd.f32 %v4473_v43, %v6145_v31  ;;  %3019 = vmatprep.mubr.bf16.mxu1 %v5411_v36  ;;  %3116 = vmatprep.mubr.bf16.mxu0 %v5413_v37  ;;  %v5437_v43 = vld [vmem:[%s5756_s11 + $0x2fc] ss:$52 sps:$4 sm:$0xff]  }
 0x121   : > { %5049 = vmatpush3.bf16.msra.mxu0 %v5473_v24 }
 0x122   : > { %v4474_v23 = vpop.f32.mrb[20].mxu1  ;;  %v4386_v49 = vpop.f32.mrb[20].mxu0  ;;  %5050 = vmatprep.subr.bf16.mxu0 %v5486_v45 }
 0x123   : > { %v4475_v50 = vpop.f32.mrb[21].mxu1  ;;  %v4387_v51 = vpop.f32.mrb[21].mxu0 }
 0x124   : > { %v4476_v54 = vadd.f32 %v4475_v50, %v4474_v23  ;;  %v4477_v55 = vpop.f32.mrb[22].mxu1  ;;  %v6221_v57 = vadd.f32 %v4387_v51, %v4386_v49  ;;  %v4389_v27 = vpop.f32.mrb[22].mxu0 }
 0x125   : > { %v4478_v31 = vpop.f32.mrb[23].mxu1  ;;  %v4390_v61 = vpop.f32.mrb[23].mxu0  ;;  %5051 = vmatpush3.bf16.msra.mxu0 %v5486_v45 }
 0x126   : > { %v6226_v62 = vadd.f32 %v4476_v54, %v6151_v40  ;;  %v4479_v1 = vadd.f32 %v4478_v31, %v4477_v55  ;;  %v6228_v2 = vadd.f32 %v4390_v61, %v4389_v27  ;;  %v5439_v27 = vld [vmem:[%s5756_s11 + $0x630] ss:$52 sps:$4 sm:$0xff]  }
 0x127   : > { %3020 = vmatmul.mubr.bf16.gmra.mrb[128].mxu1 %v5415_v52  ;;  %3117 = vmatmul.mubr.bf16.gmra.mrb[128].mxu0 %v5416_v53 }
 0x128   : > { %v6231_v3 = vadd.f32 %v4479_v1, %v6160_v48  ;;  %3027 = vmatprep.mubr.bf16.mxu1 %v5420_v59  ;;  %3124 = vmatprep.mubr.bf16.mxu0 %v5422_v60  ;;  %v5440_v59 = vld [vmem:[%s5756_s11 + $0x2f8] ss:$52 sps:$4 sm:$0xff]  }
 0x129   : > { %v5441_v1 = vld [vmem:[%s5756_s11 + $0x364] ss:$52 sps:$4 sm:$0xff]  }
 0x12a   : > { %v4480_v4 = vpop.f32.mrb[24].mxu1  ;;  %v4392_v5 = vpop.f32.mrb[24].mxu0 }
 0x12b   : > { %v4481_v6 = vpop.f32.mrb[25].mxu1  ;;  %v4393_v7 = vpop.f32.mrb[25].mxu0 }
 0x12c   : > { %v4482_v40 = vadd.f32 %v4481_v6, %v4480_v4  ;;  %v4483_v12 = vpop.f32.mrb[26].mxu1  ;;  %v6235_v13 = vadd.f32 %v4393_v7, %v4392_v5  ;;  %v4395_v14 = vpop.f32.mrb[26].mxu0  ;;  %v5445_v4 = vld [vmem:[%s5756_s11 + $0x2c] ss:$52 sps:$4 sm:$0xff]  }
 0x12d   : > { %v4484_v19 = vpop.f32.mrb[27].mxu1  ;;  %v4396_v48 = vpop.f32.mrb[27].mxu0 }
 0x12e   : > { %v6240_v20 = vadd.f32 %v4482_v40, %v6170_v58  ;;  %v4485_v22 = vadd.f32 %v4484_v19, %v4483_v12  ;;  %v6242_v24 = vadd.f32 %v4396_v48, %v4395_v14  ;;  %v5446_v19 = vld [vmem:[%s5756_s11 + $0x360] ss:$52 sps:$4 sm:$0xff]  }
 0x12f   : > { %3028 = vmatmul.mubr.bf16.gmra.mrb[132].mxu1 %v5424_v8  ;;  %3125 = vmatmul.mubr.bf16.gmra.mrb[132].mxu0 %v5425_v10 }
 0x130   : > { %v6245_v25 = vadd.f32 %v4485_v22, %v6176_v0  ;;  %3035 = vmatprep.mubr.bf16.mxu1 %v5426_v15  ;;  %3132 = vmatprep.mubr.bf16.mxu0 %v5428_v16  ;;  %v5443_v16 = vld [vmem:[%s5756_s11 + $0x28] ss:$52 sps:$4 sm:$0xff]  }
 0x132   : > { %v4486_v26 = vpop.f32.mrb[28].mxu1  ;;  %v4398_v28 = vpop.f32.mrb[28].mxu0 }
 0x133   : > { %v4487_v29 = vpop.f32.mrb[29].mxu1  ;;  %v4399_v32 = vpop.f32.mrb[29].mxu0 }
 0x134   : > { %v4488_v58 = vadd.f32 %v4487_v29, %v4486_v26  ;;  %v4489_v36 = vpop.f32.mrb[30].mxu1  ;;  %v6249_v37 = vadd.f32 %v4399_v32, %v4398_v28  ;;  %v4401_v39 = vpop.f32.mrb[30].mxu0  ;;  %v5448_v28 = vld [vmem:[%s5756_s11 + $0x3cc] ss:$52 sps:$4 sm:$0xff]   ;;  %v5450_v29 = vld [vmem:[%s5756_s11 + $0x94] ss:$52 sps:$4 sm:$0xff]  }
 0x135   : > { %v4490_v45 = vpop.f32.mrb[31].mxu1  ;;  %v4402_v0 = vpop.f32.mrb[31].mxu0 }
 0x136   : > { %v6254_v23 = vadd.f32 %v4488_v58, %v6188_v11  ;;  %v4491_v49 = vadd.f32 %v4490_v45, %v4489_v36  ;;  %v6256_v50 = vadd.f32 %v4402_v0, %v4401_v39  ;;  %v5452_v0 = vld [vmem:[%s5756_s11 + $0x3c8] ss:$52 sps:$4 sm:$0xff]  }
 0x137   : > { %3036 = vmatmul.mubr.bf16.gmra.mrb[136].mxu1 %v5430_v33  ;;  %3133 = vmatmul.mubr.bf16.gmra.mrb[136].mxu0 %v5431_v35 }
 0x138   : > { %v6259_v51 = vadd.f32 %v4491_v49, %v6194_v18  ;;  %3043 = vmatprep.mubr.bf16.mxu1 %v5435_v41  ;;  %3140 = vmatprep.mubr.bf16.mxu0 %v5437_v43  ;;  %v5453_v49 = vld [vmem:[%s5756_s11 + $0x90] ss:$52 sps:$4 sm:$0xff]  }
 0x13a   : > { %v4492_v52 = vpop.f32.mrb[32].mxu1  ;;  %v4404_v53 = vpop.f32.mrb[32].mxu0 }
 0x13b   : > { %v4493_v54 = vpop.f32.mrb[33].mxu1  ;;  %v4405_v55 = vpop.f32.mrb[33].mxu0 }
 0x13c   : > { %v4494_v11 = vadd.f32 %v4493_v54, %v4492_v52  ;;  %v4495_v60 = vpop.f32.mrb[34].mxu1  ;;  %v6263_v31 = vadd.f32 %v4405_v55, %v4404_v53  ;;  %v4407_v61 = vpop.f32.mrb[34].mxu0  ;;  %v5454_v55 = vld [vmem:[%s5756_s11 + $0x434] ss:$52 sps:$4 sm:$0xff]  }
 0x13d   : > { %v4496_v5 = vpop.f32.mrb[35].mxu1  ;;  %v4408_v18 = vpop.f32.mrb[35].mxu0 }
 0x13e   : > { %v6268_v6 = vadd.f32 %v4494_v11, %v6204_v34  ;;  %v4497_v7 = vadd.f32 %v4496_v5, %v4495_v60  ;;  %v6270_v8 = vadd.f32 %v4408_v18, %v4407_v61 }
 0x13f   : > { %3044 = vmatmul.mubr.bf16.gmra.mrb[140].mxu1 %v5439_v27  ;;  %3141 = vmatmul.mubr.bf16.gmra.mrb[140].mxu0 %v5440_v59  ;;  %v5456_v27 = vld [vmem:[%s5756_s11 + $0xfc] ss:$52 sps:$4 sm:$0xff]  }
 0x140   : > { %v6273_v10 = vadd.f32 %v4497_v7, %v6211_v44  ;;  %3148 = vmatprep.mubr.bf16.mxu0 %v5441_v1  ;;  %3245 = vmatprep.mubr.bf16.mxu1 %v5445_v4 }
 0x142   : > { %v4498_v40 = vpop.f32.mrb[36].mxu1  ;;  %v4410_v12 = vpop.f32.mrb[36].mxu0 }
 0x143   : > { %v4499_v14 = vpop.f32.mrb[37].mxu1  ;;  %v4411_v15 = vpop.f32.mrb[37].mxu0 }
 0x144   : > { %v4500_v34 = vadd.f32 %v4499_v14, %v4498_v40  ;;  %v4501_v48 = vpop.f32.mrb[38].mxu1  ;;  %v6277_v22 = vadd.f32 %v4411_v15, %v4410_v12  ;;  %v4413_v26 = vpop.f32.mrb[38].mxu0  ;;  %v5458_v40 = vld [vmem:[%s5756_s11 + $0x430] ss:$52 sps:$4 sm:$0xff]   ;;  %v5459_v12 = vld [vmem:[%s5756_s11 + $0xf8] ss:$52 sps:$4 sm:$0xff]  }
 0x145   : > { %v4502_v32 = vpop.f32.mrb[39].mxu1  ;;  %v4414_v44 = vpop.f32.mrb[39].mxu0 }
 0x146   : > { %v6282_v33 = vadd.f32 %v4500_v34, %v6221_v57  ;;  %v4503_v35 = vadd.f32 %v4502_v32, %v4501_v48  ;;  %v6284_v58 = vadd.f32 %v4414_v44, %v4413_v26  ;;  %v5463_v34 = vld [vmem:[%s5756_s11 + $0x164] ss:$52 sps:$4 sm:$0xff]  }
 0x147   : > { %3149 = vmatmul.mubr.bf16.gmra.mrb[144].mxu0 %v5446_v19  ;;  %3246 = vmatmul.mubr.bf16.vlgmr.msra.gmra.mrb[144].mxu1 %v5443_v16  ;;  %v5461_v19 = vld [vmem:[%s5756_s11 + $0x49c] ss:$52 sps:$4 sm:$0xff]  }
 0x148   : > { %v6287_v36 = vadd.f32 %v4503_v35, %v6228_v2  ;;  %3156 = vmatprep.mubr.bf16.mxu0 %v5448_v28  ;;  %3253 = vmatprep.mubr.bf16.mxu1 %v5450_v29 }
 0x14a   : > { %v4504_v39 = vpop.f32.mrb[40].mxu1  ;;  %v4416_v41 = vpop.f32.mrb[40].mxu0 }
 0x14b   : > { %v4505_v43 = vpop.f32.mrb[41].mxu1  ;;  %v4417_v45 = vpop.f32.mrb[41].mxu0 }
 0x14c   : > { %v4506_v57 = vadd.f32 %v4505_v43, %v4504_v39  ;;  %v4507_v52 = vpop.f32.mrb[42].mxu1  ;;  %v6291_v53 = vadd.f32 %v4417_v45, %v4416_v41  ;;  %v4419_v54 = vpop.f32.mrb[42].mxu0  ;;  %v5465_v43 = vld [vmem:[%s5756_s11 + $0x498] ss:$52 sps:$4 sm:$0xff]   ;;  %v5466_v45 = vld [vmem:[%s5756_s11 + $0x160] ss:$52 sps:$4 sm:$0xff]  }
 0x14d   : > { %v4508_v59 = vpop.f32.mrb[43].mxu1  ;;  %v4420_v2 = vpop.f32.mrb[43].mxu0 }
 0x14e   : > { %v6296_v11 = vadd.f32 %v4506_v57, %v6235_v13  ;;  %v4509_v60 = vadd.f32 %v4508_v59, %v4507_v52  ;;  %v6298_v61 = vadd.f32 %v4420_v2, %v4419_v54  ;;  %v5467_v52 = vld [vmem:[%s5756_s11 + $0x504] ss:$52 sps:$4 sm:$0xff]   ;;  %v5469_v54 = vld [vmem:[%s5756_s11 + $0x1cc] ss:$52 sps:$4 sm:$0xff]  }
 0x14f   : > { %3157 = vmatmul.mubr.bf16.gmra.mrb[148].mxu0 %v5452_v0  ;;  %3254 = vmatmul.mubr.bf16.gmra.mrb[148].mxu1 %v5453_v49 }
 0x150   : > { %v6301_v1 = vadd.f32 %v4509_v60, %v6242_v24  ;;  %3164 = vmatprep.mubr.bf16.mxu0 %v5454_v55  ;;  %3261 = vmatprep.mubr.bf16.mxu1 %v5456_v27 }
 0x152   : > { %v4510_v4 = vpop.f32.mrb[44].mxu1  ;;  %v4422_v5 = vpop.f32.mrb[44].mxu0 }
 0x153   : > { %v4511_v18 = vpop.f32.mrb[45].mxu1  ;;  %v4423_v7 = vpop.f32.mrb[45].mxu0 }
 0x154   : > { %v4512_v13 = vadd.f32 %v4511_v18, %v4510_v4  ;;  %v4513_v14 = vpop.f32.mrb[46].mxu1  ;;  %v6305_v15 = vadd.f32 %v4423_v7, %v4422_v5  ;;  %v4425_v16 = vpop.f32.mrb[46].mxu0 }
 0x155   : > { %v4514_v48 = vpop.f32.mrb[47].mxu1  ;;  %v4426_v24 = vpop.f32.mrb[47].mxu0 }
 0x156   : > { %v6310_v26 = vadd.f32 %v4512_v13, %v6249_v37  ;;  %v4515_v28 = vadd.f32 %v4514_v48, %v4513_v14  ;;  %v6312_v29 = vadd.f32 %v4426_v24, %v4425_v16  ;;  %v5476_v48 = vld [vmem:[%s5756_s11 + $0x234] ss:$52 sps:$4 sm:$0xff]  }
 0x157   : > { %3165 = vmatmul.mubr.bf16.gmra.mrb[152].mxu0 %v5458_v40  ;;  %3262 = vmatmul.mubr.bf16.gmra.mrb[152].mxu1 %v5459_v12  ;;  %v5472_v12 = vld [vmem:[%s5756_s11 + $0x1c8] ss:$52 sps:$4 sm:$0xff]  }
 0x158   : > { %v6315_v32 = vadd.f32 %v4515_v28, %v6256_v50  ;;  %3172 = vmatprep.mubr.bf16.mxu0 %v5461_v19  ;;  %3269 = vmatprep.mubr.bf16.mxu1 %v5463_v34  ;;  %v5474_v34 = vld [vmem:[%s5756_s11 + $0x56c] ss:$52 sps:$4 sm:$0xff]  }
 0x15a   : > { %v4516_v44 = vpop.f32.mrb[48].mxu1  ;;  %v4580_v35 = vpop.f32.mrb[48].mxu0 }
 0x15b   : > { %v4517_v39 = vpop.f32.mrb[49].mxu1  ;;  %v4581_v41 = vpop.f32.mrb[49].mxu0 }
 0x15c   : > { %v4518_v37 = vadd.f32 %v4517_v39, %v4516_v44  ;;  %v4582_v0 = vadd.f32 %v4581_v41, %v4580_v35  ;;  %v4519_v49 = vpop.f32.mrb[50].mxu1  ;;  %v4583_v57 = vpop.f32.mrb[50].mxu0 }
 0x15d   : > { %v4520_v55 = vpop.f32.mrb[51].mxu1  ;;  %v4584_v27 = vpop.f32.mrb[51].mxu0 }
 0x15e   : > { %v6322_v50 = vadd.f32 %v4518_v37, %v6263_v31  ;;  %v6325_v59 = vadd.f32 %v4582_v0, %v6209_v42  ;;  %v4521_v2 = vadd.f32 %v4520_v55, %v4519_v49  ;;  %v4585_v60 = vadd.f32 %v4584_v27, %v4583_v57  ;;  %v5471_v42 = vld [vmem:[%s5756_s11 + $0x500] ss:$52 sps:$4 sm:$0xff]   ;;  %v5479_v0 = vld [vmem:[%s5756_s11 + $0x230] ss:$52 sps:$4 sm:$0xff]  }
 0x15f   : > { %3173 = vmatmul.mubr.bf16.gmra.mrb[156].mxu0 %v5465_v43  ;;  %3270 = vmatmul.mubr.bf16.gmra.mrb[156].mxu1 %v5466_v45  ;;  %v5480_v55 = vld [vmem:[%s5756_s11 + $0x5d4] ss:$52 sps:$4 sm:$0xff]   ;;  %v5482_v27 = vld [vmem:[%s5756_s11 + $0x29c] ss:$52 sps:$4 sm:$0xff]  }
 0x160   : > { %v6328_v4 = vadd.f32 %v4521_v2, %v6270_v8  ;;  %v6331_v5 = vadd.f32 %v4585_v60, %v6217_v46  ;;  %3180 = vmatprep.mubr.bf16.mxu0 %v5467_v52  ;;  %3277 = vmatprep.mubr.bf16.mxu1 %v5469_v54 }
 0x162   : > { %v4522_v18 = vpop.f32.mrb[52].mxu1  ;;  %v4586_v31 = vpop.f32.mrb[52].mxu0 }
 0x163   : > { %v4523_v7 = vpop.f32.mrb[53].mxu1  ;;  %v4587_v40 = vpop.f32.mrb[53].mxu0 }
 0x164   : > { %v4524_v13 = vadd.f32 %v4523_v7, %v4522_v18  ;;  %v4588_v14 = vadd.f32 %v4587_v40, %v4586_v31  ;;  %v4525_v16 = vpop.f32.mrb[54].mxu1  ;;  %v4589_v19 = vpop.f32.mrb[54].mxu0 }
 0x165   : > { %v4526_v24 = vpop.f32.mrb[55].mxu1  ;;  %v4590_v8 = vpop.f32.mrb[55].mxu0 }
 0x166   : > { %v6338_v46 = vadd.f32 %v4524_v13, %v6277_v22  ;;  %v6341_v28 = vadd.f32 %v4588_v14, %v6226_v62  ;;  %v4527_v44 = vadd.f32 %v4526_v24, %v4525_v16  ;;  %v4591_v35 = vadd.f32 %v4590_v8, %v4589_v19  ;;  %v5478_v62 = vld [vmem:[%s5756_s11 + $0x568] ss:$52 sps:$4 sm:$0xff]   ;;  %v5485_v14 = vld [vmem:[%s5756_s11 + $0x298] ss:$52 sps:$4 sm:$0xff]  }
 0x167   : > { %3181 = vmatmul.mubr.bf16.gmra.mrb[160].mxu0 %v5471_v42  ;;  %3278 = vmatmul.mubr.bf16.gmra.mrb[160].mxu1 %v5472_v12  ;;  %v5487_v24 = vld [vmem:[%s5756_s11 + $0x63c] ss:$52 sps:$4 sm:$0xff]   ;;  %v5489_v8 = vld [vmem:[%s5756_s11 + $0x304] ss:$52 sps:$4 sm:$0xff]  }
 0x168   : > { %v6344_v39 = vadd.f32 %v4527_v44, %v6284_v58  ;;  %v6347_v41 = vadd.f32 %v4591_v35, %v6231_v3  ;;  %3188 = vmatprep.mubr.bf16.mxu0 %v5474_v34  ;;  %3285 = vmatprep.mubr.bf16.mxu1 %v5476_v48 }
 0x16a   : > { %v4528_v43 = vpop.f32.mrb[56].mxu1  ;;  %v4592_v22 = vpop.f32.mrb[56].mxu0 }
 0x16b   : > { %v4529_v45 = vpop.f32.mrb[57].mxu1  ;;  %v4593_v37 = vpop.f32.mrb[57].mxu0 }
 0x16c   : > { %v4530_v49 = vadd.f32 %v4529_v45, %v4528_v43  ;;  %v4594_v57 = vadd.f32 %v4593_v37, %v4592_v22  ;;  %v4531_v52 = vpop.f32.mrb[58].mxu1  ;;  %v4595_v54 = vpop.f32.mrb[58].mxu0 }
 0x16d   : > { %v4532_v2 = vpop.f32.mrb[59].mxu1  ;;  %v4596_v58 = vpop.f32.mrb[59].mxu0 }
 0x16e   : > { %v6354_v3 = vadd.f32 %v4530_v49, %v6291_v53  ;;  %v6357_v60 = vadd.f32 %v4594_v57, %v6240_v20  ;;  %v4533_v18 = vadd.f32 %v4532_v2, %v4531_v52  ;;  %v4597_v31 = vadd.f32 %v4596_v58, %v4595_v54  ;;  %v5484_v20 = vld [vmem:[%s5756_s11 + $0x5d0] ss:$52 sps:$4 sm:$0xff]   ;;  %v5492_v57 = vld [vmem:[%s5756_s11 + $0x300] ss:$52 sps:$4 sm:$0xff]  }
 0x16f   : > { %3189 = vmatmul.mubr.bf16.gmra.mrb[164].mxu0 %v5478_v62  ;;  %3286 = vmatmul.mubr.bf16.gmra.mrb[164].mxu1 %v5479_v0  ;;  %v5493_v2 = vld [vmem:[%s5756_s11 + $0x36c] ss:$52 sps:$4 sm:$0xff]   ;;  %v5495_v58 = vld [vmem:[%s5756_s11 + $0x30] ss:$52 sps:$4 sm:$0xff]  }
 0x170   : > { %v6360_v7 = vadd.f32 %v4533_v18, %v6298_v61  ;;  %v6363_v40 = vadd.f32 %v4597_v31, %v6245_v25  ;;  %3196 = vmatprep.mubr.bf16.mxu0 %v5480_v55  ;;  %3293 = vmatprep.mubr.bf16.mxu1 %v5482_v27 }
 0x172   : > { %v4534_v42 = vpop.f32.mrb[60].mxu1  ;;  %v4598_v53 = vpop.f32.mrb[60].mxu0 }
 0x173   : > { %v4535_v12 = vpop.f32.mrb[61].mxu1  ;;  %v4599_v13 = vpop.f32.mrb[61].mxu0 }
 0x174   : > { %v4536_v16 = vadd.f32 %v4535_v12, %v4534_v42  ;;  %v4600_v19 = vadd.f32 %v4599_v13, %v4598_v53  ;;  %v4537_v34 = vpop.f32.mrb[62].mxu1  ;;  %v4601_v48 = vpop.f32.mrb[62].mxu0 }
 0x175   : > { %v4538_v44 = vpop.f32.mrb[63].mxu1  ;;  %v4602_v61 = vpop.f32.mrb[63].mxu0 }
 0x176   : > { %v6370_v25 = vadd.f32 %v4536_v16, %v6305_v15  ;;  %v6373_v35 = vadd.f32 %v4600_v19, %v6254_v23  ;;  %v4539_v43 = vadd.f32 %v4538_v44, %v4537_v34  ;;  %v4603_v22 = vadd.f32 %v4602_v61, %v4601_v48  ;;  %v5491_v23 = vld [vmem:[%s5756_s11 + $0x638] ss:$52 sps:$4 sm:$0xff]   ;;  %v5498_v44 = vld [vmem:[%s5756_s11 + $0x3d4] ss:$52 sps:$4 sm:$0xff]  }
 0x177   : > { %3197 = vmatmul.mubr.bf16.gmra.mrb[168].mxu0 %v5484_v20  ;;  %3294 = vmatmul.mubr.bf16.gmra.mrb[168].mxu1 %v5485_v14  ;;  %v5497_v19 = vld [vmem:[%s5756_s11 + $0x98] ss:$52 sps:$4 sm:$0xff]   ;;  %v5500_v61 = vld [vmem:[%s5756_s11 + $0x100] ss:$52 sps:$4 sm:$0xff]  }
 0x178   : > { %v6376_v45 = vadd.f32 %v4539_v43, %v6312_v29  ;;  %v6379_v37 = vadd.f32 %v4603_v22, %v6259_v51  ;;  %3204 = vmatprep.mubr.bf16.mxu0 %v5487_v24  ;;  %3301 = vmatprep.mubr.bf16.mxu1 %v5489_v8 }
 0x17a   : > { %v4540_v62 = vpop.f32.mrb[64].mxu1  ;;  %v4604_v15 = vpop.f32.mrb[64].mxu0 }
 0x17b   : > { %v4541_v0 = vpop.f32.mrb[65].mxu1  ;;  %v4605_v49 = vpop.f32.mrb[65].mxu0 }
 0x17c   : > { %v4542_v52 = vadd.f32 %v4541_v0, %v4540_v62  ;;  %v4606_v54 = vadd.f32 %v4605_v49, %v4604_v15  ;;  %v4543_v55 = vpop.f32.mrb[66].mxu1  ;;  %v4607_v27 = vpop.f32.mrb[66].mxu0 }
 0x17d   : > { %v4544_v18 = vpop.f32.mrb[67].mxu1  ;;  %v4608_v29 = vpop.f32.mrb[67].mxu0 }
 0x17e   : > { %v6386_v51 = vadd.f32 %v4542_v52, %v6137_v21  ;;  %v6389_v31 = vadd.f32 %v4606_v54, %v6268_v6  ;;  %v4545_v42 = vadd.f32 %v4544_v18, %v4543_v55  ;;  %v4609_v53 = vadd.f32 %v4608_v29, %v4607_v27  ;;  %v5496_v6 = vld [vmem:[%s5756_s11 + $0x368] ss:$52 sps:$4 sm:$0xff]   ;;  %v5505_v29 = vld [vmem:[%s5756_s11 + $0x1d0] ss:$52 sps:$4 sm:$0xff]  }
 0x17f   : > { %3205 = vmatmul.mubr.bf16.gmra.mrb[172].mxu0 %v5491_v23  ;;  %3302 = vmatmul.mubr.bf16.gmra.mrb[172].mxu1 %v5492_v57  ;;  %v5502_v54 = vld [vmem:[%s5756_s11 + $0x168] ss:$52 sps:$4 sm:$0xff]  }
 0x180   : > { %v6392_v12 = vadd.f32 %v4545_v42, %v6143_v30  ;;  %v6395_v13 = vadd.f32 %v4609_v53, %v6273_v10  ;;  %3309 = vmatprep.mubr.bf16.mxu1 %v5493_v2  ;;  %5052 = vmatprep.mubr.bf16.mxu0 %v5495_v58  ;;  %v5503_v18 = vld [vmem:[%s5756_s11 + $0x43c] ss:$52 sps:$4 sm:$0xff]  }
 0x182   : > { %v4546_v20 = vpop.f32.mrb[68].mxu1  ;;  %v4610_v21 = vpop.f32.mrb[68].mxu0 }
 0x183   : > { %v4547_v14 = vpop.f32.mrb[69].mxu1  ;;  %v4611_v16 = vpop.f32.mrb[69].mxu0 }
 0x184   : > { %v4548_v34 = vadd.f32 %v4547_v14, %v4546_v20  ;;  %v4612_v48 = vadd.f32 %v4611_v16, %v4610_v21  ;;  %v4549_v24 = vpop.f32.mrb[70].mxu1  ;;  %v4613_v8 = vpop.f32.mrb[70].mxu0 }
 0x185   : > { %v4550_v43 = vpop.f32.mrb[71].mxu1  ;;  %v4614_v30 = vpop.f32.mrb[71].mxu0 }
 0x186   : > { %v6402_v10 = vadd.f32 %v4548_v34, %v6149_v38  ;;  %v6405_v22 = vadd.f32 %v4612_v48, %v6282_v33  ;;  %v4551_v62 = vadd.f32 %v4550_v43, %v4549_v24  ;;  %v4615_v15 = vadd.f32 %v4614_v30, %v4613_v8  ;;  %v5501_v33 = vld [vmem:[%s5756_s11 + $0x3d0] ss:$52 sps:$4 sm:$0xff]   ;;  %v5507_v48 = vld [vmem:[%s5756_s11 + $0x238] ss:$52 sps:$4 sm:$0xff]   ;;  %v5510_v30 = vld [vmem:[%s5756_s11 + $0x2a0] ss:$52 sps:$4 sm:$0xff]  }
 0x187   : > { %3310 = vmatmul.mubr.bf16.gmra.mrb[176].mxu1 %v5496_v6  ;;  %5053 = vmatmul.mubr.bf16.vlgmr.msra.gmra.mrb[176].mxu0 %v5497_v19  ;;  %v5508_v43 = vld [vmem:[%s5756_s11 + $0x4a4] ss:$52 sps:$4 sm:$0xff]  }
 0x188   : > { %v6408_v0 = vadd.f32 %v4551_v62, %v6158_v47  ;;  %v6411_v49 = vadd.f32 %v4615_v15, %v6287_v36  ;;  %3317 = vmatprep.mubr.bf16.mxu1 %v5498_v44  ;;  %5056 = vmatprep.mubr.bf16.mxu0 %v5500_v61 }
 0x18a   : > { %v4552_v23 = vpop.f32.mrb[72].mxu1  ;;  %v4616_v38 = vpop.f32.mrb[72].mxu0 }
 0x18b   : > { %v4553_v57 = vpop.f32.mrb[73].mxu1  ;;  %v4617_v52 = vpop.f32.mrb[73].mxu0 }
 0x18c   : > { %v4554_v55 = vadd.f32 %v4553_v57, %v4552_v23  ;;  %v4618_v27 = vadd.f32 %v4617_v52, %v4616_v38  ;;  %v4555_v2 = vpop.f32.mrb[74].mxu1  ;;  %v4619_v58 = vpop.f32.mrb[74].mxu0 }
 0x18d   : > { %v4556_v42 = vpop.f32.mrb[75].mxu1  ;;  %v4620_v47 = vpop.f32.mrb[75].mxu0 }
 0x18e   : > { %v6418_v36 = vadd.f32 %v4554_v55, %v6168_v56  ;;  %v6421_v53 = vadd.f32 %v4618_v27, %v6296_v11  ;;  %v4557_v20 = vadd.f32 %v4556_v42, %v4555_v2  ;;  %v4621_v21 = vadd.f32 %v4620_v47, %v4619_v58  ;;  %v5506_v11 = vld [vmem:[%s5756_s11 + $0x438] ss:$52 sps:$4 sm:$0xff]   ;;  %v5512_v27 = vld [vmem:[%s5756_s11 + $0x308] ss:$52 sps:$4 sm:$0xff]   ;;  %v5515_v47 = vld [vmem:[%s5756_s11 + $0x370] ss:$52 sps:$4 sm:$0xff]  }
 0x18f   : > { %3318 = vmatmul.mubr.bf16.gmra.mrb[180].mxu1 %v5501_v33  ;;  %5057 = vmatmul.mubr.bf16.gmra.mrb[180].mxu0 %v5502_v54  ;;  %v5513_v42 = vld [vmem:[%s5756_s11 + $0x50c] ss:$52 sps:$4 sm:$0xff]  }
 0x190   : > { %v6424_v14 = vadd.f32 %v4557_v20, %v6174_v63  ;;  %v6427_v16 = vadd.f32 %v4621_v21, %v6301_v1  ;;  %3325 = vmatprep.mubr.bf16.mxu1 %v5503_v18  ;;  %5060 = vmatprep.mubr.bf16.mxu0 %v5505_v29 }
 0x192   : > { %v4558_v6 = vpop.f32.mrb[76].mxu1  ;;  %v4622_v56 = vpop.f32.mrb[76].mxu0 }
 0x193   : > { %v4559_v19 = vpop.f32.mrb[77].mxu1  ;;  %v4623_v34 = vpop.f32.mrb[77].mxu0 }
 0x194   : > { %v4560_v24 = vadd.f32 %v4559_v19, %v4558_v6  ;;  %v4624_v8 = vadd.f32 %v4623_v34, %v4622_v56  ;;  %v4561_v44 = vpop.f32.mrb[78].mxu1  ;;  %v4625_v61 = vpop.f32.mrb[78].mxu0 }
 0x195   : > { %v4562_v62 = vpop.f32.mrb[79].mxu1  ;;  %v4626_v63 = vpop.f32.mrb[79].mxu0 }
 0x196   : > { %v6434_v1 = vadd.f32 %v4560_v24, %v6186_v9  ;;  %v6437_v15 = vadd.f32 %v4624_v8, %v6310_v26  ;;  %v4563_v23 = vadd.f32 %v4562_v62, %v4561_v44  ;;  %v4627_v38 = vadd.f32 %v4626_v63, %v4625_v61  ;;  %v5511_v26 = vld [vmem:[%s5756_s11 + $0x4a0] ss:$52 sps:$4 sm:$0xff]   ;;  %v5517_v8 = vld [vmem:[%s5756_s11 + $0x3d8] ss:$52 sps:$4 sm:$0xff]  }
 0x197   : > { %3326 = vmatmul.mubr.bf16.gmra.mrb[184].mxu1 %v5506_v11  ;;  %5061 = vmatmul.mubr.bf16.gmra.mrb[184].mxu0 %v5507_v48  ;;  %v5518_v62 = vld [vmem:[%s5756_s11 + $0x574] ss:$52 sps:$4 sm:$0xff]  }
 0x198   : > { %v6440_v57 = vadd.f32 %v4563_v23, %v6192_v17  ;;  %v6443_v52 = vadd.f32 %v4627_v38, %v6315_v32  ;;  %3333 = vmatprep.mubr.bf16.mxu1 %v5508_v43  ;;  %5064 = vmatprep.mubr.bf16.mxu0 %v5510_v30  ;;  %v5520_v63 = vld [vmem:[%s5756_s11 + $0x440] ss:$52 sps:$4 sm:$0xff]  }
 0x19a   : > { %v4628_v33 = vpop.f32.mrb[80].mxu0  ;;  %v4692_v9 = vpop.f32.mrb[80].mxu1 }
 0x19b   : > { %v4629_v54 = vpop.f32.mrb[81].mxu0  ;;  %v4693_v55 = vpop.f32.mrb[81].mxu1 }
 0x19c   : > { %v4630_v2 = vadd.f32 %v4629_v54, %v4628_v33  ;;  %v4694_v58 = vadd.f32 %v4693_v55, %v4692_v9  ;;  %v4631_v18 = vpop.f32.mrb[82].mxu0  ;;  %v4695_v29 = vpop.f32.mrb[82].mxu1 }
 0x19d   : > { %v4632_v20 = vpop.f32.mrb[83].mxu0  ;;  %v4696_v17 = vpop.f32.mrb[83].mxu1 }
 0x19e   : > { %v6450_v32 = vadd.f32 %v4630_v2, %v6322_v50  ;;  %v6453_v21 = vadd.f32 %v4694_v58, %v6325_v59  ;;  %v4633_v6 = vadd.f32 %v4632_v20, %v4631_v18  ;;  %v4697_v56 = vadd.f32 %v4696_v17, %v4695_v29  ;;  %v5516_v59 = vld [vmem:[%s5756_s11 + $0x508] ss:$52 sps:$4 sm:$0xff]   ;;  %v5525_v17 = vld [vmem:[%s5756_s11 + $0x510] ss:$52 sps:$4 sm:$0xff]  }
 0x19f   : > { %3334 = vmatmul.mubr.bf16.gmra.mrb[188].mxu1 %v5511_v26  ;;  %5065 = vmatmul.mubr.bf16.gmra.mrb[188].mxu0 %v5512_v27  ;;  %v5522_v58 = vld [vmem:[%s5756_s11 + $0x4a8] ss:$52 sps:$4 sm:$0xff]  }
 0x1a0   : > { %v6456_v19 = vadd.f32 %v4633_v6, %v6328_v4  ;;  %v6459_v34 = vadd.f32 %v4697_v56, %v6331_v5  ;;  %3341 = vmatprep.mubr.bf16.mxu1 %v5513_v42  ;;  %5068 = vmatprep.mubr.bf16.mxu0 %v5515_v47  ;;  %v5523_v20 = vld [vmem:[%s5756_s11 + $0x5dc] ss:$52 sps:$4 sm:$0xff]  }
 0x1a2   : > { %v4634_v11 = vpop.f32.mrb[84].mxu0  ;;  %v4698_v50 = vpop.f32.mrb[84].mxu1 }
 0x1a3   : > { %v4635_v48 = vpop.f32.mrb[85].mxu0  ;;  %v4699_v24 = vpop.f32.mrb[85].mxu1 }
 0x1a4   : > { %v4636_v44 = vadd.f32 %v4635_v48, %v4634_v11  ;;  %v4700_v61 = vadd.f32 %v4699_v24, %v4698_v50  ;;  %v4637_v43 = vpop.f32.mrb[86].mxu0  ;;  %v4701_v30 = vpop.f32.mrb[86].mxu1 }
 0x1a5   : > { %v4638_v23 = vpop.f32.mrb[87].mxu0  ;;  %v4702_v4 = vpop.f32.mrb[87].mxu1 }
 0x1a6   : > { %v6466_v5 = vadd.f32 %v4636_v44, %v6338_v46  ;;  %v6469_v38 = vadd.f32 %v4700_v61, %v6341_v28  ;;  %v4639_v33 = vadd.f32 %v4638_v23, %v4637_v43  ;;  %v4703_v9 = vadd.f32 %v4702_v4, %v4701_v30  ;;  %v5521_v28 = vld [vmem:[%s5756_s11 + $0x570] ss:$52 sps:$4 sm:$0xff]   ;;  %v5527_v61 = vld [vmem:[%s5756_s11 + $0x578] ss:$52 sps:$4 sm:$0xff]   ;;  %v5530_v4 = vld [vmem:[%s5756_s11 + $0x5e0] ss:$52 sps:$4 sm:$0xff]  }
 0x1a7   : > { %3342 = vmatmul.mubr.bf16.gmra.mrb[192].mxu1 %v5516_v59  ;;  %5069 = vmatmul.mubr.bf16.gmra.mrb[192].mxu0 %v5517_v8  ;;  %v5528_v23 = vld [vmem:[%s5756_s11 + $0x644] ss:$52 sps:$4 sm:$0xff]  }
 0x1a8   : > { %v6472_v54 = vadd.f32 %v4639_v33, %v6344_v39  ;;  %v6475_v55 = vadd.f32 %v4703_v9, %v6347_v41  ;;  %3349 = vmatprep.mubr.bf16.mxu1 %v5518_v62  ;;  %5072 = vmatprep.mubr.bf16.mxu0 %v5520_v63 }
 0x1aa   : > { %v4640_v26 = vpop.f32.mrb[88].mxu0  ;;  %v4704_v46 = vpop.f32.mrb[88].mxu1 }
 0x1ab   : > { %v4641_v27 = vpop.f32.mrb[89].mxu0  ;;  %v4705_v2 = vpop.f32.mrb[89].mxu1 }
 0x1ac   : > { %v4642_v18 = vadd.f32 %v4641_v27, %v4640_v26  ;;  %v4706_v29 = vadd.f32 %v4705_v2, %v4704_v46  ;;  %v4643_v42 = vpop.f32.mrb[90].mxu0  ;;  %v4707_v47 = vpop.f32.mrb[90].mxu1 }
 0x1ad   : > { %v4644_v6 = vpop.f32.mrb[91].mxu0  ;;  %v4708_v39 = vpop.f32.mrb[91].mxu1 }
 0x1ae   : > { %v6482_v41 = vadd.f32 %v4642_v18, %v6354_v3  ;;  %v6485_v56 = vadd.f32 %v4706_v29, %v6357_v60  ;;  %v4645_v11 = vadd.f32 %v4644_v6, %v4643_v42  ;;  %v4709_v50 = vadd.f32 %v4708_v39, %v4707_v47  ;;  %v5526_v60 = vld [vmem:[%s5756_s11 + $0x5d8] ss:$52 sps:$4 sm:$0xff]   ;;  %v5531_v29 = vld [vmem:[%s5756_s11 + $0x640] ss:$52 sps:$4 sm:$0xff]   ;;  %v5532_v42 = vld [vmem:[%s5756_s11 + $0x648] ss:$52 sps:$4 sm:$0xff]  }
 0x1af   : > { %3350 = vmatmul.mubr.bf16.gmra.mrb[196].mxu1 %v5521_v28  ;;  %5073 = vmatmul.mubr.bf16.gmra.mrb[196].mxu0 %v5522_v58 }
 0x1b0   : > { %v6488_v48 = vadd.f32 %v4645_v11, %v6360_v7  ;;  %v6491_v24 = vadd.f32 %v4709_v50, %v6363_v40  ;;  %3357 = vmatprep.mubr.bf16.mxu1 %v5523_v20  ;;  %5076 = vmatprep.mubr.bf16.mxu0 %v5525_v17 }
 0x1b2   : > { %v4646_v59 = vpop.f32.mrb[92].mxu0  ;;  %v4710_v3 = vpop.f32.mrb[92].mxu1 }
 0x1b3   : > { %v4647_v8 = vpop.f32.mrb[93].mxu0  ;;  %v4711_v44 = vpop.f32.mrb[93].mxu1 }
 0x1b4   : > { %v4648_v43 = vadd.f32 %v4647_v8, %v4646_v59  ;;  %v4712_v30 = vadd.f32 %v4711_v44, %v4710_v3  ;;  %v4649_v62 = vpop.f32.mrb[94].mxu0  ;;  %v4713_v63 = vpop.f32.mrb[94].mxu1 }
 0x1b5   : > { %v4650_v33 = vpop.f32.mrb[95].mxu0  ;;  %v4714_v7 = vpop.f32.mrb[95].mxu1 }
 0x1b6   : > { %v6498_v40 = vadd.f32 %v4648_v43, %v6370_v25  ;;  %v6501_v9 = vadd.f32 %v4712_v30, %v6373_v35  ;;  %v4651_v26 = vadd.f32 %v4650_v33, %v4649_v62  ;;  %v4715_v46 = vadd.f32 %v4714_v7, %v4713_v63 }
 0x1b7   : > { %3358 = vmatmul.mubr.bf16.gmra.mrb[200].mxu1 %v5526_v60  ;;  %5077 = vmatmul.mubr.bf16.gmra.mrb[200].mxu0 %v5527_v61 }
 0x1b8   : > { %v6504_v27 = vadd.f32 %v4651_v26, %v6376_v45  ;;  %v6507_v2 = vadd.f32 %v4715_v46, %v6379_v37  ;;  %3365 = vmatprep.mubr.bf16.mxu1 %v5528_v23  ;;  %5080 = vmatprep.mubr.bf16.mxu0 %v5530_v4 }
 0x1ba   : > { %v4652_v28 = vpop.f32.mrb[96].mxu0  ;;  %v4716_v58 = vpop.f32.mrb[96].mxu1 }
 0x1bb   : > { %v4653_v18 = vpop.f32.mrb[97].mxu0  ;;  %v4717_v25 = vpop.f32.mrb[97].mxu1 }
 0x1bc   : > { %v4654_v35 = vadd.f32 %v4653_v18, %v4652_v28  ;;  %v4718_v47 = vadd.f32 %v4717_v25, %v4716_v58  ;;  %v4655_v20 = vpop.f32.mrb[98].mxu0  ;;  %v4719_v17 = vpop.f32.mrb[98].mxu1 }
 0x1bd   : > { %v4656_v6 = vpop.f32.mrb[99].mxu0  ;;  %v4720_v39 = vpop.f32.mrb[99].mxu1 }
 0x1be   : > { %v6512_v45 = vadd.f32 %v4654_v35, %v6386_v51  ;;  %v6515_v37 = vadd.f32 %v4718_v47, %v6389_v31  ;;  %v4657_v11 = vadd.f32 %v4656_v6, %v4655_v20  ;;  %v4721_v50 = vadd.f32 %v4720_v39, %v4719_v17 }
 0x1bf   : > { %3366 = vmatmul.mubr.bf16.gmra.mrb[204].mxu1 %v5531_v29  ;;  %5081 = vmatmul.mubr.bf16.gmra.mrb[204].mxu0 %v5532_v42 }
 0x1c0   : > { %v6518_v59 = vadd.f32 %v4657_v11, %v6392_v12  ;;  %v6521_v3 = vadd.f32 %v4721_v50, %v6395_v13 }
 0x1c2   : > { %v4658_v8 = vpop.f32.mrb[100].mxu0  ;;  %v4722_v44 = vpop.f32.mrb[100].mxu1 }
 0x1c3   : > { %v4659_v60 = vpop.f32.mrb[101].mxu0  ;;  %v4723_v61 = vpop.f32.mrb[101].mxu1 }
 0x1c4   : > { %v4660_v43 = vadd.f32 %v4659_v60, %v4658_v8  ;;  %v4724_v51 = vadd.f32 %v4723_v61, %v4722_v44  ;;  %v4661_v30 = vpop.f32.mrb[102].mxu0  ;;  %v4725_v62 = vpop.f32.mrb[102].mxu1 }
 0x1c5   : > { %v4662_v31 = vpop.f32.mrb[103].mxu0  ;;  %v4726_v63 = vpop.f32.mrb[103].mxu1 }
 0x1c6   : > { %v6524_v23 = vadd.f32 %v4660_v43, %v6402_v10  ;;  %v6527_v4 = vadd.f32 %v4724_v51, %v6405_v22  ;;  %v4663_v12 = vadd.f32 %v4662_v31, %v4661_v30  ;;  %v4727_v33 = vadd.f32 %v4726_v63, %v4725_v62 }
 0x1c8   : > { %v6530_v13 = vadd.f32 %v4663_v12, %v6408_v0  ;;  %v6533_v7 = vadd.f32 %v4727_v33, %v6411_v49 }
 0x1ca   : > { %v4664_v26 = vpop.f32.mrb[104].mxu0  ;;  %v4728_v46 = vpop.f32.mrb[104].mxu1 }
 0x1cb   : > { %v4665_v28 = vpop.f32.mrb[105].mxu0  ;;  %v4729_v58 = vpop.f32.mrb[105].mxu1 }
 0x1cc   : > { %v4666_v18 = vadd.f32 %v4665_v28, %v4664_v26  ;;  %v4730_v25 = vadd.f32 %v4729_v58, %v4728_v46  ;;  %v4667_v29 = vpop.f32.mrb[106].mxu0  ;;  %v4731_v10 = vpop.f32.mrb[106].mxu1 }
 0x1cd   : > { %v4668_v42 = vpop.f32.mrb[107].mxu0  ;;  %v4732_v35 = vpop.f32.mrb[107].mxu1 }
 0x1ce   : > { %v6536_v22 = vadd.f32 %v4666_v18, %v6418_v36  ;;  %v6539_v47 = vadd.f32 %v4730_v25, %v6421_v53  ;;  %v4669_v0 = vadd.f32 %v4668_v42, %v4667_v29  ;;  %v4733_v20 = vadd.f32 %v4732_v35, %v4731_v10 }
 0x1d0   : > { %v6542_v49 = vadd.f32 %v4669_v0, %v6424_v14  ;;  %v6545_v17 = vadd.f32 %v4733_v20, %v6427_v16 }
 0x1d2   : > { %v4670_v6 = vpop.f32.mrb[108].mxu0  ;;  %v4734_v39 = vpop.f32.mrb[108].mxu1 }
 0x1d3   : > { %v4671_v11 = vpop.f32.mrb[109].mxu0  ;;  %v4735_v50 = vpop.f32.mrb[109].mxu1 }
 0x1d4   : > { %v4672_v8 = vadd.f32 %v4671_v11, %v4670_v6  ;;  %v4736_v44 = vadd.f32 %v4735_v50, %v4734_v39  ;;  %v4673_v60 = vpop.f32.mrb[110].mxu0  ;;  %v4737_v36 = vpop.f32.mrb[110].mxu1 }
 0x1d5   : > { %v4674_v61 = vpop.f32.mrb[111].mxu0  ;;  %v4738_v43 = vpop.f32.mrb[111].mxu1 }
 0x1d6   : > { %v6548_v53 = vadd.f32 %v4672_v8, %v6434_v1  ;;  %v6551_v51 = vadd.f32 %v4736_v44, %v6437_v15  ;;  %v4675_v14 = vadd.f32 %v4674_v61, %v4673_v60  ;;  %v4739_v30 = vadd.f32 %v4738_v43, %v4737_v36 }
 0x1d8   : > { %v6554_v16 = vadd.f32 %v4675_v14, %v6440_v57  ;;  %v6557_v62 = vadd.f32 %v4739_v30, %v6443_v52 }
 0x1da   : > { %v4740_v31 = vpop.f32.mrb[112].mxu1  ;;  %v4804_v63 = vpop.f32.mrb[112].mxu0 }
 0x1db   : > { %v4741_v12 = vpop.f32.mrb[113].mxu1  ;;  %v4805_v33 = vpop.f32.mrb[113].mxu0 }
 0x1dc   : > { %v4742_v26 = vadd.f32 %v4741_v12, %v4740_v31  ;;  %v4806_v46 = vadd.f32 %v4805_v33, %v4804_v63  ;;  %v4743_v28 = vpop.f32.mrb[114].mxu1  ;;  %v4807_v1 = vpop.f32.mrb[114].mxu0 }
 0x1dd   : > { %v4744_v58 = vpop.f32.mrb[115].mxu1  ;;  %v4808_v18 = vpop.f32.mrb[115].mxu0 }
 0x1de   : > { %v6560_v15 = vadd.f32 %v4742_v26, %v6450_v32  ;;  %v6563_v25 = vadd.f32 %v4806_v46, %v6453_v21  ;;  %v4745_v57 = vadd.f32 %v4744_v58, %v4743_v28  ;;  %v4809_v29 = vadd.f32 %v4808_v18, %v4807_v1 }
 0x1e0   : > { %v6566_v52 = vadd.f32 %v4745_v57, %v6456_v19  ;;  %v6569_v10 = vadd.f32 %v4809_v29, %v6459_v34 }
 0x1e2   : > { %v4746_v42 = vpop.f32.mrb[116].mxu1  ;;  %v4810_v35 = vpop.f32.mrb[116].mxu0 }
 0x1e3   : > { %v4747_v0 = vpop.f32.mrb[117].mxu1  ;;  %v4811_v20 = vpop.f32.mrb[117].mxu0 }
 0x1e4   : > { %v4748_v6 = vadd.f32 %v4747_v0, %v4746_v42  ;;  %v4812_v39 = vadd.f32 %v4811_v20, %v4810_v35  ;;  %v4749_v11 = vpop.f32.mrb[118].mxu1  ;;  %v4813_v32 = vpop.f32.mrb[118].mxu0 }
 0x1e5   : > { %v4750_v50 = vpop.f32.mrb[119].mxu1  ;;  %v4814_v8 = vpop.f32.mrb[119].mxu0 }
 0x1e6   : > { %v6572_v21 = vadd.f32 %v4748_v6, %v6466_v5  ;;  %v6575_v44 = vadd.f32 %v4812_v39, %v6469_v38  ;;  %v4751_v19 = vadd.f32 %v4750_v50, %v4749_v11  ;;  %v4815_v60 = vadd.f32 %v4814_v8, %v4813_v32 }
 0x1e8   : > { %v6578_v34 = vadd.f32 %v4751_v19, %v6472_v54  ;;  %v6581_v36 = vadd.f32 %v4815_v60, %v6475_v55 }
 0x1ea   : > { %v4752_v61 = vpop.f32.mrb[120].mxu1  ;;  %v4816_v43 = vpop.f32.mrb[120].mxu0 }
 0x1eb   : > { %v4753_v14 = vpop.f32.mrb[121].mxu1  ;;  %v4817_v30 = vpop.f32.mrb[121].mxu0 }
 0x1ec   : > { %v4754_v31 = vadd.f32 %v4753_v14, %v4752_v61  ;;  %v4818_v63 = vadd.f32 %v4817_v30, %v4816_v43  ;;  %v4755_v12 = vpop.f32.mrb[122].mxu1  ;;  %v4819_v5 = vpop.f32.mrb[122].mxu0 }
 0x1ed   : > { %v4756_v33 = vpop.f32.mrb[123].mxu1  ;;  %v4820_v26 = vpop.f32.mrb[123].mxu0 }
 0x1ee   : > { %v6584_v38 = vadd.f32 %v4754_v31, %v6482_v41  ;;  %v6587_v46 = vadd.f32 %v4818_v63, %v6485_v56  ;;  %v4757_v54 = vadd.f32 %v4756_v33, %v4755_v12  ;;  %v4821_v28 = vadd.f32 %v4820_v26, %v4819_v5 }
 0x1f0   : > { %v6590_v55 = vadd.f32 %v4757_v54, %v6488_v48  ;;  %v6593_v1 = vadd.f32 %v4821_v28, %v6491_v24 }
 0x1f2   : > { %v4758_v58 = vpop.f32.mrb[124].mxu1  ;;  %v4822_v18 = vpop.f32.mrb[124].mxu0 }
 0x1f3   : > { %v4759_v57 = vpop.f32.mrb[125].mxu1  ;;  %v4823_v29 = vpop.f32.mrb[125].mxu0 }
 0x1f4   : > { %v4760_v42 = vadd.f32 %v4759_v57, %v4758_v58  ;;  %v4824_v35 = vadd.f32 %v4823_v29, %v4822_v18  ;;  %v4761_v0 = vpop.f32.mrb[126].mxu1  ;;  %v4825_v41 = vpop.f32.mrb[126].mxu0 }
 0x1f5   : > { %v4762_v20 = vpop.f32.mrb[127].mxu1  ;;  %v4826_v6 = vpop.f32.mrb[127].mxu0 }
 0x1f6   : > { %v6596_v56 = vadd.f32 %v4760_v42, %v6498_v40  ;;  %v6599_v39 = vadd.f32 %v4824_v35, %v6501_v9  ;;  %v4763_v48 = vadd.f32 %v4762_v20, %v4761_v0  ;;  %v4827_v11 = vadd.f32 %v4826_v6, %v4825_v41 }
 0x1f8   : > { %v6602_v24 = vadd.f32 %v4763_v48, %v6504_v27  ;;  %v6605_v32 = vadd.f32 %v4827_v11, %v6507_v2 }
 0x1fa   : > { %v4764_v50 = vpop.f32.mrb[128].mxu1  ;;  %v4828_v8 = vpop.f32.mrb[128].mxu0 }
 0x1fb   : > { %v4765_v19 = vpop.f32.mrb[129].mxu1  ;;  %v4829_v60 = vpop.f32.mrb[129].mxu0 }
 0x1fc   : > { %v4766_v61 = vadd.f32 %v4765_v19, %v4764_v50  ;;  %v4830_v43 = vadd.f32 %v4829_v60, %v4828_v8  ;;  %v4767_v14 = vpop.f32.mrb[130].mxu1  ;;  %v4831_v40 = vpop.f32.mrb[130].mxu0 }
 0x1fd   : > { %v4768_v30 = vpop.f32.mrb[131].mxu1  ;;  %v4832_v31 = vpop.f32.mrb[131].mxu0 }
 0x1fe   : > { %v6608_v9 = vadd.f32 %v4766_v61, %v6512_v45  ;;  %v6611_v63 = vadd.f32 %v4830_v43, %v6515_v37  ;;  %v4769_v27 = vadd.f32 %v4768_v30, %v4767_v14  ;;  %v4833_v12 = vadd.f32 %v4832_v31, %v4831_v40 }
 0x200   : > { %v6614_v2 = vadd.f32 %v4769_v27, %v6518_v59  ;;  %v6617_v5 = vadd.f32 %v4833_v12, %v6521_v3 }
 0x202   : > { %v4770_v33 = vpop.f32.mrb[132].mxu1  ;;  %v4834_v26 = vpop.f32.mrb[132].mxu0 }
 0x203   : > { %v4771_v54 = vpop.f32.mrb[133].mxu1  ;;  %v4835_v28 = vpop.f32.mrb[133].mxu0 }
 0x204   : > { %v4772_v58 = vadd.f32 %v4771_v54, %v4770_v33  ;;  %v4836_v18 = vadd.f32 %v4835_v28, %v4834_v26  ;;  %v4773_v57 = vpop.f32.mrb[134].mxu1  ;;  %v4837_v45 = vpop.f32.mrb[134].mxu0 }
 0x205   : > { %v4774_v29 = vpop.f32.mrb[135].mxu1  ;;  %v4838_v42 = vpop.f32.mrb[135].mxu0 }
 0x206   : > { %v6620_v37 = vadd.f32 %v4772_v58, %v6524_v23  ;;  %v6623_v35 = vadd.f32 %v4836_v18, %v6527_v4  ;;  %v4775_v59 = vadd.f32 %v4774_v29, %v4773_v57  ;;  %v4839_v0 = vadd.f32 %v4838_v42, %v4837_v45 }
 0x208   : > { %v6626_v3 = vadd.f32 %v4775_v59, %v6530_v13  ;;  %v6629_v41 = vadd.f32 %v4839_v0, %v6533_v7 }
 0x20a   : > { %v4776_v20 = vpop.f32.mrb[136].mxu1  ;;  %v4840_v6 = vpop.f32.mrb[136].mxu0 }
 0x20b   : > { %v4777_v48 = vpop.f32.mrb[137].mxu1  ;;  %v4841_v11 = vpop.f32.mrb[137].mxu0 }
 0x20c   : > { %v4778_v50 = vadd.f32 %v4777_v48, %v4776_v20  ;;  %v4842_v8 = vadd.f32 %v4841_v11, %v4840_v6  ;;  %v4779_v19 = vpop.f32.mrb[138].mxu1  ;;  %v4843_v23 = vpop.f32.mrb[138].mxu0 }
 0x20d   : > { %v4780_v60 = vpop.f32.mrb[139].mxu1  ;;  %v4844_v61 = vpop.f32.mrb[139].mxu0 }
 0x20e   : > { %v6632_v4 = vadd.f32 %v4778_v50, %v6536_v22  ;;  %v6635_v43 = vadd.f32 %v4842_v8, %v6539_v47  ;;  %v4781_v13 = vadd.f32 %v4780_v60, %v4779_v19  ;;  %v4845_v14 = vadd.f32 %v4844_v61, %v4843_v23 }
 0x210   : > { %v6638_v7 = vadd.f32 %v4781_v13, %v6542_v49  ;;  %v6641_v40 = vadd.f32 %v4845_v14, %v6545_v17 }
 0x212   : > { %v4782_v30 = vpop.f32.mrb[140].mxu1  ;;  %v4846_v31 = vpop.f32.mrb[140].mxu0 }
 0x213   : > { %v4783_v27 = vpop.f32.mrb[141].mxu1  ;;  %v4847_v12 = vpop.f32.mrb[141].mxu0 }
 0x214   : > { %v4784_v33 = vadd.f32 %v4783_v27, %v4782_v30  ;;  %v4848_v26 = vadd.f32 %v4847_v12, %v4846_v31  ;;  %v4785_v54 = vpop.f32.mrb[142].mxu1  ;;  %v4849_v22 = vpop.f32.mrb[142].mxu0 }
 0x215   : > { %v4786_v28 = vpop.f32.mrb[143].mxu1  ;;  %v4850_v58 = vpop.f32.mrb[143].mxu0 }
 0x216   : > { %v6644_v47 = vadd.f32 %v4784_v33, %v6548_v53  ;;  %v6647_v18 = vadd.f32 %v4848_v26, %v6551_v51  ;;  %v4787_v49 = vadd.f32 %v4786_v28, %v4785_v54  ;;  %v4851_v57 = vadd.f32 %v4850_v58, %v4849_v22 }
 0x218   : > { %v6650_v17 = vadd.f32 %v4787_v49, %v6554_v16  ;;  %v6653_v45 = vadd.f32 %v4851_v57, %v6557_v62 }
 0x21a   : > { %v4852_v29 = vpop.f32.mrb[144].mxu0  ;;  %v4916_v42 = vpop.f32.mrb[144].mxu1 }
 0x21b   : > { %v4853_v59 = vpop.f32.mrb[145].mxu0  ;;  %v4917_v0 = vpop.f32.mrb[145].mxu1 }
 0x21c   : > { %v4854_v20 = vadd.f32 %v4853_v59, %v4852_v29  ;;  %v4918_v6 = vadd.f32 %v4917_v0, %v4916_v42  ;;  %v4855_v48 = vpop.f32.mrb[146].mxu0  ;;  %v4919_v53 = vpop.f32.mrb[146].mxu1 }
 0x21d   : > { %v4856_v11 = vpop.f32.mrb[147].mxu0  ;;  %v4920_v50 = vpop.f32.mrb[147].mxu1 }
 0x21e   : > { %v6656_v51 = vadd.f32 %v4854_v20, %v6560_v15  ;;  %v4857_v8 = vadd.f32 %v4856_v11, %v4855_v48  ;;  %v4921_v19 = vadd.f32 %v4920_v50, %v4919_v53  ;;  %v6659_v16 = vadd.f32 %v4918_v6, %v6563_v25 }
 0x220   : > { %v6662_v62 = vadd.f32 %v4857_v8, %v6566_v52  ;;  %v6665_v23 = vadd.f32 %v4921_v19, %v6569_v10 }
 0x222   : > { %v4858_v60 = vpop.f32.mrb[148].mxu0  ;;  %v4922_v61 = vpop.f32.mrb[148].mxu1 }
 0x223   : > { %v4859_v13 = vpop.f32.mrb[149].mxu0  ;;  %v4923_v14 = vpop.f32.mrb[149].mxu1 }
 0x224   : > { %v4860_v30 = vadd.f32 %v4859_v13, %v4858_v60  ;;  %v4924_v31 = vadd.f32 %v4923_v14, %v4922_v61  ;;  %v4861_v27 = vpop.f32.mrb[150].mxu0  ;;  %v4925_v15 = vpop.f32.mrb[150].mxu1 }
 0x225   : > { %v4862_v12 = vpop.f32.mrb[151].mxu0  ;;  %v4926_v33 = vpop.f32.mrb[151].mxu1 }
 0x226   : > { %v6668_v26 = vadd.f32 %v4860_v30, %v6572_v21  ;;  %v4863_v25 = vadd.f32 %v4862_v12, %v4861_v27  ;;  %v4927_v54 = vadd.f32 %v4926_v33, %v4925_v15  ;;  %v6671_v52 = vadd.f32 %v4924_v31, %v6575_v44 }
 0x228   : > { %v6674_v10 = vadd.f32 %v4863_v25, %v6578_v34  ;;  %v6677_v22 = vadd.f32 %v4927_v54, %v6581_v36 }
 0x22a   : > { %v4864_v28 = vpop.f32.mrb[152].mxu0  ;;  %v4928_v58 = vpop.f32.mrb[152].mxu1 }
 0x22b   : > { %v4865_v49 = vpop.f32.mrb[153].mxu0  ;;  %v4929_v57 = vpop.f32.mrb[153].mxu1 }
 0x22c   : > { %v4866_v29 = vadd.f32 %v4865_v49, %v4864_v28  ;;  %v4930_v42 = vadd.f32 %v4929_v57, %v4928_v58  ;;  %v4867_v59 = vpop.f32.mrb[154].mxu0  ;;  %v4931_v21 = vpop.f32.mrb[154].mxu1 }
 0x22d   : > { %v4868_v0 = vpop.f32.mrb[155].mxu0  ;;  %v4932_v20 = vpop.f32.mrb[155].mxu1 }
 0x22e   : > { %v6680_v6 = vadd.f32 %v4866_v29, %v6584_v38  ;;  %v4869_v44 = vadd.f32 %v4868_v0, %v4867_v59  ;;  %v4933_v48 = vadd.f32 %v4932_v20, %v4931_v21  ;;  %v6683_v34 = vadd.f32 %v4930_v42, %v6587_v46 }
 0x230   : > { %v6686_v36 = vadd.f32 %v4869_v44, %v6590_v55  ;;  %v6689_v53 = vadd.f32 %v4933_v48, %v6593_v1 }
 0x232   : > { %v4870_v11 = vpop.f32.mrb[156].mxu0  ;;  %v4934_v50 = vpop.f32.mrb[156].mxu1 }
 0x233   : > { %v4871_v8 = vpop.f32.mrb[157].mxu0  ;;  %v4935_v19 = vpop.f32.mrb[157].mxu1 }
 0x234   : > { %v4872_v60 = vadd.f32 %v4871_v8, %v4870_v11  ;;  %v4936_v61 = vadd.f32 %v4935_v19, %v4934_v50  ;;  %v4873_v13 = vpop.f32.mrb[158].mxu0  ;;  %v4937_v38 = vpop.f32.mrb[158].mxu1 }
 0x235   : > { %v4874_v14 = vpop.f32.mrb[159].mxu0  ;;  %v4938_v30 = vpop.f32.mrb[159].mxu1 }
 0x236   : > { %v6692_v31 = vadd.f32 %v4872_v60, %v6596_v56  ;;  %v4875_v46 = vadd.f32 %v4874_v14, %v4873_v13  ;;  %v4939_v27 = vadd.f32 %v4938_v30, %v4937_v38  ;;  %v6695_v55 = vadd.f32 %v4936_v61, %v6599_v39 }
 0x238   : > { %v6698_v1 = vadd.f32 %v4875_v46, %v6602_v24  ;;  %v6701_v15 = vadd.f32 %v4939_v27, %v6605_v32 }
 0x23a   : > { %v4876_v12 = vpop.f32.mrb[160].mxu0  ;;  %v4940_v33 = vpop.f32.mrb[160].mxu1 }
 0x23b   : > { %v4877_v25 = vpop.f32.mrb[161].mxu0  ;;  %v4941_v54 = vpop.f32.mrb[161].mxu1 }
 0x23c   : > { %v4878_v28 = vadd.f32 %v4877_v25, %v4876_v12  ;;  %v4942_v58 = vadd.f32 %v4941_v54, %v4940_v33  ;;  %v4879_v49 = vpop.f32.mrb[162].mxu0  ;;  %v4943_v56 = vpop.f32.mrb[162].mxu1 }
 0x23d   : > { %v4880_v57 = vpop.f32.mrb[163].mxu0  ;;  %v4944_v29 = vpop.f32.mrb[163].mxu1 }
 0x23e   : > { %v6704_v42 = vadd.f32 %v4878_v28, %v6608_v9  ;;  %v4881_v39 = vadd.f32 %v4880_v57, %v4879_v49  ;;  %v4945_v59 = vadd.f32 %v4944_v29, %v4943_v56  ;;  %v6707_v24 = vadd.f32 %v4942_v58, %v6611_v63 }
 0x240   : > { %v6710_v32 = vadd.f32 %v4881_v39, %v6614_v2  ;;  %v6713_v21 = vadd.f32 %v4945_v59, %v6617_v5 }
 0x242   : > { %v4882_v0 = vpop.f32.mrb[164].mxu0  ;;  %v4946_v20 = vpop.f32.mrb[164].mxu1 }
 0x243   : > { %v4883_v44 = vpop.f32.mrb[165].mxu0  ;;  %v4947_v48 = vpop.f32.mrb[165].mxu1 }
 0x244   : > { %v4884_v11 = vadd.f32 %v4883_v44, %v4882_v0  ;;  %v4948_v50 = vadd.f32 %v4947_v48, %v4946_v20  ;;  %v4885_v8 = vpop.f32.mrb[166].mxu0  ;;  %v4949_v9 = vpop.f32.mrb[166].mxu1 }
 0x245   : > { %v4886_v19 = vpop.f32.mrb[167].mxu0  ;;  %v4950_v60 = vpop.f32.mrb[167].mxu1 }
 0x246   : > { %v6716_v61 = vadd.f32 %v4884_v11, %v6620_v37  ;;  %v4887_v63 = vadd.f32 %v4886_v19, %v4885_v8  ;;  %v4951_v13 = vadd.f32 %v4950_v60, %v4949_v9  ;;  %v6719_v2 = vadd.f32 %v4948_v50, %v6623_v35 }
 0x248   : > { %v6722_v5 = vadd.f32 %v4887_v63, %v6626_v3  ;;  %v6725_v38 = vadd.f32 %v4951_v13, %v6629_v41  ;;  %v6754_v63 = vld [vmem:[%s6896_s2] ss:$0 sm:$0xff] }
 0x24a   : > { %v4888_v14 = vpop.f32.mrb[168].mxu0  ;;  %v4952_v30 = vpop.f32.mrb[168].mxu1 }
 0x24b   : > { %v4889_v46 = vpop.f32.mrb[169].mxu0  ;;  %v4953_v27 = vpop.f32.mrb[169].mxu1 }
 0x24c   : > { %v4890_v12 = vadd.f32 %v4889_v46, %v4888_v14  ;;  %v4954_v33 = vadd.f32 %v4953_v27, %v4952_v30  ;;  %v4891_v25 = vpop.f32.mrb[170].mxu0  ;;  %v4955_v37 = vpop.f32.mrb[170].mxu1 }
 0x24d   : > { %v4892_v54 = vpop.f32.mrb[171].mxu0  ;;  %v4956_v28 = vpop.f32.mrb[171].mxu1 }
 0x24e   : > { %v6728_v58 = vadd.f32 %v4890_v12, %v6632_v4  ;;  %v4893_v35 = vadd.f32 %v4892_v54, %v4891_v25  ;;  %v4957_v49 = vadd.f32 %v4956_v28, %v4955_v37  ;;  %v6731_v3 = vadd.f32 %v4954_v33, %v6635_v43 }
 0x250   : > { %v6734_v41 = vadd.f32 %v4893_v35, %v6638_v7  ;;  %v6737_v56 = vadd.f32 %v4957_v49, %v6641_v40 }
 0x252   : > { %v4894_v57 = vpop.f32.mrb[172].mxu0  ;;  %v4958_v29 = vpop.f32.mrb[172].mxu1 }
 0x253   : > { %v4895_v39 = vpop.f32.mrb[173].mxu0  ;;  %v4959_v59 = vpop.f32.mrb[173].mxu1 }
 0x254   : > { %v4896_v0 = vadd.f32 %v4895_v39, %v4894_v57  ;;  %v4960_v20 = vadd.f32 %v4959_v59, %v4958_v29  ;;  %v4897_v44 = vpop.f32.mrb[174].mxu0  ;;  %v4961_v4 = vpop.f32.mrb[174].mxu1 }
 0x255   : > { %v4898_v48 = vpop.f32.mrb[175].mxu0  ;;  %v4962_v11 = vpop.f32.mrb[175].mxu1 }
 0x256   : > { %v6740_v50 = vadd.f32 %v4896_v0, %v6644_v47  ;;  %v4899_v43 = vadd.f32 %v4898_v48, %v4897_v44  ;;  %v4963_v8 = vadd.f32 %v4962_v11, %v4961_v4  ;;  %v6743_v7 = vadd.f32 %v4960_v20, %v6647_v18 }
 0x258   : > { %v6746_v40 = vadd.f32 %v4899_v43, %v6650_v17  ;;  %v6749_v9 = vadd.f32 %v4963_v8, %v6653_v45 }
 0x25a   : > { %v4964_v19 = vpop.f32.mrb[176].mxu1  ;;  %v5054_v60 = vpop.f32.mrb[176].mxu0 }
 0x25b   : > { %v3417_v47 = vadd.f32 %v5054_v60, %v6671_v52  ;;  %v4965_v13 = vpop.f32.mrb[177].mxu1  ;;  %v3408_v14 = vpop.f32.mrb[177].mxu0 }
 0x25c   : > { %v4966_v30 = vadd.f32 %v4965_v13, %v4964_v19  ;;  %v3409_v18 = vadd.f32 %v3408_v14, %v6659_v16  ;;  %v4967_v46 = vpop.f32.mrb[178].mxu1  ;;  %v5055_v17 = vpop.f32.mrb[178].mxu0 }
 0x25d   : > { %v3643_v27 = vadd.f32 %v6754_v63, %v3417_v47  ;;  %v3420_v45 = vadd.f32 %v5055_v17, %v6677_v22  ;;  %v4968_v12 = vpop.f32.mrb[179].mxu1  ;;  %v3411_v33 = vpop.f32.mrb[179].mxu0 }
 0x25e   : > { %v3641_v25 = vadd.f32 %v6754_v63, %v3409_v18  ;;  %v4969_v37 = vadd.f32 %v4968_v12, %v4967_v46  ;;  %v3412_v54 = vadd.f32 %v3411_v33, %v6665_v23  ;;  %v6763_v52 = vadd.f32 %v4966_v30, %v6656_v51 }
 0x25f   : > { %v4308_v28 = vmul.f32 -1.442695, %v3643_v27  ;;  %v3644_v35 = vadd.f32 %v6754_v63, %v3420_v45 }
 0x260   : > { %v4306_v16 = vmul.f32 -1.442695, %v3641_v25  ;;  %v3642_v49 = vadd.f32 %v6754_v63, %v3412_v54  ;;  %v6768_v57 = vadd.f32 %v4969_v37, %v6662_v62 }
 0x261   : > { %5533 = vpow2.f32 %v4308_v28  ;;  %v4309_v22 = vmul.f32 -1.442695, %v3644_v35 }
 0x262   : > { %5535 = vpow2.f32 %v4306_v16  ;;  %v4307_v29 = vmul.f32 -1.442695, %v3642_v49  ;;  %v4970_v39 = vpop.f32.mrb[180].mxu1  ;;  %v5058_v59 = vpop.f32.mrb[180].mxu0 }
 0x263   : > { %5537 = vpow2.f32 %v4309_v22  ;;  %v3433_v23 = vadd.f32 %v5058_v59, %v6695_v55  ;;  %v4971_v51 = vpop.f32.mrb[181].mxu1  ;;  %v3424_v0 = vpop.f32.mrb[181].mxu0 }
 0x264   : > { %5539 = vpow2.f32 %v4307_v29  ;;  %v4972_v20 = vadd.f32 %v4971_v51, %v4970_v39  ;;  %v3425_v44 = vadd.f32 %v3424_v0, %v6683_v34  ;;  %v4973_v4 = vpop.f32.mrb[182].mxu1  ;;  %v5059_v48 = vpop.f32.mrb[182].mxu0 }
 0x265   : > { %v3647_v62 = vadd.f32 %v6754_v63, %v3433_v23  ;;  %v3436_v11 = vadd.f32 %v5059_v48, %v6701_v15  ;;  %v4974_v43 = vpop.f32.mrb[183].mxu1  ;;  %v3427_v8 = vpop.f32.mrb[183].mxu0 }
 0x266   : > { %v3645_v19 = vadd.f32 %v6754_v63, %v3425_v44  ;;  %v4975_v60 = vadd.f32 %v4974_v43, %v4973_v4  ;;  %v3428_v47 = vadd.f32 %v3427_v8, %v6689_v53  ;;  %v6777_v55 = vadd.f32 %v4972_v20, %v6668_v26 }
 0x267   : > { %v4312_v13 = vmul.f32 -1.442695, %v3647_v62  ;;  %v3648_v14 = vadd.f32 %v6754_v63, %v3436_v11 }
 0x268   : > { %v4310_v34 = vmul.f32 -1.442695, %v3645_v19  ;;  %v3646_v30 = vadd.f32 %v6754_v63, %v3428_v47  ;;  %v6782_v18 = vadd.f32 %v4975_v60, %v6674_v10 }
 0x269   : > { %5541 = vpow2.f32 %v4312_v13  ;;  %v4313_v15 = vmul.f32 -1.442695, %v3648_v14 }
 0x26a   : > { %5543 = vpow2.f32 %v4310_v34  ;;  %v4311_v46 = vmul.f32 -1.442695, %v3646_v30  ;;  %v4976_v17 = vpop.f32.mrb[184].mxu1  ;;  %v5062_v27 = vpop.f32.mrb[184].mxu0 }
 0x26b   : > { %v5534_v45 = vpop.eup %5533  ;;  %5545 = vpow2.f32 %v4313_v15  ;;  %v3449_v26 = vadd.f32 %v5062_v27, %v6719_v2  ;;  %v4977_v53 = vpop.f32.mrb[185].mxu1 }
 0x26c   : > { %v3440_v12 = vpop.f32.mrb[185].mxu0  ;;  %v5536_v33 = vpop.eup %5535  ;;  %v3771_v25 = vadd.f32 1.0, %v5534_v45  ;;  %5547 = vpow2.f32 %v4311_v46  ;;  %v4978_v37 = vadd.f32 %v4977_v53, %v4976_v17 }
 0x26d   : > { %v3441_v54 = vadd.f32 %v3440_v12, %v6707_v24  ;;  %v4979_v10 = vpop.f32.mrb[186].mxu1  ;;  %v5063_v28 = vpop.f32.mrb[186].mxu0  ;;  %v3769_v16 = vadd.f32 1.0, %v5536_v33  ;;  %v3651_v49 = vadd.f32 %v6754_v63, %v3449_v26 }
 0x26e   : > { %v5538_v35 = vpop.eup %5537  ;;  %v3452_v22 = vadd.f32 %v5063_v28, %v6725_v38  ;;  %v4980_v29 = vpop.f32.mrb[187].mxu1  ;;  %5549 = vrcp.f32 %v3771_v25  ;;  %v6792_v38 = vadd.f32 %v4978_v37, %v6680_v6 }
 0x26f   : > { %v3443_v39 = vpop.f32.mrb[187].mxu0  ;;  %v5540_v59 = vpop.eup %5539  ;;  %v3772_v2 = vadd.f32 1.0, %v5538_v35  ;;  %v3649_v23 = vadd.f32 %v6754_v63, %v3441_v54  ;;  %v4981_v51 = vadd.f32 %v4980_v29, %v4979_v10  ;;  %5551 = vrcp.f32 %v3769_v16 }
 0x270   : > { %v3770_v0 = vadd.f32 1.0, %v5540_v59  ;;  %v4316_v24 = vmul.f32 -1.442695, %v3651_v49  ;;  %v3652_v20 = vadd.f32 %v6754_v63, %v3452_v22  ;;  %v3444_v4 = vadd.f32 %v3443_v39, %v6713_v21 }
 0x271   : > { %5553 = vrcp.f32 %v3772_v2  ;;  %v4314_v44 = vmul.f32 -1.442695, %v3649_v23  ;;  %v6795_v62 = vadd.f32 %v4981_v51, %v6686_v36 }
 0x272   : > { %5555 = vrcp.f32 %v3770_v0  ;;  %v4317_v48 = vmul.f32 -1.442695, %v3652_v20  ;;  %v3650_v11 = vadd.f32 %v6754_v63, %v3444_v4  ;;  %v4982_v43 = vpop.f32.mrb[188].mxu1  ;;  %v5066_v8 = vpop.f32.mrb[188].mxu0 }
 0x273   : > { %5557 = vpow2.f32 %v4316_v24  ;;  %v5542_v19 = vpop.eup %5541  ;;  %v3465_v60 = vadd.f32 %v5066_v8, %v6743_v7  ;;  %v4983_v47 = vpop.f32.mrb[189].mxu1 }
 0x274   : > { %5559 = vpow2.f32 %v4314_v44  ;;  %v3456_v21 = vpop.f32.mrb[189].mxu0  ;;  %v5544_v13 = vpop.eup %5543  ;;  %v3775_v6 = vadd.f32 1.0, %v5542_v19  ;;  %v4315_v14 = vmul.f32 -1.442695, %v3650_v11  ;;  %v4984_v34 = vadd.f32 %v4983_v47, %v4982_v43 }
 0x275   : > { %5561 = vpow2.f32 %v4317_v48  ;;  %v4985_v30 = vpop.f32.mrb[190].mxu1  ;;  %v5067_v36 = vpop.f32.mrb[190].mxu0  ;;  %v3773_v46 = vadd.f32 1.0, %v5544_v13  ;;  %v3655_v17 = vadd.f32 %v6754_v63, %v3465_v60  ;;  %v3457_v27 = vadd.f32 %v3456_v21, %v6731_v3 }
 0x276   : > { %v5546_v15 = vpop.eup %5545  ;;  %v3468_v45 = vadd.f32 %v5067_v36, %v6749_v9  ;;  %v4986_v26 = vpop.f32.mrb[191].mxu1  ;;  %5563 = vrcp.f32 %v3775_v6  ;;  %v3336_v35 = vadd.f32 %v4984_v34, %v6692_v31 }
 0x277   : > { %v3459_v53 = vpop.f32.mrb[191].mxu0  ;;  %v5548_v7 = vpop.eup %5547  ;;  %v3776_v12 = vadd.f32 1.0, %v5546_v15  ;;  %v4987_v33 = vadd.f32 %v4986_v26, %v4985_v30  ;;  %5565 = vrcp.f32 %v3773_v46  ;;  %v4320_v3 = vmul.f32 -1.442695, %v3655_v17 }
 0x278   : > { %v3460_v25 = vadd.f32 %v3459_v53, %v6737_v56  ;;  %v3774_v37 = vadd.f32 1.0, %v5548_v7  ;;  %v3653_v9 = vadd.f32 %v6754_v63, %v3457_v27  ;;  %v5550_v54 = vpop.eup %5549  ;;  %v3656_v10 = vadd.f32 %v6754_v63, %v3468_v45 }
 0x279   : > { %5567 = vrcp.f32 %v3776_v12  ;;  %v5552_v16 = vpop.eup %5551  ;;  %3867 = vst [vmem:[%s6806_s6 + $0x10] sm:$0xff] %v5550_v54  ;;  %v6815_v56 = vadd.f32 %v4987_v33, %v6698_v1 }
 0x27a   : > { %v3654_v28 = vadd.f32 %v6754_v63, %v3460_v25  ;;  %5569 = vrcp.f32 %v3774_v37  ;;  %v4318_v49 = vmul.f32 -1.442695, %v3653_v9  ;;  %3865 = vst [vmem:[%s6806_s6] sm:$0xff] %v5552_v16  ;;  %v4321_v29 = vmul.f32 -1.442695, %v3656_v10  ;;  %v4988_v59 = vpop.f32.mrb[192].mxu1  ;;  %v5070_v2 = vpop.f32.mrb[192].mxu0 }
 0x27b   : > { %v5554_v22 = vpop.eup %5553  ;;  %5571 = vpow2.f32 %v4315_v14  ;;  %v3481_v31 = vadd.f32 %v5070_v2, %v6777_v55  ;;  %v4989_v51 = vpop.f32.mrb[193].mxu1 }
 0x27c   : > { %v4319_v39 = vmul.f32 -1.442695, %v3654_v28  ;;  %v5556_v23 = vpop.eup %5555  ;;  %3868 = vst [vmem:[%s6806_s6 + $0x18] sm:$0xff] %v5554_v22  ;;  %5573 = vpow2.f32 %v4320_v3  ;;  %v3472_v0 = vpop.f32.mrb[193].mxu0  ;;  %v4990_v20 = vadd.f32 %v4989_v51, %v4988_v59 }
 0x27d   : > { %v5558_v24 = vpop.eup %5557  ;;  %3866 = vst [vmem:[%s6806_s6 + $0x8] sm:$0xff] %v5556_v23  ;;  %5575 = vpow2.f32 %v4318_v49  ;;  %v3473_v1 = vadd.f32 %v3472_v0, %v6763_v52  ;;  %v4991_v44 = vpop.f32.mrb[194].mxu1  ;;  %v3659_v43 = vadd.f32 %v6754_v63, %v3481_v31 }
 0x27e   : > { %v5071_v4 = vpop.f32.mrb[194].mxu0  ;;  %v5560_v48 = vpop.eup %5559  ;;  %v3779_v11 = vadd.f32 1.0, %v5558_v24  ;;  %5577 = vpow2.f32 %v4321_v29  ;;  %v6828_v36 = vadd.f32 %v4990_v20, %v6704_v42 }
 0x27f   : > { %v3484_v8 = vadd.f32 %v5071_v4, %v6782_v18  ;;  %v4992_v19 = vpop.f32.mrb[195].mxu1  ;;  %v3475_v60 = vpop.f32.mrb[195].mxu0  ;;  %v3777_v47 = vadd.f32 1.0, %v5560_v48  ;;  %5579 = vpow2.f32 %v4319_v39  ;;  %v3657_v21 = vadd.f32 %v6754_v63, %v3473_v1 }
 0x280   : > { %v5562_v55 = vpop.eup %5561  ;;  %v4993_v13 = vadd.f32 %v4992_v19, %v4991_v44  ;;  %5581 = vrcp.f32 %v3779_v11  ;;  %v4324_v6 = vmul.f32 -1.442695, %v3659_v43  ;;  %v3476_v18 = vadd.f32 %v3475_v60, %v6768_v57 }
 0x281   : > { %v3780_v52 = vadd.f32 1.0, %v5562_v55  ;;  %v3660_v14 = vadd.f32 %v6754_v63, %v3484_v8  ;;  %v5564_v34 = vpop.eup %5563  ;;  %5583 = vrcp.f32 %v3777_v47  ;;  %v4322_v30 = vmul.f32 -1.442695, %v3657_v21 }
 0x282   : > { %v5566_v15 = vpop.eup %5565  ;;  %3871 = vst [vmem:[%s6806_s6 + $0x30] sm:$0xff] %v5564_v34  ;;  %v6832_v17 = vadd.f32 %v4993_v13, %v6710_v32  ;;  %v3658_v45 = vadd.f32 %v6754_v63, %v3476_v18  ;;  %v4994_v26 = vpop.f32.mrb[196].mxu1 }
 0x283   : > { %5585 = vrcp.f32 %v3780_v52  ;;  %v4325_v46 = vmul.f32 -1.442695, %v3660_v14  ;;  %v5568_v27 = vpop.eup %5567  ;;  %3869 = vst [vmem:[%s6806_s6 + $0x20] sm:$0xff] %v5566_v15  ;;  %v5074_v53 = vpop.f32.mrb[196].mxu0 }
 0x284   : > { %5587 = vpow2.f32 %v4324_v6  ;;  %v5570_v7 = vpop.eup %5569  ;;  %3872 = vst [vmem:[%s6806_s6 + $0x38] sm:$0xff] %v5568_v27  ;;  %v3497_v42 = vadd.f32 %v5074_v53, %v3336_v35  ;;  %v4995_v57 = vpop.f32.mrb[197].mxu1  ;;  %v4323_v25 = vmul.f32 -1.442695, %v3658_v45 }
 0x285   : > { %5589 = vpow2.f32 %v4322_v30  ;;  %v3488_v12 = vpop.f32.mrb[197].mxu0  ;;  %v5572_v33 = vpop.eup %5571  ;;  %3870 = vst [vmem:[%s6806_s6 + $0x28] sm:$0xff] %v5570_v7  ;;  %v4996_v37 = vadd.f32 %v4995_v57, %v4994_v26 }
 0x286   : > { %5591 = vpow2.f32 %v4325_v46  ;;  %v3489_v32 = vadd.f32 %v3488_v12, %v6792_v38  ;;  %v4997_v3 = vpop.f32.mrb[198].mxu1  ;;  %v5075_v9 = vpop.f32.mrb[198].mxu0  ;;  %v3778_v10 = vadd.f32 1.0, %v5572_v33  ;;  %v3663_v28 = vadd.f32 %v6754_v63, %v3497_v42 }
 0x287   : > { %v5574_v54 = vpop.eup %5573  ;;  %v3500_v16 = vadd.f32 %v5075_v9, %v6815_v56  ;;  %v4998_v49 = vpop.f32.mrb[199].mxu1  ;;  %5593 = vpow2.f32 %v4323_v25  ;;  %v3352_v44 = vadd.f32 %v4996_v37, %v6716_v61 }
 0x288   : > { %v3491_v22 = vpop.f32.mrb[199].mxu0  ;;  %v5576_v35 = vpop.eup %5575  ;;  %v3783_v29 = vadd.f32 1.0, %v5574_v54  ;;  %v3661_v39 = vadd.f32 %v6754_v63, %v3489_v32  ;;  %v4999_v59 = vadd.f32 %v4998_v49, %v4997_v3  ;;  %5595 = vrcp.f32 %v3778_v10 }
 0x289   : > { %v5578_v2 = vpop.eup %5577  ;;  %v3781_v38 = vadd.f32 1.0, %v5576_v35  ;;  %v3664_v23 = vadd.f32 %v6754_v63, %v3500_v16  ;;  %v4328_v0 = vmul.f32 -1.442695, %v3663_v28  ;;  %v3492_v56 = vadd.f32 %v3491_v22, %v6795_v62 }
 0x28a   : > { %v5580_v31 = vpop.eup %5579  ;;  %5597 = vrcp.f32 %v3783_v29  ;;  %v3784_v51 = vadd.f32 1.0, %v5578_v2  ;;  %v4326_v1 = vmul.f32 -1.442695, %v3661_v39  ;;  %v5000_v43 = vpop.f32.mrb[200].mxu1  ;;  %v3355_v19 = vadd.f32 %v4999_v59, %v6722_v5 }
 0x28b   : > { %v5582_v24 = vpop.eup %5581  ;;  %5599 = vrcp.f32 %v3781_v38  ;;  %v3782_v20 = vadd.f32 1.0, %v5580_v31  ;;  %v4329_v48 = vmul.f32 -1.442695, %v3664_v23  ;;  %v3662_v11 = vadd.f32 %v6754_v63, %v3492_v56  ;;  %v5078_v8 = vpop.f32.mrb[200].mxu0 }
 0x28c   : > { %v5584_v4 = vpop.eup %5583  ;;  %3875 = vst [vmem:[%s6806_s6 + $0x50] sm:$0xff] %v5582_v24  ;;  %5601 = vrcp.f32 %v3784_v51  ;;  %v3513_v62 = vadd.f32 %v5078_v8, %v3352_v44  ;;  %v5001_v55 = vpop.f32.mrb[201].mxu1 }
 0x28d   : > { %v5586_v60 = vpop.eup %5585  ;;  %3873 = vst [vmem:[%s6806_s6 + $0x40] sm:$0xff] %v5584_v4  ;;  %5603 = vrcp.f32 %v3782_v20  ;;  %v3504_v47 = vpop.f32.mrb[201].mxu0  ;;  %v4327_v61 = vmul.f32 -1.442695, %v3662_v11  ;;  %v5002_v13 = vadd.f32 %v5001_v55, %v5000_v43 }
 0x28e   : > { %v5588_v21 = vpop.eup %5587  ;;  %3876 = vst [vmem:[%s6806_s6 + $0x58] sm:$0xff] %v5586_v60  ;;  %5605 = vpow2.f32 %v4328_v0  ;;  %v3505_v52 = vadd.f32 %v3504_v47, %v6828_v36  ;;  %v5003_v6 = vpop.f32.mrb[202].mxu1  ;;  %v3667_v5 = vadd.f32 %v6754_v63, %v3513_v62 }
 0x28f   : > { %v5079_v14 = vpop.f32.mrb[202].mxu0  ;;  %v5590_v34 = vpop.eup %5589  ;;  %v3787_v30 = vadd.f32 1.0, %v5588_v21  ;;  %5607 = vpow2.f32 %v4326_v1  ;;  %v3360_v33 = vadd.f32 %v5002_v13, %v6728_v58 }
 0x290   : > { %v3516_v18 = vadd.f32 %v5079_v14, %v3355_v19  ;;  %v5004_v15 = vpop.f32.mrb[203].mxu1  ;;  %v3507_v46 = vpop.f32.mrb[203].mxu0  ;;  %v3785_v45 = vadd.f32 1.0, %v5590_v34  ;;  %5609 = vpow2.f32 %v4329_v48  ;;  %v3665_v26 = vadd.f32 %v6754_v63, %v3505_v52 }
 0x291   : > { %v5592_v27 = vpop.eup %5591  ;;  %v5005_v53 = vadd.f32 %v5004_v15, %v5003_v6  ;;  %5611 = vrcp.f32 %v3787_v30  ;;  %v4332_v57 = vmul.f32 -1.442695, %v3667_v5  ;;  %v3508_v12 = vadd.f32 %v3507_v46, %v6832_v17 }
 0x292   : > { %v3788_v7 = vadd.f32 1.0, %v5592_v27  ;;  %v3668_v36 = vadd.f32 %v6754_v63, %v3516_v18  ;;  %v5594_v42 = vpop.eup %5593  ;;  %5613 = vrcp.f32 %v3785_v45  ;;  %v4330_v32 = vmul.f32 -1.442695, %v3665_v26  ;;  %v5006_v28 = vpop.f32.mrb[204].mxu1 }
 0x293   : > { %v5596_v25 = vpop.eup %5595  ;;  %v3786_v37 = vadd.f32 1.0, %v5594_v42  ;;  %v3363_v3 = vadd.f32 %v5005_v53, %v6734_v41  ;;  %v3666_v10 = vadd.f32 %v6754_v63, %v3508_v12  ;;  %v5082_v16 = vpop.f32.mrb[204].mxu0 }
 0x294   : > { %5615 = vrcp.f32 %v3788_v7  ;;  %v5598_v9 = vpop.eup %5597  ;;  %3874 = vst [vmem:[%s6806_s6 + $0x48] sm:$0xff] %v5596_v25  ;;  %v4333_v54 = vmul.f32 -1.442695, %v3668_v36  ;;  %v5007_v58 = vpop.f32.mrb[205].mxu1 }
 0x295   : > { %5617 = vpow2.f32 %v4327_v61  ;;  %v5600_v49 = vpop.eup %5599  ;;  %3879 = vst [vmem:[%s6806_s6 + $0x70] sm:$0xff] %v5598_v9  ;;  %v3520_v17 = vpop.f32.mrb[205].mxu0  ;;  %v4331_v35 = vmul.f32 -1.442695, %v3666_v10  ;;  %v5008_v41 = vadd.f32 %v5007_v58, %v5006_v28 }
 0x296   : > { %5619 = vrcp.f32 %v3786_v37  ;;  %v5602_v22 = vpop.eup %5601  ;;  %3877 = vst [vmem:[%s6806_s6 + $0x60] sm:$0xff] %v5600_v49  ;;  %v3521_v29 = vadd.f32 %v3520_v17, %v3360_v33  ;;  %v5009_v39 = vpop.f32.mrb[206].mxu1 }
 0x297   : > { %5621 = vpow2.f32 %v4332_v57  ;;  %v5083_v59 = vpop.f32.mrb[206].mxu0  ;;  %v5604_v2 = vpop.eup %5603  ;;  %3880 = vst [vmem:[%s6806_s6 + $0x78] sm:$0xff] %v5602_v22  ;;  %v3368_v51 = vadd.f32 %v5008_v41, %v6740_v50 }
 0x298   : > { %5623 = vpow2.f32 %v4330_v32  ;;  %v5010_v38 = vpop.f32.mrb[207].mxu1  ;;  %v3523_v23 = vpop.f32.mrb[207].mxu0  ;;  %3878 = vst [vmem:[%s6806_s6 + $0x68] sm:$0xff] %v5604_v2  ;;  %v3669_v0 = vadd.f32 %v6754_v63, %v3521_v29 }
 0x299   : > { %v5606_v31 = vpop.eup %5605  ;;  %5625 = vpow2.f32 %v4333_v54  ;;  %v5011_v56 = vadd.f32 %v5010_v38, %v5009_v39  ;;  %v3524_v1 = vadd.f32 %v3523_v23, %v3363_v3  ;;  %v3529_v48 = vadd.f32 %v5082_v16, %v3368_v51 }
 0x29a   : > { %v5608_v24 = vpop.eup %5607  ;;  %v3791_v20 = vadd.f32 1.0, %v5606_v31  ;;  %5627 = vpow2.f32 %v4331_v35  ;;  %v4334_v11 = vmul.f32 -1.442695, %v3669_v0 }
 0x29b   : > { %v5610_v44 = vpop.eup %5609  ;;  %v3789_v4 = vadd.f32 1.0, %v5608_v24  ;;  %v3371_v43 = vadd.f32 %v5011_v56, %v6746_v40  ;;  %v3670_v50 = vadd.f32 %v6754_v63, %v3524_v1  ;;  %v3671_v62 = vadd.f32 %v6754_v63, %v3529_v48 }
 0x29c   : > { %v5612_v8 = vpop.eup %5611  ;;  %5629 = vrcp.f32 %v3791_v20  ;;  %v3792_v19 = vadd.f32 1.0, %v5610_v44 }
 0x29d   : > { %v5614_v60 = vpop.eup %5613  ;;  %3883 = vst [vmem:[%s6806_s6 + $0x90] sm:$0xff] %v5612_v8  ;;  %5631 = vrcp.f32 %v3789_v4  ;;  %v3532_v55 = vadd.f32 %v5083_v59, %v3371_v43  ;;  %v4335_v21 = vmul.f32 -1.442695, %v3670_v50  ;;  %v4336_v13 = vmul.f32 -1.442695, %v3671_v62 }
 0x29e   : > { %v5616_v47 = vpop.eup %5615  ;;  %3881 = vst [vmem:[%s6806_s6 + $0x80] sm:$0xff] %v5614_v60  ;;  %5633 = vrcp.f32 %v3792_v19 }
 0x29f   : > { %v5618_v61 = vpop.eup %5617  ;;  %3884 = vst [vmem:[%s6806_s6 + $0x98] sm:$0xff] %v5616_v47  ;;  %5635 = vpow2.f32 %v4334_v11  ;;  %v3672_v40 = vadd.f32 %v6754_v63, %v3532_v55 }
 0x2a0   : > { %v5620_v52 = vpop.eup %5619  ;;  %v3790_v6 = vadd.f32 1.0, %v5618_v61  ;;  %5637 = vpow2.f32 %v4335_v21 }
 0x2a1   : > { %v5622_v14 = vpop.eup %5621  ;;  %3882 = vst [vmem:[%s6806_s6 + $0x88] sm:$0xff] %v5620_v52  ;;  %5639 = vpow2.f32 %v4336_v13  ;;  %v4337_v34 = vmul.f32 -1.442695, %v3672_v40 }
 0x2a2   : > { %v5624_v30 = vpop.eup %5623  ;;  %5641 = vrcp.f32 %v3790_v6  ;;  %v3795_v5 = vadd.f32 1.0, %v5622_v14 }
 0x2a3   : > { %v5626_v18 = vpop.eup %5625  ;;  %v3793_v15 = vadd.f32 1.0, %v5624_v30  ;;  %5643 = vpow2.f32 %v4337_v34 }
 0x2a4   : > { %v5628_v46 = vpop.eup %5627  ;;  %5645 = vrcp.f32 %v3795_v5  ;;  %v3796_v27 = vadd.f32 1.0, %v5626_v18 }
 0x2a5   : > { %5647 = vrcp.f32 %v3793_v15  ;;  %v3794_v63 = vadd.f32 1.0, %v5628_v46 }
 0x2a6   : > { %v5630_v45 = vpop.eup %5629  ;;  %5649 = vrcp.f32 %v3796_v27 }
 0x2a7   : > { %v5632_v26 = vpop.eup %5631  ;;  %3887 = vst [vmem:[%s6806_s6 + $0xb0] sm:$0xff] %v5630_v45  ;;  %5651 = vrcp.f32 %v3794_v63 }
 0x2a8   : > { %v5634_v53 = vpop.eup %5633  ;;  %3885 = vst [vmem:[%s6806_s6 + $0xa0] sm:$0xff] %v5632_v26 }
 0x2a9   : > { %v5636_v7 = vpop.eup %5635  ;;  %3888 = vst [vmem:[%s6806_s6 + $0xb8] sm:$0xff] %v5634_v53 }
 0x2aa   : > { %v5638_v36 = vpop.eup %5637  ;;  %v3797_v42 = vadd.f32 1.0, %v5636_v7 }
 0x2ab   : > { %v5640_v57 = vpop.eup %5639  ;;  %v3798_v12 = vadd.f32 1.0, %v5638_v36 }
 0x2ac   : > { %v5642_v33 = vpop.eup %5641  ;;  %v3799_v25 = vadd.f32 1.0, %v5640_v57  ;;  %5653 = vrcp.f32 %v3797_v42 }
 0x2ad   : > { %v5644_v37 = vpop.eup %5643  ;;  %3886 = vst [vmem:[%s6806_s6 + $0xa8] sm:$0xff] %v5642_v33  ;;  %5655 = vrcp.f32 %v3798_v12 }
 0x2ae   : > { %v5646_v32 = vpop.eup %5645  ;;  %5657 = vrcp.f32 %v3799_v25  ;;  %v3800_v3 = vadd.f32 1.0, %v5644_v37 }
 0x2af   : > { %v5648_v9 = vpop.eup %5647  ;;  %3891 = vst [vmem:[%s6806_s6 + $0xd0] sm:$0xff] %v5646_v32 }
 0x2b0   : > { %v5650_v54 = vpop.eup %5649  ;;  %3889 = vst [vmem:[%s6806_s6 + $0xc0] sm:$0xff] %v5648_v9  ;;  %5659 = vrcp.f32 %v3800_v3 }
 0x2b1   : > { %v5652_v10 = vpop.eup %5651  ;;  %3892 = vst [vmem:[%s6806_s6 + $0xd8] sm:$0xff] %v5650_v54 }
 0x2b2   : > { %3890 = vst [vmem:[%s6806_s6 + $0xc8] sm:$0xff] %v5652_v10 }
 0x2b6   : > { %v5654_v28 = vpop.eup %5653 }
 0x2b7   : > { %v5656_v16 = vpop.eup %5655  ;;  %3893 = vst [vmem:[%s6806_s6 + $0xe0] sm:$0xff] %v5654_v28 }
 0x2b8   : > { %v5658_v49 = vpop.eup %5657  ;;  %3894 = vst [vmem:[%s6806_s6 + $0xe8] sm:$0xff] %v5656_v16 }
 0x2b9   : > { %3895 = vst [vmem:[%s6806_s6 + $0xf0] sm:$0xff] %v5658_v49 }
 0x2ba   : > { %v5660_v58 = vpop.eup %5659 }
 0x2bb   : > { %3896 = vst [vmem:[%s6806_s6 + $0xf8] sm:$0xff] %v5660_v58 }
 0x2bc PF: > { %s13_s14 = sadd.s32 1, %s5683_s14   ;;  %s6898_s12 = smov %s5679_s13 }
 0x2bd   : > { %p10_p5 = scmp.ge.s32.totalorder %s13_s14, 4   ;;  %s6899_s13 = smov %s6901_s15 }
 0x2bf   :  { %12 = sbr.rel (!%p10_p5) target bundleno = 2 (0x2), region = 73 }

</bundles_post_ra>
